<compile_context>
chip_gen: v7x
topology: tpu7x:2x2x1
jax: 0.10.0
libtpu: 0.0.40
codegen_flags: <defaults>
</compile_context>

<pallas_src>
import functools
import math

import jax
import jax.numpy as jnp
from jax.experimental import pallas as pl
from jax.experimental.pallas import tpu as pltpu


# ----------------------------- small math helpers ----------------------------
def _layernorm(x, w, b, eps=1e-5):
    mu = jnp.mean(x, axis=-1, keepdims=True)
    var = jnp.mean((x - mu) ** 2, axis=-1, keepdims=True)
    return (x - mu) * jax.lax.rsqrt(var + eps) * w + b


def _softplus(x):
    return jnp.maximum(x, 0.0) + jnp.log1p(jnp.exp(-jnp.abs(x)))


def _silu(x):
    return x * jax.nn.sigmoid(x)


def _round_up(n, m):
    return (n + m - 1) // m * m


# --------------------------------- the kernel --------------------------------
def block_kernel(x_ref, p32_ref, w_in_ref, w_xp_ref, wff1_ref, o_ref,
                 y_sc, dt_sc, du_sc, Bm_sc, Cm_sc, *,
                 Bg, T, d_model, d_inner, d_state, d_conv, dt_rank, d_ff,
                 off32, off_ff1, mm_dtype):
    TB = T * Bg
    f32 = jnp.float32

    def p32(name):
        s, n = off32[name]              # 8-row-aligned static offsets
        return p32_ref[s:s + n, :]

    def mm(a):                          # cast a matmul operand for the MXU
        return a.astype(mm_dtype)

    x = x_ref[...].astype(f32)                                   # (TB, D)

    # ---------------- sub-block 1: x = x + Mamba(LN1(x)) ----------------
    xn = _layernorm(x, p32("ln1_w"), p32("ln1_b"))

    # fused in_proj (xc | z): one matmul against a slab padded only to the
    # next 128-lane multiple (not d_ff).
    xz = jnp.dot(mm(xn), w_in_ref[0:d_model, :],
                 preferred_element_type=f32)                     # (TB, Win)
    xc = xz[:, :d_inner]
    z = xz[:, d_inner:2 * d_inner]

    # causal depthwise conv1d.  Rows are time-major with Bg (=8) rows per
    # timestep, so every tap shift k*Bg is a sublane-aligned slice.
    pad = jnp.zeros(((d_conv - 1) * Bg, d_inner), f32)
    xpad = jnp.concatenate([pad, xc], axis=0)                    # ((T+K-1)*Bg, I)
    conv_w = p32("conv_w")                                       # (d_conv, I)
    acc = jnp.zeros((TB, d_inner), f32) + p32("conv_b")
    for k in range(d_conv):                                      # K=8 static
        acc = acc + xpad[k * Bg:k * Bg + TB, :] * conv_w[k:k + 1, :]
    u = _silu(acc)                                               # (TB, I)

    # fused x_proj (B | C | dt_lo): real width 2*d_state+dt_rank, padded to 128.
    xp = jnp.dot(mm(u), w_xp_ref[0:d_inner, :],
                 preferred_element_type=f32)                     # (TB, Wxp)
    Bm = xp[:, :d_state]
    Cm = xp[:, d_state:2 * d_state]
    dt_lo = xp[:, 2 * d_state:2 * d_state + dt_rank]

    # dt projection: at tiny dt_rank a K=2 MXU pass is all push/pop latency,
    # so use VPU multiply-adds; fall back to the MXU for larger dt_rank.
    wdt = p32("w_dt")                                            # (dt_rank, I)
    if dt_rank <= 8:
        dt_pre = dt_lo[:, 0:1] * wdt[0:1, :] + p32("b_dt")
        for k in range(1, dt_rank):
            dt_pre = dt_pre + dt_lo[:, k:k + 1] * wdt[k:k + 1, :]
    else:
        dt_pre = jnp.dot(mm(dt_lo), mm(wdt),
                         preferred_element_type=f32) + p32("b_dt")
    dt = _softplus(dt_pre)                                       # (TB, I)

    A = p32("A")                                                 # (d_state, I)

    # Park the per-row scan inputs in VMEM scratch with single aligned full
    # stores; dA/dBu are built per-timestep inside the loop, so the
    # (rows, d_state, d_inner) tensors are never materialized in full.
    dt_sc[...] = dt
    du_sc[...] = dt * u
    Bm_sc[...] = Bm
    Cm_sc[...] = Cm

    def scan_step(t, h):
        r0 = pl.multiple_of(t * Bg, 8)
        dt_t = dt_sc[pl.ds(r0, Bg), :]                           # (Bg, I)
        du_t = du_sc[pl.ds(r0, Bg), :]
        B_t = Bm_sc[pl.ds(r0, Bg), :]                            # (Bg, S)
        C_t = Cm_sc[pl.ds(r0, Bg), :]
        dA_t = jnp.exp(dt_t[:, None, :] * A[None, :, :])         # (Bg, S, I)
        dBu_t = du_t[:, None, :] * B_t[:, :, None]               # (Bg, S, I)
        h = dA_t * h + dBu_t
        # one aligned 8-row store per timestep (unmasked sublane tile)
        y_sc[pl.ds(r0, Bg), :] = jnp.sum(h * C_t[:, :, None], axis=1)
        return h

    h0 = jnp.zeros((Bg, d_state, d_inner), f32)
    jax.lax.fori_loop(0, T, scan_step, h0, unroll=True)

    y = (y_sc[...] + p32("D") * u) * _silu(z)
    sa = jnp.dot(mm(y), mm(p32("w_out")), preferred_element_type=f32)
    x1 = x + sa

    # ---------------- sub-block 2: x = x + FFN(LN2(x)) ----------------
    xn2 = _layernorm(x1, p32("ln2_w"), p32("ln2_b"))
    w1s, w1n = off_ff1["w_ff1"]
    b1s, _ = off_ff1["b_ff1"]
    hff = jnp.dot(mm(xn2), wff1_ref[w1s:w1s + w1n, :],
                  preferred_element_type=f32)
    hff = jnp.maximum(hff + wff1_ref[b1s:b1s + 1, :].astype(f32), 0.0)
    if hff.shape[1] != d_ff:               # drop lane padding before ffn2
        hff = hff[:, :d_ff]
    ff = jnp.dot(mm(hff), mm(p32("w_ff2")),
                 preferred_element_type=f32) + p32("b_ff2")
    # nn.Dropout is identity in inference / eval mode.
    # TODO(synk): training-mode dropout (RNG masking) is not implemented.
    o_ref[...] = (x1 + ff).astype(o_ref.dtype)


# ------------------------- host-side parameter packing -----------------------
def _pack_rows_aligned(entries, width, dtype=jnp.float32):
    """Row-stack 2-D params into one (rows, width) slab.

    Every group is zero-padded to `width` lanes AND to a multiple of 8 rows,
    so every static slice taken inside the kernel starts on a sublane-tile
    boundary (no realignment copies).  Returns (slab, {name: (row_off, rows)}).
    """
    offsets, mats, r = {}, [], 0
    for name, arr in entries:
        arr = jnp.asarray(arr, jnp.float32)
        assert arr.ndim == 2, name
        rows = arr.shape[0]
        rows_p = _round_up(rows, 8)
        if arr.shape[1] < width:
            arr = jnp.pad(arr, ((0, 0), (0, width - arr.shape[1])))
        assert arr.shape[1] == width, (name, arr.shape, width)
        if rows_p > rows:
            arr = jnp.pad(arr, ((0, rows_p - rows), (0, 0)))
        offsets[name] = (r, rows)
        mats.append(arr)
        r += rows_p
    return jnp.concatenate(mats, axis=0).astype(dtype), offsets


def block_forward(x, params, *, matmul_dtype=jnp.bfloat16):
    B, T, Dm = x.shape
    d_conv, d_inner = params["conv_w"].shape
    d_state = params["A"].shape[0]
    dt_rank = params["w_dt"].shape[0]
    d_ff = params["w_ff1"].shape[1]
    assert d_inner == Dm, "Mamba(expand=1) => d_inner == n_embed"

    Bg = 8                               # batches per grid step = one sublane tile
    BG = pl.cdiv(B, Bg)                  # batch groups ("parallel" grid axis)
    Bp = BG * Bg

    # slab of width d_inner (mixed elementwise/matmul use -> keep f32)
    p32_slab, off32 = _pack_rows_aligned([
        ("conv_w", params["conv_w"]),
        ("A", params["A"]),
        ("w_out", params["w_out"]),
        ("w_ff2", params["w_ff2"]),
        ("w_dt", params["w_dt"]),
        ("ln1_w", params["ln1_w"]), ("ln1_b", params["ln1_b"]),
        ("conv_b", params["conv_b"]), ("b_dt", params["b_dt"]),
        ("D", params["D"]),
        ("ln2_w", params["ln2_w"]), ("ln2_b", params["ln2_b"]),
        ("b_ff2", params["b_ff2"]),
    ], d_inner, jnp.float32)

    # matmul-only weight slabs, each padded only to its own 128-lane multiple
    # and stored in the MXU dtype (halves resident weight VMEM for bf16).
    w_in = jnp.concatenate([params["w_in_x"], params["w_in_z"]], axis=1)
    w_xp = jnp.concatenate([params["w_xp_B"], params["w_xp_C"],
                            params["w_xp_dt"]], axis=1)
    w_in_slab, _ = _pack_rows_aligned(
        [("w", w_in)], _round_up(2 * d_inner, 128), matmul_dtype)
    w_xp_slab, _ = _pack_rows_aligned(
        [("w", w_xp)], _round_up(2 * d_state + dt_rank, 128), matmul_dtype)
    wff1_slab, off_ff1 = _pack_rows_aligned(
        [("w_ff1", params["w_ff1"]), ("b_ff1", params["b_ff1"])],
        _round_up(d_ff, 128), matmul_dtype)

    # batch padded to a multiple of 8, laid out (group, time, batch-in-group, D)
    # so all conv shifts / scan stores inside the kernel are sublane-aligned.
    xb = jnp.pad(x, ((0, Bp - B), (0, 0), (0, 0))) if Bp != B else x
    xg = xb.reshape(BG, Bg, T, Dm).transpose(0, 2, 1, 3).reshape(BG, T * Bg, Dm)

    kernel = functools.partial(
        block_kernel, Bg=Bg, T=T, d_model=Dm, d_inner=d_inner, d_state=d_state,
        d_conv=d_conv, dt_rank=dt_rank, d_ff=d_ff,
        off32=off32, off_ff1=off_ff1, mm_dtype=matmul_dtype)

    out_g = pl.pallas_call(
        kernel,
        out_shape=jax.ShapeDtypeStruct((BG, T * Bg, Dm), x.dtype),
        grid=(BG,),
        in_specs=[
            pl.BlockSpec((None, T * Bg, Dm), lambda g: (g, 0, 0)),
            pl.BlockSpec(p32_slab.shape, lambda g: (0, 0)),
            pl.BlockSpec(w_in_slab.shape, lambda g: (0, 0)),
            pl.BlockSpec(w_xp_slab.shape, lambda g: (0, 0)),
            pl.BlockSpec(wff1_slab.shape, lambda g: (0, 0)),
        ],
        out_specs=pl.BlockSpec((None, T * Bg, Dm), lambda g: (g, 0, 0)),
        scratch_shapes=[
            pltpu.VMEM((T * Bg, d_inner), jnp.float32),   # y (SSM output rows)
            pltpu.VMEM((T * Bg, d_inner), jnp.float32),   # dt
            pltpu.VMEM((T * Bg, d_inner), jnp.float32),   # dt * u
            pltpu.VMEM((T * Bg, d_state), jnp.float32),   # B
            pltpu.VMEM((T * Bg, d_state), jnp.float32),   # C
        ],
        compiler_params=pltpu.CompilerParams(
            dimension_semantics=("parallel",),
            vmem_limit_bytes=32 * 1024 * 1024),
        # TODO(synk): at production shapes (D % 128 == 0, large T*B, d_ff)
        # additionally tile time and d_ff with BlockSpecs so nothing has to be
        # resident in VMEM at once (re-derive tile sizes for v7x's 64 MiB).
    )(xg, p32_slab, w_in_slab, w_xp_slab, wff1_slab)

    out = out_g.reshape(BG, T, Bg, Dm).transpose(0, 2, 1, 3).reshape(Bp, T, Dm)
    return out[:B]


# ----------------------- pure-JAX reference (for checking) -------------------
def reference_block(x, p):
    hi = jax.lax.Precision.HIGHEST

    def single(xb):  # (T, D)
        xn = _layernorm(xb, p["ln1_w"], p["ln1_b"])
        xc = jnp.dot(xn, p["w_in_x"], precision=hi)
        z = jnp.dot(xn, p["w_in_z"], precision=hi)
        K, d_inner = p["conv_w"].shape
        Tn = xc.shape[0]
        xpad = jnp.concatenate([jnp.zeros((K - 1, d_inner), jnp.float32), xc], 0)
        conv = p["conv_b"] + sum(xpad[k:k + Tn] * p["conv_w"][k:k + 1]
                                 for k in range(K))
        u = _silu(conv)
        dt = _softplus(jnp.dot(jnp.dot(u, p["w_xp_dt"], precision=hi),
                               p["w_dt"], precision=hi) + p["b_dt"])
        Bm = jnp.dot(u, p["w_xp_B"], precision=hi)
        Cm = jnp.dot(u, p["w_xp_C"], precision=hi)
        A, Dv = p["A"], p["D"]                 # (d_state,d_inner), (1,d_inner)
        d_state = A.shape[0]

        def step(h, inp):
            dt_t, u_t, B_t, C_t = inp
            h = jnp.exp(dt_t[None, :] * A) * h + (dt_t * u_t)[None, :] * B_t[:, None]
            y_t = jnp.sum(h * C_t[:, None], axis=0) + Dv[0] * u_t
            return h, y_t

        h0 = jnp.zeros((d_state, d_inner), jnp.float32)
        _, ys = jax.lax.scan(step, h0, (dt, u, Bm, Cm))
        y = ys * _silu(z)
        x1 = xb + jnp.dot(y, p["w_out"], precision=hi)
        xn2 = _layernorm(x1, p["ln2_w"], p["ln2_b"])
        ff = jnp.dot(jnp.maximum(jnp.dot(xn2, p["w_ff1"], precision=hi)
                                 + p["b_ff1"], 0.0),
                     p["w_ff2"], precision=hi) + p["b_ff2"]
        return x1 + ff

    return jax.vmap(single)(x)


# ------------------------------------ main ------------------------------------
if __name__ == "__main__":
    B, T, n_embed = 2, 8, 32
    d_state, d_conv, expand = 16, 8, 1
    d_inner = expand * n_embed
    dt_rank = math.ceil(n_embed / 16)
    d_ff = 4 * n_embed

    key = jax.random.PRNGKey(0)
    ks = jax.random.split(key, 16)

    def rand(k, shape, scale=0.1):
        return scale * jax.random.normal(k, shape, dtype=jnp.float32)

    params = dict(
        ln1_w=jnp.ones((1, n_embed), jnp.float32),
        ln1_b=jnp.zeros((1, n_embed), jnp.float32),
        w_in_x=rand(ks[0], (n_embed, d_inner)),
        w_in_z=rand(ks[1], (n_embed, d_inner)),
        conv_w=rand(ks[2], (d_conv, d_inner)),
        conv_b=rand(ks[3], (1, d_inner)),
        w_xp_dt=rand(ks[4], (d_inner, dt_rank)),
        w_xp_B=rand(ks[5], (d_inner, d_state)),
        w_xp_C=rand(ks[6], (d_inner, d_state)),
        w_dt=rand(ks[7], (dt_rank, d_inner)),
        b_dt=rand(ks[8], (1, d_inner)),
        # A = -exp(A_log) with Mamba's S4D-real init, stored transposed (d_state, d_inner)
        A=-jnp.broadcast_to(
            jnp.arange(1, d_state + 1, dtype=jnp.float32)[:, None], (d_state, d_inner)),
        D=jnp.ones((1, d_inner), jnp.float32),
        w_out=rand(ks[9], (d_inner, n_embed)),
        ln2_w=jnp.ones((1, n_embed), jnp.float32),
        ln2_b=jnp.zeros((1, n_embed), jnp.float32),
        w_ff1=rand(ks[10], (n_embed, d_ff)),
        b_ff1=rand(ks[11], (1, d_ff)),
        w_ff2=rand(ks[12], (d_ff, n_embed)),
        b_ff2=rand(ks[13], (1, n_embed)),
    )

    x = jax.random.normal(ks[14], (B, T, n_embed), dtype=jnp.float32)

    # default (performance) path: bf16 MXU inputs, f32 elementwise/scan/accum
    out_bf16 = block_forward(x, params, matmul_dtype=jnp.bfloat16)
    jax.block_until_ready(out_bf16)
    # exactness path: pure f32 matmuls
    out_f32 = block_forward(x, params, matmul_dtype=jnp.float32)
    jax.block_until_ready(out_f32)

    ref = reference_block(x, params)
    err_f32 = float(jnp.max(jnp.abs(out_f32 - ref)))
    err_bf16 = float(jnp.max(jnp.abs(out_bf16 - ref)))
    assert err_f32 < 2e-3, f"f32 kernel/reference mismatch, max abs err = {err_f32}"
    assert err_bf16 < 5e-2, f"bf16 kernel/reference mismatch, max abs err = {err_bf16}"
    print("KERNEL_OK")
</pallas_src>

<mosaic_0001>
module attributes {stable_mosaic.version = 11 : i64} {
  func.func @block_kernel(%arg0: i32, %arg1: memref<1x64x32xf32, #tpu.memory_space<vmem>>, %arg2: memref<256x32xf32, #tpu.memory_space<vmem>>, %arg3: memref<32x128xbf16, #tpu.memory_space<vmem>>, %arg4: memref<32x128xbf16, #tpu.memory_space<vmem>>, %arg5: memref<40x128xbf16, #tpu.memory_space<vmem>>, %arg6: memref<1x64x32xf32, #tpu.memory_space<vmem>>, %arg7: memref<64x32xf32, #tpu.memory_space<vmem>>, %arg8: memref<64x32xf32, #tpu.memory_space<vmem>>, %arg9: memref<64x32xf32, #tpu.memory_space<vmem>>, %arg10: memref<64x16xf32, #tpu.memory_space<vmem>>, %arg11: memref<64x16xf32, #tpu.memory_space<vmem>>) attributes {dimension_semantics = [#tpu.dimension_semantics<parallel>], iteration_bounds = array<i64: 1>, scalar_prefetch = 0 : i64, scratch_operands = 5 : i64, tpu.core_type = #tpu.core_type<tc>, window_params = [{transform_indices = @transform_0, window_bounds = array<i64: 1, 64, 32>}, {pipeline_mode = #tpu.pipeline_mode<synchronous>, transform_indices = @transform_1, window_bounds = array<i64: 256, 32>}, {pipeline_mode = #tpu.pipeline_mode<synchronous>, transform_indices = @transform_2, window_bounds = array<i64: 32, 128>}, {pipeline_mode = #tpu.pipeline_mode<synchronous>, transform_indices = @transform_3, window_bounds = array<i64: 32, 128>}, {pipeline_mode = #tpu.pipeline_mode<synchronous>, transform_indices = @transform_4, window_bounds = array<i64: 40, 128>}, {transform_indices = @transform_5, window_bounds = array<i64: 1, 64, 32>}]} {
    %c0 = arith.constant 0 : index
    %c0_0 = arith.constant 0 : index
    %c0_1 = arith.constant 0 : index
    %0 = vector.load %arg1[%c0, %c0_0, %c0_1] : memref<1x64x32xf32, #tpu.memory_space<vmem>>, vector<1x64x32xf32>
    %1 = vector.shape_cast %0 : vector<1x64x32xf32> to vector<64x32xf32>
    %c192 = arith.constant 192 : index
    %c0_2 = arith.constant 0 : index
    %2 = vector.load %arg2[%c192, %c0_2] : memref<256x32xf32, #tpu.memory_space<vmem>>, vector<1x32xf32>
    %c200 = arith.constant 200 : index
    %c0_3 = arith.constant 0 : index
    %3 = vector.load %arg2[%c200, %c0_3] : memref<256x32xf32, #tpu.memory_space<vmem>>, vector<1x32xf32>
    %cst = arith.constant dense<0.000000e+00> : vector<64xf32>
    %4 = vector.multi_reduction <add>, %1, %cst [1] : vector<64x32xf32> to vector<64xf32>
    %5 = vector.shape_cast %4 : vector<64xf32> to vector<64x1xf32>
    %cst_4 = arith.constant 3.200000e+01 : f32
    %6 = vector.broadcast %cst_4 : f32 to vector<64x1xf32>
    %7 = arith.divf %5, %6 : vector<64x1xf32>
    %8 = vector.broadcast %7 : vector<64x1xf32> to vector<64x32xf32>
    %9 = arith.subf %1, %8 : vector<64x32xf32>
    %10 = arith.mulf %9, %9 : vector<64x32xf32>
    %cst_5 = arith.constant dense<0.000000e+00> : vector<64xf32>
    %11 = vector.multi_reduction <add>, %10, %cst_5 [1] : vector<64x32xf32> to vector<64xf32>
    %12 = vector.shape_cast %11 : vector<64xf32> to vector<64x1xf32>
    %cst_6 = arith.constant 3.200000e+01 : f32
    %13 = vector.broadcast %cst_6 : f32 to vector<64x1xf32>
    %14 = arith.divf %12, %13 : vector<64x1xf32>
    %15 = vector.broadcast %7 : vector<64x1xf32> to vector<64x32xf32>
    %16 = arith.subf %1, %15 : vector<64x32xf32>
    %cst_7 = arith.constant 9.99999974E-6 : f32
    %17 = vector.broadcast %cst_7 : f32 to vector<64x1xf32>
    %18 = arith.addf %14, %17 : vector<64x1xf32>
    %19 = math.rsqrt %18 : vector<64x1xf32>
    %20 = vector.broadcast %19 : vector<64x1xf32> to vector<64x32xf32>
    %21 = arith.mulf %16, %20 : vector<64x32xf32>
    %22 = vector.broadcast %2 : vector<1x32xf32> to vector<64x32xf32>
    %23 = arith.mulf %21, %22 : vector<64x32xf32>
    %24 = vector.broadcast %3 : vector<1x32xf32> to vector<64x32xf32>
    %25 = arith.addf %23, %24 : vector<64x32xf32>
    %26 = arith.truncf %25 : vector<64x32xf32> to vector<64x32xbf16>
    %c0_8 = arith.constant 0 : index
    %c0_9 = arith.constant 0 : index
    %27 = vector.load %arg3[%c0_8, %c0_9] : memref<32x128xbf16, #tpu.memory_space<vmem>>, vector<32x128xbf16>
    %cst_10 = arith.constant dense<0.000000e+00> : vector<64x128xf32>
    %28 = tpu.matmul %26, %27, %cst_10 {dimension_numbers = #tpu.dot_dimension_numbers<[1], [0], [0], [1], [0, 0, 1, 1], [], []>} : vector<64x32xbf16>, vector<32x128xbf16>, vector<64x128xf32> -> vector<64x128xf32>
    %29 = vector.extract_strided_slice %28 {offsets = [0, 0], sizes = [64, 32], strides = [1, 1]} : vector<64x128xf32> to vector<64x32xf32>
    %30 = vector.extract_strided_slice %28 {offsets = [0, 32], sizes = [64, 32], strides = [1, 1]} : vector<64x128xf32> to vector<64x32xf32>
    %cst_11 = arith.constant 0.000000e+00 : f32
    %31 = vector.broadcast %cst_11 : f32 to vector<56x32xf32>
    %32 = tpu.concatenate %31, %29 in 0 : vector<56x32xf32>, vector<64x32xf32> -> vector<120x32xf32>
    %c0_12 = arith.constant 0 : index
    %c0_13 = arith.constant 0 : index
    %33 = vector.load %arg2[%c0_12, %c0_13] : memref<256x32xf32, #tpu.memory_space<vmem>>, vector<8x32xf32>
    %cst_14 = arith.constant 0.000000e+00 : f32
    %34 = vector.broadcast %cst_14 : f32 to vector<64x32xf32>
    %c208 = arith.constant 208 : index
    %c0_15 = arith.constant 0 : index
    %35 = vector.load %arg2[%c208, %c0_15] : memref<256x32xf32, #tpu.memory_space<vmem>>, vector<1x32xf32>
    %36 = vector.broadcast %35 : vector<1x32xf32> to vector<64x32xf32>
    %37 = arith.addf %34, %36 : vector<64x32xf32>
    %38 = vector.extract_strided_slice %32 {offsets = [0, 0], sizes = [64, 32], strides = [1, 1]} : vector<120x32xf32> to vector<64x32xf32>
    %39 = vector.extract_strided_slice %33 {offsets = [0, 0], sizes = [1, 32], strides = [1, 1]} : vector<8x32xf32> to vector<1x32xf32>
    %40 = vector.broadcast %39 : vector<1x32xf32> to vector<64x32xf32>
    %41 = arith.mulf %38, %40 : vector<64x32xf32>
    %42 = arith.addf %37, %41 : vector<64x32xf32>
    %43 = vector.extract_strided_slice %32 {offsets = [8, 0], sizes = [64, 32], strides = [1, 1]} : vector<120x32xf32> to vector<64x32xf32>
    %44 = vector.extract_strided_slice %33 {offsets = [1, 0], sizes = [1, 32], strides = [1, 1]} : vector<8x32xf32> to vector<1x32xf32>
    %45 = vector.broadcast %44 : vector<1x32xf32> to vector<64x32xf32>
    %46 = arith.mulf %43, %45 : vector<64x32xf32>
    %47 = arith.addf %42, %46 : vector<64x32xf32>
    %48 = vector.extract_strided_slice %32 {offsets = [16, 0], sizes = [64, 32], strides = [1, 1]} : vector<120x32xf32> to vector<64x32xf32>
    %49 = vector.extract_strided_slice %33 {offsets = [2, 0], sizes = [1, 32], strides = [1, 1]} : vector<8x32xf32> to vector<1x32xf32>
    %50 = vector.broadcast %49 : vector<1x32xf32> to vector<64x32xf32>
    %51 = arith.mulf %48, %50 : vector<64x32xf32>
    %52 = arith.addf %47, %51 : vector<64x32xf32>
    %53 = vector.extract_strided_slice %32 {offsets = [24, 0], sizes = [64, 32], strides = [1, 1]} : vector<120x32xf32> to vector<64x32xf32>
    %54 = vector.extract_strided_slice %33 {offsets = [3, 0], sizes = [1, 32], strides = [1, 1]} : vector<8x32xf32> to vector<1x32xf32>
    %55 = vector.broadcast %54 : vector<1x32xf32> to vector<64x32xf32>
    %56 = arith.mulf %53, %55 : vector<64x32xf32>
    %57 = arith.addf %52, %56 : vector<64x32xf32>
    %58 = vector.extract_strided_slice %32 {offsets = [32, 0], sizes = [64, 32], strides = [1, 1]} : vector<120x32xf32> to vector<64x32xf32>
    %59 = vector.extract_strided_slice %33 {offsets = [4, 0], sizes = [1, 32], strides = [1, 1]} : vector<8x32xf32> to vector<1x32xf32>
    %60 = vector.broadcast %59 : vector<1x32xf32> to vector<64x32xf32>
    %61 = arith.mulf %58, %60 : vector<64x32xf32>
    %62 = arith.addf %57, %61 : vector<64x32xf32>
    %63 = vector.extract_strided_slice %32 {offsets = [40, 0], sizes = [64, 32], strides = [1, 1]} : vector<120x32xf32> to vector<64x32xf32>
    %64 = vector.extract_strided_slice %33 {offsets = [5, 0], sizes = [1, 32], strides = [1, 1]} : vector<8x32xf32> to vector<1x32xf32>
    %65 = vector.broadcast %64 : vector<1x32xf32> to vector<64x32xf32>
    %66 = arith.mulf %63, %65 : vector<64x32xf32>
    %67 = arith.addf %62, %66 : vector<64x32xf32>
    %68 = vector.extract_strided_slice %32 {offsets = [48, 0], sizes = [64, 32], strides = [1, 1]} : vector<120x32xf32> to vector<64x32xf32>
    %69 = vector.extract_strided_slice %33 {offsets = [6, 0], sizes = [1, 32], strides = [1, 1]} : vector<8x32xf32> to vector<1x32xf32>
    %70 = vector.broadcast %69 : vector<1x32xf32> to vector<64x32xf32>
    %71 = arith.mulf %68, %70 : vector<64x32xf32>
    %72 = arith.addf %67, %71 : vector<64x32xf32>
    %73 = vector.extract_strided_slice %32 {offsets = [56, 0], sizes = [64, 32], strides = [1, 1]} : vector<120x32xf32> to vector<64x32xf32>
    %74 = vector.extract_strided_slice %33 {offsets = [7, 0], sizes = [1, 32], strides = [1, 1]} : vector<8x32xf32> to vector<1x32xf32>
    %75 = vector.broadcast %74 : vector<1x32xf32> to vector<64x32xf32>
    %76 = arith.mulf %73, %75 : vector<64x32xf32>
    %77 = arith.addf %72, %76 : vector<64x32xf32>
    %78 = arith.negf %77 : vector<64x32xf32>
    %79 = math.exp %78 : vector<64x32xf32>
    %cst_16 = arith.constant 1.000000e+00 : f32
    %80 = vector.broadcast %cst_16 : f32 to vector<64x32xf32>
    %81 = arith.addf %80, %79 : vector<64x32xf32>
    %82 = arith.divf %80, %81 : vector<64x32xf32>
    %83 = arith.mulf %77, %82 : vector<64x32xf32>
    %84 = arith.truncf %83 : vector<64x32xf32> to vector<64x32xbf16>
    %c0_17 = arith.constant 0 : index
    %c0_18 = arith.constant 0 : index
    %85 = vector.load %arg4[%c0_17, %c0_18] : memref<32x128xbf16, #tpu.memory_space<vmem>>, vector<32x128xbf16>
    %cst_19 = arith.constant dense<0.000000e+00> : vector<64x128xf32>
    %86 = tpu.matmul %84, %85, %cst_19 {dimension_numbers = #tpu.dot_dimension_numbers<[1], [0], [0], [1], [0, 0, 1, 1], [], []>} : vector<64x32xbf16>, vector<32x128xbf16>, vector<64x128xf32> -> vector<64x128xf32>
    %87 = vector.extract_strided_slice %86 {offsets = [0, 0], sizes = [64, 16], strides = [1, 1]} : vector<64x128xf32> to vector<64x16xf32>
    %88 = vector.extract_strided_slice %86 {offsets = [0, 16], sizes = [64, 16], strides = [1, 1]} : vector<64x128xf32> to vector<64x16xf32>
    %89 = vector.extract_strided_slice %86 {offsets = [0, 32], sizes = [64, 2], strides = [1, 1]} : vector<64x128xf32> to vector<64x2xf32>
    %c184 = arith.constant 184 : index
    %c0_20 = arith.constant 0 : index
    %90 = vector.load %arg2[%c184, %c0_20] : memref<256x32xf32, #tpu.memory_space<vmem>>, vector<2x32xf32>
    %91 = vector.extract_strided_slice %89 {offsets = [0, 0], sizes = [64, 1], strides = [1, 1]} : vector<64x2xf32> to vector<64x1xf32>
    %92 = vector.extract_strided_slice %90 {offsets = [0, 0], sizes = [1, 32], strides = [1, 1]} : vector<2x32xf32> to vector<1x32xf32>
    %93 = vector.broadcast %91 : vector<64x1xf32> to vector<64x32xf32>
    %94 = vector.broadcast %92 : vector<1x32xf32> to vector<64x32xf32>
    %95 = arith.mulf %93, %94 : vector<64x32xf32>
    %c216 = arith.constant 216 : index
    %c0_21 = arith.constant 0 : index
    %96 = vector.load %arg2[%c216, %c0_21] : memref<256x32xf32, #tpu.memory_space<vmem>>, vector<1x32xf32>
    %97 = vector.broadcast %96 : vector<1x32xf32> to vector<64x32xf32>
    %98 = arith.addf %95, %97 : vector<64x32xf32>
    %99 = vector.extract_strided_slice %89 {offsets = [0, 1], sizes = [64, 1], strides = [1, 1]} : vector<64x2xf32> to vector<64x1xf32>
    %100 = vector.extract_strided_slice %90 {offsets = [1, 0], sizes = [1, 32], strides = [1, 1]} : vector<2x32xf32> to vector<1x32xf32>
    %101 = vector.broadcast %99 : vector<64x1xf32> to vector<64x32xf32>
    %102 = vector.broadcast %100 : vector<1x32xf32> to vector<64x32xf32>
    %103 = arith.mulf %101, %102 : vector<64x32xf32>
    %104 = arith.addf %98, %103 : vector<64x32xf32>
    %cst_22 = arith.constant 0.000000e+00 : f32
    %105 = vector.broadcast %cst_22 : f32 to vector<64x32xf32>
    %106 = arith.maximumf %104, %105 : vector<64x32xf32>
    %107 = math.absf %104 : vector<64x32xf32>
    %cst_23 = arith.constant 0.000000e+00 : f32
    %108 = vector.broadcast %cst_23 : f32 to vector<64x32xf32>
    %109 = arith.subf %108, %107 : vector<64x32xf32>
    %110 = math.exp %109 : vector<64x32xf32>
    %111 = math.log1p %110 : vector<64x32xf32>
    %112 = arith.addf %106, %111 : vector<64x32xf32>
    %c8 = arith.constant 8 : index
    %c0_24 = arith.constant 0 : index
    %113 = vector.load %arg2[%c8, %c0_24] : memref<256x32xf32, #tpu.memory_space<vmem>>, vector<16x32xf32>
    %c0_25 = arith.constant 0 : index
    %c0_26 = arith.constant 0 : index
    %114 = vector.load %arg8[%c0_25, %c0_26] : memref<64x32xf32, #tpu.memory_space<vmem>>, vector<64x32xf32>
    tpu.vector_store %arg8[%c0_25, %c0_26], %112 {strides = array<i32>} : memref<64x32xf32, #tpu.memory_space<vmem>>, vector<64x32xf32>,
    %115 = arith.mulf %112, %83 : vector<64x32xf32>
    %c0_27 = arith.constant 0 : index
    %c0_28 = arith.constant 0 : index
    %116 = vector.load %arg9[%c0_27, %c0_28] : memref<64x32xf32, #tpu.memory_space<vmem>>, vector<64x32xf32>
    tpu.vector_store %arg9[%c0_27, %c0_28], %115 {strides = array<i32>} : memref<64x32xf32, #tpu.memory_space<vmem>>, vector<64x32xf32>,
    %c0_29 = arith.constant 0 : index
    %c0_30 = arith.constant 0 : index
    %117 = vector.load %arg10[%c0_29, %c0_30] : memref<64x16xf32, #tpu.memory_space<vmem>>, vector<64x16xf32>
    tpu.vector_store %arg10[%c0_29, %c0_30], %87 {strides = array<i32>} : memref<64x16xf32, #tpu.memory_space<vmem>>, vector<64x16xf32>,
    %c0_31 = arith.constant 0 : index
    %c0_32 = arith.constant 0 : index
    %118 = vector.load %arg11[%c0_31, %c0_32] : memref<64x16xf32, #tpu.memory_space<vmem>>, vector<64x16xf32>
    tpu.vector_store %arg11[%c0_31, %c0_32], %88 {strides = array<i32>} : memref<64x16xf32, #tpu.memory_space<vmem>>, vector<64x16xf32>,
    %cst_33 = arith.constant 0.000000e+00 : f32
    %119 = vector.broadcast %cst_33 : f32 to vector<8x16x32xf32>
    %c0_i32 = arith.constant 0 : i32
    %c8_i32 = arith.constant 8 : i32
    %120 = arith.muli %c0_i32, %c8_i32 : i32
    %121 = tpu.assume_multiple %120, 8 : i32
    %122 = arith.index_cast %121 : i32 to index
    %c0_34 = arith.constant 0 : index
    %123 = vector.load %arg8[%122, %c0_34] : memref<64x32xf32, #tpu.memory_space<vmem>>, vector<8x32xf32>
    %124 = arith.index_cast %121 : i32 to index
    %c0_35 = arith.constant 0 : index
    %125 = vector.load %arg9[%124, %c0_35] : memref<64x32xf32, #tpu.memory_space<vmem>>, vector<8x32xf32>
    %126 = arith.index_cast %121 : i32 to index
    %c0_36 = arith.constant 0 : index
    %127 = vector.load %arg10[%126, %c0_36] : memref<64x16xf32, #tpu.memory_space<vmem>>, vector<8x16xf32>
    %128 = arith.index_cast %121 : i32 to index
    %c0_37 = arith.constant 0 : index
    %129 = vector.load %arg11[%128, %c0_37] : memref<64x16xf32, #tpu.memory_space<vmem>>, vector<8x16xf32>
    %130 = vector.shape_cast %123 : vector<8x32xf32> to vector<8x1x32xf32>
    %131 = vector.shape_cast %113 : vector<16x32xf32> to vector<1x16x32xf32>
    %132 = vector.broadcast %130 : vector<8x1x32xf32> to vector<8x16x32xf32>
    %133 = vector.broadcast %131 : vector<1x16x32xf32> to vector<8x16x32xf32>
    %134 = arith.mulf %132, %133 : vector<8x16x32xf32>
    %135 = math.exp %134 : vector<8x16x32xf32>
    %136 = vector.shape_cast %125 : vector<8x32xf32> to vector<8x1x32xf32>
    %137 = vector.shape_cast %127 : vector<8x16xf32> to vector<8x16x1xf32>
    %138 = vector.broadcast %136 : vector<8x1x32xf32> to vector<8x16x32xf32>
    %139 = vector.broadcast %137 : vector<8x16x1xf32> to vector<8x16x32xf32>
    %140 = arith.mulf %138, %139 : vector<8x16x32xf32>
    %141 = arith.mulf %135, %119 : vector<8x16x32xf32>
    %142 = arith.addf %141, %140 : vector<8x16x32xf32>
    %143 = vector.shape_cast %129 : vector<8x16xf32> to vector<8x16x1xf32>
    %144 = vector.broadcast %143 : vector<8x16x1xf32> to vector<8x16x32xf32>
    %145 = arith.mulf %142, %144 : vector<8x16x32xf32>
    %cst_38 = arith.constant dense<0.000000e+00> : vector<8x32xf32>
    %146 = vector.multi_reduction <add>, %145, %cst_38 [1] : vector<8x16x32xf32> to vector<8x32xf32>
    %147 = arith.index_cast %121 : i32 to index
    %c0_39 = arith.constant 0 : index
    %148 = vector.load %arg7[%147, %c0_39] : memref<64x32xf32, #tpu.memory_space<vmem>>, vector<8x32xf32>
    tpu.vector_store %arg7[%147, %c0_39], %146 {strides = array<i32>} : memref<64x32xf32, #tpu.memory_space<vmem>>, vector<8x32xf32>,
    %c1_i32 = arith.constant 1 : i32
    %c8_i32_40 = arith.constant 8 : i32
    %149 = arith.muli %c1_i32, %c8_i32_40 : i32
    %150 = tpu.assume_multiple %149, 8 : i32
    %151 = arith.index_cast %150 : i32 to index
    %c0_41 = arith.constant 0 : index
    %152 = vector.load %arg8[%151, %c0_41] : memref<64x32xf32, #tpu.memory_space<vmem>>, vector<8x32xf32>
    %153 = arith.index_cast %150 : i32 to index
    %c0_42 = arith.constant 0 : index
    %154 = vector.load %arg9[%153, %c0_42] : memref<64x32xf32, #tpu.memory_space<vmem>>, vector<8x32xf32>
    %155 = arith.index_cast %150 : i32 to index
    %c0_43 = arith.constant 0 : index
    %156 = vector.load %arg10[%155, %c0_43] : memref<64x16xf32, #tpu.memory_space<vmem>>, vector<8x16xf32>
    %157 = arith.index_cast %150 : i32 to index
    %c0_44 = arith.constant 0 : index
    %158 = vector.load %arg11[%157, %c0_44] : memref<64x16xf32, #tpu.memory_space<vmem>>, vector<8x16xf32>
    %159 = vector.shape_cast %152 : vector<8x32xf32> to vector<8x1x32xf32>
    %160 = vector.shape_cast %113 : vector<16x32xf32> to vector<1x16x32xf32>
    %161 = vector.broadcast %159 : vector<8x1x32xf32> to vector<8x16x32xf32>
    %162 = vector.broadcast %160 : vector<1x16x32xf32> to vector<8x16x32xf32>
    %163 = arith.mulf %161, %162 : vector<8x16x32xf32>
    %164 = math.exp %163 : vector<8x16x32xf32>
    %165 = vector.shape_cast %154 : vector<8x32xf32> to vector<8x1x32xf32>
    %166 = vector.shape_cast %156 : vector<8x16xf32> to vector<8x16x1xf32>
    %167 = vector.broadcast %165 : vector<8x1x32xf32> to vector<8x16x32xf32>
    %168 = vector.broadcast %166 : vector<8x16x1xf32> to vector<8x16x32xf32>
    %169 = arith.mulf %167, %168 : vector<8x16x32xf32>
    %170 = arith.mulf %164, %142 : vector<8x16x32xf32>
    %171 = arith.addf %170, %169 : vector<8x16x32xf32>
    %172 = vector.shape_cast %158 : vector<8x16xf32> to vector<8x16x1xf32>
    %173 = vector.broadcast %172 : vector<8x16x1xf32> to vector<8x16x32xf32>
    %174 = arith.mulf %171, %173 : vector<8x16x32xf32>
    %cst_45 = arith.constant dense<0.000000e+00> : vector<8x32xf32>
    %175 = vector.multi_reduction <add>, %174, %cst_45 [1] : vector<8x16x32xf32> to vector<8x32xf32>
    %176 = arith.index_cast %150 : i32 to index
    %c0_46 = arith.constant 0 : index
    %177 = vector.load %arg7[%176, %c0_46] : memref<64x32xf32, #tpu.memory_space<vmem>>, vector<8x32xf32>
    tpu.vector_store %arg7[%176, %c0_46], %175 {strides = array<i32>} : memref<64x32xf32, #tpu.memory_space<vmem>>, vector<8x32xf32>,
    %c2_i32 = arith.constant 2 : i32
    %c8_i32_47 = arith.constant 8 : i32
    %178 = arith.muli %c2_i32, %c8_i32_47 : i32
    %179 = tpu.assume_multiple %178, 8 : i32
    %180 = arith.index_cast %179 : i32 to index
    %c0_48 = arith.constant 0 : index
    %181 = vector.load %arg8[%180, %c0_48] : memref<64x32xf32, #tpu.memory_space<vmem>>, vector<8x32xf32>
    %182 = arith.index_cast %179 : i32 to index
    %c0_49 = arith.constant 0 : index
    %183 = vector.load %arg9[%182, %c0_49] : memref<64x32xf32, #tpu.memory_space<vmem>>, vector<8x32xf32>
    %184 = arith.index_cast %179 : i32 to index
    %c0_50 = arith.constant 0 : index
    %185 = vector.load %arg10[%184, %c0_50] : memref<64x16xf32, #tpu.memory_space<vmem>>, vector<8x16xf32>
    %186 = arith.index_cast %179 : i32 to index
    %c0_51 = arith.constant 0 : index
    %187 = vector.load %arg11[%186, %c0_51] : memref<64x16xf32, #tpu.memory_space<vmem>>, vector<8x16xf32>
    %188 = vector.shape_cast %181 : vector<8x32xf32> to vector<8x1x32xf32>
    %189 = vector.shape_cast %113 : vector<16x32xf32> to vector<1x16x32xf32>
    %190 = vector.broadcast %188 : vector<8x1x32xf32> to vector<8x16x32xf32>
    %191 = vector.broadcast %189 : vector<1x16x32xf32> to vector<8x16x32xf32>
    %192 = arith.mulf %190, %191 : vector<8x16x32xf32>
    %193 = math.exp %192 : vector<8x16x32xf32>
    %194 = vector.shape_cast %183 : vector<8x32xf32> to vector<8x1x32xf32>
    %195 = vector.shape_cast %185 : vector<8x16xf32> to vector<8x16x1xf32>
    %196 = vector.broadcast %194 : vector<8x1x32xf32> to vector<8x16x32xf32>
    %197 = vector.broadcast %195 : vector<8x16x1xf32> to vector<8x16x32xf32>
    %198 = arith.mulf %196, %197 : vector<8x16x32xf32>
    %199 = arith.mulf %193, %171 : vector<8x16x32xf32>
    %200 = arith.addf %199, %198 : vector<8x16x32xf32>
    %201 = vector.shape_cast %187 : vector<8x16xf32> to vector<8x16x1xf32>
    %202 = vector.broadcast %201 : vector<8x16x1xf32> to vector<8x16x32xf32>
    %203 = arith.mulf %200, %202 : vector<8x16x32xf32>
    %cst_52 = arith.constant dense<0.000000e+00> : vector<8x32xf32>
    %204 = vector.multi_reduction <add>, %203, %cst_52 [1] : vector<8x16x32xf32> to vector<8x32xf32>
    %205 = arith.index_cast %179 : i32 to index
    %c0_53 = arith.constant 0 : index
    %206 = vector.load %arg7[%205, %c0_53] : memref<64x32xf32, #tpu.memory_space<vmem>>, vector<8x32xf32>
    tpu.vector_store %arg7[%205, %c0_53], %204 {strides = array<i32>} : memref<64x32xf32, #tpu.memory_space<vmem>>, vector<8x32xf32>,
    %c3_i32 = arith.constant 3 : i32
    %c8_i32_54 = arith.constant 8 : i32
    %207 = arith.muli %c3_i32, %c8_i32_54 : i32
    %208 = tpu.assume_multiple %207, 8 : i32
    %209 = arith.index_cast %208 : i32 to index
    %c0_55 = arith.constant 0 : index
    %210 = vector.load %arg8[%209, %c0_55] : memref<64x32xf32, #tpu.memory_space<vmem>>, vector<8x32xf32>
    %211 = arith.index_cast %208 : i32 to index
    %c0_56 = arith.constant 0 : index
    %212 = vector.load %arg9[%211, %c0_56] : memref<64x32xf32, #tpu.memory_space<vmem>>, vector<8x32xf32>
    %213 = arith.index_cast %208 : i32 to index
    %c0_57 = arith.constant 0 : index
    %214 = vector.load %arg10[%213, %c0_57] : memref<64x16xf32, #tpu.memory_space<vmem>>, vector<8x16xf32>
    %215 = arith.index_cast %208 : i32 to index
    %c0_58 = arith.constant 0 : index
    %216 = vector.load %arg11[%215, %c0_58] : memref<64x16xf32, #tpu.memory_space<vmem>>, vector<8x16xf32>
    %217 = vector.shape_cast %210 : vector<8x32xf32> to vector<8x1x32xf32>
    %218 = vector.shape_cast %113 : vector<16x32xf32> to vector<1x16x32xf32>
    %219 = vector.broadcast %217 : vector<8x1x32xf32> to vector<8x16x32xf32>
    %220 = vector.broadcast %218 : vector<1x16x32xf32> to vector<8x16x32xf32>
    %221 = arith.mulf %219, %220 : vector<8x16x32xf32>
    %222 = math.exp %221 : vector<8x16x32xf32>
    %223 = vector.shape_cast %212 : vector<8x32xf32> to vector<8x1x32xf32>
    %224 = vector.shape_cast %214 : vector<8x16xf32> to vector<8x16x1xf32>
    %225 = vector.broadcast %223 : vector<8x1x32xf32> to vector<8x16x32xf32>
    %226 = vector.broadcast %224 : vector<8x16x1xf32> to vector<8x16x32xf32>
    %227 = arith.mulf %225, %226 : vector<8x16x32xf32>
    %228 = arith.mulf %222, %200 : vector<8x16x32xf32>
    %229 = arith.addf %228, %227 : vector<8x16x32xf32>
    %230 = vector.shape_cast %216 : vector<8x16xf32> to vector<8x16x1xf32>
    %231 = vector.broadcast %230 : vector<8x16x1xf32> to vector<8x16x32xf32>
    %232 = arith.mulf %229, %231 : vector<8x16x32xf32>
    %cst_59 = arith.constant dense<0.000000e+00> : vector<8x32xf32>
    %233 = vector.multi_reduction <add>, %232, %cst_59 [1] : vector<8x16x32xf32> to vector<8x32xf32>
    %234 = arith.index_cast %208 : i32 to index
    %c0_60 = arith.constant 0 : index
    %235 = vector.load %arg7[%234, %c0_60] : memref<64x32xf32, #tpu.memory_space<vmem>>, vector<8x32xf32>
    tpu.vector_store %arg7[%234, %c0_60], %233 {strides = array<i32>} : memref<64x32xf32, #tpu.memory_space<vmem>>, vector<8x32xf32>,
    %c4_i32 = arith.constant 4 : i32
    %c8_i32_61 = arith.constant 8 : i32
    %236 = arith.muli %c4_i32, %c8_i32_61 : i32
    %237 = tpu.assume_multiple %236, 8 : i32
    %238 = arith.index_cast %237 : i32 to index
    %c0_62 = arith.constant 0 : index
    %239 = vector.load %arg8[%238, %c0_62] : memref<64x32xf32, #tpu.memory_space<vmem>>, vector<8x32xf32>
    %240 = arith.index_cast %237 : i32 to index
    %c0_63 = arith.constant 0 : index
    %241 = vector.load %arg9[%240, %c0_63] : memref<64x32xf32, #tpu.memory_space<vmem>>, vector<8x32xf32>
    %242 = arith.index_cast %237 : i32 to index
    %c0_64 = arith.constant 0 : index
    %243 = vector.load %arg10[%242, %c0_64] : memref<64x16xf32, #tpu.memory_space<vmem>>, vector<8x16xf32>
    %244 = arith.index_cast %237 : i32 to index
    %c0_65 = arith.constant 0 : index
    %245 = vector.load %arg11[%244, %c0_65] : memref<64x16xf32, #tpu.memory_space<vmem>>, vector<8x16xf32>
    %246 = vector.shape_cast %239 : vector<8x32xf32> to vector<8x1x32xf32>
    %247 = vector.shape_cast %113 : vector<16x32xf32> to vector<1x16x32xf32>
    %248 = vector.broadcast %246 : vector<8x1x32xf32> to vector<8x16x32xf32>
    %249 = vector.broadcast %247 : vector<1x16x32xf32> to vector<8x16x32xf32>
    %250 = arith.mulf %248, %249 : vector<8x16x32xf32>
    %251 = math.exp %250 : vector<8x16x32xf32>
    %252 = vector.shape_cast %241 : vector<8x32xf32> to vector<8x1x32xf32>
    %253 = vector.shape_cast %243 : vector<8x16xf32> to vector<8x16x1xf32>
    %254 = vector.broadcast %252 : vector<8x1x32xf32> to vector<8x16x32xf32>
    %255 = vector.broadcast %253 : vector<8x16x1xf32> to vector<8x16x32xf32>
    %256 = arith.mulf %254, %255 : vector<8x16x32xf32>
    %257 = arith.mulf %251, %229 : vector<8x16x32xf32>
    %258 = arith.addf %257, %256 : vector<8x16x32xf32>
    %259 = vector.shape_cast %245 : vector<8x16xf32> to vector<8x16x1xf32>
    %260 = vector.broadcast %259 : vector<8x16x1xf32> to vector<8x16x32xf32>
    %261 = arith.mulf %258, %260 : vector<8x16x32xf32>
    %cst_66 = arith.constant dense<0.000000e+00> : vector<8x32xf32>
    %262 = vector.multi_reduction <add>, %261, %cst_66 [1] : vector<8x16x32xf32> to vector<8x32xf32>
    %263 = arith.index_cast %237 : i32 to index
    %c0_67 = arith.constant 0 : index
    %264 = vector.load %arg7[%263, %c0_67] : memref<64x32xf32, #tpu.memory_space<vmem>>, vector<8x32xf32>
    tpu.vector_store %arg7[%263, %c0_67], %262 {strides = array<i32>} : memref<64x32xf32, #tpu.memory_space<vmem>>, vector<8x32xf32>,
    %c5_i32 = arith.constant 5 : i32
    %c8_i32_68 = arith.constant 8 : i32
    %265 = arith.muli %c5_i32, %c8_i32_68 : i32
    %266 = tpu.assume_multiple %265, 8 : i32
    %267 = arith.index_cast %266 : i32 to index
    %c0_69 = arith.constant 0 : index
    %268 = vector.load %arg8[%267, %c0_69] : memref<64x32xf32, #tpu.memory_space<vmem>>, vector<8x32xf32>
    %269 = arith.index_cast %266 : i32 to index
    %c0_70 = arith.constant 0 : index
    %270 = vector.load %arg9[%269, %c0_70] : memref<64x32xf32, #tpu.memory_space<vmem>>, vector<8x32xf32>
    %271 = arith.index_cast %266 : i32 to index
    %c0_71 = arith.constant 0 : index
    %272 = vector.load %arg10[%271, %c0_71] : memref<64x16xf32, #tpu.memory_space<vmem>>, vector<8x16xf32>
    %273 = arith.index_cast %266 : i32 to index
    %c0_72 = arith.constant 0 : index
    %274 = vector.load %arg11[%273, %c0_72] : memref<64x16xf32, #tpu.memory_space<vmem>>, vector<8x16xf32>
    %275 = vector.shape_cast %268 : vector<8x32xf32> to vector<8x1x32xf32>
    %276 = vector.shape_cast %113 : vector<16x32xf32> to vector<1x16x32xf32>
    %277 = vector.broadcast %275 : vector<8x1x32xf32> to vector<8x16x32xf32>
    %278 = vector.broadcast %276 : vector<1x16x32xf32> to vector<8x16x32xf32>
    %279 = arith.mulf %277, %278 : vector<8x16x32xf32>
    %280 = math.exp %279 : vector<8x16x32xf32>
    %281 = vector.shape_cast %270 : vector<8x32xf32> to vector<8x1x32xf32>
    %282 = vector.shape_cast %272 : vector<8x16xf32> to vector<8x16x1xf32>
    %283 = vector.broadcast %281 : vector<8x1x32xf32> to vector<8x16x32xf32>
    %284 = vector.broadcast %282 : vector<8x16x1xf32> to vector<8x16x32xf32>
    %285 = arith.mulf %283, %284 : vector<8x16x32xf32>
    %286 = arith.mulf %280, %258 : vector<8x16x32xf32>
    %287 = arith.addf %286, %285 : vector<8x16x32xf32>
    %288 = vector.shape_cast %274 : vector<8x16xf32> to vector<8x16x1xf32>
    %289 = vector.broadcast %288 : vector<8x16x1xf32> to vector<8x16x32xf32>
    %290 = arith.mulf %287, %289 : vector<8x16x32xf32>
    %cst_73 = arith.constant dense<0.000000e+00> : vector<8x32xf32>
    %291 = vector.multi_reduction <add>, %290, %cst_73 [1] : vector<8x16x32xf32> to vector<8x32xf32>
    %292 = arith.index_cast %266 : i32 to index
    %c0_74 = arith.constant 0 : index
    %293 = vector.load %arg7[%292, %c0_74] : memref<64x32xf32, #tpu.memory_space<vmem>>, vector<8x32xf32>
    tpu.vector_store %arg7[%292, %c0_74], %291 {strides = array<i32>} : memref<64x32xf32, #tpu.memory_space<vmem>>, vector<8x32xf32>,
    %c6_i32 = arith.constant 6 : i32
    %c8_i32_75 = arith.constant 8 : i32
    %294 = arith.muli %c6_i32, %c8_i32_75 : i32
    %295 = tpu.assume_multiple %294, 8 : i32
    %296 = arith.index_cast %295 : i32 to index
    %c0_76 = arith.constant 0 : index
    %297 = vector.load %arg8[%296, %c0_76] : memref<64x32xf32, #tpu.memory_space<vmem>>, vector<8x32xf32>
    %298 = arith.index_cast %295 : i32 to index
    %c0_77 = arith.constant 0 : index
    %299 = vector.load %arg9[%298, %c0_77] : memref<64x32xf32, #tpu.memory_space<vmem>>, vector<8x32xf32>
    %300 = arith.index_cast %295 : i32 to index
    %c0_78 = arith.constant 0 : index
    %301 = vector.load %arg10[%300, %c0_78] : memref<64x16xf32, #tpu.memory_space<vmem>>, vector<8x16xf32>
    %302 = arith.index_cast %295 : i32 to index
    %c0_79 = arith.constant 0 : index
    %303 = vector.load %arg11[%302, %c0_79] : memref<64x16xf32, #tpu.memory_space<vmem>>, vector<8x16xf32>
    %304 = vector.shape_cast %297 : vector<8x32xf32> to vector<8x1x32xf32>
    %305 = vector.shape_cast %113 : vector<16x32xf32> to vector<1x16x32xf32>
    %306 = vector.broadcast %304 : vector<8x1x32xf32> to vector<8x16x32xf32>
    %307 = vector.broadcast %305 : vector<1x16x32xf32> to vector<8x16x32xf32>
    %308 = arith.mulf %306, %307 : vector<8x16x32xf32>
    %309 = math.exp %308 : vector<8x16x32xf32>
    %310 = vector.shape_cast %299 : vector<8x32xf32> to vector<8x1x32xf32>
    %311 = vector.shape_cast %301 : vector<8x16xf32> to vector<8x16x1xf32>
    %312 = vector.broadcast %310 : vector<8x1x32xf32> to vector<8x16x32xf32>
    %313 = vector.broadcast %311 : vector<8x16x1xf32> to vector<8x16x32xf32>
    %314 = arith.mulf %312, %313 : vector<8x16x32xf32>
    %315 = arith.mulf %309, %287 : vector<8x16x32xf32>
    %316 = arith.addf %315, %314 : vector<8x16x32xf32>
    %317 = vector.shape_cast %303 : vector<8x16xf32> to vector<8x16x1xf32>
    %318 = vector.broadcast %317 : vector<8x16x1xf32> to vector<8x16x32xf32>
    %319 = arith.mulf %316, %318 : vector<8x16x32xf32>
    %cst_80 = arith.constant dense<0.000000e+00> : vector<8x32xf32>
    %320 = vector.multi_reduction <add>, %319, %cst_80 [1] : vector<8x16x32xf32> to vector<8x32xf32>
    %321 = arith.index_cast %295 : i32 to index
    %c0_81 = arith.constant 0 : index
    %322 = vector.load %arg7[%321, %c0_81] : memref<64x32xf32, #tpu.memory_space<vmem>>, vector<8x32xf32>
    tpu.vector_store %arg7[%321, %c0_81], %320 {strides = array<i32>} : memref<64x32xf32, #tpu.memory_space<vmem>>, vector<8x32xf32>,
    %c7_i32 = arith.constant 7 : i32
    %c8_i32_82 = arith.constant 8 : i32
    %323 = arith.muli %c7_i32, %c8_i32_82 : i32
    %324 = tpu.assume_multiple %323, 8 : i32
    %325 = arith.index_cast %324 : i32 to index
    %c0_83 = arith.constant 0 : index
    %326 = vector.load %arg8[%325, %c0_83] : memref<64x32xf32, #tpu.memory_space<vmem>>, vector<8x32xf32>
    %327 = arith.index_cast %324 : i32 to index
    %c0_84 = arith.constant 0 : index
    %328 = vector.load %arg9[%327, %c0_84] : memref<64x32xf32, #tpu.memory_space<vmem>>, vector<8x32xf32>
    %329 = arith.index_cast %324 : i32 to index
    %c0_85 = arith.constant 0 : index
    %330 = vector.load %arg10[%329, %c0_85] : memref<64x16xf32, #tpu.memory_space<vmem>>, vector<8x16xf32>
    %331 = arith.index_cast %324 : i32 to index
    %c0_86 = arith.constant 0 : index
    %332 = vector.load %arg11[%331, %c0_86] : memref<64x16xf32, #tpu.memory_space<vmem>>, vector<8x16xf32>
    %333 = vector.shape_cast %326 : vector<8x32xf32> to vector<8x1x32xf32>
    %334 = vector.shape_cast %113 : vector<16x32xf32> to vector<1x16x32xf32>
    %335 = vector.broadcast %333 : vector<8x1x32xf32> to vector<8x16x32xf32>
    %336 = vector.broadcast %334 : vector<1x16x32xf32> to vector<8x16x32xf32>
    %337 = arith.mulf %335, %336 : vector<8x16x32xf32>
    %338 = math.exp %337 : vector<8x16x32xf32>
    %339 = vector.shape_cast %328 : vector<8x32xf32> to vector<8x1x32xf32>
    %340 = vector.shape_cast %330 : vector<8x16xf32> to vector<8x16x1xf32>
    %341 = vector.broadcast %339 : vector<8x1x32xf32> to vector<8x16x32xf32>
    %342 = vector.broadcast %340 : vector<8x16x1xf32> to vector<8x16x32xf32>
    %343 = arith.mulf %341, %342 : vector<8x16x32xf32>
    %344 = arith.mulf %338, %316 : vector<8x16x32xf32>
    %345 = arith.addf %344, %343 : vector<8x16x32xf32>
    %346 = vector.shape_cast %332 : vector<8x16xf32> to vector<8x16x1xf32>
    %347 = vector.broadcast %346 : vector<8x16x1xf32> to vector<8x16x32xf32>
    %348 = arith.mulf %345, %347 : vector<8x16x32xf32>
    %cst_87 = arith.constant dense<0.000000e+00> : vector<8x32xf32>
    %349 = vector.multi_reduction <add>, %348, %cst_87 [1] : vector<8x16x32xf32> to vector<8x32xf32>
    %350 = arith.index_cast %324 : i32 to index
    %c0_88 = arith.constant 0 : index
    %351 = vector.load %arg7[%350, %c0_88] : memref<64x32xf32, #tpu.memory_space<vmem>>, vector<8x32xf32>
    tpu.vector_store %arg7[%350, %c0_88], %349 {strides = array<i32>} : memref<64x32xf32, #tpu.memory_space<vmem>>, vector<8x32xf32>,
    %c8_i32_89 = arith.constant 8 : i32
    %c0_90 = arith.constant 0 : index
    %c0_91 = arith.constant 0 : index
    %352 = vector.load %arg7[%c0_90, %c0_91] : memref<64x32xf32, #tpu.memory_space<vmem>>, vector<64x32xf32>
    %c224 = arith.constant 224 : index
    %c0_92 = arith.constant 0 : index
    %353 = vector.load %arg2[%c224, %c0_92] : memref<256x32xf32, #tpu.memory_space<vmem>>, vector<1x32xf32>
    %354 = vector.broadcast %353 : vector<1x32xf32> to vector<64x32xf32>
    %355 = arith.mulf %354, %83 : vector<64x32xf32>
    %356 = arith.addf %352, %355 : vector<64x32xf32>
    %357 = arith.negf %30 : vector<64x32xf32>
    %358 = math.exp %357 : vector<64x32xf32>
    %cst_93 = arith.constant 1.000000e+00 : f32
    %359 = vector.broadcast %cst_93 : f32 to vector<64x32xf32>
    %360 = arith.addf %359, %358 : vector<64x32xf32>
    %361 = arith.divf %359, %360 : vector<64x32xf32>
    %362 = arith.mulf %30, %361 : vector<64x32xf32>
    %363 = arith.mulf %356, %362 : vector<64x32xf32>
    %364 = arith.truncf %363 : vector<64x32xf32> to vector<64x32xbf16>
    %c24 = arith.constant 24 : index
    %c0_94 = arith.constant 0 : index
    %365 = vector.load %arg2[%c24, %c0_94] : memref<256x32xf32, #tpu.memory_space<vmem>>, vector<32x32xf32>
    %366 = arith.truncf %365 : vector<32x32xf32> to vector<32x32xbf16>
    %cst_95 = arith.constant dense<0.000000e+00> : vector<64x32xf32>
    %367 = tpu.matmul %364, %366, %cst_95 {dimension_numbers = #tpu.dot_dimension_numbers<[1], [0], [0], [1], [0, 0, 1, 1], [], []>} : vector<64x32xbf16>, vector<32x32xbf16>, vector<64x32xf32> -> vector<64x32xf32>
    %368 = arith.addf %1, %367 : vector<64x32xf32>
    %c232 = arith.constant 232 : index
    %c0_96 = arith.constant 0 : index
    %369 = vector.load %arg2[%c232, %c0_96] : memref<256x32xf32, #tpu.memory_space<vmem>>, vector<1x32xf32>
    %c240 = arith.constant 240 : index
    %c0_97 = arith.constant 0 : index
    %370 = vector.load %arg2[%c240, %c0_97] : memref<256x32xf32, #tpu.memory_space<vmem>>, vector<1x32xf32>
    %cst_98 = arith.constant dense<0.000000e+00> : vector<64xf32>
    %371 = vector.multi_reduction <add>, %368, %cst_98 [1] : vector<64x32xf32> to vector<64xf32>
    %372 = vector.shape_cast %371 : vector<64xf32> to vector<64x1xf32>
    %cst_99 = arith.constant 3.200000e+01 : f32
    %373 = vector.broadcast %cst_99 : f32 to vector<64x1xf32>
    %374 = arith.divf %372, %373 : vector<64x1xf32>
    %375 = vector.broadcast %374 : vector<64x1xf32> to vector<64x32xf32>
    %376 = arith.subf %368, %375 : vector<64x32xf32>
    %377 = arith.mulf %376, %376 : vector<64x32xf32>
    %cst_100 = arith.constant dense<0.000000e+00> : vector<64xf32>
    %378 = vector.multi_reduction <add>, %377, %cst_100 [1] : vector<64x32xf32> to vector<64xf32>
    %379 = vector.shape_cast %378 : vector<64xf32> to vector<64x1xf32>
    %cst_101 = arith.constant 3.200000e+01 : f32
    %380 = vector.broadcast %cst_101 : f32 to vector<64x1xf32>
    %381 = arith.divf %379, %380 : vector<64x1xf32>
    %382 = vector.broadcast %374 : vector<64x1xf32> to vector<64x32xf32>
    %383 = arith.subf %368, %382 : vector<64x32xf32>
    %cst_102 = arith.constant 9.99999974E-6 : f32
    %384 = vector.broadcast %cst_102 : f32 to vector<64x1xf32>
    %385 = arith.addf %381, %384 : vector<64x1xf32>
    %386 = math.rsqrt %385 : vector<64x1xf32>
    %387 = vector.broadcast %386 : vector<64x1xf32> to vector<64x32xf32>
    %388 = arith.mulf %383, %387 : vector<64x32xf32>
    %389 = vector.broadcast %369 : vector<1x32xf32> to vector<64x32xf32>
    %390 = arith.mulf %388, %389 : vector<64x32xf32>
    %391 = vector.broadcast %370 : vector<1x32xf32> to vector<64x32xf32>
    %392 = arith.addf %390, %391 : vector<64x32xf32>
    %393 = arith.truncf %392 : vector<64x32xf32> to vector<64x32xbf16>
    %c0_103 = arith.constant 0 : index
    %c0_104 = arith.constant 0 : index
    %394 = vector.load %arg5[%c0_103, %c0_104] : memref<40x128xbf16, #tpu.memory_space<vmem>>, vector<32x128xbf16>
    %cst_105 = arith.constant dense<0.000000e+00> : vector<64x128xf32>
    %395 = tpu.matmul %393, %394, %cst_105 {dimension_numbers = #tpu.dot_dimension_numbers<[1], [0], [0], [1], [0, 0, 1, 1], [], []>} : vector<64x32xbf16>, vector<32x128xbf16>, vector<64x128xf32> -> vector<64x128xf32>
    %c32 = arith.constant 32 : index
    %c0_106 = arith.constant 0 : index
    %396 = vector.load %arg5[%c32, %c0_106] : memref<40x128xbf16, #tpu.memory_space<vmem>>, vector<1x128xbf16>
    %397 = arith.extf %396 : vector<1x128xbf16> to vector<1x128xf32>
    %398 = vector.broadcast %397 : vector<1x128xf32> to vector<64x128xf32>
    %399 = arith.addf %395, %398 : vector<64x128xf32>
    %cst_107 = arith.constant 0.000000e+00 : f32
    %400 = vector.broadcast %cst_107 : f32 to vector<64x128xf32>
    %401 = arith.maximumf %399, %400 : vector<64x128xf32>
    %402 = arith.truncf %401 : vector<64x128xf32> to vector<64x128xbf16>
    %c56 = arith.constant 56 : index
    %c0_108 = arith.constant 0 : index
    %403 = vector.load %arg2[%c56, %c0_108] : memref<256x32xf32, #tpu.memory_space<vmem>>, vector<128x32xf32>
    %404 = arith.truncf %403 : vector<128x32xf32> to vector<128x32xbf16>
    %cst_109 = arith.constant dense<0.000000e+00> : vector<64x32xf32>
    %405 = tpu.matmul %402, %404, %cst_109 {dimension_numbers = #tpu.dot_dimension_numbers<[1], [0], [0], [1], [0, 0, 1, 1], [], []>} : vector<64x128xbf16>, vector<128x32xbf16>, vector<64x32xf32> -> vector<64x32xf32>
    %c248 = arith.constant 248 : index
    %c0_110 = arith.constant 0 : index
    %406 = vector.load %arg2[%c248, %c0_110] : memref<256x32xf32, #tpu.memory_space<vmem>>, vector<1x32xf32>
    %407 = vector.broadcast %406 : vector<1x32xf32> to vector<64x32xf32>
    %408 = arith.addf %405, %407 : vector<64x32xf32>
    %409 = arith.addf %368, %408 : vector<64x32xf32>
    %c0_111 = arith.constant 0 : index
    %c0_112 = arith.constant 0 : index
    %c0_113 = arith.constant 0 : index
    %410 = vector.load %arg6[%c0_111, %c0_112, %c0_113] : memref<1x64x32xf32, #tpu.memory_space<vmem>>, vector<1x64x32xf32>
    %411 = vector.shape_cast %410 : vector<1x64x32xf32> to vector<64x32xf32>
    %412 = vector.shape_cast %409 : vector<64x32xf32> to vector<1x64x32xf32>
    tpu.vector_store %arg6[%c0_111, %c0_112, %c0_113], %412 {strides = array<i32>} : memref<1x64x32xf32, #tpu.memory_space<vmem>>, vector<1x64x32xf32>,
    return
  }
  func.func @transform_0(%arg0: i32) -> (i32, i32, i32) {
    %c0_i32 = arith.constant 0 : i32
    %c0_i32_0 = arith.constant 0 : i32
    %c0_i32_1 = arith.constant 0 : i32
    return %arg0, %c0_i32, %c0_i32_0 : i32, i32, i32
  }
  func.func @transform_1(%arg0: i32) -> (i32, i32) {
    %c0_i32 = arith.constant 0 : i32
    %c0_i32_0 = arith.constant 0 : i32
    %c0_i32_1 = arith.constant 0 : i32
    return %c0_i32, %c0_i32_0 : i32, i32
  }
  func.func @transform_2(%arg0: i32) -> (i32, i32) {
    %c0_i32 = arith.constant 0 : i32
    %c0_i32_0 = arith.constant 0 : i32
    %c0_i32_1 = arith.constant 0 : i32
    return %c0_i32, %c0_i32_0 : i32, i32
  }
  func.func @transform_3(%arg0: i32) -> (i32, i32) {
    %c0_i32 = arith.constant 0 : i32
    %c0_i32_0 = arith.constant 0 : i32
    %c0_i32_1 = arith.constant 0 : i32
    return %c0_i32, %c0_i32_0 : i32, i32
  }
  func.func @transform_4(%arg0: i32) -> (i32, i32) {
    %c0_i32 = arith.constant 0 : i32
    %c0_i32_0 = arith.constant 0 : i32
    %c0_i32_1 = arith.constant 0 : i32
    return %c0_i32, %c0_i32_0 : i32, i32
  }
  func.func @transform_5(%arg0: i32) -> (i32, i32, i32) {
    %c0_i32 = arith.constant 0 : i32
    %c0_i32_0 = arith.constant 0 : i32
    %c0_i32_1 = arith.constant 0 : i32
    return %arg0, %c0_i32, %c0_i32_0 : i32, i32, i32
  }
}

</mosaic_0001>

<bundles_post_ra>
// kernel: tpu_custom_call.1
= control target key start
LH: loop header
LB: loop body
LE: loop exit
PB: predicated region body
PF: predicated region fallthrough
CT: control target
= control target key end

     0   :  { %vm31_vm0 = vcmask 261120   ;;  %vm800_vm1 = vcmask 130048   ;;  %s6538_s23 = smov 112   ;;  %vm1393_vm10 = vcmask 1041409   ;;  %vm1395_vm11 = vcmask 1042434   ;;  %s6541_s16 = smov 96   ;;  %s10746_s0 = inlined_call_operand.vmem [shape: f32[1,64,32], index: 0, kind: input, shape index: {}]   ;;  %s10747_s2 = inlined_call_operand.vmem [shape: bf16[32,128], index: 2, kind: input, shape index: {}]   ;;  %s10748_s1 = inlined_call_operand.vmem [shape: f32[256,32], index: 1, kind: input, shape index: {}]   ;;  %s10749_s3 = inlined_call_operand.vmem [shape: bf16[32,128], index: 3, kind: input, shape index: {}]   ;;  %s10750_s4 = inlined_call_operand.vmem [shape: bf16[40,128], index: 4, kind: input, shape index: {}]   ;;  %s10751_s5 = inlined_call_operand.vmem [shape: f32[1,64,32], index: 5, kind: output, shape index: {}]  }
   0x1   :  { %v21_v0 = vld [vmem:[%s10746_s0] sm:$0xff]  ;;  %v23_v1 = vld [vmem:[%s10746_s0 + $0x10] sm:$0xff]  ;;  %v22_v2 = vld [vmem:[%s10746_s0 + $0x8] sm:$0xff]  ;;  %vm1397_vm12 = vcmask 1043459   ;;  %vm1399_vm13 = vcmask 1044484   ;;  %vm1401_vm14 = vcmask 1045509  }
   0x2   :  { %v32_v3 = vsel %vm31_vm0, %v21_v0, 0.0  ;;  %v38_v4 = vsel %vm31_vm0, %v23_v1, 0.0  ;;  %v24_v5 = vld [vmem:[%s10746_s0 + $0x18] sm:$0xff]  ;;  %v35_v6 = vsel %vm31_vm0, %v22_v2, 0.0  ;;  %v25_v8 = vld [vmem:[%s10746_s0 + $0x20] sm:$0xff]  ;;  %v26_v9 = vld [vmem:[%s10746_s0 + $0x28] sm:$0xff] }
   0x3   :  { %33 = vadd.xlane.f32.xlu0 %v32_v3  ;;  %39 = vadd.xlane.f32.xlu1 %v38_v4  ;;  %v41_v7 = vsel %vm31_vm0, %v24_v5, 0.0  ;;  %v44_v10 = vsel %vm31_vm0, %v25_v8, 0.0  ;;  %v47_v11 = vsel %vm31_vm0, %v26_v9, 0.0  ;;  %v27_v12 = vld [vmem:[%s10746_s0 + $0x30] sm:$0xff]  ;;  %v28_v13 = vld [vmem:[%s10746_s0 + $0x38] sm:$0xff]  ;;  %v6119_v56 = vld [vmem:[%s10747_s2] sm:$0xff]  }
   0x4   :  { %v50_v14 = vsel %vm31_vm0, %v27_v12, 0.0  ;;  %v53_v15 = vsel %vm31_vm0, %v28_v13, 0.0  ;;  %v6120_v57 = vld [vmem:[%s10747_s2 + $0x8] sm:$0xff]   ;;  %6032 = vmatprep.subr.bf16.mxu1 %v6119_v56  ;;  %vm1403_vm15 = vcmask 1046534  }
   0x5   :  { %6033 = vmatpush3.bf16.msra.mxu1 %v6119_v56 }
   0x6   :  { %6034 = vmatprep.subr.bf16.mxu1 %v6120_v57 }
   0x7   :  { %36 = vadd.xlane.f32.xlu0 %v35_v6  ;;  %42 = vadd.xlane.f32.xlu1 %v41_v7 }
   0x9   :  { %6035 = vmatpush3.bf16.msra.mxu1 %v6120_v57 }
   0xb   :  { %45 = vadd.xlane.f32.xlu0 %v44_v10  ;;  %48 = vadd.xlane.f32.xlu1 %v47_v11 }
   0xf   :  { %51 = vadd.xlane.f32.xlu0 %v50_v14  ;;  %54 = vadd.xlane.f32.xlu1 %v53_v15 }
  0x90   :  { %v34_v16 = vpop.xlane.xlu0 %33  ;;  %v40_v17 = vpop.xlane.xlu1 %39 }
  0x91   :  { %v57_v18 = vmul.f32 0.03125, %v34_v16  ;;  %v59_v19 = vmul.f32 0.03125, %v40_v17 }
  0x93   :  { %v6604_v20 = vsub.f32 %v21_v0, %v57_v18  ;;  %v6606_v21 = vsub.f32 %v23_v1, %v59_v19  ;;  %v5950_v19 = vld [vmem:[%s10748_s1 + $0xc0] ss:$0 sm:$0xff] }
  0x94   :  { %v37_v22 = vpop.xlane.xlu0 %36  ;;  %v43_v23 = vpop.xlane.xlu1 %42 }
  0x95   :  { %v58_v24 = vmul.f32 0.03125, %v37_v22  ;;  %v60_v25 = vmul.f32 0.03125, %v43_v23  ;;  %v73_v26 = vmul.f32 %v6604_v20, %v6604_v20  ;;  %v75_v27 = vmul.f32 %v6606_v21, %v6606_v21 }
  0x97   :  { %v6612_v28 = vsub.f32 %v22_v2, %v58_v24  ;;  %v6614_v29 = vsub.f32 %v24_v5, %v60_v25  ;;  %v81_v30 = vsel %vm31_vm0, %v73_v26, 0.0  ;;  %v87_v33 = vsel %vm31_vm0, %v75_v27, 0.0  ;;  %v5951_v27 = vld [vmem:[%s10748_s1 + $0xc8] ss:$0 sm:$0xff] }
  0x98   :  { %82 = vadd.xlane.f32.xlu0 %v81_v30  ;;  %v46_v31 = vpop.xlane.xlu0 %45  ;;  %v49_v32 = vpop.xlane.xlu1 %48 }
  0x99   :  { %v61_v34 = vmul.f32 0.03125, %v46_v31  ;;  %v62_v35 = vmul.f32 0.03125, %v49_v32  ;;  %v74_v36 = vmul.f32 %v6612_v28, %v6612_v28  ;;  %v76_v37 = vmul.f32 %v6614_v29, %v6614_v29 }
  0x9b   :  { %v6622_v38 = vsub.f32 %v25_v8, %v61_v34  ;;  %v6624_v39 = vsub.f32 %v26_v9, %v62_v35  ;;  %v84_v40 = vsel %vm31_vm0, %v74_v36, 0.0  ;;  %v90_v43 = vsel %vm31_vm0, %v76_v37, 0.0 }
  0x9c   :  { %88 = vadd.xlane.f32.xlu0 %v87_v33  ;;  %85 = vadd.xlane.f32.xlu1 %v84_v40  ;;  %v52_v41 = vpop.xlane.xlu0 %51  ;;  %v55_v42 = vpop.xlane.xlu1 %54 }
  0x9d   :  { %v63_v44 = vmul.f32 0.03125, %v52_v41  ;;  %v64_v45 = vmul.f32 0.03125, %v55_v42  ;;  %v77_v46 = vmul.f32 %v6622_v38, %v6622_v38  ;;  %v78_v47 = vmul.f32 %v6624_v39, %v6624_v39 }
  0x9f   :  { %v6632_v48 = vsub.f32 %v27_v12, %v63_v44  ;;  %v6634_v49 = vsub.f32 %v28_v13, %v64_v45  ;;  %v93_v50 = vsel %vm31_vm0, %v77_v46, 0.0  ;;  %v96_v51 = vsel %vm31_vm0, %v78_v47, 0.0 }
  0xa0   :  { %91 = vadd.xlane.f32.xlu1 %v90_v43  ;;  %94 = vadd.xlane.f32.xlu0 %v93_v50 }
  0xa1   :  { %v79_v52 = vmul.f32 %v6632_v48, %v6632_v48  ;;  %v80_v53 = vmul.f32 %v6634_v49, %v6634_v49 }
  0xa3   :  { %v99_v54 = vsel %vm31_vm0, %v79_v52, 0.0  ;;  %v102_v55 = vsel %vm31_vm0, %v80_v53, 0.0 }
  0xa4   :  { %97 = vadd.xlane.f32.xlu1 %v96_v51  ;;  %100 = vadd.xlane.f32.xlu0 %v99_v54 }
  0xa8   :  { %103 = vadd.xlane.f32.xlu1 %v102_v55 }
 0x125   :  { %v83_v58 = vpop.xlane.xlu0 %82 }
 0x126   :  { %v105_v59 = vmul.f32 0.03125, %v83_v58  ;;  %v6122_v58 = vld [vmem:[%s10749_s3 + $0x8] sm:$0xff]  }
 0x128   :  { %v113_v60 = vadd.f32 1e-05, %v105_v59  ;;  %v265_v59 = vlaneseq }
 0x129   :  { %v86_v61 = vpop.xlane.xlu1 %85  ;;  %v89_v62 = vpop.xlane.xlu0 %88 }
 0x12a   :  { %6136 = vrsqrt.f32 %v113_v60  ;;  %v106_v63 = vmul.f32 0.03125, %v86_v61  ;;  %v107_v0 = vmul.f32 0.03125, %v89_v62  ;;  %v6676_v60 = vshrl.u32 %v265_v59, 7  ;;  %v258_v62 = vld [vmem:[%s10748_s1] sm:$0xff] }
 0x12c   :  { %v114_v1 = vadd.f32 1e-05, %v106_v63  ;;  %v115_v2 = vadd.f32 1e-05, %v107_v0  ;;  %v6679_v61 = vsub.s32 0, %v6676_v60  ;;  %v6686_v0 = vsub.s32 1, %v6676_v60 }
 0x12d   :  { %v92_v3 = vpop.xlane.xlu1 %91  ;;  %v95_v4 = vpop.xlane.xlu0 %94 }
 0x12e   :  { %6138 = vrsqrt.f32 %v114_v1  ;;  %v108_v5 = vmul.f32 0.03125, %v92_v3  ;;  %v109_v6 = vmul.f32 0.03125, %v95_v4  ;;  %10993 = vst [vmem:[#allocation7_spill] sm:$0xff] %v6679_v61  ;;  %v268_v63 = vrot.slane %v258_v62, %v6679_v61  ;;  %10994 = vst [vmem:[#allocation8_spill] sm:$0xff] %v6686_v0  ;;  %v5958_v4 = vld [vmem:[%s10748_s1 + $0xd0] ss:$0 sm:$0xff] }
 0x12f   :  { %6140 = vrsqrt.f32 %v115_v2  ;;  %v276_v2 = vrot.slane %v258_v62, %v6686_v0  ;;  %v6690_v3 = vsub.s32 2, %v6676_v60 }
 0x130   :  { %v116_v7 = vadd.f32 1e-05, %v108_v5  ;;  %v117_v8 = vadd.f32 1e-05, %v109_v6  ;;  %v269_v1 = vmul.f32 0.0, %v268_v63  ;;  %v6696_v5 = vsub.s32 3, %v6676_v60 }
 0x131   :  { %v98_v9 = vpop.xlane.xlu1 %97  ;;  %v101_v10 = vpop.xlane.xlu0 %100  ;;  %10995 = vst [vmem:[#allocation9_spill] sm:$0xff] %v6690_v3 }
 0x132   :  { %6142 = vrsqrt.f32 %v116_v7  ;;  %v110_v11 = vmul.f32 0.03125, %v98_v9  ;;  %v111_v12 = vmul.f32 0.03125, %v101_v10  ;;  %10996 = vst [vmem:[#allocation10_spill] sm:$0xff] %v6696_v5  ;;  %v271_v6 = vadd.f32 %v5958_v4, %v269_v1 }
 0x133   :  { %6144 = vrsqrt.f32 %v117_v8  ;;  %v277_v7 = vmul.f32 0.0, %v276_v2  ;;  %v286_v8 = vrot.slane %v258_v62, %v6690_v3  ;;  %v298_v9 = vrot.slane %v258_v62, %v6696_v5 }
 0x134   :  { %v6137_v13 = vpop.eup %6136  ;;  %v118_v14 = vadd.f32 1e-05, %v110_v11  ;;  %v119_v15 = vadd.f32 1e-05, %v111_v12  ;;  %v6701_v10 = vsub.s32 4, %v6676_v60 }
 0x135   :  { %v104_v16 = vpop.xlane.xlu1 %103  ;;  %v129_v17 = vmul.f32 %v6137_v13, %v6604_v20  ;;  %v280_v11 = vadd.f32 %v277_v7, %v271_v6  ;;  %v287_v12 = vmul.f32 0.0, %v286_v8 }
 0x136   :  { %6146 = vrsqrt.f32 %v118_v14  ;;  %v112_v18 = vmul.f32 0.03125, %v104_v16  ;;  %10997 = vst [vmem:[#allocation11_spill] sm:$0xff] %v6701_v10  ;;  %v6704_v13 = vrot.slane %v258_v62, %v6701_v10  ;;  %v6707_v14 = vsub.s32 5, %v6676_v60 }
 0x137   :  { %6148 = vrsqrt.f32 %v119_v15  ;;  %v141_v26 = vmul.f32 %v5950_v19, %v129_v17  ;;  %v291_v15 = vadd.f32 %v287_v12, %v280_v11  ;;  %v299_v16 = vmul.f32 0.0, %v298_v9 }
 0x138   :  { %v6139_v22 = vpop.eup %6138  ;;  %v120_v23 = vadd.f32 1e-05, %v112_v18  ;;  %10998 = vst [vmem:[#allocation12_spill] sm:$0xff] %v6707_v14  ;;  %v6710_v17 = vsub.s32 6, %v6676_v60  ;;  %v6713_v18 = vrot.slane %v258_v62, %v6707_v14 }
 0x139   :  { %v6141_v24 = vpop.eup %6140  ;;  %v130_v25 = vmul.f32 %v6139_v22, %v6612_v28  ;;  %v153_v33 = vadd.f32 %v5951_v27, %v141_v26  ;;  %v313_v22 = vmul.f32 0.0, %v6704_v13 }
 0x13a   :  { %6150 = vrsqrt.f32 %v120_v23  ;;  %v131_v20 = vmul.f32 %v6141_v24, %v6606_v21  ;;  %10999 = vst [vmem:[#allocation13_spill] sm:$0xff] %v6710_v17  ;;  %v6719_v23 = vrot.slane %v258_v62, %v6710_v17 }
 0x13b   :  { %v142_v30 = vmul.f32 %v5950_v19, %v130_v25  ;;  %v329_v25 = vmul.f32 0.0, %v6713_v18 }
 0x13c   :  { %v6143_v31 = vpop.eup %6142  ;;  %v143_v36 = vmul.f32 %v5950_v19, %v131_v20 }
 0x13d   :  { %v6145_v32 = vpop.eup %6144  ;;  %v154_v34 = vadd.f32 %v5951_v27, %v142_v30  ;;  %v132_v35 = vmul.f32 %v6143_v31, %v6614_v29 }
 0x13e   :  { %v133_v37 = vmul.f32 %v6145_v32, %v6622_v38  ;;  %v155_v43 = vadd.f32 %v5951_v27, %v143_v36  ;;  %v347_v36 = vmul.f32 0.0, %v6719_v23 }
 0x13f   :  { %v161_v40 = vpack.c.bf16 %v154_v34, %v153_v33  ;;  %v144_v28 = vmul.f32 %v5950_v19, %v132_v35 }
 0x140   :  { %v6147_v41 = vpop.eup %6146  ;;  %v145_v45 = vmul.f32 %v5950_v19, %v133_v37 }
 0x141   :  { %v6149_v42 = vpop.eup %6148  ;;  %6036 = vmatprep.mubr.msk.bf16.mxu1 %vm31_vm0, %v161_v40  ;;  %v156_v44 = vadd.f32 %v5951_v27, %v144_v28  ;;  %v134_v21 = vmul.f32 %v6147_v41, %v6624_v39 }
 0x142   :  { %v135_v46 = vmul.f32 %v6149_v42, %v6632_v48  ;;  %v157_v29 = vadd.f32 %v5951_v27, %v145_v45  ;;  %v6121_v48 = vld [vmem:[%s10749_s3] sm:$0xff]  }
 0x143   :  { %v162_v47 = vpack.c.bf16 %v156_v44, %v155_v43  ;;  %v146_v50 = vmul.f32 %v5950_v19, %v134_v21  ;;  %6044 = vmatprep.subr.bf16.mxu1 %v6121_v48 }
 0x144   :  { %v6151_v51 = vpop.eup %6150  ;;  %v147_v53 = vmul.f32 %v5950_v19, %v135_v46 }
 0x145   :  { %6037 = vmatmul.mubr.msk.bf16.vlgmr.msra.gmra.mrb[0].mxu1 %vm31_vm0, %v162_v47  ;;  %v158_v38 = vadd.f32 %v5951_v27, %v146_v50  ;;  %v136_v52 = vmul.f32 %v6151_v51, %v6634_v49  ;;  %v6537_v49 = vmov 32  }
 0x146   :  { %v159_v56 = vadd.f32 %v5951_v27, %v147_v53  ;;  %6045 = vmatpush3.bf16.msra.mxu1 %v6121_v48  ;;  %6109 = vset.pattern.permute.xlu1 %v6537_v49 }
 0x147   :  { %v163_v54 = vpack.c.bf16 %v158_v38, %v157_v29  ;;  %v148_v55 = vmul.f32 %v5950_v19, %v136_v52  ;;  %6046 = vmatprep.subr.bf16.mxu1 %v6122_v58  ;;  %6111 = vset.pattern.permute.xlu0 %v6537_v49  ;;  %v6715_v19 = vadd.f32 %v299_v16, %v291_v15 }
 0x149   :  { %6040 = vmatprep.mubr.msk.bf16.mxu1 %vm31_vm0, %v163_v54  ;;  %v160_v57 = vadd.f32 %v5951_v27, %v148_v55  ;;  %v6722_v24 = vadd.f32 %v313_v22, %v6715_v19  ;;  %v6728_v27 = vsub.s32 7, %v6676_v60 }
 0x14a   :  { %6047 = vmatpush3.bf16.msra.mxu1 %v6122_v58 }
 0x14b   :  { %v164_v39 = vpack.c.bf16 %v160_v57, %v159_v56  ;;  %11000 = vst [vmem:[#allocation14_spill] sm:$0xff] %v6728_v27  ;;  %v6740_v35 = vadd.f32 %v329_v25, %v6722_v24  ;;  %v6745_v40 = vrot.slane %v258_v62, %v6728_v27 }
 0x14d   :  { %6041 = vmatmul.mubr.msk.bf16.gmra.mrb[4].mxu1 %vm31_vm0, %v164_v39  ;;  %v355_v47 = vadd.f32 %v347_v36, %v6740_v35 }
 0x218   :  { %v6725_v26 = vpop.f32.mrb[0].mxu1 }
 0x219   :  { %v6730_v20 = vpop.f32.mrb[1].mxu1  ;;  %v332_v46 = vmul.f32 %v6725_v26, %v6713_v18  ;;  %v350_v53 = vmul.f32 %v6725_v26, %v6719_v23  ;;  %v369_v54 = vmul.f32 %v6725_v26, %v6745_v40  ;;  %v290_v59 = vmul.f32 %v6725_v26, %v286_v8 }
 0x21a   :  { %v6732_v30 = vpop.f32.mrb[2].mxu1  ;;  %v300_v31 = vmul.f32 %v298_v9, %v6730_v20  ;;  %v270_v32 = vmul.f32 %v268_v63, %v6730_v20  ;;  %v278_v33 = vmul.f32 %v276_v2, %v6730_v20  ;;  %v288_v37 = vmul.f32 %v286_v8, %v6730_v20 }
 0x21b   :  { %v6737_v34 = vpop.f32.mrb[3].mxu1  ;;  %v351_v55 = vmul.f32 %v6732_v30, %v6719_v23  ;;  %v303_v39 = vmul.f32 %v6732_v30, %v298_v9  ;;  %v302_v62 = vmul.f32 %v6725_v26, %v298_v9  ;;  %v317_v63 = vmul.f32 %v6732_v30, %v6704_v13 }
 0x21c   :  { %v305_v28 = vadd.f32 %v300_v31, %v291_v15  ;;  %v315_v41 = vmul.f32 %v6704_v13, %v6737_v34  ;;  %v272_v42 = vadd.f32 %v5958_v4, %v270_v32  ;;  %v279_v43 = vmul.f32 %v276_v2, %v6737_v34 }
 0x21d   :  { %v281_v44 = vadd.f32 %v278_v33, %v271_v6  ;;  %v289_v21 = vmul.f32 %v286_v8, %v6737_v34  ;;  %v292_v29 = vadd.f32 %v288_v37, %v280_v11  ;;  %v301_v52 = vmul.f32 %v298_v9, %v6737_v34 }
 0x21e   :  { %v321_v45 = vadd.f32 %v315_v41, %v305_v28  ;;  %v282_v51 = vadd.f32 %v279_v43, %v272_v42  ;;  %v316_v6 = vmul.f32 %v6725_v26, %v6704_v13  ;;  %v333_v9 = vmul.f32 %v6732_v30, %v6713_v18 }
 0x21f   :  { %v293_v38 = vadd.f32 %v289_v21, %v281_v44  ;;  %v306_v12 = vadd.f32 %v301_v52, %v292_v29  ;;  %v370_v36 = vmul.f32 %v6732_v30, %v6745_v40  ;;  %v331_v37 = vmul.f32 %v6713_v18, %v6737_v34 }
 0x220   :  { %v6754_v50 = vpop.f32.mrb[4].mxu1  ;;  %v339_v57 = vadd.f32 %v332_v46, %v321_v45  ;;  %v294_v11 = vadd.f32 %v290_v59, %v282_v51  ;;  %v314_v41 = vmul.f32 %v6704_v13, %v6730_v20  ;;  %v330_v21 = vmul.f32 %v6713_v18, %v6730_v20 }
 0x221   :  { %v6763_v56 = vpop.f32.mrb[5].mxu1  ;;  %v307_v8 = vadd.f32 %v302_v62, %v293_v38  ;;  %v322_v31 = vadd.f32 %v316_v6, %v306_v12  ;;  %v349_v45 = vmul.f32 %v6719_v23, %v6737_v34  ;;  %v354_v46 = vmul.f32 %v6754_v50, %v6719_v23 }
 0x222   :  { %v371_v48 = vmul.f32 %v6745_v40, %v6763_v56  ;;  %v6768_v58 = vpop.f32.mrb[6].mxu1  ;;  %v318_v1 = vmul.f32 %v6704_v13, %v6763_v56  ;;  %v359_v2 = vadd.f32 %v351_v55, %v339_v57  ;;  %v334_v7 = vmul.f32 %v6713_v18, %v6763_v56 }
 0x223   :  { %v6776_v4 = vpop.f32.mrb[7].mxu1  ;;  %v352_v15 = vmul.f32 %v6719_v23, %v6763_v56  ;;  %v308_v25 = vadd.f32 %v303_v39, %v294_v11  ;;  %v323_v32 = vadd.f32 %v317_v63, %v307_v8  ;;  %v340_v43 = vadd.f32 %v333_v9, %v322_v31 }
 0x224   :  { %v6786_v16 = vadd.f32 %v371_v48, %v359_v2  ;;  %v335_v22 = vmul.f32 %v6713_v18, %v6776_v4  ;;  %v353_v33 = vmul.f32 %v6719_v23, %v6776_v4  ;;  %v372_v28 = vmul.f32 %v6745_v40, %v6776_v4 }
 0x225   :  { %v324_v42 = vadd.f32 %v318_v1, %v308_v25  ;;  %v341_v44 = vadd.f32 %v334_v7, %v323_v32  ;;  %v320_v51 = vadd.f32 %v314_v41, %v6715_v19  ;;  %v348_v29 = vmul.f32 %v6719_v23, %v6730_v20 }
 0x226   :  { %v373_v13 = vmul.f32 %v6754_v50, %v6745_v40  ;;  %v360_v52 = vadd.f32 %v352_v15, %v340_v43  ;;  %v337_v57 = vadd.f32 %v330_v21, %v6722_v24  ;;  %v367_v48 = vmul.f32 %v6745_v40, %v6730_v20 }
 0x227   :  { %v342_v38 = vadd.f32 %v335_v22, %v324_v42  ;;  %v361_v55 = vadd.f32 %v353_v33, %v341_v44  ;;  %v338_v18 = vadd.f32 %v331_v37, %v320_v51  ;;  %v356_v39 = vadd.f32 %v348_v29, %v6740_v35 }
 0x228   :  { %v380_v62 = vadd.f32 %v372_v28, %v360_v52  ;;  %v368_v23 = vmul.f32 %v6745_v40, %v6737_v34  ;;  %v374_v63 = vmul.f32 %v6768_v58, %v6745_v40  ;;  %v357_v1 = vadd.f32 %v349_v45, %v337_v57 }
 0x229   :  { %v362_v59 = vadd.f32 %v354_v46, %v342_v38  ;;  %v6815_v19 = vadd.f32 %v373_v13, %v361_v55  ;;  %v375_v2 = vadd.f32 %v367_v48, %v355_v47  ;;  %v358_v6 = vadd.f32 %v350_v53, %v338_v18 }
 0x22a   :  { %v5964_v24 = vmul.f32 -1.442695, %v380_v62  ;;  %v376_v7 = vadd.f32 %v368_v23, %v356_v39  ;;  %v5963_v35 = vmul.f32 -1.442695, %v6786_v16  ;;  %v377_v11 = vadd.f32 %v369_v54, %v357_v1 }
 0x22b   :  { %v378_v12 = vadd.f32 %v370_v36, %v358_v6  ;;  %v382_v8 = vadd.f32 %v374_v63, %v362_v59  ;;  %v5959_v9 = vmul.f32 -1.442695, %v375_v2  ;;  %v5965_v15 = vmul.f32 -1.442695, %v6815_v19 }
 0x22c   :  { %6152 = vpow2.f32 %v5964_v24  ;;  %v5960_v22 = vmul.f32 -1.442695, %v376_v7  ;;  %v5961_v25 = vmul.f32 -1.442695, %v377_v11 }
 0x22d   :  { %6154 = vpow2.f32 %v5963_v35  ;;  %v5962_v31 = vmul.f32 -1.442695, %v378_v12  ;;  %v5966_v40 = vmul.f32 -1.442695, %v382_v8 }
 0x22e   :  { %6156 = vpow2.f32 %v5959_v9  ;;  %v6539_v9 = vmov 33  }
 0x22f   :  { %6158 = vpow2.f32 %v5965_v15 }
 0x230   :  { %6160 = vpow2.f32 %v5960_v22 }
 0x231   :  { %6162 = vpow2.f32 %v5961_v25 }
 0x232   :  { %6164 = vpow2.f32 %v5962_v31 }
 0x233   :  { %6166 = vpow2.f32 %v5966_v40 }
 0x236   :  { %v6153_v47 = vpop.eup %6152 }
 0x237   :  { %v6155_v53 = vpop.eup %6154  ;;  %v412_v54 = vadd.f32 1.0, %v6153_v47 }
 0x238   :  { %v6157_v32 = vpop.eup %6156  ;;  %v411_v33 = vadd.f32 1.0, %v6155_v53 }
 0x239   :  { %v407_v36 = vadd.f32 1.0, %v6157_v32  ;;  %v6159_v37 = vpop.eup %6158  ;;  %6168 = vrcp.f32 %v412_v54 }
 0x23a   :  { %v6161_v28 = vpop.eup %6160  ;;  %v413_v51 = vadd.f32 1.0, %v6159_v37 }
 0x23b   :  { %v6163_v41 = vpop.eup %6162  ;;  %v408_v42 = vadd.f32 1.0, %v6161_v28  ;;  %6170 = vrcp.f32 %v407_v36 }
 0x23c   :  { %v6165_v43 = vpop.eup %6164  ;;  %6172 = vrcp.f32 %v411_v33  ;;  %v409_v44 = vadd.f32 1.0, %v6163_v41 }
 0x23d   :  { %v6167_v21 = vpop.eup %6166  ;;  %6174 = vrcp.f32 %v408_v42  ;;  %v410_v45 = vadd.f32 1.0, %v6165_v43 }
 0x23e   :  { %6176 = vrcp.f32 %v409_v44  ;;  %v414_v46 = vadd.f32 1.0, %v6167_v21 }
 0x23f   :  { %6178 = vrcp.f32 %v410_v45 }
 0x240   :  { %6180 = vrcp.f32 %v414_v46 }
 0x241   :  { %6182 = vrcp.f32 %v413_v51 }
 0x243   :  { %v6169_v29 = vpop.eup %6168 }
 0x244   :  { %v6823_v55 = vmul.f32 %v6169_v29, %v380_v62 }
 0x245   :  { %v6171_v13 = vpop.eup %6170 }
 0x246   :  { %v6173_v38 = vpop.eup %6172  ;;  %11001 = vst [vmem:[#allocation15_spill] sm:$0xff] %v6823_v55  ;;  %v6825_v18 = vmul.f32 %v6171_v13, %v375_v2 }
 0x247   :  { %v6175_v52 = vpop.eup %6174  ;;  %v6830_v59 = vmul.f32 %v6173_v38, %v6786_v16 }
 0x248   :  { %v6177_v57 = vpop.eup %6176  ;;  %11002 = vst [vmem:[#allocation16_spill] sm:$0xff] %v6825_v18  ;;  %v6827_v39 = vmul.f32 %v6175_v52, %v376_v7 }
 0x249   :  { %v6179_v48 = vpop.eup %6178  ;;  %11004 = vst [vmem:[#allocation18_spill] sm:$0xff] %v6830_v59  ;;  %v6834_v63 = vmul.f32 %v6177_v57, %v377_v11  ;;  %v441_v62 = vpack.c.bf16 %v6823_v55, %v6830_v59 }
 0x24a   :  { %11003 = vst [vmem:[#allocation17_spill] sm:$0xff] %v6827_v39  ;;  %v439_v23 = vpack.c.bf16 %v6827_v39, %v6825_v18  ;;  %v6836_v1 = vmul.f32 %v6179_v48, %v378_v12  ;;  %v6181_v6 = vpop.eup %6180 }
 0x24b   :  { %11005 = vst [vmem:[#allocation19_spill] sm:$0xff] %v6834_v63  ;;  %v6183_v24 = vpop.eup %6182  ;;  %v6844_v16 = vmul.f32 %v6181_v6, %v382_v8 }
 0x24c   :  { %11006 = vst [vmem:[#allocation20_spill] sm:$0xff] %v6836_v1  ;;  %6048 = vmatprep.mubr.msk.bf16.mxu1 %vm31_vm0, %v439_v23  ;;  %v440_v2 = vpack.c.bf16 %v6836_v1, %v6834_v63  ;;  %v6848_v7 = vmul.f32 %v6183_v24, %v6815_v19 }
 0x24d   :  { %11007 = vst [vmem:[#allocation21_spill] sm:$0xff] %v6844_v16 }
 0x24e   :  { %6049 = vmatmul.mubr.msk.bf16.vlgmr.msra.gmra.mrb[8].mxu1 %vm31_vm0, %v440_v2  ;;  %11008 = vst [vmem:[#allocation22_spill] sm:$0xff] %v6848_v7  ;;  %v442_v35 = vpack.c.bf16 %v6844_v16, %v6848_v7 }
 0x24f   :  { %6052 = vmatprep.mubr.msk.bf16.mxu1 %vm31_vm0, %v441_v62 }
 0x256   :  { %6053 = vmatmul.mubr.msk.bf16.gmra.mrb[12].mxu1 %vm31_vm0, %v442_v35 }
 0x321   :  { %v6050_v11 = vpop.f32.mrb[8].mxu1 }
 0x322   :  { %803 = vst.msk [vmem:[#allocation5 + $0x10] sm:$0xff] %vm800_vm1, %v6050_v11  ;;  %813 = vrot.lane.b32.xlu0 %v6050_v11, %s6538_s23  ;;  %549 = vperm.xlu1 %6109, %v6050_v11   ;;  %v505_v12 = vpop.f32.mrb[9].mxu1 }
 0x323   :  { %801 = vst.msk [vmem:[#allocation5] sm:$0xff] %vm800_vm1, %v505_v12  ;;  %v6051_v8 = vpop.f32.mrb[10].mxu1 }
 0x324   :  { %804 = vst.msk [vmem:[#allocation5 + $0x18] sm:$0xff] %vm800_vm1, %v6051_v8  ;;  %v508_v19 = vpop.f32.mrb[11].mxu1 }
 0x325   :  { %802 = vst.msk [vmem:[#allocation5 + $0x8] sm:$0xff] %vm800_vm1, %v508_v19 }
 0x326   :  { %6110 = vset.pattern.permute.xlu1 %v6539_v9  ;;  %539 = vperm.xlu0 %6111, %v505_v12  }
 0x327   :  { %611 = vperm.xlu1 %6110, %v6050_v11   ;;  %v536_v11 = vld [vmem:[%s10748_s1 + $0xb8] sm:$0x3] }
 0x329   :  { %v6054_v15 = vpop.f32.mrb[12].mxu1  ;;  %v1980_v40 = vld [vmem:[#allocation5 + $0x10] sm:$0xff] }
 0x32a   :  { %807 = vst.msk [vmem:[#allocation5 + $0x30] sm:$0xff] %vm800_vm1, %v6054_v15  ;;  %569 = vperm.xlu0 %6111, %v6054_v15   ;;  %v521_v22 = vpop.f32.mrb[13].mxu1  ;;  %v2174_v47 = vrot.slane %v1980_v40, %v6679_v61  ;;  %v2185_v53 = vrot.slane %v1980_v40, %v6686_v0  ;;  %v2196_v54 = vrot.slane %v1980_v40, %v6690_v3  ;;  %v843_v41 = vld [vmem:[#allocation5] sm:$0xff] }
 0x32b   :  { %805 = vst.msk [vmem:[#allocation5 + $0x20] sm:$0xff] %vm800_vm1, %v521_v22  ;;  %603 = vperm.xlu1 %6110, %v505_v12   ;;  %v6055_v25 = vpop.f32.mrb[14].mxu1  ;;  %v2207_v32 = vrot.slane %v1980_v40, %v6696_v5  ;;  %v2218_v33 = vrot.slane %v1980_v40, %v6701_v10  ;;  %v2229_v36 = vrot.slane %v1980_v40, %v6707_v14  ;;  %v2546_v29 = vld [vmem:[#allocation5 + $0x18] sm:$0xff] }
 0x32c   :  { %808 = vst.msk [vmem:[#allocation5 + $0x38] sm:$0xff] %vm800_vm1, %v6055_v25  ;;  %v6862_v31 = vpop.f32.mrb[15].mxu1  ;;  %v2240_v37 = vrot.slane %v1980_v40, %v6710_v17  ;;  %v2251_v28 = vrot.slane %v1980_v40, %v6728_v27  ;;  %v1036_v42 = vrot.slane %v843_v41, %v6679_v61  ;;  %v1047_v43 = vrot.slane %v843_v41, %v6686_v0  ;;  %v1414_v24 = vld [vmem:[#allocation5 + $0x8] sm:$0xff] }
 0x32d   :  { %806 = vst.msk [vmem:[#allocation5 + $0x28] sm:$0xff] %vm800_vm1, %v6862_v31  ;;  %v1069_v44 = vrot.slane %v843_v41, %v6696_v5  ;;  %v1080_v21 = vrot.slane %v843_v41, %v6701_v10  ;;  %v1091_v45 = vrot.slane %v843_v41, %v6707_v14  ;;  %v1102_v46 = vrot.slane %v843_v41, %v6710_v17 }
 0x32e   :  { %821 = vrot.lane.b32.xlu0 %v6054_v15, %s6538_s23  ;;  %v1113_v51 = vrot.slane %v843_v41, %v6728_v27  ;;  %v2740_v13 = vrot.slane %v2546_v29, %v6679_v61  ;;  %v6897_v38 = vrot.slane %v2546_v29, %v6686_v0  ;;  %v6903_v52 = vrot.slane %v2546_v29, %v6690_v3 }
 0x32f   :  { %809 = vrot.lane.b32.xlu1 %v505_v12, %s6538_s23  ;;  %6117 = vset.pattern.permute.xlu0 %v6539_v9  ;;  %v6909_v57 = vrot.slane %v2546_v29, %v6696_v5  ;;  %v6913_v48 = vrot.slane %v2546_v29, %v6701_v10  ;;  %v6917_v23 = vrot.slane %v2546_v29, %v6707_v14 }
 0x330   :  { %6112 = vset.pattern.permute.xlu1 %v6537_v49  ;;  %v6921_v62 = vrot.slane %v2546_v29, %v6710_v17  ;;  %v6926_v2 = vrot.slane %v2546_v29, %v6728_v27  ;;  %v6930_v35 = vrot.slane %v1414_v24, %v6679_v61  ;;  %v6937_v12 = vrot.slane %v536_v11, %v6679_v61 }
 0x331   :  { %v6981_v29 = vrot.slane %v1414_v24, %v6707_v14 }
 0x332   :  { %619 = vperm.xlu0 %6117, %v521_v22  }
 0x333   :  { %554 = vperm.xlu1 %6112, %v6051_v8  }
 0x336   :  { %817 = vrot.lane.b32.xlu0 %v521_v22, %s6538_s23 }
 0x337   :  { %6113 = vset.pattern.permute.xlu1 %v6539_v9 }
 0x338   :  { %615 = vperm.xlu1 %6113, %v6051_v8  }
 0x33a   :  { %631 = vperm.xlu0 %6117, %v6055_v25  }
 0x33c   :  { %815 = vrot.lane.b32.xlu1 %v6051_v8, %s6538_s23  ;;  %v6940_v8 = vrot.slane %v1414_v24, %v6686_v0 }
 0x33d   :  { %6114 = vset.pattern.permute.xlu1 %v6537_v49 }
 0x33e   :  { %2176 = vbcast.lane.b32.xlu0 %v2174_v47, 256 }
 0x340   :  { %544 = vperm.xlu1 %6114, %v508_v19  }
 0x342   :  { %2187 = vbcast.lane.b32.xlu0 %v2185_v53, 256 }
 0x344   :  { %6115 = vset.pattern.permute.xlu1 %v6539_v9 }
 0x345   :  { %607 = vperm.xlu1 %6115, %v508_v19  }
 0x346   :  { %2198 = vbcast.lane.b32.xlu0 %v2196_v54, 256 }
 0x349   :  { %811 = vrot.lane.b32.xlu1 %v508_v19, %s6538_s23 }
 0x34a   :  { %2209 = vbcast.lane.b32.xlu0 %v2207_v32, 256 }
 0x34d   :  { %627 = vperm.xlu1 %6115, %v6054_v15   ;;  %v6945_v15 = vrot.slane %v536_v11, %v6686_v0 }
 0x34e   :  { %2220 = vbcast.lane.b32.xlu0 %v2218_v33, 256 }
 0x351   :  { %6116 = vset.pattern.permute.xlu1 %v6537_v49  ;;  %v1058_v49 = vrot.slane %v843_v41, %v6690_v3 }
 0x352   :  { %559 = vperm.xlu1 %6116, %v521_v22   ;;  %2231 = vbcast.lane.b32.xlu0 %v2229_v36, 256  ;;  %v6950_v22 = vld [vmem:[%s10748_s1 + $0xd8] ss:$0 sm:$0xff] }
 0x356   :  { %2242 = vbcast.lane.b32.xlu0 %v2240_v37, 256  ;;  %574 = vperm.xlu1 %6116, %v6055_v25  }
 0x35a   :  { %2253 = vbcast.lane.b32.xlu0 %v2251_v28, 256  ;;  %823 = vrot.lane.b32.xlu1 %v6055_v25, %s6538_s23  ;;  %v6953_v25 = vrot.slane %v1414_v24, %v6690_v3 }
 0x35e   :  { %1038 = vbcast.lane.b32.xlu0 %v1036_v42, 256  ;;  %2180 = vbcast.lane.b32.xlu1 %v2174_v47, 264 }
 0x362   :  { %1049 = vbcast.lane.b32.xlu0 %v1047_v43, 256  ;;  %2191 = vbcast.lane.b32.xlu1 %v2185_v53, 264 }
 0x366   :  { %1060 = vbcast.lane.b32.xlu0 %v1058_v49, 256  ;;  %2202 = vbcast.lane.b32.xlu1 %v2196_v54, 264 }
 0x36a   :  { %1071 = vbcast.lane.b32.xlu0 %v1069_v44, 256  ;;  %2213 = vbcast.lane.b32.xlu1 %v2207_v32, 264  ;;  %v6960_v32 = vrot.slane %v1414_v24, %v6696_v5 }
 0x36e   :  { %1082 = vbcast.lane.b32.xlu0 %v1080_v21, 256  ;;  %2224 = vbcast.lane.b32.xlu1 %v2218_v33, 264 }
 0x372   :  { %1093 = vbcast.lane.b32.xlu0 %v1091_v45, 256  ;;  %2235 = vbcast.lane.b32.xlu1 %v2229_v36, 264 }
 0x376   :  { %1104 = vbcast.lane.b32.xlu0 %v1102_v46, 256  ;;  %2246 = vbcast.lane.b32.xlu1 %v2240_v37, 264 }
 0x37a   :  { %1115 = vbcast.lane.b32.xlu0 %v1113_v51, 256  ;;  %2257 = vbcast.lane.b32.xlu1 %v2251_v28, 264 }
 0x37e   :  { %2742 = vbcast.lane.b32.xlu0 %v2740_v13, 256  ;;  %564 = vperm.xlu1 %6116, %v6862_v31  }
 0x382   :  { %2753 = vbcast.lane.b32.xlu0 %v6897_v38, 256  ;;  %6118 = vset.pattern.permute.xlu1 %v6539_v9 }
 0x383   :  { %623 = vperm.xlu1 %6118, %v6862_v31  }
 0x386   :  { %2764 = vbcast.lane.b32.xlu0 %v6903_v52, 256 }
 0x387   :  { %819 = vrot.lane.b32.xlu1 %v6862_v31, %s6538_s23 }
 0x38a   :  { %2775 = vbcast.lane.b32.xlu0 %v6909_v57, 256 }
 0x38b   :  { %1042 = vbcast.lane.b32.xlu1 %v1036_v42, 264 }
 0x38e   :  { %2786 = vbcast.lane.b32.xlu0 %v6913_v48, 256 }
 0x38f   :  { %1053 = vbcast.lane.b32.xlu1 %v1047_v43, 264  ;;  %v6971_v43 = vrot.slane %v1414_v24, %v6701_v10 }
 0x392   :  { %2797 = vbcast.lane.b32.xlu0 %v6917_v23, 256 }
 0x393   :  { %1064 = vbcast.lane.b32.xlu1 %v1058_v49, 264 }
 0x394   :  { %v814_v6 = vpop.permute.xlu0 %813 }
 0x395   :  { %835 = vst.msk [vmem:[#allocation6 + $0x10] sm:$0xff] %vm800_vm1, %v814_v6 }
 0x396   :  { %2808 = vbcast.lane.b32.xlu0 %v6921_v62, 256 }
 0x397   :  { %1075 = vbcast.lane.b32.xlu1 %v1069_v44, 264 }
 0x39a   :  { %2819 = vbcast.lane.b32.xlu0 %v6926_v2, 256 }
 0x39b   :  { %1086 = vbcast.lane.b32.xlu1 %v1080_v21, 264 }
 0x39e   :  { %1610 = vbcast.lane.b32.xlu0 %v6930_v35, 256 }
 0x39f   :  { %1097 = vbcast.lane.b32.xlu1 %v1091_v45, 264 }
 0x3a1   :  { %v550_v19 = vpop.permute.xlu1 %549 }
 0x3a2   :  { %1621 = vbcast.lane.b32.xlu0 %v6940_v8, 256  ;;  %v583_v9 = vmul.f32 %v6937_v12, %v550_v19 }
 0x3a3   :  { %1108 = vbcast.lane.b32.xlu1 %v1102_v46, 264 }
 0x3a4   :  { %v596_v47 = vadd.f32 %v6950_v22, %v583_v9 }
 0x3a5   :  { %v540_v31 = vpop.permute.xlu0 %539 }
 0x3a6   :  { %v612_v40 = vpop.permute.xlu1 %611  ;;  %1632 = vbcast.lane.b32.xlu0 %v6953_v25, 256  ;;  %v581_v53 = vmul.f32 %v6937_v12, %v540_v31  ;;  %v6989_v31 = vrot.slane %v1414_v24, %v6710_v17 }
 0x3a7   :  { %v640_v54 = vmul.f32 %v6945_v15, %v612_v40  ;;  %1119 = vbcast.lane.b32.xlu1 %v1113_v51, 264 }
 0x3a8   :  { %v594_v28 = vadd.f32 %v6950_v22, %v581_v53 }
 0x3a9   :  { %v6962_v33 = vadd.f32 %v640_v54, %v596_v47  ;;  %v6964_v36 = vpop.permute.xlu0 %569 }
 0x3aa   :  { %v604_v37 = vpop.permute.xlu1 %603  ;;  %1643 = vbcast.lane.b32.xlu0 %v6960_v32, 256 }
 0x3ab   :  { %v664_v41 = vand.u32 2147483647, %v6962_v33  ;;  %v638_v42 = vmul.f32 %v6945_v15, %v604_v37  ;;  %2746 = vbcast.lane.b32.xlu1 %v2740_v13, 264  ;;  %v7001_v37 = vld [vmem:[#allocation5 + $0x30] sm:$0xff] }
 0x3ad   :  { %v672_v49 = vsub.f32 0.0, %v664_v41  ;;  %v6973_v44 = vadd.f32 %v638_v42, %v594_v28  ;;  %v822_v21 = vpop.permute.xlu0 %821 }
 0x3ae   :  { %839 = vst.msk [vmem:[#allocation6 + $0x30] sm:$0xff] %vm800_vm1, %v822_v21  ;;  %v810_v45 = vpop.permute.xlu1 %809  ;;  %1654 = vbcast.lane.b32.xlu0 %v6971_v43, 256 }
 0x3af   :  { %v682_v46 = vmul.f32 1.442695, %v672_v49  ;;  %v662_v51 = vand.u32 2147483647, %v6973_v44  ;;  %833 = vst.msk [vmem:[#allocation6] sm:$0xff] %vm800_vm1, %v810_v45  ;;  %2757 = vbcast.lane.b32.xlu1 %v6897_v38, 264  ;;  %v7010_v49 = vrot.slane %v7001_v37, %v6679_v61 }
 0x3b1   :  { %6184 = vpow2.f32 %v682_v46  ;;  %v670_v13 = vsub.f32 0.0, %v662_v51  ;;  %v6983_v6 = vpop.permute.xlu0 %619 }
 0x3b2   :  { %v555_v11 = vpop.permute.xlu1 %554  ;;  %1665 = vbcast.lane.b32.xlu0 %v6981_v29, 256 }
 0x3b3   :  { %v678_v19 = vmul.f32 1.442695, %v670_v13  ;;  %2768 = vbcast.lane.b32.xlu1 %v6903_v52, 264  ;;  %v584_v9 = vmul.f32 %v6937_v12, %v555_v11  ;;  %v6997_v52 = vrot.slane %v1414_v24, %v6728_v27  ;;  %v7019_v13 = vrot.slane %v7001_v37, %v6686_v0 }
 0x3b5   :  { %6186 = vpow2.f32 %v678_v19  ;;  %v818_v38 = vpop.permute.xlu0 %817  ;;  %v597_v47 = vadd.f32 %v6950_v22, %v584_v9 }
 0x3b6   :  { %837 = vst.msk [vmem:[#allocation6 + $0x20] sm:$0xff] %vm800_vm1, %v818_v38  ;;  %1676 = vbcast.lane.b32.xlu0 %v6989_v31, 256 }
 0x3b7   :  { %v616_v40 = vpop.permute.xlu1 %615  ;;  %2779 = vbcast.lane.b32.xlu1 %v6909_v57, 264 }
 0x3b8   :  { %v641_v53 = vmul.f32 %v6945_v15, %v616_v40 }
 0x3b9   :  { %v6999_v54 = vpop.permute.xlu0 %631 }
 0x3ba   :  { %v7003_v28 = vadd.f32 %v641_v53, %v597_v47  ;;  %1687 = vbcast.lane.b32.xlu0 %v6997_v52, 256 }
 0x3bb   :  { %v6185_v41 = vpop.eup %6184  ;;  %v816_v42 = vpop.permute.xlu1 %815  ;;  %2790 = vbcast.lane.b32.xlu1 %v6913_v48, 264 }
 0x3bc   :  { %v712_v57 = vadd.f32 1.0, %v6185_v41  ;;  %836 = vst.msk [vmem:[#allocation6 + $0x18] sm:$0xff] %vm800_vm1, %v816_v42  ;;  %v665_v24 = vand.u32 2147483647, %v7003_v28  ;;  %v715_v11 = vmul.f32 -0.5, %v6185_v41 }
 0x3bd   :  { %v7013_v21 = vpop.permute.xlu0 %2176 }
 0x3be   :  { %11009 = vst [vmem:[#allocation23_spill] sm:$0xff] %v7013_v21  ;;  %6188 = vlog2.f32 %v712_v57  ;;  %4440 = vbcast.lane.b32.xlu0 %v7010_v49, 256  ;;  %v673_v46 = vsub.f32 0.0, %v665_v24  ;;  %v716_v47 = vadd.f32 1.0, %v715_v11  ;;  %v587_v11 = vmul.f32 %v6937_v12, %v6964_v36 }
 0x3bf   :  { %v6187_v45 = vpop.eup %6186  ;;  %v545_v51 = vpop.permute.xlu1 %544  ;;  %2801 = vbcast.lane.b32.xlu1 %v6917_v23, 264  ;;  %v7028_v23 = vrot.slane %v7001_v37, %v6690_v3  ;;  %v5979_v36 = vmul.f32 -1.442695, %v6763_v56 }
 0x3c0   :  { %v694_v48 = vadd.f32 1.0, %v6187_v45  ;;  %v684_v19 = vmul.f32 1.442695, %v673_v46  ;;  %v582_v9 = vmul.f32 %v6937_v12, %v545_v51  ;;  %v697_v53 = vmul.f32 -0.5, %v6187_v45 }
 0x3c1   :  { %v7022_v38 = vpop.permute.xlu0 %2187  ;;  %v718_v46 = vand.u32 2147483647, %v6185_v41  ;;  %v5981_v51 = vmul.f32 -1.442695, %v6754_v50  ;;  %v717_v55 = vmul.f32 %v6185_v41, %v716_v47  ;;  %v5982_v47 = vmul.f32 -1.442695, %v6768_v58 }
 0x3c2   :  { %11010 = vst [vmem:[#allocation24_spill] sm:$0xff] %v7022_v38  ;;  %6190 = vlog2.f32 %v694_v48  ;;  %4451 = vbcast.lane.b32.xlu0 %v7019_v13, 256  ;;  %v595_v42 = vadd.f32 %v6950_v22, %v582_v9  ;;  %v7043_v9 = vrot.slane %v7001_v37, %v6696_v5 }
 0x3c3   :  { %6192 = vpow2.f32 %v684_v19  ;;  %2812 = vbcast.lane.b32.xlu1 %v6921_v62, 264  ;;  %vm719_vm2 = vcmp.lt.f32.partialorder %v718_v46, 0.0004427343 }
 0x3c4   :  { %v608_v40 = vpop.permute.xlu1 %607  ;;  %6194 = vpow2.f32 %v5981_v51 }
 0x3c5   :  { %v639_v57 = vmul.f32 %v6945_v15, %v608_v40  ;;  %v7032_v24 = vpop.permute.xlu0 %2198 }
 0x3c6   :  { %11011 = vst [vmem:[#allocation25_spill] sm:$0xff] %v7032_v24  ;;  %4462 = vbcast.lane.b32.xlu0 %v7028_v23, 256  ;;  %v698_v24 = vadd.f32 1.0, %v697_v53 }
 0x3c7   :  { %v7036_v48 = vadd.f32 %v639_v57, %v595_v42  ;;  %2823 = vbcast.lane.b32.xlu1 %v6926_v2, 264  ;;  %v656_v2 = vmax.f32 %v6962_v33, 0.0  ;;  %v700_v57 = vand.u32 2147483647, %v6187_v45  ;;  %v7057_v33 = vrot.slane %v7001_v37, %v6701_v10 }
 0x3c8   :  { %v6189_v62 = vpop.eup %6188  ;;  %v812_v19 = vpop.permute.xlu1 %811 }
 0x3c9   :  { %v714_v40 = vmul.f32 0.6931472, %v6189_v62  ;;  %v663_v38 = vand.u32 2147483647, %v7036_v48  ;;  %834 = vst.msk [vmem:[#allocation6 + $0x8] sm:$0xff] %vm800_vm1, %v812_v19  ;;  %v7047_v42 = vpop.permute.xlu0 %2209  ;;  %v600_v62 = vadd.f32 %v6950_v22, %v587_v11 }
 0x3ca   :  { %11012 = vst [vmem:[#allocation26_spill] sm:$0xff] %v7047_v42  ;;  %4473 = vbcast.lane.b32.xlu0 %v7043_v9, 256  ;;  %v699_v42 = vmul.f32 %v6187_v45, %v698_v24  ;;  %vm701_vm3 = vcmp.lt.f32.partialorder %v700_v57, 0.0004427343  ;;  %v5977_v24 = vmul.f32 -1.442695, %v6725_v26 }
 0x3cb   :  { %v720_v21 = vsel %vm719_vm2, %v717_v55, %v714_v40  ;;  %v671_v16 = vsub.f32 0.0, %v663_v38  ;;  %1614 = vbcast.lane.b32.xlu1 %v6930_v35, 264 }
 0x3cc   :  { %v6191_v41 = vpop.eup %6190  ;;  %v768_v53 = vadd.f32 %v720_v21, %v656_v2  ;;  %v628_v19 = vpop.permute.xlu1 %627  ;;  %v654_v21 = vmax.f32 %v6973_v44, 0.0  ;;  %v7076_v44 = vrot.slane %v7001_v37, %v6707_v14 }
 0x3cd   :  { %v7059_v46 = vpop.eup %6192  ;;  %v696_v51 = vmul.f32 0.6931472, %v6191_v41  ;;  %v680_v59 = vmul.f32 1.442695, %v671_v16  ;;  %v644_v55 = vmul.f32 %v6945_v15, %v628_v19  ;;  %v7062_v38 = vpop.permute.xlu0 %2220  ;;  %v5980_v16 = vmul.f32 -1.442695, %v6776_v4 }
 0x3ce   :  { %778 = vst.msk [vmem:[#allocation3 + $0x10] sm:$0xff] %vm31_vm0, %v768_v53  ;;  %v786_v35 = vmul.f32 %v768_v53, %v6834_v63  ;;  %v721_v11 = vadd.f32 1.0, %v7059_v46  ;;  %4484 = vbcast.lane.b32.xlu0 %v7057_v33, 256  ;;  %v5975_v53 = vmul.f32 -1.442695, %v6730_v20 }
 0x3cf   :  { %v702_v40 = vsel %vm701_vm3, %v699_v42, %v696_v51  ;;  %6196 = vpow2.f32 %v680_v59  ;;  %v7069_v2 = vadd.f32 %v644_v55, %v600_v62  ;;  %1625 = vbcast.lane.b32.xlu1 %v6940_v8, 264  ;;  %v5978_v62 = vmul.f32 -1.442695, %v6732_v30 }
 0x3d0   :  { %794 = vst.msk [vmem:[#allocation4 + $0x10] sm:$0xff] %vm31_vm0, %v786_v35  ;;  %v766_v45 = vadd.f32 %v702_v40, %v654_v21  ;;  %6198 = vlog2.f32 %v721_v11  ;;  %v7096_v55 = vrot.slane %v7001_v37, %v6710_v17  ;;  %v6195_v35 = vpop.eup %6194 }
 0x3d1   :  { %6200 = vpow2.f32 %v5979_v36  ;;  %v668_v42 = vand.u32 2147483647, %v7069_v2  ;;  %v560_v59 = vpop.permute.xlu1 %559  ;;  %v7080_v57 = vpop.permute.xlu0 %2231  ;;  %v724_v36 = vmul.f32 -0.5, %v7059_v46 }
 0x3d2   :  { %6202 = vpow2.f32 %v5982_v47  ;;  %776 = vst.msk [vmem:[#allocation3] sm:$0xff] %vm31_vm0, %v766_v45  ;;  %v784_v8 = vmul.f32 %v766_v45, %v6825_v18  ;;  %v585_v41 = vmul.f32 %v6937_v12, %v560_v59  ;;  %4495 = vbcast.lane.b32.xlu0 %v7076_v44, 256  ;;  %v642_v47 = vmul.f32 %v6945_v15, %v6983_v6 }
 0x3d3   :  { %v676_v19 = vsub.f32 0.0, %v668_v42  ;;  %1636 = vbcast.lane.b32.xlu1 %v6953_v25, 264  ;;  %6204 = vpow2.f32 %v5980_v16  ;;  %v5976_v25 = vmul.f32 -1.442695, %v6737_v34  ;;  %v725_v6 = vadd.f32 1.0, %v724_v36 }
 0x3d4   :  { %792 = vst.msk [vmem:[#allocation4] sm:$0xff] %vm31_vm0, %v784_v8  ;;  %v598_v51 = vadd.f32 %v6950_v22, %v585_v41  ;;  %6206 = vpow2.f32 %v5977_v24  ;;  %v727_v45 = vand.u32 2147483647, %v7059_v46  ;;  %v7109_v42 = vrot.slane %v7001_v37, %v6728_v27 }
 0x3d5   :  { %v690_v21 = vmul.f32 1.442695, %v676_v19  ;;  %v7098_v11 = vpop.permute.xlu0 %2242  ;;  %v575_v40 = vpop.permute.xlu1 %574  ;;  %6208 = vpow2.f32 %v5975_v53  ;;  %v7115_v19 = vld [vmem:[#allocation5 + $0x20] sm:$0xff]  ;;  %v5430_v36 = vadd.f32 1.0, %v6195_v35  ;;  %v726_v37 = vmul.f32 %v7059_v46, %v725_v6 }
 0x3d6   :  { %v7101_v16 = vadd.f32 %v642_v47, %v598_v51  ;;  %4506 = vbcast.lane.b32.xlu0 %v7096_v55, 256  ;;  %vm728_vm4 = vcmp.lt.f32.partialorder %v727_v45, 0.0004427343  ;;  %v7126_v35 = vrot.slane %v7115_v19, %v6679_v61 }
 0x3d7   :  { %6210 = vpow2.f32 %v690_v21  ;;  %1647 = vbcast.lane.b32.xlu1 %v6960_v32, 264  ;;  %v588_v21 = vmul.f32 %v6937_v12, %v575_v40 }
 0x3d8   :  { %6212 = vpow2.f32 %v5978_v62  ;;  %v666_v24 = vand.u32 2147483647, %v7101_v16 }
 0x3d9   :  { %v7111_v59 = vpop.eup %6196  ;;  %v7113_v8 = vpop.permute.xlu0 %2253  ;;  %6214 = vpow2.f32 %v5976_v25  ;;  %v657_v25 = vmax.f32 %v7003_v28, 0.0 }
 0x3da   :  { %11013 = vst [vmem:[#allocation27_spill] sm:$0xff] %v7113_v8  ;;  %v824_v41 = vpop.permute.xlu1 %823  ;;  %v6199_v53 = vpop.eup %6198  ;;  %v703_v32 = vadd.f32 1.0, %v7111_v59  ;;  %4517 = vbcast.lane.b32.xlu0 %v7109_v42, 256  ;;  %v674_v51 = vsub.f32 0.0, %v666_v24  ;;  %v706_v28 = vmul.f32 -0.5, %v7111_v59 }
 0x3db   :  { %840 = vst.msk [vmem:[#allocation6 + $0x38] sm:$0xff] %vm800_vm1, %v824_v41  ;;  %v6201_v62 = vpop.eup %6200  ;;  %v723_v47 = vmul.f32 0.6931472, %v6199_v53  ;;  %1658 = vbcast.lane.b32.xlu1 %v6971_v43, 264 }
 0x3dc   :  { %v6203_v63 = vpop.eup %6202  ;;  %6216 = vlog2.f32 %v703_v32  ;;  %v5428_v6 = vadd.f32 1.0, %v6201_v62  ;;  %v686_v45 = vmul.f32 1.442695, %v674_v51  ;;  %v601_v32 = vadd.f32 %v6950_v22, %v588_v21 }
 0x3dd   :  { %v729_v41 = vsel %vm728_vm4, %v726_v37, %v723_v47  ;;  %v7128_v18 = vpop.permute.xlu0 %1038  ;;  %v6205_v46 = vpop.eup %6204  ;;  %v5431_v40 = vadd.f32 1.0, %v6203_v63  ;;  %6218 = vrcp.f32 %v5430_v36  ;;  %v7140_v62 = vrot.slane %v7115_v19, %v6686_v0 }
 0x3de   :  { %v7130_v53 = vpop.permute.xlu1 %2180  ;;  %v769_v24 = vadd.f32 %v729_v41, %v657_v25  ;;  %3308 = vbcast.lane.b32.xlu0 %v7126_v35, 256  ;;  %v6207_v43 = vpop.eup %6206  ;;  %v5429_v63 = vadd.f32 1.0, %v6205_v46  ;;  %v645_v51 = vmul.f32 %v6945_v15, %v6999_v54  ;;  %6220 = vpow2.f32 %v686_v45 }
 0x3df   :  { %1669 = vbcast.lane.b32.xlu1 %v6981_v29, 264  ;;  %v6209_v8 = vpop.eup %6208  ;;  %6222 = vrcp.f32 %v5428_v6  ;;  %v5426_v41 = vadd.f32 1.0, %v6207_v43  ;;  %v707_v46 = vadd.f32 1.0, %v706_v28  ;;  %v709_v54 = vand.u32 2147483647, %v7111_v59 }
 0x3e0   :  { %779 = vst.msk [vmem:[#allocation3 + $0x18] sm:$0xff] %vm31_vm0, %v769_v24  ;;  %v787_v47 = vmul.f32 %v769_v24, %v6836_v1  ;;  %6224 = vrcp.f32 %v5431_v40  ;;  %v7153_v1 = vadd.f32 %v645_v51, %v601_v32  ;;  %v7159_v6 = vrot.slane %v7115_v19, %v6690_v3 }
 0x3e1   :  { %v7142_v37 = vpop.eup %6210  ;;  %v7146_v21 = vpop.permute.xlu0 %1049  ;;  %v5424_v45 = vadd.f32 1.0, %v6209_v8  ;;  %v708_v51 = vmul.f32 %v7111_v59, %v707_v46  ;;  %v655_v8 = vmax.f32 %v7036_v48, 0.0  ;;  %vm710_vm5 = vcmp.lt.f32.partialorder %v709_v54, 0.0004427343 }
 0x3e2   :  { %11014 = vst [vmem:[#allocation28_spill] sm:$0xff] %v7146_v21  ;;  %v7148_v29 = vpop.permute.xlu1 %2191  ;;  %v6213_v36 = vpop.eup %6212  ;;  %795 = vst.msk [vmem:[#allocation4 + $0x18] sm:$0xff] %vm31_vm0, %v787_v47  ;;  %v748_v25 = vadd.f32 1.0, %v7142_v37  ;;  %3319 = vbcast.lane.b32.xlu0 %v7140_v62, 256  ;;  %v669_v21 = vand.u32 2147483647, %v7153_v1 }
 0x3e3   :  { %11015 = vst [vmem:[#allocation29_spill] sm:$0xff] %v7148_v29  ;;  %v6215_v24 = vpop.eup %6214  ;;  %1680 = vbcast.lane.b32.xlu1 %v6989_v31, 264  ;;  %v5427_v47 = vadd.f32 1.0, %v6213_v36  ;;  %v754_v54 = vand.u32 2147483647, %v7142_v37 }
 0x3e4   :  { %6226 = vlog2.f32 %v748_v25  ;;  %v5425_v31 = vadd.f32 1.0, %v6215_v24  ;;  %v751_v25 = vmul.f32 -0.5, %v7142_v37  ;;  %v677_v29 = vsub.f32 0.0, %v669_v21 }
 0x3e5   :  { %6228 = vrcp.f32 %v5429_v63  ;;  %v7162_v43 = vpop.permute.xlu0 %1060  ;;  %v7173_v63 = vrot.slane %v7115_v19, %v6696_v5  ;;  %vm755_vm6 = vcmp.lt.f32.partialorder %v754_v54, 0.0004427343 }
 0x3e6   :  { %v7164_v40 = vpop.permute.xlu1 %2202  ;;  %v6217_v28 = vpop.eup %6216  ;;  %3330 = vbcast.lane.b32.xlu0 %v7159_v6, 256  ;;  %6230 = vrcp.f32 %v5426_v41  ;;  %v752_v48 = vadd.f32 1.0, %v751_v25 }
 0x3e7   :  { %11016 = vst [vmem:[#allocation30_spill] sm:$0xff] %v7164_v40  ;;  %v705_v32 = vmul.f32 0.6931472, %v6217_v28  ;;  %1691 = vbcast.lane.b32.xlu1 %v6997_v52, 264  ;;  %6232 = vrcp.f32 %v5424_v45  ;;  %v692_v40 = vmul.f32 1.442695, %v677_v29  ;;  %v6219_v59 = vpop.eup %6218 }
 0x3e8   :  { %6234 = vrcp.f32 %v5427_v47  ;;  %v7180_v52 = vpop.eup %6220  ;;  %v7189_v47 = vrot.slane %v7115_v19, %v6701_v10  ;;  %v753_v25 = vmul.f32 %v7142_v37, %v752_v48  ;;  %v7212_v54 = vmul.f32 %v6219_v59, %v6754_v50  ;;  %v4810_v50 = vld [vmem:[#allocation5 + $0x38] sm:$0xff] }
 0x3e9   :  { %v711_v36 = vsel %vm710_vm5, %v708_v51, %v705_v32  ;;  %v7175_v41 = vpop.permute.xlu0 %1071  ;;  %6236 = vrcp.f32 %v5425_v31  ;;  %v6223_v21 = vpop.eup %6222  ;;  %v730_v45 = vadd.f32 1.0, %v7180_v52 }
 0x3ea   :  { %11017 = vst [vmem:[#allocation31_spill] sm:$0xff] %v7175_v41  ;;  %v7177_v24 = vpop.permute.xlu1 %2213  ;;  %v767_v46 = vadd.f32 %v711_v36, %v655_v8  ;;  %3341 = vbcast.lane.b32.xlu0 %v7173_v63, 256  ;;  %6238 = vpow2.f32 %v692_v40  ;;  %v6225_v28 = vpop.eup %6224  ;;  %v660_v36 = vmax.f32 %v7069_v2, 0.0  ;;  %v6540_v41 = vmov 1966171168   ;;  %11020 = vst [vmem:[#allocation34_spill] sm:$0xff] %v7212_v54 }
 0x3eb   :  { %4444 = vbcast.lane.b32.xlu1 %v7010_v49, 264  ;;  %6240 = vlog2.f32 %v730_v45  ;;  %v848_v37 = vunpack.c.l.s4 %v6540_v41  ;;  %v736_v54 = vand.u32 2147483647, %v7180_v52 }
 0x3ec   :  { %777 = vst.msk [vmem:[#allocation3 + $0x8] sm:$0xff] %vm31_vm0, %v767_v46  ;;  %v785_v29 = vmul.f32 %v767_v46, %v6827_v39  ;;  %v7202_v46 = vrot.slane %v7115_v19, %v6707_v14 }
 0x3ed   :  { %v7191_v31 = vpop.permute.xlu0 %1082  ;;  %vm737_vm7 = vcmp.lt.f32.partialorder %v736_v54, 0.0004427343 }
 0x3ee   :  { %11018 = vst [vmem:[#allocation32_spill] sm:$0xff] %v7191_v31  ;;  %v7193_v32 = vpop.permute.xlu1 %2224  ;;  %v6227_v40 = vpop.eup %6226  ;;  %793 = vst.msk [vmem:[#allocation4 + $0x8] sm:$0xff] %vm31_vm0, %v785_v29  ;;  %3352 = vbcast.lane.b32.xlu0 %v7189_v47, 256  ;;  %v733_v29 = vmul.f32 -0.5, %v7180_v52 }
 0x3ef   :  { %v6229_v49 = vpop.eup %6228  ;;  %v750_v51 = vmul.f32 0.6931472, %v6227_v40  ;;  %4455 = vbcast.lane.b32.xlu1 %v7019_v13, 264 }
 0x3f0   :  { %v6231_v8 = vpop.eup %6230  ;;  %v734_v41 = vadd.f32 1.0, %v733_v29  ;;  %v7254_v29 = vmul.f32 %v6229_v49, %v6776_v4  ;;  %v7273_v49 = vrot.slane %v4810_v50, %v6696_v5 }
 0x3f1   :  { %v756_v39 = vsel %vm755_vm6, %v753_v25, %v750_v51  ;;  %v7205_v45 = vpop.permute.xlu0 %1093  ;;  %v6233_v40 = vpop.eup %6232  ;;  %v7218_v25 = vrot.slane %v7115_v19, %v6710_v17 }
 0x3f2   :  { %11019 = vst [vmem:[#allocation33_spill] sm:$0xff] %v7205_v45  ;;  %v7207_v31 = vpop.permute.xlu1 %2235  ;;  %v772_v48 = vadd.f32 %v756_v39, %v660_v36  ;;  %3363 = vbcast.lane.b32.xlu0 %v7202_v46, 256  ;;  %v6235_v13 = vpop.eup %6234  ;;  %v7223_v39 = vmul.f32 %v6225_v28, %v6768_v58  ;;  %v7230_v59 = vmul.f32 %v6233_v40, %v6730_v20  ;;  %11027 = vst [vmem:[#allocation41_spill] sm:$0xff] %v7254_v29 }
 0x3f3   :  { %4466 = vbcast.lane.b32.xlu1 %v7028_v23, 264  ;;  %v6237_v2 = vpop.eup %6236  ;;  %v7240_v28 = vmul.f32 %v6235_v13, %v6732_v30  ;;  %v7245_v20 = vrot.slane %v7115_v19, %v6728_v27  ;;  %v7257_v30 = vrot.slane %v4810_v50, %v6679_v61  ;;  %v7263_v19 = vrot.slane %v4810_v50, %v6690_v3 }
 0x3f4   :  { %782 = vst.msk [vmem:[#allocation3 + $0x30] sm:$0xff] %vm31_vm0, %v772_v48  ;;  %v790_v51 = vmul.f32 %v772_v48, %v6848_v7  ;;  %v7220_v45 = vpop.eup %6238  ;;  %11021 = vst [vmem:[#allocation35_spill] sm:$0xff] %v7223_v39  ;;  %v7233_v48 = vmul.f32 %v6231_v8, %v6725_v26  ;;  %v849_v7 = vunpack.c.0.s8 %v848_v37  ;;  %v7248_v26 = vmul.f32 %v6223_v21, %v6763_v56  ;;  %v7266_v21 = vld [vmem:[#allocation3] sm:$0xff] }
 0x3f5   :  { %v7225_v36 = vpop.permute.xlu0 %1104  ;;  %11022 = vst [vmem:[#allocation36_spill] sm:$0xff] %v7230_v59  ;;  %v757_v58 = vadd.f32 1.0, %v7220_v45  ;;  %11024 = vst [vmem:[#allocation38_spill] sm:$0xff] %v7240_v28  ;;  %v7251_v8 = vmul.f32 %v6237_v2, %v6737_v34  ;;  %v6241_v40 = vpop.eup %6240  ;;  %v735_v56 = vmul.f32 %v7180_v52, %v734_v41  ;;  %v7276_v13 = vrot.slane %v4810_v50, %v6701_v10  ;;  %v3678_v2 = vld [vmem:[#allocation5 + $0x28] sm:$0xff] }
 0x3f6   :  { %v7227_v23 = vpop.permute.xlu1 %2246  ;;  %11023 = vst [vmem:[#allocation37_spill] sm:$0xff] %v7233_v48  ;;  %798 = vst.msk [vmem:[#allocation4 + $0x30] sm:$0xff] %vm31_vm0, %v790_v51  ;;  %3374 = vbcast.lane.b32.xlu0 %v7218_v25, 256  ;;  %v732_v37 = vmul.f32 0.6931472, %v6241_v40  ;;  %v7279_v51 = vsub.s32 %v849_v7, %v6676_v60  ;;  %v7284_v52 = vrot.slane %v4810_v50, %v6707_v14  ;;  %v760_v40 = vmul.f32 -0.5, %v7220_v45 }
 0x3f7   :  { %4477 = vbcast.lane.b32.xlu1 %v7043_v9, 264  ;;  %11025 = vst [vmem:[#allocation39_spill] sm:$0xff] %v7248_v26  ;;  %11026 = vst [vmem:[#allocation40_spill] sm:$0xff] %v7251_v8  ;;  %6242 = vlog2.f32 %v757_v58  ;;  %v7260_v9 = vrot.slane %v4810_v50, %v6686_v0  ;;  %v658_v58 = vmax.f32 %v7101_v16, 0.0  ;;  %v7289_v39 = vrot.slane %v4810_v50, %v6710_v17  ;;  %v1982_v60 = vld [vmem:[#allocation6 + $0x10] sm:$0xff]  ;;  %v11045_v8 = vld [vmem:[#allocation18_spill] sm:$0xff] }
 0x3f8   :  { %11028 = vst [vmem:[#allocation42_spill] sm:$0xff] %v7257_v30  ;;  %11032 = vst [vmem:[#allocation46_spill] sm:$0xff] %v7273_v49  ;;  %v738_v41 = vsel %vm737_vm7, %v735_v56, %v732_v37  ;;  %v7292_v29 = vrot.slane %v4810_v50, %v6728_v27  ;;  %v853_v16 = vrot.slane %v7266_v21, %v7279_v51 }
 0x3f9   :  { %11029 = vst [vmem:[#allocation43_spill] sm:$0xff] %v7260_v9  ;;  %v7268_v34 = vpop.permute.xlu0 %1115  ;;  %11033 = vst [vmem:[#allocation47_spill] sm:$0xff] %v7276_v13  ;;  %v770_v7 = vadd.f32 %v738_v41, %v658_v58  ;;  %v7297_v54 = vrot.slane %v3678_v2, %v6679_v61  ;;  %v7300_v37 = vrot.slane %v3678_v2, %v6686_v0 }
 0x3fa   :  { %11030 = vst [vmem:[#allocation44_spill] sm:$0xff] %v7268_v34  ;;  %v7270_v4 = vpop.permute.xlu1 %2257  ;;  %11034 = vst [vmem:[#allocation48_spill] sm:$0xff] %v7279_v51  ;;  %3385 = vbcast.lane.b32.xlu0 %v7245_v20, 256  ;;  %v7305_v28 = vrot.slane %v3678_v2, %v6690_v3  ;;  %v7308_v50 = vrot.slane %v3678_v2, %v6696_v5  ;;  %v7311_v58 = vrot.slane %v3678_v2, %v6701_v10  ;;  %v844_v34 = vld [vmem:[#allocation6] sm:$0xff] }
 0x3fb   :  { %11031 = vst [vmem:[#allocation45_spill] sm:$0xff] %v7270_v4  ;;  %11035 = vst [vmem:[#allocation49_spill] sm:$0xff] %v7284_v52  ;;  %4488 = vbcast.lane.b32.xlu1 %v7057_v33, 264  ;;  %v7314_v41 = vrot.slane %v3678_v2, %v6707_v14  ;;  %v788_v26 = vmul.f32 %v770_v7, %v11045_v8  ;;  %v7320_v48 = vrot.slane %v3678_v2, %v6710_v17 }
 0x3fc   :  { %11036 = vst [vmem:[#allocation50_spill] sm:$0xff] %v7289_v39  ;;  %11037 = vst [vmem:[#allocation51_spill] sm:$0xff] %v7292_v29  ;;  %v7323_v59 = vrot.slane %v3678_v2, %v6728_v27  ;;  %v7336_v8 = vrot.slane %v1982_v60, %v6696_v5  ;;  %v763_v2 = vand.u32 2147483647, %v7220_v45  ;;  %v661_v4 = vmax.f32 %v7153_v1, 0.0 }
 0x3fd   :  { %11038 = vst [vmem:[#allocation52_spill] sm:$0xff] %v7297_v54  ;;  %11039 = vst [vmem:[#allocation53_spill] sm:$0xff] %v7300_v37  ;;  %v7302_v56 = vpop.permute.xlu0 %2742 }
 0x3fe   :  { %11040 = vst [vmem:[#allocation54_spill] sm:$0xff] %v7302_v56  ;;  %v565_v33 = vpop.permute.xlu1 %564  ;;  %11041 = vst [vmem:[#allocation55_spill] sm:$0xff] %v7305_v28  ;;  %5006 = vbcast.lane.b32.xlu0 %v7257_v30, 256  ;;  %v7326_v56 = vrot.slane %v1982_v60, %v6679_v61  ;;  %vm764_vm8 = vcmp.lt.f32.partialorder %v763_v2, 0.0004427343 }
 0x3ff   :  { %11042 = vst [vmem:[#allocation56_spill] sm:$0xff] %v7308_v50  ;;  %11043 = vst [vmem:[#allocation57_spill] sm:$0xff] %v7311_v58  ;;  %v1978_v58 = vld [vmem:[#allocation4 + $0x10] sm:$0xff]  ;;  %v761_v50 = vadd.f32 1.0, %v760_v40  ;;  %4499 = vbcast.lane.b32.xlu1 %v7076_v44, 264  ;;  %v7344_v40 = vrot.slane %v1982_v60, %v6707_v14  ;;  %v869_v44 = vrot.slane %v853_v16, %v7279_v51 }
 0x400   :  { %11044 = vst [vmem:[#allocation58_spill] sm:$0xff] %v7314_v41  ;;  %780 = vst.msk [vmem:[#allocation3 + $0x20] sm:$0xff] %vm31_vm0, %v770_v7  ;;  %v7330_v41 = vrot.slane %v1982_v60, %v6686_v0  ;;  %v7333_v7 = vrot.slane %v1982_v60, %v6690_v3  ;;  %v2122_v30 = vcombine.high %v1978_v58, %v1978_v58 }
 0x401   :  { %11046 = vst [vmem:[#allocation59_spill] sm:$0xff] %v7320_v48  ;;  %11047 = vst [vmem:[#allocation60_spill] sm:$0xff] %v7323_v59  ;;  %v861_v59 = vcombine.high %v853_v16, %v853_v16  ;;  %v6243_v48 = vpop.eup %6242  ;;  %v7363_v16 = vrot.slane %v844_v34, %v6690_v3 }
 0x402   :  { %11048 = vst [vmem:[#allocation61_spill] sm:$0xff] %v7326_v56  ;;  %11049 = vst [vmem:[#allocation62_spill] sm:$0xff] %v7330_v41  ;;  %v7341_v56 = vrot.slane %v1982_v60, %v6701_v10  ;;  %v7347_v41 = vpop.permute.xlu0 %2753  ;;  %5017 = vbcast.lane.b32.xlu0 %v7260_v9, 256  ;;  %v7372_v9 = vld [vmem:[#allocation3 + $0x10] sm:$0xff] }
 0x403   :  { %11050 = vst [vmem:[#allocation63_spill] sm:$0xff] %v7333_v7  ;;  %11051 = vst [vmem:[#allocation64_spill] sm:$0xff] %v7336_v8  ;;  %v7350_v7 = vrot.slane %v1982_v60, %v6710_v17  ;;  %v7353_v8 = vrot.slane %v1982_v60, %v6728_v27  ;;  %v2129_v60 = vrot.slane %v1978_v58, %v7279_v51  ;;  %4510 = vbcast.lane.b32.xlu1 %v7096_v55, 264 }
 0x404   :  { %796 = vst.msk [vmem:[#allocation4 + $0x20] sm:$0xff] %vm31_vm0, %v788_v26  ;;  %11052 = vst [vmem:[#allocation65_spill] sm:$0xff] %v7341_v56  ;;  %v7356_v26 = vrot.slane %v844_v34, %v6679_v61  ;;  %v624_v56 = vpop.permute.xlu1 %623 }
 0x405   :  { %11053 = vst [vmem:[#allocation66_spill] sm:$0xff] %v7344_v40  ;;  %11054 = vst [vmem:[#allocation67_spill] sm:$0xff] %v7347_v41  ;;  %v7360_v40 = vrot.slane %v844_v34, %v6686_v0  ;;  %v7366_v41 = vrot.slane %v844_v34, %v6696_v5  ;;  %v846_v5 = vcombine.high %v7266_v21, %v7266_v21  ;;  %v2548_v21 = vld [vmem:[#allocation6 + $0x18] sm:$0xff] }
 0x406   :  { %11055 = vst [vmem:[#allocation68_spill] sm:$0xff] %v7350_v7  ;;  %11056 = vst [vmem:[#allocation69_spill] sm:$0xff] %v7353_v8  ;;  %v759_v8 = vmul.f32 0.6931472, %v6243_v48  ;;  %v762_v7 = vmul.f32 %v7220_v45, %v761_v50  ;;  %v643_v45 = vmul.f32 %v6945_v15, %v624_v56  ;;  %v7380_v50 = vpop.permute.xlu0 %2764  ;;  %5028 = vbcast.lane.b32.xlu0 %v7263_v19, 256  ;;  %v11065_v56 = vld [vmem:[#allocation21_spill] sm:$0xff] }
 0x407   :  { %11057 = vst [vmem:[#allocation70_spill] sm:$0xff] %v7356_v26  ;;  %11058 = vst [vmem:[#allocation71_spill] sm:$0xff] %v7360_v40  ;;  %v586_v26 = vmul.f32 %v6937_v12, %v565_v33  ;;  %v883_v40 = vrot.slane %v861_v59, %v7279_v51  ;;  %v2136_v12 = vrot.slane %v2122_v30, %v7279_v51  ;;  %4521 = vbcast.lane.b32.xlu1 %v7109_v42, 264 }
 0x408   :  { %11059 = vst [vmem:[#allocation72_spill] sm:$0xff] %v7363_v16  ;;  %11060 = vst [vmem:[#allocation73_spill] sm:$0xff] %v7366_v41  ;;  %v765_v41 = vsel %vm764_vm8, %v762_v7, %v759_v8  ;;  %v891_v16 = vcombine.high %v869_v44, %v869_v44  ;;  %v820_v1 = vpop.permute.xlu1 %819  ;;  %v7385_v33 = vrot.slane %v844_v34, %v6701_v10 }
 0x409   :  { %v599_v48 = vadd.f32 %v6950_v22, %v586_v26  ;;  %v773_v55 = vadd.f32 %v765_v41, %v661_v4  ;;  %v7388_v59 = vrot.slane %v844_v34, %v6707_v14  ;;  %v7391_v8 = vrot.slane %v869_v44, %v6679_v61  ;;  %838 = vst.msk [vmem:[#allocation6 + $0x28] sm:$0xff] %vm800_vm1, %v820_v1  ;;  %v7438_v1 = vld [vmem:[#allocation4] sm:$0xff] }
 0x40a   :  { %11061 = vst [vmem:[#allocation74_spill] sm:$0xff] %v7385_v33  ;;  %v7399_v15 = vrot.slane %v7372_v9, %v7279_v51  ;;  %v7402_v30 = vrot.slane %v844_v34, %v6710_v17  ;;  %v2137_v4 = vcombine.high %v2129_v60, %v2129_v60  ;;  %v7407_v41 = vrot.slane %v883_v40, %v6679_v61  ;;  %v7415_v26 = vpop.permute.xlu0 %2775 }
 0x40b   :  { %11062 = vst [vmem:[#allocation75_spill] sm:$0xff] %v7388_v59  ;;  %v7393_v22 = vadd.f32 %v643_v45, %v599_v48  ;;  %783 = vst.msk [vmem:[#allocation3 + $0x38] sm:$0xff] %vm31_vm0, %v773_v55  ;;  %v791_v58 = vmul.f32 %v773_v55, %v11065_v56  ;;  %v860_v7 = vrot.slane %v846_v5, %v7279_v51  ;;  %v7424_v55 = vld [vmem:[%s10748_s1 + $0x8] sm:$0xff]  ;;  %5039 = vbcast.lane.b32.xlu0 %v7273_v49, 256  ;;  %vm1405_vm1 = vcmask 1047559  }
 0x40c   :  { %11063 = vst [vmem:[#allocation76_spill] sm:$0xff] %v7399_v15  ;;  %11064 = vst [vmem:[#allocation77_spill] sm:$0xff] %v7402_v30  ;;  %v2145_v42 = vrot.slane %v2129_v60, %v7279_v51  ;;  %v7412_v2 = vrot.slane %v891_v16, %v6679_v61  ;;  %v7418_v48 = vrot.slane %v844_v34, %v6728_v27  ;;  %v7427_v5 = vpop.permute.xlu1 %1042  ;;  %3312 = vbcast.lane.b32.xlu1 %v7126_v35, 264 }
 0x40d   :  { %v667_v44 = vand.u32 2147483647, %v7393_v22  ;;  %v2138_v45 = vcombine.high %v2136_v12, %v2136_v12  ;;  %799 = vst.msk [vmem:[#allocation4 + $0x38] sm:$0xff] %vm31_vm0, %v791_v58  ;;  %v7430_v16 = vrot.slane %v2548_v21, %v6679_v61  ;;  %v7433_v60 = vrot.slane %v2548_v21, %v6686_v0 }
 0x40e   :  { %11066 = vst [vmem:[#allocation78_spill] sm:$0xff] %v7418_v48  ;;  %v7436_v34 = vrot.slane %v2548_v21, %v6690_v3  ;;  %v935_v58 = vmul.f32 %v7391_v8, %v7424_v55  ;;  %v893_v56 = vcombine.high %v883_v40, %v883_v40  ;;  %v1984_v17 = vcombine.high %v7372_v9, %v7372_v9  ;;  %v7458_v9 = vpop.permute.xlu0 %2786 }
 0x40f   :  { %11067 = vst [vmem:[#allocation79_spill] sm:$0xff] %v7430_v16  ;;  %11068 = vst [vmem:[#allocation80_spill] sm:$0xff] %v7433_v60  ;;  %v675_v27 = vsub.f32 0.0, %v667_v44  ;;  %v2159_v14 = vrot.slane %v2137_v4, %v7279_v51  ;;  %v937_v0 = vmul.f32 %v7407_v41, %v7424_v55  ;;  %v862_v10 = vcombine.high %v860_v7, %v860_v7 }
 0x410   :  { %11069 = vst [vmem:[#allocation81_spill] sm:$0xff] %v7436_v34  ;;  %v7450_v21 = vrot.slane %v7399_v15, %v7279_v51  ;;  %v7453_v3 = vrot.slane %v2145_v42, %v6679_v61  ;;  %v2152_v40 = vrot.slane %v2136_v12, %v7279_v51  ;;  %v939_v35 = vmul.f32 %v7412_v2, %v7424_v55  ;;  %v7464_v16 = vpop.permute.xlu1 %1053 }
 0x411   :  { %v688_v44 = vmul.f32 1.442695, %v675_v27  ;;  %v2167_v4 = vcombine.high %v2145_v42, %v2145_v42  ;;  %v2166_v34 = vrot.slane %v2138_v45, %v7279_v51  ;;  %v991_v60 = vrot.slane %v7438_v1, %v7279_v51  ;;  %5050 = vbcast.lane.b32.xlu0 %v7276_v13, 256  ;;  %3323 = vbcast.lane.b32.xlu1 %v7140_v62, 264  ;;  %v11071_v13 = vld [vmem:[#allocation23_spill] sm:$0xff] }
 0x412   :  { %v951_v12 = vmul.f32 1.442695, %v935_v58  ;;  %v7469_v30 = vrot.slane %v893_v56, %v6679_v61  ;;  %v876_v27 = vrot.slane %v860_v7, %v7279_v51  ;;  %v2169_v42 = vcombine.high %v2159_v14, %v2159_v14  ;;  %v7484_v7 = vpop.permute.xlu0 %2797 }
 0x413   :  { %6244 = vpow2.f32 %v688_v44  ;;  %v955_v45 = vmul.f32 1.442695, %v937_v0  ;;  %v890_v59 = vrot.slane %v862_v10, %v7279_v51  ;;  %v7475_v33 = vrot.slane %v1984_v17, %v7279_v51 }
 0x414   :  { %v7479_v49 = vmul.f32 %v7453_v3, %v11071_v13  ;;  %v7482_v58 = vrot.slane %v2159_v14, %v6679_v61  ;;  %v2168_v56 = vcombine.high %v2152_v40, %v2152_v40  ;;  %v959_v48 = vmul.f32 1.442695, %v939_v35  ;;  %v7491_v17 = vpop.permute.xlu1 %1064 }
 0x415   :  { %11070 = vst [vmem:[#allocation82_spill] sm:$0xff] %v7475_v33  ;;  %v7487_v62 = vrot.slane %v2167_v4, %v6679_v61  ;;  %v2170_v0 = vcombine.high %v2166_v34, %v2166_v34  ;;  %v1007_v10 = vrot.slane %v991_v60, %v7279_v51  ;;  %v999_v44 = vcombine.high %v991_v60, %v991_v60 }
 0x416   :  { %11072 = vst [vmem:[#allocation23_spill] sm:$0xff] %v7479_v49  ;;  %5061 = vbcast.lane.b32.xlu0 %v7284_v52, 256  ;;  %6246 = vpow2.f32 %v951_v12  ;;  %v941_v14 = vmul.f32 %v7469_v30, %v7424_v55  ;;  %v7496_v13 = vrot.slane %v876_v27, %v6679_v61  ;;  %v984_v35 = vcombine.high %v7438_v1, %v7438_v1  ;;  %v7514_v1 = vpop.permute.xlu0 %2808 }
 0x417   :  { %3334 = vbcast.lane.b32.xlu1 %v7159_v6, 264  ;;  %v2274_v4 = vrot.slane %v2169_v42, %v6679_v61  ;;  %v7503_v60 = vrot.slane %v2152_v40, %v6679_v61  ;;  %6248 = vpow2.f32 %v955_v45  ;;  %v7506_v49 = vrot.slane %v890_v59, %v6679_v61  ;;  %11073 = vst [vmem:[#allocation83_spill] sm:$0xff] %v7514_v1  ;;  %v11074_v6 = vld [vmem:[#allocation24_spill] sm:$0xff]  ;;  %v11076_v40 = vld [vmem:[#allocation25_spill] sm:$0xff] }
 0x418   :  { %v7509_v12 = vrot.slane %v2166_v34, %v6679_v61  ;;  %v7512_v33 = vrot.slane %v2168_v56, %v6679_v61  ;;  %6250 = vpow2.f32 %v959_v48  ;;  %v892_v52 = vcombine.high %v876_v27, %v876_v27  ;;  %v7529_v56 = vpop.permute.xlu1 %1075 }
 0x419   :  { %v7518_v42 = vmul.f32 %v7482_v58, %v11074_v6  ;;  %v7522_v45 = vmul.f32 %v7487_v62, %v11076_v40  ;;  %v7525_v15 = vrot.slane %v2170_v0, %v6679_v61  ;;  %v1021_v34 = vrot.slane %v999_v44, %v7279_v51  ;;  %v11078_v40 = vld [vmem:[#allocation26_spill] sm:$0xff] }
 0x41a   :  { %5072 = vbcast.lane.b32.xlu0 %v7289_v39, 256  ;;  %v1029_v48 = vcombine.high %v1007_v10, %v1007_v10  ;;  %v963_v27 = vmul.f32 1.442695, %v941_v14  ;;  %v943_v1 = vmul.f32 %v7496_v13, %v7424_v55  ;;  %v998_v6 = vrot.slane %v984_v35, %v7279_v51 }
 0x41b   :  { %11075 = vst [vmem:[#allocation24_spill] sm:$0xff] %v7518_v42  ;;  %11077 = vst [vmem:[#allocation25_spill] sm:$0xff] %v7522_v45  ;;  %3345 = vbcast.lane.b32.xlu1 %v7173_v63, 264  ;;  %v7536_v45 = vmul.f32 %v2274_v4, %v11078_v40  ;;  %v7540_v0 = vmul.f32 %v7503_v60, %v7062_v38  ;;  %v945_v44 = vmul.f32 %v7506_v49, %v7424_v55  ;;  %v7560_v40 = vpop.permute.xlu0 %2819 }
 0x41c   :  { %v894_v42 = vcombine.high %v890_v59, %v890_v59  ;;  %v7548_v14 = vmul.f32 %v7509_v12, %v7080_v57  ;;  %v7552_v63 = vmul.f32 %v7512_v33, %v7098_v11  ;;  %v7555_v35 = vrot.slane %v1007_v10, %v6679_v61  ;;  %11083 = vst [vmem:[#allocation87_spill] sm:$0xff] %v7560_v40  ;;  %v7575_v10 = vpop.permute.xlu1 %1086  ;;  %v11091_v40 = vld [vmem:[#allocation30_spill] sm:$0xff] }
 0x41d   :  { %11079 = vst [vmem:[#allocation26_spill] sm:$0xff] %v7536_v45  ;;  %11080 = vst [vmem:[#allocation84_spill] sm:$0xff] %v7540_v0  ;;  %v7544_v39 = vpop.eup %6244  ;;  %v7558_v38 = vrot.slane %v892_v52, %v6679_v61  ;;  %v11084_v0 = vld [vmem:[#allocation27_spill] sm:$0xff]  ;;  %v7568_v57 = vmul.f32 %v7453_v3, %v7130_v53  ;;  %v7578_v52 = vrot.slane %v1029_v48, %v6679_v61  ;;  %6252 = vpow2.f32 %v963_v27  ;;  %v11090_v27 = vld [vmem:[#allocation28_spill] sm:$0xff] }
 0x41e   :  { %11081 = vst [vmem:[#allocation85_spill] sm:$0xff] %v7548_v14  ;;  %11082 = vst [vmem:[#allocation86_spill] sm:$0xff] %v7552_v63  ;;  %v7564_v59 = vmul.f32 %v7525_v15, %v11084_v0  ;;  %v7571_v14 = vrot.slane %v1021_v34, %v6679_v61  ;;  %v739_v11 = vadd.f32 1.0, %v7544_v39  ;;  %5083 = vbcast.lane.b32.xlu0 %v7292_v29, 256  ;;  %v967_v63 = vmul.f32 1.442695, %v943_v1 }
 0x41f   :  { %11086 = vst [vmem:[#allocation88_spill] sm:$0xff] %v7568_v57  ;;  %11087 = vst [vmem:[#allocation89_spill] sm:$0xff] %v7575_v10  ;;  %v1000_v0 = vcombine.high %v998_v6, %v998_v6  ;;  %3356 = vbcast.lane.b32.xlu1 %v7189_v47, 264  ;;  %v971_v3 = vmul.f32 1.442695, %v945_v44  ;;  %v7582_v53 = vrot.slane %v894_v42, %v6679_v61  ;;  %v7584_v57 = vld [vmem:[#allocation4 + $0x18] sm:$0xff] }
 0x420   :  { %11085 = vst [vmem:[#allocation27_spill] sm:$0xff] %v7564_v59  ;;  %v1031_v59 = vcombine.high %v1021_v34, %v1021_v34  ;;  %6254 = vlog2.f32 %v739_v11  ;;  %v6247_v45 = vpop.eup %6246  ;;  %v1161_v29 = vmul.f32 %v7555_v35, %v7128_v18  ;;  %v11088_v10 = vld [vmem:[#allocation29_spill] sm:$0xff]  ;;  %v1014_v1 = vrot.slane %v998_v6, %v7279_v51  ;;  %v7595_v34 = vpop.permute.xlu0 %1610 }
 0x421   :  { %v7590_v48 = vmul.f32 %v7482_v58, %v11088_v10  ;;  %v947_v47 = vmul.f32 %v7558_v38, %v7424_v55  ;;  %v6249_v42 = vpop.eup %6248  ;;  %v1163_v44 = vmul.f32 %v7571_v14, %v11090_v27  ;;  %v1165_v11 = vmul.f32 %v7578_v52, %v7162_v43  ;;  %v7608_v6 = vpop.permute.xlu1 %1097 }
 0x422   :  { %v7603_v18 = vmul.f32 %v7487_v62, %v11091_v40  ;;  %v7606_v58 = vmul.f32 %v2274_v4, %v7177_v24  ;;  %11094 = vst [vmem:[#allocation90_spill] sm:$0xff] %v7608_v6  ;;  %3874 = vbcast.lane.b32.xlu0 %v7297_v54, 256  ;;  %v6251_v10 = vpop.eup %6250  ;;  %6256 = vpow2.f32 %v967_v63  ;;  %v2695_v27 = vrot.slane %v7584_v57, %v7279_v51  ;;  %v11096_v6 = vld [vmem:[#allocation31_spill] sm:$0xff] }
 0x423   :  { %11089 = vst [vmem:[#allocation29_spill] sm:$0xff] %v7590_v48  ;;  %v1028_v48 = vrot.slane %v1000_v0, %v7279_v51  ;;  %v742_v43 = vmul.f32 -0.5, %v7544_v39  ;;  %3367 = vbcast.lane.b32.xlu1 %v7202_v46, 264  ;;  %v1177_v62 = vmul.f32 0.0, %v6247_v45  ;;  %v7617_v40 = vrot.slane %v1031_v59, %v6679_v61 }
 0x424   :  { %11092 = vst [vmem:[#allocation28_spill] sm:$0xff] %v7603_v18  ;;  %11093 = vst [vmem:[#allocation30_spill] sm:$0xff] %v7606_v58  ;;  %6258 = vpow2.f32 %v971_v3  ;;  %v949_v24 = vmul.f32 %v7582_v53, %v7424_v55  ;;  %v1179_v4 = vmul.f32 0.0, %v6249_v42  ;;  %v7623_v63 = vmul.f32 %v7503_v60, %v7193_v32  ;;  %v7625_v18 = vpop.permute.xlu0 %1621 }
 0x425   :  { %v975_v0 = vmul.f32 1.442695, %v947_v47  ;;  %v1030_v58 = vcombine.high %v1014_v1, %v1014_v1  ;;  %v1181_v54 = vmul.f32 0.0, %v6251_v10  ;;  %v1167_v46 = vmul.f32 %v7617_v40, %v11096_v6  ;;  %v7636_v3 = vpop.permute.xlu1 %1108  ;;  %v11100_v6 = vld [vmem:[#allocation32_spill] sm:$0xff] }
 0x426   :  { %11095 = vst [vmem:[#allocation91_spill] sm:$0xff] %v7623_v63  ;;  %v7630_v45 = vrot.slane %v1014_v1, %v6679_v61  ;;  %v7634_v59 = vmul.f32 %v7509_v12, %v7207_v31  ;;  %3885 = vbcast.lane.b32.xlu0 %v7300_v37, 256  ;;  %v7640_v32 = vrot.slane %v1028_v48, %v6679_v61  ;;  %v743_v42 = vadd.f32 1.0, %v742_v43  ;;  %v11102_v37 = vld [vmem:[#allocation33_spill] sm:$0xff] }
 0x427   :  { %v7644_v60 = vmul.f32 %v7512_v33, %v7227_v23  ;;  %v2703_v47 = vcombine.high %v2695_v27, %v2695_v27  ;;  %3378 = vbcast.lane.b32.xlu1 %v7218_v25, 264  ;;  %v7647_v1 = vadd.f32 %v1177_v62, %v1161_v29  ;;  %v979_v12 = vmul.f32 1.442695, %v949_v24  ;;  %v7663_v25 = vld [vmem:[#allocation3 + $0x8] sm:$0xff] }
 0x428   :  { %11097 = vst [vmem:[#allocation31_spill] sm:$0xff] %v7634_v59  ;;  %v7651_v31 = vmul.f32 %v7630_v45, %v11100_v6  ;;  %v745_v10 = vand.u32 2147483647, %v7544_v39  ;;  %v6253_v59 = vpop.eup %6252  ;;  %v7654_v63 = vadd.f32 %v1179_v4, %v1163_v44  ;;  %v7658_v23 = vmul.f32 %v7640_v32, %v11102_v37  ;;  %v7665_v29 = vpop.permute.xlu0 %1632  ;;  %v7673_v44 = vld [vmem:[%s10748_s1 + $0x10] sm:$0xff] }
 0x429   :  { %11098 = vst [vmem:[#allocation92_spill] sm:$0xff] %v7644_v60  ;;  %11099 = vst [vmem:[#allocation93_spill] sm:$0xff] %v7647_v1  ;;  %6260 = vpow2.f32 %v975_v0  ;;  %v7661_v33 = vrot.slane %v1030_v58, %v6679_v61  ;;  %v7667_v62 = vadd.f32 %v1181_v54, %v1165_v11  ;;  %v1032_v24 = vcombine.high %v1028_v48, %v1028_v48  ;;  %v7677_v58 = vpop.permute.xlu1 %1119 }
 0x42a   :  { %11101 = vst [vmem:[#allocation32_spill] sm:$0xff] %v7654_v63  ;;  %v6255_v43 = vpop.eup %6254  ;;  %v2711_v6 = vrot.slane %v2695_v27, %v7279_v51  ;;  %v2688_v37 = vcombine.high %v7584_v57, %v7584_v57  ;;  %3896 = vbcast.lane.b32.xlu0 %v7305_v28, 256  ;;  %v2725_v4 = vrot.slane %v2703_v47, %v7279_v51  ;;  %6262 = vpow2.f32 %v979_v12 }
 0x42b   :  { %11103 = vst [vmem:[#allocation33_spill] sm:$0xff] %v7667_v62  ;;  %v741_v0 = vmul.f32 0.6931472, %v6255_v43  ;;  %v744_v54 = vmul.f32 %v7544_v39, %v743_v42  ;;  %v936_v48 = vmul.f32 %v7391_v8, %v7673_v44  ;;  %v659_v11 = vmax.f32 %v7393_v22, 0.0  ;;  %3389 = vbcast.lane.b32.xlu1 %v7245_v20, 264  ;;  %v11104_v39 = vld [vmem:[#allocation45_spill] sm:$0xff] }
 0x42c   :  { %vm746_vm9 = vcmp.lt.f32.partialorder %v745_v10, 0.0004427343  ;;  %v7687_v27 = vrot.slane %v7663_v25, %v7279_v51  ;;  %v6257_v57 = vpop.eup %6256  ;;  %v1183_v60 = vmul.f32 0.0, %v6253_v59  ;;  %v7692_v47 = vmul.f32 %v7661_v33, %v7225_v36  ;;  %v7698_v12 = vpop.permute.xlu0 %1643  ;;  %v11108_v62 = vld [vmem:[#allocation56_spill] sm:$0xff] }
 0x42d   :  { %v7696_v42 = vmul.f32 %v7525_v15, %v11104_v39  ;;  %v747_v8 = vsel %vm746_vm9, %v744_v54, %v741_v0  ;;  %11106 = vst [vmem:[#allocation94_spill] sm:$0xff] %v7698_v12  ;;  %v7701_v10 = vrot.slane %v1032_v24, %v6679_v61  ;;  %v2733_v28 = vcombine.high %v2711_v6, %v2711_v6  ;;  %v7704_v59 = vpop.permute.xlu1 %2746  ;;  %v11109_v24 = vld [vmem:[#allocation15_spill] sm:$0xff] }
 0x42e   :  { %v6259_v22 = vpop.eup %6258  ;;  %v771_v43 = vadd.f32 %v747_v8, %v659_v11  ;;  %v2702_v20 = vrot.slane %v2688_v37, %v7279_v51  ;;  %11107 = vst [vmem:[#allocation95_spill] sm:$0xff] %v7704_v59  ;;  %3907 = vbcast.lane.b32.xlu0 %v11108_v62, 256  ;;  %v7708_v36 = vrot.slane %v2711_v6, %v6679_v61  ;;  %v953_v0 = vmul.f32 1.442695, %v936_v48  ;;  %v11110_v6 = vld [vmem:[#allocation42_spill] sm:$0xff]  ;;  %v11112_v59 = vld [vmem:[#allocation44_spill] sm:$0xff] }
 0x42f   :  { %11105 = vst [vmem:[#allocation45_spill] sm:$0xff] %v7696_v42  ;;  %v7711_v15 = vrot.slane %v2725_v4, %v6679_v61  ;;  %v938_v54 = vmul.f32 %v7407_v41, %v7673_v44  ;;  %v2735_v39 = vcombine.high %v2725_v4, %v2725_v4  ;;  %v940_v37 = vmul.f32 %v7412_v2, %v7673_v44  ;;  %v11115_v2 = vld [vmem:[#allocation67_spill] sm:$0xff] }
 0x430   :  { %781 = vst.msk [vmem:[#allocation3 + $0x28] sm:$0xff] %vm31_vm0, %v771_v43  ;;  %v789_v11 = vmul.f32 %v771_v43, %v11109_v24  ;;  %v7721_v8 = vrot.slane %v7687_v27, %v7279_v51  ;;  %5010 = vbcast.lane.b32.xlu1 %v11110_v6, 264  ;;  %v7724_v42 = vadd.f32 %v1183_v60, %v1167_v46  ;;  %v1185_v48 = vmul.f32 0.0, %v6257_v57  ;;  %v7728_v12 = vpop.permute.xlu0 %1654  ;;  %v11113_v43 = vld [vmem:[#allocation54_spill] sm:$0xff] }
 0x431   :  { %v1187_v62 = vmul.f32 0.0, %v6259_v22  ;;  %v1175_v41 = vmul.f32 %v7701_v10, %v11112_v59  ;;  %v7732_v4 = vmul.f32 %v7708_v36, %v11113_v43  ;;  %v7736_v24 = vmul.f32 %v7711_v15, %v11115_v2  ;;  %v7742_v57 = vpop.permute.xlu1 %2757  ;;  %v11117_v22 = vld [vmem:[#allocation57_spill] sm:$0xff] }
 0x432   :  { %11111 = vst [vmem:[#allocation42_spill] sm:$0xff] %v7724_v42  ;;  %797 = vst.msk [vmem:[#allocation4 + $0x28] sm:$0xff] %vm31_vm0, %v789_v11  ;;  %v7740_v46 = vrot.slane %v2733_v28, %v6679_v61  ;;  %v2704_v60 = vcombine.high %v2702_v20, %v2702_v20  ;;  %3918 = vbcast.lane.b32.xlu0 %v11117_v22, 256  ;;  %6264 = vpow2.f32 %v953_v0  ;;  %v957_v43 = vmul.f32 1.442695, %v938_v54  ;;  %v11118_v22 = vld [vmem:[#allocation43_spill] sm:$0xff] }
 0x433   :  { %11114 = vst [vmem:[#allocation44_spill] sm:$0xff] %v7732_v4  ;;  %11116 = vst [vmem:[#allocation54_spill] sm:$0xff] %v7736_v24  ;;  %v6261_v59 = vpop.eup %6260  ;;  %v2718_v6 = vrot.slane %v2702_v20, %v7279_v51  ;;  %v1433_v4 = vcombine.high %v7687_v27, %v7687_v27  ;;  %v7749_v2 = vrot.slane %v2735_v39, %v6679_v61  ;;  %v961_v11 = vmul.f32 1.442695, %v940_v37 }
 0x434   :  { %v942_v28 = vmul.f32 %v7469_v30, %v7673_v44  ;;  %v7755_v24 = vrot.slane %v7721_v8, %v6679_v61  ;;  %5021 = vbcast.lane.b32.xlu1 %v11118_v22, 264  ;;  %v7759_v0 = vadd.f32 %v1185_v48, %v7651_v31  ;;  %v7762_v20 = vadd.f32 %v1187_v62, %v7658_v23  ;;  %v7772_v30 = vpop.permute.xlu0 %1665  ;;  %v6263_v39 = vpop.eup %6262  ;;  %v7781_v62 = vld [vmem:[#allocation4 + $0x8] sm:$0xff]  ;;  %v11123_v48 = vld [vmem:[#allocation58_spill] sm:$0xff] }
 0x435   :  { %v7766_v27 = vmul.f32 %v7740_v46, %v7380_v50  ;;  %v7770_v54 = vmul.f32 %v7555_v35, %v7427_v5  ;;  %v1189_v37 = vmul.f32 0.0, %v6261_v59  ;;  %v7776_v22 = vmul.f32 %v7749_v2, %v7415_v26  ;;  %v7783_v50 = vpop.permute.xlu1 %2768 }
 0x436   :  { %11119 = vst [vmem:[#allocation67_spill] sm:$0xff] %v7759_v0  ;;  %11120 = vst [vmem:[#allocation43_spill] sm:$0xff] %v7762_v20  ;;  %v2732_v31 = vrot.slane %v2704_v60, %v7279_v51  ;;  %v944_v23 = vmul.f32 %v7496_v13, %v7673_v44  ;;  %3929 = vbcast.lane.b32.xlu0 %v11123_v48, 256  ;;  %v7787_v5 = vrot.slane %v2718_v6, %v6679_v61  ;;  %v11132_v20 = vld [vmem:[#allocation46_spill] sm:$0xff] }
 0x437   :  { %11121 = vst [vmem:[#allocation96_spill] sm:$0xff] %v7766_v27  ;;  %11122 = vst [vmem:[#allocation97_spill] sm:$0xff] %v7776_v22  ;;  %6266 = vpow2.f32 %v957_v43  ;;  %v2734_v35 = vcombine.high %v2718_v6, %v2718_v6  ;;  %v1455_v59 = vrot.slane %v1433_v4, %v7279_v51  ;;  %v965_v26 = vmul.f32 1.442695, %v942_v28 }
 0x438   :  { %6268 = vpow2.f32 %v961_v11  ;;  %v1507_v60 = vmul.f32 %v7755_v24, %v7424_v55  ;;  %v7794_v13 = vrot.slane %v7450_v21, %v6679_v61  ;;  %5032 = vbcast.lane.b32.xlu1 %v7263_v19, 264  ;;  %v7798_v22 = vadd.f32 %v1189_v37, %v7692_v47  ;;  %v7806_v43 = vpop.permute.xlu0 %1676 }
 0x439   :  { %v1191_v27 = vmul.f32 0.0, %v6263_v39  ;;  %v7802_v6 = vmul.f32 %v7571_v14, %v7464_v16  ;;  %v1563_v4 = vrot.slane %v7781_v62, %v7279_v51  ;;  %v7810_v11 = vmul.f32 %v7787_v5, %v7458_v9  ;;  %v7817_v39 = vpop.permute.xlu1 %2779  ;;  %v11128_v16 = vld [vmem:[#allocation59_spill] sm:$0xff] }
 0x43a   :  { %11124 = vst [vmem:[#allocation58_spill] sm:$0xff] %v7794_v13  ;;  %11125 = vst [vmem:[#allocation98_spill] sm:$0xff] %v7798_v22  ;;  %v7813_v28 = vrot.slane %v2732_v31, %v6679_v61  ;;  %v969_v19 = vmul.f32 1.442695, %v944_v23  ;;  %v1463_v47 = vcombine.high %v7721_v8, %v7721_v8  ;;  %3940 = vbcast.lane.b32.xlu0 %v11128_v16, 256  ;;  %6270 = vpow2.f32 %v965_v26 }
 0x43b   :  { %11126 = vst [vmem:[#allocation99_spill] sm:$0xff] %v7810_v11  ;;  %v7821_v14 = vrot.slane %v2734_v35, %v6679_v61  ;;  %v2736_v37 = vcombine.high %v2732_v31, %v2732_v31  ;;  %v946_v22 = vmul.f32 %v7506_v49, %v7673_v44  ;;  %v7826_v9 = vrot.slane %v1455_v59, %v6679_v61 }
 0x43c   :  { %11127 = vst [vmem:[#allocation100_spill] sm:$0xff] %v7813_v28  ;;  %v7828_v11 = vadd.f32 %v1191_v27, %v1175_v41  ;;  %v1523_v23 = vmul.f32 1.442695, %v1507_v60  ;;  %v2073_v8 = vmul.f32 %v7794_v13, %v7424_v55  ;;  %5043 = vbcast.lane.b32.xlu1 %v11132_v20, 264  ;;  %v6265_v16 = vpop.eup %6264  ;;  %v7835_v35 = vmul.f32 %v7813_v28, %v7484_v7  ;;  %v7842_v27 = vpop.permute.xlu0 %1687  ;;  %v11135_v20 = vld [vmem:[#allocation76_spill] sm:$0xff]  ;;  %v11139_v13 = vld [vmem:[#allocation83_spill] sm:$0xff] }
 0x43d   :  { %11129 = vst [vmem:[#allocation101_spill] sm:$0xff] %v7821_v14  ;;  %11130 = vst [vmem:[#allocation102_spill] sm:$0xff] %v7826_v9  ;;  %v7838_v31 = vrot.slane %v1563_v4, %v7279_v51  ;;  %v1465_v49 = vcombine.high %v1455_v59, %v1455_v59  ;;  %v1418_v41 = vcombine.high %v7663_v25, %v7663_v25  ;;  %6272 = vpow2.f32 %v969_v19  ;;  %v11138_v59 = vld [vmem:[#allocation60_spill] sm:$0xff] }
 0x43e   :  { %11131 = vst [vmem:[#allocation103_spill] sm:$0xff] %v7828_v11  ;;  %11133 = vst [vmem:[#allocation46_spill] sm:$0xff] %v7835_v35  ;;  %v1166_v26 = vmul.f32 %v7578_v52, %v7491_v17  ;;  %v11136_v60 = vcombine.high %v11135_v20, %v11135_v20  ;;  %v7851_v7 = vrot.slane %v1463_v47, %v6679_v61  ;;  %v7853_v35 = vpop.permute.xlu1 %2790  ;;  %3951 = vbcast.lane.b32.xlu0 %v11138_v59, 256 }
 0x43f   :  { %11134 = vst [vmem:[#allocation104_spill] sm:$0xff] %v7842_v27  ;;  %v7858_v25 = vmul.f32 %v7821_v14, %v11139_v13  ;;  %v7861_v27 = vrot.slane %v2736_v37, %v6679_v61  ;;  %v973_v17 = vmul.f32 1.442695, %v946_v22  ;;  %v1509_v52 = vmul.f32 %v7826_v9, %v7424_v55 }
 0x440   :  { %v2021_v11 = vrot.slane %v11136_v60, %v7279_v51  ;;  %11137 = vst [vmem:[#allocation76_spill] sm:$0xff] %v7851_v7  ;;  %v1178_v19 = vmul.f32 0.0, %v6265_v16  ;;  %v1168_v47 = vmul.f32 %v7617_v40, %v7529_v56  ;;  %6274 = vpow2.f32 %v1523_v23  ;;  %v11142_v60 = vld [vmem:[#allocation47_spill] sm:$0xff]  ;;  %v7876_v14 = vpop.permute.xlu0 %4440 }
 0x441   :  { %11140 = vst [vmem:[#allocation83_spill] sm:$0xff] %v7858_v25  ;;  %11141 = vst [vmem:[#allocation105_spill] sm:$0xff] %v7861_v27  ;;  %v2089_v20 = vmul.f32 1.442695, %v2073_v8  ;;  %5054 = vbcast.lane.b32.xlu1 %v11142_v60, 264  ;;  %v6267_v59 = vpop.eup %6266  ;;  %v7870_v13 = vrot.slane %v7838_v31, %v6679_v61  ;;  %v1571_v25 = vcombine.high %v1563_v4, %v1563_v4  ;;  %6276 = vpow2.f32 %v973_v17 }
 0x442   :  { %v7873_v37 = vrot.slane %v1465_v49, %v6679_v61  ;;  %v1432_v22 = vrot.slane %v1418_v41, %v7279_v51  ;;  %11144 = vst [vmem:[#allocation106_spill] sm:$0xff] %v7876_v14  ;;  %v6269_v16 = vpop.eup %6268  ;;  %v7879_v56 = vadd.f32 %v1178_v19, %v7770_v54  ;;  %v7882_v40 = vrot.slane %v2021_v11, %v6679_v61  ;;  %v7888_v8 = vpop.permute.xlu1 %2801  ;;  %v11147_v49 = vld [vmem:[#allocation61_spill] sm:$0xff]  ;;  %v11148_v41 = vld [vmem:[#allocation87_spill] sm:$0xff] }
 0x443   :  { %11143 = vst [vmem:[#allocation47_spill] sm:$0xff] %v7870_v13  ;;  %v1511_v23 = vmul.f32 %v7851_v7, %v7424_v55  ;;  %v2029_v4 = vcombine.high %v7450_v21, %v7450_v21  ;;  %2352 = vbcast.lane.b32.xlu0 %v11147_v49, 256  ;;  %v7893_v60 = vmul.f32 %v7861_v27, %v11148_v41  ;;  %v1527_v54 = vmul.f32 1.442695, %v1509_v52  ;;  %v11150_v14 = vld [vmem:[#allocation89_spill] sm:$0xff] }
 0x444   :  { %11145 = vst [vmem:[#allocation107_spill] sm:$0xff] %v7879_v56  ;;  %11146 = vst [vmem:[#allocation108_spill] sm:$0xff] %v7882_v40  ;;  %v948_v19 = vmul.f32 %v7558_v38, %v7673_v44  ;;  %v1180_v56 = vmul.f32 0.0, %v6267_v59  ;;  %v1170_v7 = vmul.f32 %v7630_v45, %v11150_v14  ;;  %6278 = vpow2.f32 %v2089_v20  ;;  %v11151_v21 = vld [vmem:[#allocation49_spill] sm:$0xff]  ;;  %v7908_v52 = vpop.permute.xlu0 %4451  ;;  %v6271_v38 = vpop.eup %6270 }
 0x445   :  { %11149 = vst [vmem:[#allocation87_spill] sm:$0xff] %v7893_v60  ;;  %v2031_v9 = vcombine.high %v2021_v11, %v2021_v11  ;;  %5065 = vbcast.lane.b32.xlu1 %v11151_v21, 264  ;;  %v1182_v28 = vmul.f32 0.0, %v6269_v16  ;;  %v7901_v49 = vrot.slane %v1571_v25, %v7279_v51  ;;  %v1513_v41 = vmul.f32 %v7873_v37, %v7424_v55  ;;  %v11153_v25 = vld [vmem:[#allocation62_spill] sm:$0xff] }
 0x446   :  { %v7906_v17 = vrot.slane %v1432_v22, %v7279_v51  ;;  %11152 = vst [vmem:[#allocation89_spill] sm:$0xff] %v7908_v52  ;;  %v2075_v45 = vmul.f32 %v7882_v40, %v7424_v55  ;;  %v1531_v14 = vmul.f32 1.442695, %v1511_v23  ;;  %v7913_v11 = vrot.slane %v2029_v4, %v6679_v61  ;;  %v7915_v20 = vpop.permute.xlu1 %2812  ;;  %v11156_v23 = vld [vmem:[#allocation90_spill] sm:$0xff] }
 0x447   :  { %v1434_v59 = vcombine.high %v1432_v22, %v1432_v22  ;;  %2363 = vbcast.lane.b32.xlu0 %v11153_v25, 256  ;;  %v7919_v16 = vadd.f32 %v1180_v56, %v7802_v6  ;;  %v1733_v21 = vmul.f32 %v7870_v13, %v7595_v34  ;;  %6280 = vpow2.f32 %v1527_v54  ;;  %v6273_v27 = vpop.eup %6272  ;;  %v11157_v25 = vld [vmem:[#allocation50_spill] sm:$0xff]  ;;  %v11162_v13 = vld [vmem:[#allocation51_spill] sm:$0xff] }
 0x448   :  { %v977_v60 = vmul.f32 1.442695, %v948_v19  ;;  %v7923_v52 = vadd.f32 %v1182_v28, %v1166_v26  ;;  %v1172_v4 = vmul.f32 %v7640_v32, %v11156_v23  ;;  %v950_v22 = vmul.f32 %v7582_v53, %v7673_v44  ;;  %v7941_v26 = vpop.permute.xlu0 %4462 }
 0x449   :  { %11154 = vst [vmem:[#allocation49_spill] sm:$0xff] %v7919_v16  ;;  %v7930_v40 = vrot.slane %v2031_v9, %v6679_v61  ;;  %5076 = vbcast.lane.b32.xlu1 %v11157_v25, 264  ;;  %v1184_v6 = vmul.f32 0.0, %v6271_v38  ;;  %v7935_v34 = vrot.slane %v7901_v49, %v6679_v61  ;;  %v1535_v56 = vmul.f32 1.442695, %v1513_v41  ;;  %v11159_v38 = vld [vmem:[#allocation63_spill] sm:$0xff] }
 0x44a   :  { %11155 = vst [vmem:[#allocation109_spill] sm:$0xff] %v7923_v52  ;;  %v7939_v28 = vrot.slane %v7906_v17, %v6679_v61  ;;  %v6275_v32 = vpop.eup %6274  ;;  %v2093_v54 = vmul.f32 1.442695, %v2075_v45  ;;  %6282 = vpow2.f32 %v1531_v14  ;;  %v2077_v53 = vmul.f32 %v7913_v11, %v7424_v55  ;;  %v7948_v19 = vpop.permute.xlu1 %2823 }
 0x44b   :  { %v7946_v9 = vrot.slane %v1434_v59, %v7279_v51  ;;  %2374 = vbcast.lane.b32.xlu0 %v11159_v38, 256  ;;  %v7951_v41 = vadd.f32 %v1184_v6, %v1168_v47  ;;  %v1186_v25 = vmul.f32 0.0, %v6273_v27  ;;  %6284 = vpow2.f32 %v977_v60  ;;  %v11161_v59 = vld [vmem:[#allocation82_spill] sm:$0xff]  ;;  %v6277_v47 = vpop.eup %6276 }
 0x44c   :  { %11158 = vst [vmem:[#allocation90_spill] sm:$0xff] %v7939_v28  ;;  %v1601_v23 = vcombine.high %v7838_v31, %v7838_v31  ;;  %v981_v52 = vmul.f32 1.442695, %v950_v22  ;;  %v2079_v45 = vmul.f32 %v7930_v40, %v7424_v55  ;;  %v1556_v14 = vcombine.high %v7781_v62, %v7781_v62  ;;  %v7969_v22 = vpop.permute.xlu0 %4473 }
 0x44d   :  { %11160 = vst [vmem:[#allocation50_spill] sm:$0xff] %v7951_v41  ;;  %v7961_v16 = vrot.slane %v11161_v59, %v7279_v51  ;;  %5087 = vbcast.lane.b32.xlu1 %v11162_v13, 264  ;;  %v1749_v27 = vmul.f32 %v6275_v32, %v7647_v1  ;;  %6286 = vpow2.f32 %v1535_v56  ;;  %v1515_v31 = vmul.f32 %v7939_v28, %v7424_v55  ;;  %v11164_v56 = vld [vmem:[#allocation64_spill] sm:$0xff] }
 0x44e   :  { %v2000_v60 = vcombine.high %v11161_v59, %v11161_v59  ;;  %v6279_v6 = vpop.eup %6278  ;;  %6288 = vpow2.f32 %v2093_v54  ;;  %v2097_v62 = vmul.f32 1.442695, %v2077_v53  ;;  %v7973_v41 = vrot.slane %v7946_v9, %v6679_v61  ;;  %v7977_v32 = vpop.permute.xlu1 %1614 }
 0x44f   :  { %v1464_v13 = vcombine.high %v7906_v17, %v7906_v17  ;;  %11163 = vst [vmem:[#allocation82_spill] sm:$0xff] %v7977_v32  ;;  %2385 = vbcast.lane.b32.xlu0 %v11164_v56, 256  ;;  %v7980_v1 = vadd.f32 %v1186_v25, %v1170_v7  ;;  %v7982_v38 = vadd.f32 %v1749_v27, %v1733_v21  ;;  %6290 = vpow2.f32 %v981_v52  ;;  %v11168_v32 = vld [vmem:[#allocation52_spill] sm:$0xff] }
 0x450   :  { %v1735_v59 = vmul.f32 %v7935_v34, %v7625_v18  ;;  %v1603_v54 = vcombine.high %v7901_v49, %v7901_v49  ;;  %v2101_v53 = vmul.f32 1.442695, %v2079_v45  ;;  %v1570_v28 = vrot.slane %v1556_v14, %v7279_v51  ;;  %v8000_v49 = vpop.permute.xlu0 %4484 }
 0x451   :  { %11165 = vst [vmem:[#allocation51_spill] sm:$0xff] %v7980_v1  ;;  %11166 = vst [vmem:[#allocation110_spill] sm:$0xff] %v7982_v38  ;;  %v7991_v17 = vrot.slane %v7961_v16, %v6679_v61  ;;  %3878 = vbcast.lane.b32.xlu1 %v11168_v32, 264  ;;  %v6281_v7 = vpop.eup %6280  ;;  %v1188_v25 = vmul.f32 0.0, %v6277_v47  ;;  %v7995_v21 = vrot.slane %v1601_v23, %v6679_v61  ;;  %v1539_v27 = vmul.f32 1.442695, %v1515_v31 }
 0x452   :  { %v7998_v18 = vrot.slane %v2000_v60, %v7279_v51  ;;  %v1174_v52 = vmul.f32 %v7661_v33, %v7636_v3  ;;  %6292 = vpow2.f32 %v2097_v62  ;;  %v1517_v45 = vmul.f32 %v7973_v41, %v7424_v55  ;;  %v8009_v47 = vpop.permute.xlu1 %1625  ;;  %v11171_v23 = vld [vmem:[#allocation65_spill] sm:$0xff] }
 0x453   :  { %11167 = vst [vmem:[#allocation111_spill] sm:$0xff] %v7991_v17  ;;  %11169 = vst [vmem:[#allocation52_spill] sm:$0xff] %v7995_v21  ;;  %v8007_v14 = vrot.slane %v1464_v13, %v6679_v61  ;;  %2396 = vbcast.lane.b32.xlu0 %v11171_v23, 256  ;;  %v2315_v31 = vmul.f32 %v6279_v6, %v7982_v38  ;;  %v8013_v60 = vadd.f32 %v1188_v25, %v1172_v4  ;;  %v11173_v23 = vld [vmem:[#allocation53_spill] sm:$0xff] }
 0x454   :  { %v1737_v32 = vmul.f32 %v7995_v21, %v7665_v29  ;;  %v8018_v3 = vrot.slane %v1603_v54, %v6679_v61  ;;  %v6283_v33 = vpop.eup %6282  ;;  %v1751_v62 = vmul.f32 %v6281_v7, %v7654_v63  ;;  %6294 = vpow2.f32 %v2101_v53  ;;  %v8033_v7 = vpop.permute.xlu0 %4495  ;;  %v11178_v21 = vld [vmem:[#allocation94_spill] sm:$0xff] }
 0x455   :  { %11170 = vst [vmem:[#allocation112_spill] sm:$0xff] %v8007_v14  ;;  %11172 = vst [vmem:[#allocation113_spill] sm:$0xff] %v8013_v60  ;;  %v8022_v13 = vrot.slane %v1570_v28, %v7279_v51  ;;  %v2081_v1 = vmul.f32 %v7991_v17, %v7424_v55  ;;  %3889 = vbcast.lane.b32.xlu1 %v11173_v23, 264  ;;  %v6285_v4 = vpop.eup %6284  ;;  %6296 = vpow2.f32 %v1539_v27  ;;  %v1543_v25 = vmul.f32 1.442695, %v1517_v45  ;;  %v11175_v23 = vld [vmem:[#allocation66_spill] sm:$0xff] }
 0x456   :  { %v1572_v6 = vcombine.high %v1570_v28, %v1570_v28  ;;  %v8029_v29 = vrot.slane %v7998_v18, %v6679_v61  ;;  %v2030_v54 = vcombine.high %v7961_v16, %v7961_v16  ;;  %11174 = vst [vmem:[#allocation53_spill] sm:$0xff] %v8033_v7  ;;  %v1176_v53 = vmul.f32 %v7701_v10, %v7677_v58  ;;  %v8041_v28 = vpop.permute.xlu1 %1636  ;;  %v11177_v16 = vld [vmem:[#allocation33_spill] sm:$0xff]  ;;  %v11179_v58 = vld [vmem:[#allocation95_spill] sm:$0xff] }
 0x457   :  { %v1519_v38 = vmul.f32 %v8007_v14, %v7424_v55  ;;  %v1466_v27 = vcombine.high %v7946_v9, %v7946_v9  ;;  %2407 = vbcast.lane.b32.xlu0 %v11175_v23, 256  ;;  %v6287_v63 = vpop.eup %6286  ;;  %v8044_v60 = vadd.f32 %v1751_v62, %v1735_v59  ;;  %v1753_v56 = vmul.f32 %v6283_v33, %v11177_v16  ;;  %v11181_v14 = vld [vmem:[#allocation23_spill] sm:$0xff] }
 0x458   :  { %v1739_v17 = vmul.f32 %v8018_v3, %v11178_v21  ;;  %v8051_v10 = vmul.f32 %v7708_v36, %v11179_v58  ;;  %v6289_v45 = vpop.eup %6288  ;;  %v8054_v7 = vadd.f32 %v2315_v31, %v11181_v14  ;;  %v1190_v9 = vmul.f32 0.0, %v6285_v4  ;;  %v11183_v62 = vld [vmem:[#allocation55_spill] sm:$0xff]  ;;  %v8071_v14 = vld [vmem:[#allocation4 + $0x30] sm:$0xff]  ;;  %v8073_v31 = vpop.permute.xlu0 %4506 }
 0x459   :  { %11176 = vst [vmem:[#allocation114_spill] sm:$0xff] %v8044_v60  ;;  %v8058_v23 = vrot.slane %v8022_v13, %v6679_v61  ;;  %v2105_v59 = vmul.f32 1.442695, %v2081_v1  ;;  %3900 = vbcast.lane.b32.xlu1 %v11183_v62, 264  ;;  %v8061_v33 = vadd.f32 %v1753_v56, %v1737_v32  ;;  %v8064_v21 = vrot.slane %v1572_v6, %v7279_v51  ;;  %v6291_v4 = vpop.eup %6290  ;;  %v11185_v6 = vld [vmem:[#allocation68_spill] sm:$0xff] }
 0x45a   :  { %11180 = vst [vmem:[#allocation94_spill] sm:$0xff] %v8051_v10  ;;  %11182 = vst [vmem:[#allocation95_spill] sm:$0xff] %v8054_v7  ;;  %v2083_v36 = vmul.f32 %v8029_v29, %v7424_v55  ;;  %v8069_v58 = vrot.slane %v2030_v54, %v6679_v61  ;;  %v1755_v1 = vmul.f32 %v6287_v63, %v7724_v42  ;;  %6298 = vpow2.f32 %v1543_v25  ;;  %v8079_v32 = vpop.permute.xlu1 %1647 }
 0x45b   :  { %11184 = vst [vmem:[#allocation23_spill] sm:$0xff] %v8061_v33  ;;  %v1547_v62 = vmul.f32 1.442695, %v1519_v38  ;;  %v8077_v56 = vrot.slane %v1466_v27, %v6679_v61  ;;  %2418 = vbcast.lane.b32.xlu0 %v11185_v6, 256  ;;  %v2317_v16 = vmul.f32 %v6289_v45, %v8044_v60  ;;  %v8083_v54 = vadd.f32 %v1190_v9, %v1174_v52  ;;  %v11189_v45 = vld [vmem:[#allocation56_spill] sm:$0xff] }
 0x45c   :  { %v8087_v10 = vmul.f32 %v7711_v15, %v7742_v57  ;;  %v2032_v63 = vcombine.high %v7998_v18, %v7998_v18  ;;  %v6293_v25 = vpop.eup %6292  ;;  %v8091_v38 = vadd.f32 %v1755_v1, %v1739_v17  ;;  %6300 = vpow2.f32 %v2105_v59  ;;  %v8103_v17 = vpop.permute.xlu0 %4517 }
 0x45d   :  { %11186 = vst [vmem:[#allocation55_spill] sm:$0xff] %v8083_v54  ;;  %v1741_v27 = vmul.f32 %v8058_v23, %v7728_v12  ;;  %v4393_v42 = vrot.slane %v8071_v14, %v7279_v51  ;;  %3911 = vbcast.lane.b32.xlu1 %v11189_v45, 264  ;;  %v2319_v52 = vmul.f32 %v6293_v25, %v8061_v33  ;;  %v1192_v9 = vmul.f32 0.0, %v6291_v4  ;;  %v11190_v4 = vld [vmem:[#allocation69_spill] sm:$0xff]  ;;  %v11191_v45 = vld [vmem:[#allocation24_spill] sm:$0xff] }
 0x45e   :  { %11187 = vst [vmem:[#allocation68_spill] sm:$0xff] %v8087_v10  ;;  %11188 = vst [vmem:[#allocation115_spill] sm:$0xff] %v8091_v38  ;;  %v1602_v15 = vcombine.high %v8022_v13, %v8022_v13  ;;  %v2085_v57 = vmul.f32 %v8069_v58, %v7424_v55  ;;  %v6295_v18 = vpop.eup %6294  ;;  %v8107_v12 = vrot.slane %v8064_v21, %v6679_v61  ;;  %v2109_v59 = vmul.f32 1.442695, %v2083_v36  ;;  %v8111_v25 = vpop.permute.xlu1 %1658 }
 0x45f   :  { %6302 = vpow2.f32 %v1547_v62  ;;  %v1521_v1 = vmul.f32 %v8077_v56, %v7424_v55  ;;  %2429 = vbcast.lane.b32.xlu0 %v11190_v4, 256  ;;  %v6297_v13 = vpop.eup %6296  ;;  %v8115_v33 = vadd.f32 %v2317_v16, %v11191_v45  ;;  %v8117_v60 = vadd.f32 %v1192_v9, %v1176_v53  ;;  %v11195_v45 = vld [vmem:[#allocation57_spill] sm:$0xff] }
 0x460   :  { %v8121_v10 = vmul.f32 %v7740_v46, %v7783_v50  ;;  %v8124_v36 = vrot.slane %v2032_v63, %v6679_v61  ;;  %v2321_v62 = vmul.f32 %v6295_v18, %v8091_v38  ;;  %v1743_v54 = vmul.f32 %v8107_v12, %v7772_v30  ;;  %v11196_v53 = vld [vmem:[#allocation25_spill] sm:$0xff] }
 0x461   :  { %11192 = vst [vmem:[#allocation56_spill] sm:$0xff] %v8115_v33  ;;  %11193 = vst [vmem:[#allocation24_spill] sm:$0xff] %v8117_v60  ;;  %v1604_v4 = vcombine.high %v8064_v21, %v8064_v21  ;;  %v4409_v16 = vrot.slane %v4393_v42, %v7279_v51  ;;  %3922 = vbcast.lane.b32.xlu1 %v11195_v45, 264  ;;  %v8134_v9 = vadd.f32 %v2319_v52, %v11196_v53  ;;  %v11198_v45 = vld [vmem:[#allocation70_spill] sm:$0xff] }
 0x462   :  { %11194 = vst [vmem:[#allocation116_spill] sm:$0xff] %v8121_v10  ;;  %v8137_v46 = vrot.slane %v1602_v15, %v6679_v61  ;;  %v2113_v50 = vmul.f32 1.442695, %v2085_v57  ;;  %v4401_v63 = vcombine.high %v4393_v42, %v4393_v42  ;;  %v8139_v10 = vpop.permute.xlu0 %3308  ;;  %v1757_v18 = vmul.f32 %v6297_v13, %v7759_v0  ;;  %v8144_v38 = vpop.permute.xlu1 %1669  ;;  %v11210_v0 = vld [vmem:[#allocation104_spill] sm:$0xff] }
 0x463   :  { %11197 = vst [vmem:[#allocation57_spill] sm:$0xff] %v8134_v9  ;;  %6304 = vpow2.f32 %v2109_v59  ;;  %v1551_v30 = vmul.f32 1.442695, %v1521_v1  ;;  %v1508_v21 = vmul.f32 %v7755_v24, %v7673_v44  ;;  %1214 = vbcast.lane.b32.xlu0 %v11198_v45, 256  ;;  %v8151_v15 = vmul.f32 %v7749_v2, %v7817_v39  ;;  %v11201_v24 = vld [vmem:[#allocation26_spill] sm:$0xff] }
 0x464   :  { %v1745_v52 = vmul.f32 %v8137_v46, %v7806_v43  ;;  %v2087_v42 = vmul.f32 %v8124_v36, %v7424_v55  ;;  %v8157_v57 = vmul.f32 %v7787_v5, %v7853_v35  ;;  %v6299_v59 = vpop.eup %6298  ;;  %v8160_v1 = vadd.f32 %v2321_v62, %v11201_v24  ;;  %v11205_v55 = vld [vmem:[#allocation100_spill] sm:$0xff]  ;;  %v11209_v24 = vld [vmem:[#allocation43_spill] sm:$0xff] }
 0x465   :  { %11199 = vst [vmem:[#allocation25_spill] sm:$0xff] %v8151_v15  ;;  %v8162_v13 = vadd.f32 %v1757_v18, %v1741_v27  ;;  %v8165_v53 = vrot.slane %v1604_v4, %v6679_v61  ;;  %v4431_v43 = vcombine.high %v4409_v16, %v4409_v16  ;;  %3933 = vbcast.lane.b32.xlu1 %v11123_v48, 264  ;;  %6306 = vpow2.f32 %v2113_v50  ;;  %v11207_v48 = vld [vmem:[#allocation102_spill] sm:$0xff]  ;;  %v11214_v15 = vld [vmem:[#allocation101_spill] sm:$0xff] }
 0x466   :  { %11200 = vst [vmem:[#allocation70_spill] sm:$0xff] %v8157_v57  ;;  %11202 = vst [vmem:[#allocation26_spill] sm:$0xff] %v8160_v1  ;;  %v8169_v2 = vrot.slane %v4409_v16, %v6679_v61  ;;  %v8173_v5 = vmul.f32 %v11205_v55, %v7888_v8  ;;  %v4423_v39 = vrot.slane %v4401_v63, %v7279_v51  ;;  %v8176_v35 = vpop.permute.xlu0 %3319  ;;  %v6301_v27 = vpop.eup %6300  ;;  %6308 = vpow2.f32 %v1551_v30  ;;  %v11208_v16 = vld [vmem:[#allocation71_spill] sm:$0xff]  ;;  %v11211_v30 = vld [vmem:[#allocation58_spill] sm:$0xff] }
 0x467   :  { %11203 = vst [vmem:[#allocation117_spill] sm:$0xff] %v8162_v13  ;;  %v1525_v62 = vmul.f32 1.442695, %v1508_v21  ;;  %v4386_v4 = vcombine.high %v8071_v14, %v8071_v14  ;;  %v1510_v50 = vmul.f32 %v11207_v48, %v7673_v44  ;;  %v8182_v18 = vpop.permute.xlu1 %1680  ;;  %1225 = vbcast.lane.b32.xlu0 %v11208_v16, 256  ;;  %v1759_v8 = vmul.f32 %v6299_v59, %v11209_v24  ;;  %v11212_v57 = vld [vmem:[#allocation106_spill] sm:$0xff]  ;;  %v11217_v59 = vld [vmem:[#allocation59_spill] sm:$0xff] }
 0x468   :  { %11204 = vst [vmem:[#allocation118_spill] sm:$0xff] %v8169_v2  ;;  %11206 = vst [vmem:[#allocation100_spill] sm:$0xff] %v8173_v5  ;;  %v2117_v55 = vmul.f32 1.442695, %v2087_v42  ;;  %v8188_v63 = vmul.f32 %v8165_v53, %v11210_v0  ;;  %v2074_v21 = vmul.f32 %v11211_v30, %v7673_v44  ;;  %v2323_v14 = vmul.f32 %v6301_v27, %v8162_v13  ;;  %v11220_v27 = vld [vmem:[#allocation76_spill] sm:$0xff] }
 0x469   :  { %v6303_v5 = vpop.eup %6302  ;;  %v8195_v48 = vmul.f32 %v8169_v2, %v11212_v57  ;;  %v8199_v1 = vmul.f32 %v11214_v15, %v7915_v20  ;;  %v8202_v42 = vrot.slane %v4431_v43, %v6679_v61  ;;  %3944 = vbcast.lane.b32.xlu1 %v11217_v59, 264  ;;  %v8205_v0 = vadd.f32 %v1759_v8, %v1743_v54  ;;  %v8212_v57 = vld [vmem:[#allocation3 + $0x18] sm:$0xff]  ;;  %v11221_v8 = vld [vmem:[#allocation72_spill] sm:$0xff] }
 0x46a   :  { %v8208_v30 = vrot.slane %v4423_v39, %v6679_v61  ;;  %v4433_v24 = vcombine.high %v4423_v39, %v4423_v39  ;;  %v1512_v13 = vmul.f32 %v11220_v27, %v7673_v44  ;;  %6310 = vpow2.f32 %v1525_v62  ;;  %v11222_v59 = vld [vmem:[#allocation98_spill] sm:$0xff]  ;;  %v11223_v27 = vld [vmem:[#allocation108_spill] sm:$0xff] }
 0x46b   :  { %11213 = vst [vmem:[#allocation102_spill] sm:$0xff] %v8195_v48  ;;  %11215 = vst [vmem:[#allocation71_spill] sm:$0xff] %v8199_v1  ;;  %v8214_v48 = vpop.permute.xlu0 %3330  ;;  %v4400_v20 = vrot.slane %v4386_v4, %v7279_v51  ;;  %v1529_v15 = vmul.f32 1.442695, %v1510_v50  ;;  %v1514_v43 = vmul.f32 %v7873_v37, %v7673_v44  ;;  %v8219_v54 = vpop.permute.xlu1 %1691  ;;  %1236 = vbcast.lane.b32.xlu0 %v11221_v8, 256  ;;  %6312 = vpow2.f32 %v2117_v55  ;;  %v11224_v2 = vld [vmem:[#allocation84_spill] sm:$0xff] }
 0x46c   :  { %11216 = vst [vmem:[#allocation104_spill] sm:$0xff] %v8202_v42  ;;  %11218 = vst [vmem:[#allocation58_spill] sm:$0xff] %v8205_v0  ;;  %v1761_v39 = vmul.f32 %v6303_v5, %v11222_v59  ;;  %v2091_v1 = vmul.f32 1.442695, %v2074_v21  ;;  %v2076_v60 = vmul.f32 %v11223_v27, %v7673_v44  ;;  %v8226_v62 = vadd.f32 %v2323_v14, %v11224_v2  ;;  %v11226_v4 = vld [vmem:[#allocation89_spill] sm:$0xff]  ;;  %v11229_v55 = vld [vmem:[#allocation60_spill] sm:$0xff] }
 0x46d   :  { %11219 = vst [vmem:[#allocation106_spill] sm:$0xff] %v8208_v30  ;;  %v6305_v9 = vpop.eup %6304  ;;  %v8230_v50 = vmul.f32 %v8208_v30, %v11226_v4  ;;  %v8234_v37 = vmul.f32 %v8202_v42, %v7941_v26  ;;  %v8238_v5 = vrot.slane %v8212_v57, %v7279_v51  ;;  %3955 = vbcast.lane.b32.xlu1 %v11229_v55, 264  ;;  %v1533_v2 = vmul.f32 1.442695, %v1512_v13  ;;  %v8246_v4 = vld [vmem:[#allocation3 + $0x20] sm:$0xff]  ;;  %v11233_v55 = vld [vmem:[#allocation73_spill] sm:$0xff] }
 0x46e   :  { %11225 = vst [vmem:[#allocation101_spill] sm:$0xff] %v8226_v62  ;;  %v2325_v21 = vmul.f32 %v6305_v9, %v8205_v0  ;;  %v8242_v27 = vadd.f32 %v1761_v39, %v1745_v52  ;;  %v2078_v14 = vmul.f32 %v7913_v11, %v7673_v44  ;;  %v8251_v26 = vrot.slane %v4433_v24, %v6679_v61  ;;  %v11234_v52 = vld [vmem:[#allocation105_spill] sm:$0xff] }
 0x46f   :  { %11227 = vst [vmem:[#allocation59_spill] sm:$0xff] %v8230_v50  ;;  %11228 = vst [vmem:[#allocation76_spill] sm:$0xff] %v8234_v37  ;;  %v8248_v50 = vpop.permute.xlu0 %3341  ;;  %6314 = vpow2.f32 %v1529_v15  ;;  %v4402_v37 = vcombine.high %v4400_v20, %v4400_v20  ;;  %v1537_v59 = vmul.f32 1.442695, %v1514_v43  ;;  %v8253_v62 = vpop.permute.xlu1 %4444  ;;  %1247 = vbcast.lane.b32.xlu0 %v11233_v55, 256  ;;  %v8258_v13 = vmul.f32 %v11234_v52, %v7948_v19  ;;  %v11243_v55 = vld [vmem:[#allocation90_spill] sm:$0xff] }
 0x470   :  { %11230 = vst [vmem:[#allocation72_spill] sm:$0xff] %v8242_v27  ;;  %11231 = vst [vmem:[#allocation108_spill] sm:$0xff] %v8248_v50  ;;  %v6307_v9 = vpop.eup %6306  ;;  %6316 = vpow2.f32 %v2091_v1  ;;  %v4416_v11 = vrot.slane %v4400_v20, %v7279_v51  ;;  %v2095_v39 = vmul.f32 1.442695, %v2076_v60  ;;  %v8263_v24 = vmul.f32 %v8251_v26, %v7969_v22  ;;  %v11237_v1 = vld [vmem:[#allocation61_spill] sm:$0xff] }
 0x471   :  { %11232 = vst [vmem:[#allocation84_spill] sm:$0xff] %v8251_v26  ;;  %11235 = vst [vmem:[#allocation89_spill] sm:$0xff] %v8258_v13  ;;  %v6309_v0 = vpop.eup %6308  ;;  %v2080_v15 = vmul.f32 %v7930_v40, %v7673_v44  ;;  %v8269_v43 = vrot.slane %v8238_v5, %v7279_v51  ;;  %v8273_v19 = vrot.slane %v8246_v4, %v7279_v51  ;;  %2356 = vbcast.lane.b32.xlu1 %v11237_v1, 264  ;;  %v11238_v20 = vld [vmem:[#allocation85_spill] sm:$0xff]  ;;  %v11241_v40 = vld [vmem:[#allocation82_spill] sm:$0xff] }
 0x472   :  { %11236 = vst [vmem:[#allocation60_spill] sm:$0xff] %v8263_v24  ;;  %v8277_v60 = vadd.f32 %v2325_v21, %v11238_v20  ;;  %v2327_v52 = vmul.f32 %v6307_v9, %v8242_v27  ;;  %6318 = vpow2.f32 %v1533_v2  ;;  %v2099_v22 = vmul.f32 1.442695, %v2078_v14  ;;  %v11242_v13 = vld [vmem:[#allocation47_spill] sm:$0xff]  ;;  %v11244_v1 = vld [vmem:[#allocation74_spill] sm:$0xff] }
 0x473   :  { %v8280_v24 = vpop.permute.xlu0 %3352  ;;  %v1734_v26 = vmul.f32 %v11242_v13, %v11241_v40  ;;  %v4430_v42 = vrot.slane %v4402_v37, %v7279_v51  ;;  %6320 = vpow2.f32 %v1537_v59  ;;  %v1516_v30 = vmul.f32 %v11243_v55, %v7673_v44  ;;  %v8287_v50 = vpop.permute.xlu1 %4455  ;;  %1258 = vbcast.lane.b32.xlu0 %v11244_v1, 256  ;;  %v11245_v21 = vld [vmem:[#allocation103_spill] sm:$0xff]  ;;  %v11248_v40 = vld [vmem:[#allocation62_spill] sm:$0xff] }
 0x474   :  { %11239 = vst [vmem:[#allocation105_spill] sm:$0xff] %v8277_v60  ;;  %11240 = vst [vmem:[#allocation61_spill] sm:$0xff] %v8280_v24  ;;  %v1763_v20 = vmul.f32 %v6309_v0, %v11245_v21  ;;  %v8292_v2 = vrot.slane %v4416_v11, %v6679_v61  ;;  %6322 = vpow2.f32 %v2095_v39  ;;  %v4432_v14 = vcombine.high %v4416_v11, %v4416_v11  ;;  %v6311_v9 = vpop.eup %6310  ;;  %v11249_v27 = vld [vmem:[#allocation86_spill] sm:$0xff]  ;;  %v11251_v11 = vld [vmem:[#allocation107_spill] sm:$0xff] }
 0x475   :  { %v1736_v13 = vmul.f32 %v7935_v34, %v8009_v47  ;;  %v2103_v37 = vmul.f32 1.442695, %v2080_v15  ;;  %v8298_v59 = vrot.slane %v8269_v43, %v6679_v61  ;;  %v8302_v55 = vrot.slane %v8273_v19, %v7279_v51  ;;  %2367 = vbcast.lane.b32.xlu1 %v11248_v40, 264  ;;  %v6313_v0 = vpop.eup %6312  ;;  %v8319_v1 = vld [vmem:[#allocation4 + $0x20] sm:$0xff] }
 0x476   :  { %11246 = vst [vmem:[#allocation85_spill] sm:$0xff] %v8292_v2  ;;  %v8306_v21 = vadd.f32 %v2327_v52, %v11249_v27  ;;  %v1750_v39 = vmul.f32 %v6311_v9, %v11251_v11  ;;  %6324 = vpow2.f32 %v2099_v22  ;;  %v2565_v34 = vcombine.high %v8238_v5, %v8238_v5  ;;  %v11256_v52 = vld [vmem:[#allocation75_spill] sm:$0xff] }
 0x477   :  { %11247 = vst [vmem:[#allocation82_spill] sm:$0xff] %v8298_v59  ;;  %v8311_v47 = vpop.permute.xlu0 %3363  ;;  %v8314_v15 = vadd.f32 %v1763_v20, %v8188_v63  ;;  %v8317_v60 = vrot.slane %v4430_v42, %v6679_v61  ;;  %v4434_v24 = vcombine.high %v4430_v42, %v4430_v42  ;;  %v1541_v40 = vmul.f32 1.442695, %v1516_v30  ;;  %v8321_v27 = vpop.permute.xlu1 %4466  ;;  %1269 = vbcast.lane.b32.xlu0 %v11256_v52, 256  ;;  %v11259_v30 = vld [vmem:[#allocation53_spill] sm:$0xff] }
 0x478   :  { %11250 = vst [vmem:[#allocation47_spill] sm:$0xff] %v8306_v21  ;;  %11252 = vst [vmem:[#allocation90_spill] sm:$0xff] %v8311_v47  ;;  %v8324_v22 = vadd.f32 %v1750_v39, %v1734_v26  ;;  %v8328_v5 = vmul.f32 %v8292_v2, %v8000_v49  ;;  %v8331_v63 = vrot.slane %v4432_v14, %v6679_v61  ;;  %6326 = vpow2.f32 %v2103_v37  ;;  %v8342_v26 = vld [vmem:[%s10748_s1 + $0x8] sm:$0xff]  ;;  %v11262_v39 = vld [vmem:[#allocation63_spill] sm:$0xff] }
 0x479   :  { %11253 = vst [vmem:[#allocation62_spill] sm:$0xff] %v8314_v15  ;;  %11254 = vst [vmem:[#allocation86_spill] sm:$0xff] %v8317_v60  ;;  %v1518_v20 = vmul.f32 %v7973_v41, %v7673_v44  ;;  %v6315_v42 = vpop.eup %6314  ;;  %v8337_v9 = vmul.f32 %v8317_v60, %v11259_v30  ;;  %v2639_v49 = vmul.f32 %v8342_v26, %v8298_v59  ;;  %2378 = vbcast.lane.b32.xlu1 %v11262_v39, 264  ;;  %v11264_v30 = vld [vmem:[#allocation111_spill] sm:$0xff]  ;;  %v11266_v47 = vld [vmem:[#allocation52_spill] sm:$0xff] }
 0x47a   :  { %11255 = vst [vmem:[#allocation119_spill] sm:$0xff] %v8321_v27  ;;  %11257 = vst [vmem:[#allocation120_spill] sm:$0xff] %v8324_v22  ;;  %v8348_v14 = vrot.slane %v8302_v55, %v6679_v61  ;;  %v6317_v41 = vpop.eup %6316  ;;  %v2082_v37 = vmul.f32 %v11264_v30, %v7673_v44  ;;  %v8357_v21 = vrot.slane %v2565_v34, %v7279_v51  ;;  %6328 = vpow2.f32 %v1541_v40  ;;  %v11268_v30 = vld [vmem:[#allocation77_spill] sm:$0xff] }
 0x47b   :  { %11258 = vst [vmem:[#allocation121_spill] sm:$0xff] %v8328_v5  ;;  %11260 = vst [vmem:[#allocation53_spill] sm:$0xff] %v8337_v9  ;;  %v11263_v5 = vld [vmem:[#allocation49_spill] sm:$0xff]  ;;  %v3261_v9 = vrot.slane %v8319_v1, %v7279_v51  ;;  %v8359_v60 = vpop.permute.xlu0 %3374  ;;  %v2329_v2 = vmul.f32 %v6313_v0, %v8314_v15  ;;  %v1738_v59 = vmul.f32 %v11266_v47, %v8041_v28  ;;  %1280 = vbcast.lane.b32.xlu0 %v11268_v30, 256  ;;  %v11271_v30 = vld [vmem:[#allocation64_spill] sm:$0xff] }
 0x47c   :  { %11261 = vst [vmem:[#allocation122_spill] sm:$0xff] %v8348_v14  ;;  %v1752_v11 = vmul.f32 %v6315_v42, %v11263_v5  ;;  %11265 = vst [vmem:[#allocation63_spill] sm:$0xff] %v8359_v60  ;;  %v8365_v39 = vrot.slane %v4434_v24, %v6679_v61  ;;  %v8367_v42 = vpop.permute.xlu1 %4477  ;;  %v6319_v5 = vpop.eup %6318  ;;  %v2316_v52 = vmul.f32 %v6317_v41, %v8324_v22  ;;  %v1545_v0 = vmul.f32 1.442695, %v1518_v20  ;;  %v11270_v27 = vld [vmem:[#allocation109_spill] sm:$0xff]  ;;  %v11272_v41 = vld [vmem:[#allocation50_spill] sm:$0xff] }
 0x47d   :  { %11267 = vst [vmem:[#allocation111_spill] sm:$0xff] %v8367_v42  ;;  %v1740_v60 = vmul.f32 %v8018_v3, %v8079_v32  ;;  %v6321_v15 = vpop.eup %6320  ;;  %v1754_v28 = vmul.f32 %v6319_v5, %v11270_v27  ;;  %v2655_v47 = vmul.f32 1.442695, %v2639_v49  ;;  %v3205_v24 = vmul.f32 %v8342_v26, %v8348_v14  ;;  %2389 = vbcast.lane.b32.xlu1 %v11271_v30, 264  ;;  %v11273_v5 = vld [vmem:[#allocation27_spill] sm:$0xff]  ;;  %v11277_v30 = vld [vmem:[#allocation78_spill] sm:$0xff] }
 0x47e   :  { %v8371_v34 = vadd.f32 %v1752_v11, %v1736_v13  ;;  %v3131_v40 = vcombine.high %v8273_v19, %v8273_v19  ;;  %v6323_v42 = vpop.eup %6322  ;;  %v1756_v13 = vmul.f32 %v6321_v15, %v11272_v41  ;;  %v2107_v11 = vmul.f32 1.442695, %v2082_v37  ;;  %v11278_v27 = vld [vmem:[#allocation88_spill] sm:$0xff] }
 0x47f   :  { %v8383_v22 = vrot.slane %v3261_v9, %v7279_v51  ;;  %v8387_v3 = vrot.slane %v8357_v21, %v6679_v61  ;;  %v8389_v32 = vpop.permute.xlu0 %3385  ;;  %v8392_v20 = vadd.f32 %v2329_v2, %v11273_v5  ;;  %v8394_v49 = vadd.f32 %v1754_v28, %v1738_v59  ;;  %1291 = vbcast.lane.b32.xlu0 %v11277_v30, 256 }
 0x480   :  { %11269 = vst [vmem:[#allocation52_spill] sm:$0xff] %v8371_v34  ;;  %v8398_v19 = vmul.f32 %v8331_v63, %v8073_v31  ;;  %v2084_v15 = vmul.f32 %v8029_v29, %v7673_v44  ;;  %v8402_v37 = vpop.permute.xlu1 %4488  ;;  %v6325_v41 = vpop.eup %6324  ;;  %v8406_v14 = vadd.f32 %v2316_v52, %v11278_v27  ;;  %v2318_v2 = vmul.f32 %v6323_v42, %v8371_v34  ;;  %v11281_v29 = vld [vmem:[#allocation65_spill] sm:$0xff] }
 0x481   :  { %11274 = vst [vmem:[#allocation64_spill] sm:$0xff] %v8392_v20  ;;  %11275 = vst [vmem:[#allocation27_spill] sm:$0xff] %v8394_v49  ;;  %v8409_v5 = vadd.f32 %v1756_v13, %v1740_v60  ;;  %6330 = vpow2.f32 %v1545_v0  ;;  %v3221_v59 = vmul.f32 1.442695, %v3205_v24  ;;  %v8412_v31 = vrot.slane %v3131_v40, %v7279_v51  ;;  %2400 = vbcast.lane.b32.xlu1 %v11281_v29, 264  ;;  %v11283_v24 = vld [vmem:[#allocation112_spill] sm:$0xff] }
 0x482   :  { %11276 = vst [vmem:[#allocation123_spill] sm:$0xff] %v8398_v19  ;;  %11279 = vst [vmem:[#allocation78_spill] sm:$0xff] %v8406_v14  ;;  %6332 = vpow2.f32 %v2655_v47  ;;  %v3269_v28 = vcombine.high %v3261_v9, %v3261_v9  ;;  %v8417_v19 = vrot.slane %v8383_v22, %v6679_v61  ;;  %v2641_v27 = vmul.f32 %v8342_v26, %v8387_v3  ;;  %v6327_v42 = vpop.eup %6326  ;;  %v11285_v29 = vld [vmem:[#allocation29_spill] sm:$0xff] }
 0x483   :  { %11280 = vst [vmem:[#allocation88_spill] sm:$0xff] %v8409_v5  ;;  %6334 = vpow2.f32 %v2107_v11  ;;  %v2595_v60 = vcombine.high %v8269_v43, %v8269_v43  ;;  %v8423_v52 = vpop.permute.xlu0 %5006  ;;  %v2320_v0 = vmul.f32 %v6325_v41, %v8394_v49  ;;  %v8428_v9 = vmul.f32 %v8365_v39, %v8103_v17  ;;  %v11284_v11 = vld [vmem:[#allocation79_spill] sm:$0xff] }
 0x484   :  { %v2111_v47 = vmul.f32 1.442695, %v2084_v15  ;;  %v1520_v40 = vmul.f32 %v11283_v24, %v7673_v44  ;;  %v8432_v13 = vpop.permute.xlu1 %4499  ;;  %2918 = vbcast.lane.b32.xlu0 %v11284_v11, 256  ;;  %v8436_v34 = vadd.f32 %v2318_v2, %v11285_v29  ;;  %v2322_v43 = vmul.f32 %v6327_v42, %v8409_v5  ;;  %v6329_v15 = vpop.eup %6328  ;;  %v11287_v42 = vld [vmem:[#allocation66_spill] sm:$0xff]  ;;  %v11288_v29 = vld [vmem:[#allocation51_spill] sm:$0xff] }
 0x485   :  { %11282 = vst [vmem:[#allocation65_spill] sm:$0xff] %v8428_v9  ;;  %v1742_v41 = vmul.f32 %v8058_v23, %v8111_v25  ;;  %v8443_v17 = vmul.f32 %v8417_v19, %v8139_v10  ;;  %6336 = vpow2.f32 %v3221_v59  ;;  %v8447_v24 = vrot.slane %v8412_v31, %v6679_v61  ;;  %2411 = vbcast.lane.b32.xlu1 %v11287_v42, 264  ;;  %v11289_v9 = vld [vmem:[#allocation28_spill] sm:$0xff] }
 0x486   :  { %11286 = vst [vmem:[#allocation112_spill] sm:$0xff] %v8436_v34  ;;  %v8450_v49 = vrot.slane %v3269_v28, %v7279_v51  ;;  %v2086_v2 = vmul.f32 %v8069_v58, %v7673_v44  ;;  %v1758_v23 = vmul.f32 %v6329_v15, %v11288_v29  ;;  %v2659_v25 = vmul.f32 1.442695, %v2641_v27  ;;  %v11291_v15 = vld [vmem:[#allocation80_spill] sm:$0xff]  ;;  %v11292_v27 = vld [vmem:[#allocation30_spill] sm:$0xff] }
 0x487   :  { %v8457_v10 = vrot.slane %v2595_v60, %v6679_v61  ;;  %v2550_v59 = vcombine.high %v8212_v57, %v8212_v57  ;;  %v8461_v5 = vpop.permute.xlu0 %5017  ;;  %v8464_v34 = vadd.f32 %v2320_v0, %v11289_v9  ;;  %6338 = vpow2.f32 %v2111_v47 }
 0x488   :  { %v1549_v28 = vmul.f32 1.442695, %v1520_v40  ;;  %v2597_v44 = vcombine.high %v8357_v21, %v8357_v21  ;;  %v8468_v58 = vpop.permute.xlu1 %4510  ;;  %2929 = vbcast.lane.b32.xlu0 %v11291_v15, 256  ;;  %v8472_v60 = vadd.f32 %v2322_v43, %v11292_v27  ;;  %v8474_v42 = vadd.f32 %v1758_v23, %v1742_v41 }
 0x489   :  { %11290 = vst [vmem:[#allocation79_spill] sm:$0xff] %v8464_v34  ;;  %v1744_v57 = vmul.f32 %v8107_v12, %v8144_v38  ;;  %v3161_v0 = vcombine.high %v8302_v55, %v8302_v55  ;;  %v3207_v9 = vmul.f32 %v8342_v26, %v8447_v24  ;;  %v8484_v21 = vrot.slane %v8450_v49, %v6679_v61  ;;  %v11298_v34 = vld [vmem:[#allocation69_spill] sm:$0xff] }
 0x48a   :  { %11293 = vst [vmem:[#allocation29_spill] sm:$0xff] %v8472_v60  ;;  %11294 = vst [vmem:[#allocation66_spill] sm:$0xff] %v8474_v42  ;;  %v2115_v47 = vmul.f32 1.442695, %v2086_v2  ;;  %v8488_v40 = vmul.f32 %v8137_v46, %v8182_v18  ;;  %2422 = vbcast.lane.b32.xlu1 %v11185_v6, 264  ;;  %6340 = vpow2.f32 %v2659_v25  ;;  %v2643_v38 = vmul.f32 %v8342_v26, %v8457_v10  ;;  %v11296_v2 = vld [vmem:[#allocation113_spill] sm:$0xff] }
 0x48b   :  { %11295 = vst [vmem:[#allocation28_spill] sm:$0xff] %v8484_v21  ;;  %v6331_v43 = vpop.eup %6330  ;;  %v3299_v12 = vcombine.high %v8383_v22, %v8383_v22  ;;  %v2564_v55 = vrot.slane %v2550_v59, %v7279_v51  ;;  %v8496_v41 = vpop.permute.xlu0 %5028  ;;  %6342 = vpow2.f32 %v1549_v28  ;;  %v8502_v6 = vld [vmem:[%s10748_s1 + $0x10] sm:$0xff]  ;;  %v8507_v18 = vrot.slane %v2597_v44, %v6679_v61 }
 0x48c   :  { %v6333_v23 = vpop.eup %6332  ;;  %v1760_v27 = vmul.f32 %v6331_v43, %v11296_v2  ;;  %v1522_v46 = vmul.f32 %v8502_v6, %v8077_v56  ;;  %v8509_v22 = vpop.permute.xlu1 %4521  ;;  %v11297_v25 = vld [vmem:[#allocation81_spill] sm:$0xff]  ;;  %v8514_v28 = vrot.slane %v3161_v0, %v6679_v61  ;;  %v2088_v43 = vmul.f32 %v8502_v6, %v8124_v36 }
 0x48d   :  { %2940 = vbcast.lane.b32.xlu0 %v11297_v25, 256  ;;  %v6335_v59 = vpop.eup %6334  ;;  %v2881_v29 = vmul.f32 %v6333_v23, %v8054_v7  ;;  %v3116_v2 = vcombine.high %v8246_v4, %v8246_v4  ;;  %v3225_v44 = vmul.f32 1.442695, %v3207_v9  ;;  %v8523_v60 = vmul.f32 %v8484_v21, %v8176_v35 }
 0x48e   :  { %v2324_v56 = vmul.f32 %v6335_v59, %v8474_v42  ;;  %6344 = vpow2.f32 %v2115_v47  ;;  %2433 = vbcast.lane.b32.xlu1 %v11298_v34, 264  ;;  %v8526_v23 = vadd.f32 %v1760_v27, %v1744_v57  ;;  %v2663_v0 = vmul.f32 1.442695, %v2643_v38  ;;  %v11302_v57 = vld [vmem:[#allocation44_spill] sm:$0xff] }
 0x48f   :  { %v8529_v7 = vrot.slane %v3299_v12, %v6679_v61  ;;  %v2580_v36 = vrot.slane %v2564_v55, %v7279_v51  ;;  %v8532_v14 = vpop.permute.xlu0 %5039  ;;  %v6337_v4 = vpop.eup %6336  ;;  %v1553_v59 = vmul.f32 1.442695, %v1522_v46  ;;  %v2645_v9 = vmul.f32 %v8342_v26, %v8507_v18  ;;  %v11304_v46 = vld [vmem:[#allocation91_spill] sm:$0xff] }
 0x490   :  { %11299 = vst [vmem:[#allocation80_spill] sm:$0xff] %v8526_v23  ;;  %11301 = vst [vmem:[#allocation81_spill] sm:$0xff] %v8532_v14  ;;  %v3163_v35 = vcombine.high %v8412_v31, %v8412_v31  ;;  %v2566_v47 = vcombine.high %v2564_v55, %v2564_v55  ;;  %v8538_v34 = vpop.permute.xlu1 %3312  ;;  %v8541_v38 = vadd.f32 %v2881_v29, %v11302_v57  ;;  %v2119_v27 = vmul.f32 1.442695, %v2088_v43  ;;  %v8562_v43 = vld [vmem:[#allocation6 + $0x18] sm:$0xff] }
 0x491   :  { %11300 = vst [vmem:[#allocation30_spill] sm:$0xff] %v8529_v7  ;;  %v3209_v12 = vmul.f32 %v8342_v26, %v8514_v28  ;;  %v3130_v42 = vrot.slane %v3116_v2, %v7279_v51  ;;  %v6339_v21 = vpop.eup %6338  ;;  %v8547_v14 = vadd.f32 %v2324_v56, %v11304_v46  ;;  %6346 = vpow2.f32 %v3225_v44  ;;  %v11306_v56 = vld [vmem:[#allocation10_spill] sm:$0xff] }
 0x492   :  { %11303 = vst [vmem:[#allocation69_spill] sm:$0xff] %v8541_v38  ;;  %v8551_v31 = vmul.f32 %v8529_v7, %v8214_v48  ;;  %v8555_v55 = vmul.f32 %v8165_v53, %v8219_v54  ;;  %1218 = vbcast.lane.b32.xlu1 %v11198_v45, 264  ;;  %v2326_v29 = vmul.f32 %v6339_v21, %v8526_v23  ;;  %6348 = vpow2.f32 %v2663_v0 }
 0x493   :  { %11305 = vst [vmem:[#allocation44_spill] sm:$0xff] %v8547_v14  ;;  %v8560_v2 = vrot.slane %v2580_v36, %v6679_v61  ;;  %v8566_v44 = vrot.slane %v8562_v43, %v11306_v56  ;;  %v8568_v48 = vpop.permute.xlu0 %5050  ;;  %6350 = vpow2.f32 %v1553_v59  ;;  %v2667_v57 = vmul.f32 1.442695, %v2645_v9 }
 0x494   :  { %11308 = vst [vmem:[#allocation10_spill] sm:$0xff] %v8568_v48  ;;  %v8571_v53 = vrot.slane %v3163_v35, %v6679_v61  ;;  %v8574_v45 = vrot.slane %v2566_v47, %v7279_v51  ;;  %v8576_v54 = vpop.permute.xlu1 %3323  ;;  %v6341_v21 = vpop.eup %6340  ;;  %v3447_v0 = vmul.f32 %v6337_v4, %v8541_v38  ;;  %v3229_v46 = vmul.f32 1.442695, %v3209_v12  ;;  %v11309_v48 = vld [vmem:[#allocation55_spill] sm:$0xff] }
 0x495   :  { %11307 = vst [vmem:[#allocation91_spill] sm:$0xff] %v8566_v44  ;;  %6352 = vpow2.f32 %v2119_v27  ;;  %v3146_v23 = vrot.slane %v3130_v42, %v7279_v51  ;;  %2951 = vbcast.lane.b32.xlu0 %v8566_v44, 256  ;;  %v6343_v14 = vpop.eup %6342  ;;  %v2883_v59 = vmul.f32 %v6341_v21, %v8115_v33  ;;  %v3301_v9 = vcombine.high %v8450_v49, %v8450_v49  ;;  %v11310_v38 = vld [vmem:[#allocation11_spill] sm:$0xff] }
 0x496   :  { %v3254_v35 = vcombine.high %v8319_v1, %v8319_v1  ;;  %v2596_v47 = vcombine.high %v2580_v36, %v2580_v36  ;;  %1229 = vbcast.lane.b32.xlu1 %v11208_v16, 264  ;;  %v1762_v4 = vmul.f32 %v6343_v14, %v11309_v48  ;;  %v2647_v12 = vmul.f32 %v8342_v26, %v8560_v2  ;;  %v11313_v49 = vld [vmem:[#allocation31_spill] sm:$0xff]  ;;  %v11317_v36 = vld [vmem:[#allocation118_spill] sm:$0xff] }
 0x497   :  { %v3132_v27 = vcombine.high %v3130_v42, %v3130_v42  ;;  %v8592_v44 = vrot.slane %v8562_v43, %v11310_v38  ;;  %v8594_v21 = vpop.permute.xlu0 %5061  ;;  %v8597_v7 = vadd.f32 %v2326_v29, %v11313_v49  ;;  %6354 = vpow2.f32 %v2667_v57  ;;  %v11320_v57 = vld [vmem:[#allocation54_spill] sm:$0xff] }
 0x498   :  { %11312 = vst [vmem:[#allocation124_spill] sm:$0xff] %v8594_v21  ;;  %v6345_v33 = vpop.eup %6344  ;;  %v3211_v16 = vmul.f32 %v8342_v26, %v8571_v53  ;;  %v8603_v1 = vrot.slane %v8574_v45, %v6679_v61  ;;  %v8605_v14 = vpop.permute.xlu1 %3334  ;;  %v8608_v42 = vadd.f32 %v1762_v4, %v8488_v40  ;;  %6356 = vpow2.f32 %v3229_v46 }
 0x499   :  { %11311 = vst [vmem:[#allocation11_spill] sm:$0xff] %v8592_v44  ;;  %11314 = vst [vmem:[#allocation31_spill] sm:$0xff] %v8597_v7  ;;  %v8612_v48 = vmul.f32 %v11317_v36, %v8253_v62  ;;  %v8615_v29 = vrot.slane %v3146_v23, %v6679_v61  ;;  %2962 = vbcast.lane.b32.xlu0 %v8592_v44, 256  ;;  %v8619_v49 = vadd.f32 %v2883_v59, %v11320_v57  ;;  %v11325_v36 = vld [vmem:[#allocation12_spill] sm:$0xff] }
 0x49a   :  { %11315 = vst [vmem:[#allocation125_spill] sm:$0xff] %v8603_v1  ;;  %11316 = vst [vmem:[#allocation126_spill] sm:$0xff] %v8608_v42  ;;  %v8622_v7 = vrot.slane %v3301_v9, %v6679_v61  ;;  %v3268_v21 = vrot.slane %v3254_v35, %v7279_v51  ;;  %v8626_v40 = vrot.slane %v2596_v47, %v6679_v61  ;;  %1240 = vbcast.lane.b32.xlu1 %v11221_v8, 264 }
 0x49b   :  { %11318 = vst [vmem:[#allocation118_spill] sm:$0xff] %v8612_v48  ;;  %11319 = vst [vmem:[#allocation127_spill] sm:$0xff] %v8615_v29  ;;  %v8630_v62 = vadd.f32 %v3447_v0, %v8443_v17  ;;  %v2671_v46 = vmul.f32 1.442695, %v2647_v12  ;;  %v8633_v4 = vrot.slane %v3132_v27, %v7279_v51  ;;  %v8637_v59 = vrot.slane %v8562_v43, %v11325_v36  ;;  %v8639_v9 = vpop.permute.xlu0 %5072  ;;  %v6347_v57 = vpop.eup %6346  ;;  %v11328_v48 = vld [vmem:[#allocation108_spill] sm:$0xff] }
 0x49c   :  { %11321 = vst [vmem:[#allocation54_spill] sm:$0xff] %v8619_v49  ;;  %11322 = vst [vmem:[#allocation128_spill] sm:$0xff] %v8622_v7  ;;  %v3233_v35 = vmul.f32 1.442695, %v3211_v16  ;;  %v8643_v47 = vmul.f32 %v8622_v7, %v11328_v48  ;;  %v2649_v8 = vmul.f32 %v8342_v26, %v8603_v1  ;;  %v3162_v17 = vcombine.high %v3146_v23, %v3146_v23  ;;  %v8647_v0 = vpop.permute.xlu1 %3345  ;;  %v6349_v12 = vpop.eup %6348  ;;  %v11332_v7 = vld [vmem:[#allocation57_spill] sm:$0xff] }
 0x49d   :  { %11323 = vst [vmem:[#allocation129_spill] sm:$0xff] %v8626_v40  ;;  %11324 = vst [vmem:[#allocation130_spill] sm:$0xff] %v8630_v62  ;;  %v2328_v27 = vmul.f32 %v6345_v33, %v8608_v42  ;;  %v3213_v62 = vmul.f32 %v8342_v26, %v8615_v29  ;;  %v2598_v48 = vcombine.high %v8574_v45, %v8574_v45  ;;  %2973 = vbcast.lane.b32.xlu0 %v8637_v59, 256  ;;  %v6351_v16 = vpop.eup %6350  ;;  %v11333_v42 = vld [vmem:[#allocation73_spill] sm:$0xff] }
 0x49e   :  { %11326 = vst [vmem:[#allocation12_spill] sm:$0xff] %v8637_v59  ;;  %11327 = vst [vmem:[#allocation131_spill] sm:$0xff] %v8639_v9  ;;  %v11330_v9 = vld [vmem:[#allocation106_spill] sm:$0xff]  ;;  %v3449_v23 = vmul.f32 %v6347_v57, %v8619_v49  ;;  %v3284_v1 = vrot.slane %v3268_v21, %v7279_v51  ;;  %v2651_v33 = vmul.f32 %v8342_v26, %v8626_v40  ;;  %1251 = vbcast.lane.b32.xlu1 %v11333_v42, 264 }
 0x49f   :  { %11329 = vst [vmem:[#allocation108_spill] sm:$0xff] %v8647_v0  ;;  %v8654_v44 = vmul.f32 %v11330_v9, %v8287_v50  ;;  %v2885_v0 = vmul.f32 %v6349_v12, %v11332_v7  ;;  %v6353_v29 = vpop.eup %6352  ;;  %v11334_v50 = vld [vmem:[#allocation24_spill] sm:$0xff]  ;;  %6358 = vpow2.f32 %v2671_v46  ;;  %v8668_v45 = vrot.slane %v8633_v4, %v6679_v61  ;;  %v8674_v12 = vpop.permute.xlu0 %5083 }
 0x4a0   :  { %v1764_v9 = vmul.f32 %v6351_v16, %v11334_v50  ;;  %11337 = vst [vmem:[#allocation132_spill] sm:$0xff] %v8674_v12  ;;  %6360 = vpow2.f32 %v3233_v35  ;;  %v2675_v49 = vmul.f32 1.442695, %v2649_v8  ;;  %v3270_v7 = vcombine.high %v3268_v21, %v3268_v21  ;;  %v8679_v42 = vpop.permute.xlu1 %3356  ;;  %v11339_v16 = vld [vmem:[#allocation92_spill] sm:$0xff] }
 0x4a1   :  { %11331 = vst [vmem:[#allocation106_spill] sm:$0xff] %v8654_v44  ;;  %v11335_v44 = vld [vmem:[#allocation13_spill] sm:$0xff]  ;;  %v8677_v59 = vrot.slane %v3162_v17, %v6679_v61  ;;  %v8682_v46 = vadd.f32 %v2328_v27, %v11339_v16  ;;  %v3237_v40 = vmul.f32 1.442695, %v3213_v62  ;;  %v6355_v35 = vpop.eup %6354  ;;  %v11343_v8 = vld [vmem:[#allocation96_spill] sm:$0xff]  ;;  %v8695_v17 = vrot.slane %v3284_v1, %v6679_v61  ;;  %v11346_v16 = vld [vmem:[#allocation74_spill] sm:$0xff] }
 0x4a2   :  { %v8672_v57 = vrot.slane %v8562_v43, %v11335_v44  ;;  %v8685_v50 = vadd.f32 %v1764_v9, %v8555_v55  ;;  %v8688_v44 = vrot.slane %v2598_v48, %v6679_v61  ;;  %v8692_v21 = vadd.f32 %v2885_v0, %v11343_v8  ;;  %1262 = vbcast.lane.b32.xlu1 %v11346_v16, 264  ;;  %v6357_v55 = vpop.eup %6356  ;;  %v11348_v48 = vld [vmem:[#allocation26_spill] sm:$0xff] }
 0x4a3   :  { %11338 = vst [vmem:[#allocation133_spill] sm:$0xff] %v8677_v59  ;;  %11340 = vst [vmem:[#allocation92_spill] sm:$0xff] %v8682_v46  ;;  %v2679_v12 = vmul.f32 1.442695, %v2651_v33  ;;  %v3164_v27 = vcombine.high %v8633_v4, %v8633_v4  ;;  %v8701_v62 = vadd.f32 %v3449_v23, %v8523_v60  ;;  %v2887_v9 = vmul.f32 %v6355_v35, %v11348_v48  ;;  %v11349_v0 = vld [vmem:[#allocation14_spill] sm:$0xff]  ;;  %v11352_v33 = vld [vmem:[#allocation61_spill] sm:$0xff] }
 0x4a4   :  { %11336 = vst [vmem:[#allocation73_spill] sm:$0xff] %v8672_v57  ;;  %11341 = vst [vmem:[#allocation134_spill] sm:$0xff] %v8685_v50  ;;  %2984 = vbcast.lane.b32.xlu0 %v8672_v57, 256  ;;  %v3215_v46 = vmul.f32 %v8342_v26, %v8668_v45  ;;  %v8708_v8 = vrot.slane %v8562_v43, %v11349_v0  ;;  %v8710_v57 = vpop.permute.xlu0 %3874  ;;  %v8714_v4 = vmul.f32 %v8695_v17, %v11352_v33  ;;  %v8719_v23 = vld [vmem:[#allocation4 + $0x38] sm:$0xff]  ;;  %v8721_v35 = vpop.permute.xlu1 %3367  ;;  %v8723_v48 = vld [vmem:[#allocation6 + $0x8] sm:$0xff] }
 0x4a5   :  { %11342 = vst [vmem:[#allocation135_spill] sm:$0xff] %v8688_v44  ;;  %11344 = vst [vmem:[#allocation96_spill] sm:$0xff] %v8692_v21  ;;  %6362 = vpow2.f32 %v2675_v49  ;;  %v3298_v16 = vrot.slane %v3270_v7, %v7279_v51  ;;  %v3217_v60 = vmul.f32 %v8342_v26, %v8677_v59  ;;  %v2330_v43 = vmul.f32 %v6353_v29, %v8685_v50  ;;  %v11354_v49 = vld [vmem:[#allocation119_spill] sm:$0xff]  ;;  %v11358_v29 = vld [vmem:[#allocation97_spill] sm:$0xff] }
 0x4a6   :  { %11345 = vst [vmem:[#allocation136_spill] sm:$0xff] %v8695_v17  ;;  %11347 = vst [vmem:[#allocation74_spill] sm:$0xff] %v8701_v62  ;;  %6364 = vpow2.f32 %v3237_v40  ;;  %v3300_v62 = vcombine.high %v3284_v1, %v3284_v1  ;;  %v2653_v33 = vmul.f32 %v8342_v26, %v8688_v44  ;;  %v3451_v7 = vmul.f32 %v6357_v55, %v8692_v21  ;;  %v11357_v0 = vld [vmem:[#allocation75_spill] sm:$0xff]  ;;  %v11366_v44 = vld [vmem:[#allocation82_spill] sm:$0xff] }
 0x4a7   :  { %11350 = vst [vmem:[#allocation137_spill] sm:$0xff] %v8708_v8  ;;  %11351 = vst [vmem:[#allocation138_spill] sm:$0xff] %v8710_v57  ;;  %v11355_v57 = vld [vmem:[#allocation104_spill] sm:$0xff]  ;;  %6366 = vpow2.f32 %v2679_v12  ;;  %1273 = vbcast.lane.b32.xlu1 %v11357_v0, 264  ;;  %v8739_v40 = vadd.f32 %v2887_v9, %v11358_v29  ;;  %v3241_v1 = vmul.f32 1.442695, %v3215_v46  ;;  %v4959_v50 = vrot.slane %v8719_v23, %v7279_v51 }
 0x4a8   :  { %11353 = vst [vmem:[#allocation61_spill] sm:$0xff] %v8721_v35  ;;  %2995 = vbcast.lane.b32.xlu0 %v8708_v8, 256  ;;  %v8732_v59 = vmul.f32 %v11355_v57, %v11354_v49  ;;  %v8735_v35 = vrot.slane %v3164_v27, %v6679_v61  ;;  %v8745_v55 = vrot.slane %v8723_v48, %v6679_v61  ;;  %v8747_v21 = vpop.permute.xlu0 %3885  ;;  %v3245_v27 = vmul.f32 1.442695, %v3217_v60  ;;  %v8755_v9 = vpop.permute.xlu1 %3378  ;;  %v11364_v49 = vld [vmem:[#allocation45_spill] sm:$0xff]  ;;  %v11368_v60 = vld [vmem:[#allocation90_spill] sm:$0xff] }
 0x4a9   :  { %11359 = vst [vmem:[#allocation104_spill] sm:$0xff] %v8739_v40  ;;  %11361 = vst [vmem:[#allocation97_spill] sm:$0xff] %v8747_v21  ;;  %v8750_v57 = vadd.f32 %v3451_v7, %v8551_v31  ;;  %v8753_v12 = vrot.slane %v3298_v16, %v6679_v61  ;;  %v3302_v0 = vcombine.high %v3298_v16, %v3298_v16  ;;  %v6359_v46 = vpop.eup %6358  ;;  %v2683_v8 = vmul.f32 1.442695, %v2653_v33  ;;  %v11367_v7 = vld [vmem:[#allocation101_spill] sm:$0xff]  ;;  %v11370_v17 = vld [vmem:[#allocation84_spill] sm:$0xff] }
 0x4aa   :  { %11356 = vst [vmem:[#allocation119_spill] sm:$0xff] %v8732_v59  ;;  %11360 = vst [vmem:[#allocation75_spill] sm:$0xff] %v8745_v55  ;;  %v8758_v29 = vadd.f32 %v2330_v43, %v11364_v49  ;;  %v8761_v59 = vrot.slane %v3300_v62, %v6679_v61  ;;  %v2640_v21 = vmul.f32 %v8502_v6, %v11366_v44  ;;  %v6361_v31 = vpop.eup %6360  ;;  %v11372_v33 = vld [vmem:[#allocation77_spill] sm:$0xff]  ;;  %6368 = vpow2.f32 %v3241_v1  ;;  %v11373_v49 = vld [vmem:[#allocation63_spill] sm:$0xff] }
 0x4ab   :  { %11362 = vst [vmem:[#allocation139_spill] sm:$0xff] %v8750_v57  ;;  %11363 = vst [vmem:[#allocation140_spill] sm:$0xff] %v8755_v9  ;;  %v2889_v57 = vmul.f32 %v6359_v46, %v11367_v7  ;;  %v8769_v16 = vmul.f32 %v8753_v12, %v11368_v60  ;;  %v11369_v9 = vld [vmem:[#allocation111_spill] sm:$0xff]  ;;  %v3219_v62 = vmul.f32 %v8342_v26, %v8735_v35  ;;  %1284 = vbcast.lane.b32.xlu1 %v11372_v33, 264 }
 0x4ac   :  { %11365 = vst [vmem:[#allocation45_spill] sm:$0xff] %v8758_v29  ;;  %1786 = vbcast.lane.b32.xlu0 %v8745_v55, 256  ;;  %v8773_v43 = vmul.f32 %v11370_v17, %v11369_v9  ;;  %v3453_v44 = vmul.f32 %v6361_v31, %v8739_v40  ;;  %v8781_v29 = vmul.f32 %v8761_v59, %v11373_v49  ;;  %v8784_v60 = vpop.permute.xlu0 %3896  ;;  %6370 = vpow2.f32 %v3245_v27  ;;  %v11375_v9 = vld [vmem:[#allocation85_spill] sm:$0xff]  ;;  %v8793_v7 = vpop.permute.xlu1 %3389  ;;  %v11378_v49 = vld [vmem:[#allocation8_spill] sm:$0xff] }
 0x4ad   :  { %v4975_v46 = vrot.slane %v4959_v50, %v7279_v51  ;;  %11374 = vst [vmem:[#allocation90_spill] sm:$0xff] %v8784_v60  ;;  %v8787_v17 = vrot.slane %v3302_v0, %v6679_v61  ;;  %v4967_v33 = vcombine.high %v4959_v50, %v4959_v50  ;;  %6372 = vpow2.f32 %v2683_v8  ;;  %v11379_v60 = vld [vmem:[#allocation99_spill] sm:$0xff] }
 0x4ae   :  { %11371 = vst [vmem:[#allocation82_spill] sm:$0xff] %v8773_v43  ;;  %v8791_v43 = vmul.f32 %v11375_v9, %v8402_v37  ;;  %v8796_v1 = vadd.f32 %v3453_v44, %v8643_v47  ;;  %v2657_v31 = vmul.f32 1.442695, %v2640_v21  ;;  %v8800_v40 = vrot.slane %v8723_v48, %v11378_v49  ;;  %v11381_v21 = vld [vmem:[#allocation105_spill] sm:$0xff]  ;;  %v11382_v44 = vld [vmem:[#allocation86_spill] sm:$0xff] }
 0x4af   :  { %v6363_v27 = vpop.eup %6362  ;;  %v8803_v0 = vadd.f32 %v2889_v57, %v11379_v60  ;;  %v3249_v55 = vmul.f32 1.442695, %v3219_v62  ;;  %v8807_v37 = vmul.f32 %v8787_v17, %v8389_v32  ;;  %v2642_v50 = vmul.f32 %v8502_v6, %v8387_v3  ;;  %1295 = vbcast.lane.b32.xlu1 %v11277_v30, 264 }
 0x4b0   :  { %11376 = vst [vmem:[#allocation111_spill] sm:$0xff] %v8791_v43  ;;  %11377 = vst [vmem:[#allocation84_spill] sm:$0xff] %v8796_v1  ;;  %v6365_v47 = vpop.eup %6364  ;;  %v2891_v8 = vmul.f32 %v6363_v27, %v11381_v21  ;;  %v8815_v9 = vmul.f32 %v11382_v44, %v8432_v13  ;;  %v4997_v43 = vcombine.high %v4975_v46, %v4975_v46  ;;  %1797 = vbcast.lane.b32.xlu0 %v8800_v40, 256  ;;  %v8820_v32 = vpop.permute.xlu0 %3907  ;;  %v11386_v13 = vld [vmem:[#allocation122_spill] sm:$0xff]  ;;  %v11421_v1 = vld [vmem:[#allocation124_spill] sm:$0xff] }
 0x4b1   :  { %11380 = vst [vmem:[#allocation77_spill] sm:$0xff] %v8803_v0  ;;  %v4952_v57 = vcombine.high %v8719_v23, %v8719_v23  ;;  %v6367_v62 = vpop.eup %6366  ;;  %v4989_v3 = vrot.slane %v4967_v33, %v7279_v51  ;;  %v8825_v30 = vmul.f32 %v8331_v63, %v8468_v58  ;;  %v8829_v60 = vmul.f32 %v8365_v39, %v8509_v22  ;;  %v8833_v44 = vpop.permute.xlu1 %5010  ;;  %v11387_v23 = vld [vmem:[#allocation47_spill] sm:$0xff]  ;;  %v11388_v39 = vld [vmem:[#allocation9_spill] sm:$0xff] }
 0x4b2   :  { %11383 = vst [vmem:[#allocation63_spill] sm:$0xff] %v8815_v9  ;;  %v3206_v27 = vmul.f32 %v8502_v6, %v11386_v13  ;;  %v2893_v9 = vmul.f32 %v6367_v62, %v11387_v23  ;;  %v8837_v21 = vrot.slane %v4975_v46, %v6679_v61  ;;  %6374 = vpow2.f32 %v2657_v31  ;;  %v11389_v13 = vld [vmem:[#allocation46_spill] sm:$0xff] }
 0x4b3   :  { %11384 = vst [vmem:[#allocation85_spill] sm:$0xff] %v8825_v30  ;;  %11385 = vst [vmem:[#allocation99_spill] sm:$0xff] %v8829_v60  ;;  %v2644_v33 = vmul.f32 %v8502_v6, %v8457_v10  ;;  %v3455_v63 = vmul.f32 %v6365_v47, %v8803_v0  ;;  %6376 = vpow2.f32 %v3249_v55  ;;  %v2661_v58 = vmul.f32 1.442695, %v2642_v50  ;;  %2922 = vbcast.lane.b32.xlu1 %v11284_v11, 264 }
 0x4b4   :  { %v8844_v22 = vrot.slane %v8723_v48, %v11388_v39  ;;  %v8848_v60 = vadd.f32 %v2891_v8, %v11389_v13  ;;  %v8852_v46 = vmul.f32 %v8837_v21, %v8423_v52  ;;  %v8855_v31 = vrot.slane %v4997_v43, %v6679_v61  ;;  %v8858_v55 = vpop.permute.xlu0 %3918  ;;  %v6369_v52 = vpop.eup %6368  ;;  %v11393_v13 = vld [vmem:[#allocation83_spill] sm:$0xff] }
 0x4b5   :  { %v4966_v10 = vrot.slane %v4952_v57, %v7279_v51  ;;  %v8861_v50 = vrot.slane %v4989_v3, %v6679_v61  ;;  %v4999_v47 = vcombine.high %v4989_v3, %v4989_v3  ;;  %v3223_v62 = vmul.f32 1.442695, %v3206_v27  ;;  %v8866_v8 = vpop.permute.xlu1 %5021 }
 0x4b6   :  { %11390 = vst [vmem:[#allocation86_spill] sm:$0xff] %v8848_v60  ;;  %11391 = vst [vmem:[#allocation122_spill] sm:$0xff] %v8852_v46  ;;  %v3208_v11 = vmul.f32 %v8502_v6, %v8447_v24  ;;  %1808 = vbcast.lane.b32.xlu0 %v8844_v22, 256  ;;  %v8869_v43 = vadd.f32 %v3455_v63, %v8714_v4  ;;  %v8872_v57 = vadd.f32 %v2893_v9, %v11393_v13  ;;  %v6371_v27 = vpop.eup %6370 }
 0x4b7   :  { %v8876_v30 = vmul.f32 %v8855_v31, %v8496_v41  ;;  %v2665_v3 = vmul.f32 1.442695, %v2644_v33  ;;  %v8880_v24 = vmul.f32 %v8417_v19, %v8538_v34  ;;  %6378 = vpow2.f32 %v2661_v58  ;;  %2933 = vbcast.lane.b32.xlu1 %v11291_v15, 264  ;;  %v6373_v9 = vpop.eup %6372  ;;  %v8896_v34 = vld [vmem:[#allocation3 + $0x28] sm:$0xff] }
 0x4b8   :  { %11392 = vst [vmem:[#allocation9_spill] sm:$0xff] %v8869_v43  ;;  %11394 = vst [vmem:[#allocation46_spill] sm:$0xff] %v8872_v57  ;;  %v2646_v46 = vmul.f32 %v8502_v6, %v8507_v18  ;;  %v8886_v4 = vrot.slane %v8723_v48, %v11306_v56  ;;  %v3457_v41 = vmul.f32 %v6369_v52, %v8848_v60  ;;  %v8898_v18 = vpop.permute.xlu0 %3929  ;;  %6380 = vpow2.f32 %v3223_v62 }
 0x4b9   :  { %11395 = vst [vmem:[#allocation83_spill] sm:$0xff] %v8876_v30  ;;  %v8892_v33 = vmul.f32 %v8861_v50, %v8461_v5  ;;  %v4968_v63 = vcombine.high %v4966_v10, %v4966_v10  ;;  %v3210_v19 = vmul.f32 %v8502_v6, %v8514_v28  ;;  %v2895_v58 = vmul.f32 %v6373_v9, %v8392_v20  ;;  %v8905_v52 = vpop.permute.xlu1 %5032  ;;  %v11406_v20 = vld [vmem:[#allocation78_spill] sm:$0xff] }
 0x4ba   :  { %v8902_v13 = vrot.slane %v4999_v47, %v6679_v61  ;;  %v3227_v15 = vmul.f32 1.442695, %v3208_v11  ;;  %1819 = vbcast.lane.b32.xlu0 %v8886_v4, 256  ;;  %v8908_v5 = vadd.f32 %v3457_v41, %v8769_v16  ;;  %v3459_v28 = vmul.f32 %v6371_v27, %v8872_v57  ;;  %v11398_v11 = vld [vmem:[#allocation81_spill] sm:$0xff] }
 0x4bb   :  { %11396 = vst [vmem:[#allocation141_spill] sm:$0xff] %v8892_v33  ;;  %v4982_v30 = vrot.slane %v4966_v10, %v7279_v51  ;;  %6382 = vpow2.f32 %v2665_v3  ;;  %v2669_v33 = vmul.f32 1.442695, %v2646_v46  ;;  %v2648_v9 = vmul.f32 %v8502_v6, %v8560_v2  ;;  %2944 = vbcast.lane.b32.xlu1 %v11297_v25, 264  ;;  %v11400_v10 = vld [vmem:[#allocation28_spill] sm:$0xff]  ;;  %v11404_v25 = vld [vmem:[#allocation87_spill] sm:$0xff] }
 0x4bc   :  { %11397 = vst [vmem:[#allocation142_spill] sm:$0xff] %v8908_v5  ;;  %v3689_v47 = vrot.slane %v8896_v34, %v7279_v51  ;;  %v8918_v62 = vrot.slane %v8723_v48, %v11310_v38  ;;  %v6375_v16 = vpop.eup %6374  ;;  %v8923_v27 = vmul.f32 %v8902_v13, %v11398_v11  ;;  %v8927_v46 = vmul.f32 %v11400_v10, %v8576_v54  ;;  %v8932_v41 = vpop.permute.xlu0 %3940 }
 0x4bd   :  { %v8930_v2 = vrot.slane %v4968_v63, %v7279_v51  ;;  %v3231_v3 = vmul.f32 1.442695, %v3210_v19  ;;  %11402 = vst [vmem:[#allocation143_spill] sm:$0xff] %v8932_v41  ;;  %v6377_v57 = vpop.eup %6376  ;;  %v8935_v60 = vadd.f32 %v3459_v28, %v8781_v29  ;;  %v8938_v0 = vadd.f32 %v2895_v58, %v11404_v25  ;;  %v8942_v54 = vpop.permute.xlu1 %5043  ;;  %v11408_v19 = vld [vmem:[#allocation30_spill] sm:$0xff] }
 0x4be   :  { %11399 = vst [vmem:[#allocation81_spill] sm:$0xff] %v8923_v27  ;;  %v2882_v11 = vmul.f32 %v6375_v16, %v11406_v20  ;;  %6384 = vpow2.f32 %v3227_v15  ;;  %1830 = vbcast.lane.b32.xlu0 %v8918_v62, 256  ;;  %v8945_v63 = vrot.slane %v4982_v30, %v6679_v61  ;;  %v8949_v10 = vmul.f32 %v11408_v19, %v8605_v14  ;;  %v11410_v16 = vld [vmem:[#allocation91_spill] sm:$0xff]  ;;  %v11411_v25 = vld [vmem:[#allocation10_spill] sm:$0xff] }
 0x4bf   :  { %11401 = vst [vmem:[#allocation28_spill] sm:$0xff] %v8930_v2  ;;  %11403 = vst [vmem:[#allocation144_spill] sm:$0xff] %v8935_v60  ;;  %v4998_v27 = vcombine.high %v4982_v30, %v4982_v30  ;;  %v3212_v29 = vmul.f32 %v8502_v6, %v8571_v53  ;;  %6386 = vpow2.f32 %v2669_v33  ;;  %v2673_v58 = vmul.f32 1.442695, %v2648_v9  ;;  %2955 = vbcast.lane.b32.xlu1 %v11410_v16, 264  ;;  %v8969_v53 = vld [vmem:[#allocation4 + $0x28] sm:$0xff] }
 0x4c0   :  { %11405 = vst [vmem:[#allocation87_spill] sm:$0xff] %v8938_v0  ;;  %11407 = vst [vmem:[#allocation145_spill] sm:$0xff] %v8945_v63  ;;  %v8954_v28 = vrot.slane %v3689_v47, %v7279_v51  ;;  %v8958_v15 = vrot.slane %v8723_v48, %v11325_v36  ;;  %v8963_v23 = vmul.f32 %v8945_v63, %v11411_v25  ;;  %6388 = vpow2.f32 %v3231_v3  ;;  %v11414_v30 = vld [vmem:[#allocation125_spill] sm:$0xff]  ;;  %v8973_v9 = vpop.permute.xlu0 %3951  ;;  %v11416_v16 = vld [vmem:[#allocation94_spill] sm:$0xff] }
 0x4c1   :  { %v8967_v14 = vrot.slane %v8930_v2, %v6679_v61  ;;  %v2650_v33 = vmul.f32 %v8502_v6, %v11414_v30  ;;  %11415 = vst [vmem:[#allocation125_spill] sm:$0xff] %v8973_v9  ;;  %v6379_v19 = vpop.eup %6378  ;;  %v3461_v20 = vmul.f32 %v6377_v57, %v8938_v0  ;;  %v8977_v60 = vadd.f32 %v2882_v11, %v11416_v16  ;;  %v11418_v25 = vld [vmem:[#allocation127_spill] sm:$0xff]  ;;  %v8982_v3 = vpop.permute.xlu1 %5054  ;;  %v11420_v2 = vld [vmem:[#allocation112_spill] sm:$0xff] }
 0x4c2   :  { %11409 = vst [vmem:[#allocation30_spill] sm:$0xff] %v8958_v15  ;;  %11412 = vst [vmem:[#allocation91_spill] sm:$0xff] %v8963_v23  ;;  %v3214_v23 = vmul.f32 %v8502_v6, %v11418_v25  ;;  %v3697_v5 = vcombine.high %v3689_v47, %v3689_v47  ;;  %1841 = vbcast.lane.b32.xlu0 %v8958_v15, 256  ;;  %v2884_v43 = vmul.f32 %v6379_v19, %v11420_v2  ;;  %v6381_v11 = vpop.eup %6380  ;;  %v11424_v25 = vld [vmem:[#allocation13_spill] sm:$0xff]  ;;  %v11426_v0 = vld [vmem:[#allocation11_spill] sm:$0xff] }
 0x4c3   :  { %11413 = vst [vmem:[#allocation10_spill] sm:$0xff] %v8967_v14  ;;  %11417 = vst [vmem:[#allocation94_spill] sm:$0xff] %v8977_v60  ;;  %v8987_v30 = vmul.f32 %v8967_v14, %v11421_v1  ;;  %v8990_v9 = vrot.slane %v4998_v27, %v6679_v61  ;;  %v3235_v57 = vmul.f32 1.442695, %v3212_v29  ;;  %6390 = vpow2.f32 %v2673_v58  ;;  %2966 = vbcast.lane.b32.xlu1 %v11426_v0, 264  ;;  %v11428_v29 = vld [vmem:[#allocation108_spill] sm:$0xff] }
 0x4c4   :  { %11419 = vst [vmem:[#allocation127_spill] sm:$0xff] %v8982_v3  ;;  %v8994_v16 = vrot.slane %v8954_v28, %v6679_v61  ;;  %v3827_v47 = vrot.slane %v8969_v53, %v7279_v51  ;;  %v9000_v19 = vrot.slane %v8723_v48, %v11424_v25  ;;  %v9004_v27 = vadd.f32 %v3461_v20, %v8807_v37  ;;  %v11430_v2 = vld [vmem:[#allocation129_spill] sm:$0xff]  ;;  %v9012_v41 = vpop.permute.xlu0 %2352  ;;  %v11433_v37 = vld [vmem:[#allocation68_spill] sm:$0xff] }
 0x4c5   :  { %11422 = vst [vmem:[#allocation124_spill] sm:$0xff] %v8987_v30  ;;  %11423 = vst [vmem:[#allocation146_spill] sm:$0xff] %v8990_v9  ;;  %v6383_v1 = vpop.eup %6382  ;;  %v11429_v30 = vld [vmem:[#allocation128_spill] sm:$0xff]  ;;  %v2677_v9 = vmul.f32 1.442695, %v2650_v33  ;;  %v2652_v14 = vmul.f32 %v8502_v6, %v11430_v2  ;;  %v3448_v63 = vmul.f32 %v6381_v11, %v8977_v60  ;;  %v3216_v0 = vmul.f32 %v8502_v6, %v8668_v45  ;;  %v9021_v20 = vpop.permute.xlu1 %5065 }
 0x4c6   :  { %11425 = vst [vmem:[#allocation13_spill] sm:$0xff] %v9000_v19  ;;  %11427 = vst [vmem:[#allocation11_spill] sm:$0xff] %v9004_v27  ;;  %v9008_v58 = vmul.f32 %v11429_v30, %v11428_v29  ;;  %v3239_v3 = vmul.f32 1.442695, %v3214_v23  ;;  %v9018_v15 = vrot.slane %v3697_v5, %v7279_v51  ;;  %1852 = vbcast.lane.b32.xlu0 %v9000_v19, 256  ;;  %v11435_v30 = vld [vmem:[#allocation79_spill] sm:$0xff]  ;;  %6392 = vpow2.f32 %v3235_v57 }
 0x4c7   :  { %11431 = vst [vmem:[#allocation108_spill] sm:$0xff] %v9012_v41  ;;  %11432 = vst [vmem:[#allocation128_spill] sm:$0xff] %v9021_v20  ;;  %v9024_v33 = vadd.f32 %v2884_v43, %v11433_v37  ;;  %v2886_v2 = vmul.f32 %v6383_v1, %v11435_v30  ;;  %v11436_v29 = vld [vmem:[#allocation136_spill] sm:$0xff]  ;;  %v9032_v45 = vadd.f32 %v3448_v63, %v8880_v24  ;;  %v11438_v27 = vld [vmem:[#allocation14_spill] sm:$0xff]  ;;  %6394 = vpow2.f32 %v2677_v9 }
 0x4c8   :  { %v9029_v11 = vmul.f32 %v11436_v29, %v8679_v42  ;;  %v6385_v23 = vpop.eup %6384  ;;  %v3771_v5 = vmul.f32 %v8342_v26, %v8994_v16  ;;  %v9037_v60 = vrot.slane %v3827_v47, %v7279_v51  ;;  %v9041_v43 = vrot.slane %v8723_v48, %v11438_v27  ;;  %v11440_v1 = vld [vmem:[#allocation12_spill] sm:$0xff]  ;;  %v9048_v63 = vld [vmem:[#allocation6 + $0x30] sm:$0xff]  ;;  %v9050_v37 = vpop.permute.xlu0 %2363 }
 0x4c9   :  { %11434 = vst [vmem:[#allocation129_spill] sm:$0xff] %v9024_v33  ;;  %11437 = vst [vmem:[#allocation68_spill] sm:$0xff] %v9032_v45  ;;  %2977 = vbcast.lane.b32.xlu1 %v11440_v1, 264  ;;  %v2681_v57 = vmul.f32 1.442695, %v2652_v14  ;;  %v3727_v42 = vcombine.high %v8954_v28, %v8954_v28  ;;  %v3682_v24 = vcombine.high %v8896_v34, %v8896_v34  ;;  %v6387_v29 = vpop.eup %6386  ;;  %6396 = vpow2.f32 %v3239_v3  ;;  %v9057_v14 = vpop.permute.xlu1 %5076  ;;  %v11443_v34 = vld [vmem:[#allocation116_spill] sm:$0xff] }
 0x4ca   :  { %11439 = vst [vmem:[#allocation136_spill] sm:$0xff] %v9041_v43  ;;  %11441 = vst [vmem:[#allocation14_spill] sm:$0xff] %v9050_v37  ;;  %v3243_v30 = vmul.f32 1.442695, %v3216_v0  ;;  %v9054_v48 = vrot.slane %v9018_v15, %v6679_v61  ;;  %v3835_v1 = vcombine.high %v3827_v47, %v3827_v47  ;;  %1863 = vbcast.lane.b32.xlu0 %v9041_v43, 256  ;;  %v6389_v28 = vpop.eup %6388  ;;  %v11445_v20 = vld [vmem:[#allocation29_spill] sm:$0xff] }
 0x4cb   :  { %11442 = vst [vmem:[#allocation12_spill] sm:$0xff] %v9057_v14  ;;  %v3450_v9 = vmul.f32 %v6385_v23, %v9024_v33  ;;  %v9061_v45 = vadd.f32 %v2886_v2, %v11443_v34  ;;  %v2888_v19 = vmul.f32 %v6387_v29, %v11445_v20  ;;  %v11446_v37 = vld [vmem:[#allocation61_spill] sm:$0xff]  ;;  %v3787_v0 = vmul.f32 1.442695, %v3771_v5  ;;  %v11448_v43 = vld [vmem:[#allocation135_spill] sm:$0xff]  ;;  %v11454_v20 = vld [vmem:[#allocation138_spill] sm:$0xff] }
 0x4cc   :  { %v9066_v3 = vmul.f32 %v8753_v12, %v11446_v37  ;;  %v9070_v47 = vrot.slane %v9037_v60, %v6679_v61  ;;  %v2654_v14 = vmul.f32 %v8502_v6, %v11448_v43  ;;  %v9076_v23 = vrot.slane %v9048_v63, %v6679_v61  ;;  %v11450_v2 = vld [vmem:[#allocation73_spill] sm:$0xff]  ;;  %v9085_v37 = vpop.permute.xlu0 %2374 }
 0x4cd   :  { %11444 = vst [vmem:[#allocation116_spill] sm:$0xff] %v9061_v45  ;;  %2988 = vbcast.lane.b32.xlu1 %v11450_v2, 264  ;;  %6398 = vpow2.f32 %v2681_v57  ;;  %v11451_v29 = vld [vmem:[#allocation133_spill] sm:$0xff]  ;;  %v9082_v12 = vrot.slane %v3727_v42, %v6679_v61  ;;  %v3696_v5 = vrot.slane %v3682_v24, %v7279_v51  ;;  %11452 = vst [vmem:[#allocation73_spill] sm:$0xff] %v9085_v37  ;;  %v6391_v33 = vpop.eup %6390  ;;  %v9100_v42 = vpop.permute.xlu1 %5087 }
 0x4ce   :  { %11447 = vst [vmem:[#allocation61_spill] sm:$0xff] %v9070_v47  ;;  %11449 = vst [vmem:[#allocation135_spill] sm:$0xff] %v9076_v23  ;;  %v3218_v34 = vmul.f32 %v8502_v6, %v11451_v29  ;;  %v9088_v43 = vadd.f32 %v3450_v9, %v8927_v46  ;;  %v9092_v41 = vmul.f32 %v9070_v47, %v11454_v20  ;;  %4616 = vbcast.lane.b32.xlu0 %v9076_v23, 256  ;;  %v11456_v29 = vld [vmem:[#allocation25_spill] sm:$0xff]  ;;  %v11458_v46 = vld [vmem:[#allocation44_spill] sm:$0xff] }
 0x4cf   :  { %v3773_v57 = vmul.f32 %v8342_v26, %v9054_v48  ;;  %v9097_v2 = vrot.slane %v3835_v1, %v7279_v51  ;;  %11455 = vst [vmem:[#allocation138_spill] sm:$0xff] %v9100_v42  ;;  %v3452_v24 = vmul.f32 %v6389_v28, %v9061_v45  ;;  %v9104_v37 = vadd.f32 %v2888_v19, %v11456_v29  ;;  %v11459_v20 = vld [vmem:[#allocation140_spill] sm:$0xff]  ;;  %v11461_v23 = vld [vmem:[#allocation137_spill] sm:$0xff]  ;;  %v11463_v45 = vld [vmem:[#allocation70_spill] sm:$0xff] }
 0x4d0   :  { %11453 = vst [vmem:[#allocation133_spill] sm:$0xff] %v9088_v43  ;;  %v2890_v9 = vmul.f32 %v6391_v33, %v11458_v46  ;;  %6400 = vpow2.f32 %v3243_v30  ;;  %v9109_v43 = vmul.f32 %v8761_v59, %v11459_v20  ;;  %v2685_v47 = vmul.f32 1.442695, %v2654_v14  ;;  %v6393_v42 = vpop.eup %6392 }
 0x4d1   :  { %11457 = vst [vmem:[#allocation25_spill] sm:$0xff] %v9104_v37  ;;  %6402 = vpow2.f32 %v3787_v0  ;;  %v9113_v1 = vrot.slane %v9048_v63, %v11378_v49  ;;  %2999 = vbcast.lane.b32.xlu1 %v11461_v23, 264  ;;  %v3247_v28 = vmul.f32 1.442695, %v3218_v34  ;;  %v3775_v19 = vmul.f32 %v8342_v26, %v9082_v12  ;;  %v9120_v0 = vpop.permute.xlu0 %2385  ;;  %v9131_v34 = vpop.permute.xlu1 %3878 }
 0x4d2   :  { %v3729_v33 = vcombine.high %v9018_v15, %v9018_v15  ;;  %v3698_v30 = vcombine.high %v3696_v5, %v3696_v5  ;;  %v9123_v59 = vadd.f32 %v3452_v24, %v8949_v10  ;;  %v3791_v14 = vmul.f32 1.442695, %v3773_v57  ;;  %v6395_v20 = vpop.eup %6394 }
 0x4d3   :  { %11460 = vst [vmem:[#allocation140_spill] sm:$0xff] %v9113_v1  ;;  %v9127_v29 = vrot.slane %v9097_v2, %v6679_v61  ;;  %v3712_v23 = vrot.slane %v3696_v5, %v7279_v51  ;;  %4627 = vbcast.lane.b32.xlu0 %v9113_v1, 256  ;;  %v3454_v15 = vmul.f32 %v6393_v42, %v9104_v37  ;;  %v6397_v24 = vpop.eup %6396  ;;  %v11466_v5 = vld [vmem:[#allocation97_spill] sm:$0xff]  ;;  %6404 = vpow2.f32 %v2685_v47 }
 0x4d4   :  { %11462 = vst [vmem:[#allocation137_spill] sm:$0xff] %v9123_v59  ;;  %v9135_v46 = vadd.f32 %v2890_v9, %v11463_v45  ;;  %v3865_v10 = vcombine.high %v9037_v60, %v9037_v60  ;;  %v3220_v57 = vmul.f32 %v8502_v6, %v8735_v35  ;;  %v11465_v59 = vld [vmem:[#allocation31_spill] sm:$0xff]  ;;  %v9148_v42 = vrot.slane %v9048_v63, %v11388_v39 }
 0x4d5   :  { %v2892_v49 = vmul.f32 %v6395_v20, %v11465_v59  ;;  %v9144_v1 = vmul.f32 %v9127_v29, %v11466_v5  ;;  %v11468_v45 = vld [vmem:[#allocation75_spill] sm:$0xff]  ;;  %6406 = vpow2.f32 %v3247_v28  ;;  %v3795_v9 = vmul.f32 1.442695, %v3775_v19  ;;  %v9155_v37 = vpop.permute.xlu0 %2396  ;;  %v11472_v59 = vld [vmem:[#allocation92_spill] sm:$0xff] }
 0x4d6   :  { %11464 = vst [vmem:[#allocation70_spill] sm:$0xff] %v9135_v46  ;;  %11467 = vst [vmem:[#allocation97_spill] sm:$0xff] %v9148_v42  ;;  %1790 = vbcast.lane.b32.xlu1 %v11468_v45, 264  ;;  %v9152_v60 = vrot.slane %v3729_v33, %v6679_v61  ;;  %v3726_v35 = vrot.slane %v3698_v30, %v7279_v51  ;;  %v9158_v20 = vadd.f32 %v3454_v15, %v9008_v58  ;;  %v9163_v45 = vpop.permute.xlu1 %3889  ;;  %v11470_v15 = vld [vmem:[#allocation100_spill] sm:$0xff] }
 0x4d7   :  { %6408 = vpow2.f32 %v3791_v14  ;;  %v3820_v47 = vcombine.high %v8969_v53, %v8969_v53  ;;  %v3728_v5 = vcombine.high %v3712_v23, %v3712_v23  ;;  %4638 = vbcast.lane.b32.xlu0 %v9148_v42, 256  ;;  %v6399_v28 = vpop.eup %6398  ;;  %v3456_v19 = vmul.f32 %v6397_v24, %v9135_v46 }
 0x4d8   :  { %11469 = vst [vmem:[#allocation75_spill] sm:$0xff] %v9158_v20  ;;  %v9167_v33 = vrot.slane %v3865_v10, %v6679_v61  ;;  %v3251_v30 = vmul.f32 1.442695, %v3220_v57  ;;  %v3867_v58 = vcombine.high %v9097_v2, %v9097_v2  ;;  %v9172_v14 = vadd.f32 %v2892_v49, %v11470_v15 }
 0x4d9   :  { %v2894_v53 = vmul.f32 %v6399_v28, %v11472_v59  ;;  %v9176_v20 = vrot.slane %v3712_v23, %v6679_v61  ;;  %v9180_v42 = vrot.slane %v9048_v63, %v11306_v56  ;;  %6410 = vpow2.f32 %v3795_v9  ;;  %v9188_v24 = vpop.permute.xlu0 %2407  ;;  %v11475_v23 = vld [vmem:[#allocation90_spill] sm:$0xff] }
 0x4da   :  { %11471 = vst [vmem:[#allocation100_spill] sm:$0xff] %v9172_v14  ;;  %1801 = vbcast.lane.b32.xlu1 %v8800_v40, 264  ;;  %v6401_v10 = vpop.eup %6400  ;;  %v3777_v57 = vmul.f32 %v8342_v26, %v9152_v60  ;;  %v9186_v2 = vrot.slane %v3726_v35, %v6679_v61  ;;  %v3730_v49 = vcombine.high %v3726_v35, %v3726_v35  ;;  %11474 = vst [vmem:[#allocation148_spill] sm:$0xff] %v9188_v24  ;;  %v9203_v26 = vpop.permute.xlu1 %3900  ;;  %v11477_v59 = vld [vmem:[#allocation130_spill] sm:$0xff] }
 0x4db   :  { %11473 = vst [vmem:[#allocation147_spill] sm:$0xff] %v9180_v42  ;;  %v6403_v28 = vpop.eup %6402  ;;  %v9192_v15 = vmul.f32 %v9167_v33, %v11475_v23  ;;  %v9196_v46 = vmul.f32 %v8787_v17, %v8793_v7  ;;  %v3834_v40 = vrot.slane %v3820_v47, %v7279_v51  ;;  %v9200_v9 = vrot.slane %v3728_v5, %v6679_v61  ;;  %v11479_v7 = vld [vmem:[#allocation71_spill] sm:$0xff]  ;;  %v9222_v5 = vld [vmem:[%s10748_s1 + $0x8] sm:$0xff] }
 0x4dc   :  { %4649 = vbcast.lane.b32.xlu0 %v9180_v42, 256  ;;  %v9206_v35 = vadd.f32 %v3456_v19, %v9029_v11  ;;  %v4013_v24 = vmul.f32 %v6403_v28, %v11477_v59  ;;  %6412 = vpow2.f32 %v3251_v30  ;;  %v9211_v23 = vmul.f32 %v8837_v21, %v8833_v44  ;;  %v11485_v42 = vld [vmem:[#allocation45_spill] sm:$0xff] }
 0x4dd   :  { %v9214_v17 = vadd.f32 %v2894_v53, %v11479_v7  ;;  %v9217_v47 = vrot.slane %v3867_v58, %v6679_v61  ;;  %v3779_v11 = vmul.f32 %v9222_v5, %v9176_v20  ;;  %v9228_v19 = vrot.slane %v9048_v63, %v11310_v38  ;;  %v9237_v53 = vpop.permute.xlu0 %2418  ;;  %v6405_v28 = vpop.eup %6404 }
 0x4de   :  { %11476 = vst [vmem:[#allocation90_spill] sm:$0xff] %v9206_v35  ;;  %11478 = vst [vmem:[#allocation149_spill] sm:$0xff] %v9211_v23  ;;  %1812 = vbcast.lane.b32.xlu1 %v8844_v22, 264  ;;  %v3458_v21 = vmul.f32 %v6401_v10, %v9172_v14  ;;  %v3799_v44 = vmul.f32 1.442695, %v3777_v57  ;;  %v3781_v30 = vmul.f32 %v9222_v5, %v9186_v2  ;;  %v9247_v10 = vpop.permute.xlu1 %3911 }
 0x4df   :  { %11480 = vst [vmem:[#allocation71_spill] sm:$0xff] %v9214_v17  ;;  %11481 = vst [vmem:[#allocation150_spill] sm:$0xff] %v9228_v19  ;;  %v9235_v58 = vrot.slane %v3730_v49, %v6679_v61  ;;  %v3850_v7 = vrot.slane %v3834_v40, %v7279_v51  ;;  %v9242_v23 = vmul.f32 %v8861_v50, %v8866_v8  ;;  %v6407_v57 = vpop.eup %6406 }
 0x4e0   :  { %v3836_v59 = vcombine.high %v3834_v40, %v3834_v40  ;;  %v3783_v22 = vmul.f32 %v9222_v5, %v9200_v9  ;;  %4660 = vbcast.lane.b32.xlu0 %v9228_v19, 256  ;;  %v9250_v49 = vadd.f32 %v4013_v24, %v9092_v41  ;;  %v9253_v14 = vadd.f32 %v3458_v21, %v9066_v3  ;;  %v11487_v3 = vld [vmem:[#allocation74_spill] sm:$0xff] }
 0x4e1   :  { %11482 = vst [vmem:[#allocation151_spill] sm:$0xff] %v9242_v23  ;;  %v2896_v35 = vmul.f32 %v6405_v28, %v11485_v42  ;;  %v9258_v50 = vmul.f32 %v9217_v47, %v8820_v32  ;;  %v6409_v8 = vpop.eup %6408  ;;  %v3460_v40 = vmul.f32 %v6407_v57, %v9214_v17  ;;  %v3803_v23 = vmul.f32 1.442695, %v3779_v11  ;;  %v9273_v28 = vpop.permute.xlu0 %2429 }
 0x4e2   :  { %11483 = vst [vmem:[#allocation152_spill] sm:$0xff] %v9250_v49  ;;  %11484 = vst [vmem:[#allocation153_spill] sm:$0xff] %v9253_v14  ;;  %v9263_v19 = vmul.f32 %v8855_v31, %v8905_v52  ;;  %v9267_v41 = vrot.slane %v9048_v63, %v11325_v36  ;;  %1823 = vbcast.lane.b32.xlu1 %v8886_v4, 264  ;;  %v4015_v24 = vmul.f32 %v6409_v8, %v11487_v3  ;;  %v9282_v4 = vpop.permute.xlu1 %3922 }
 0x4e3   :  { %6414 = vpow2.f32 %v3799_v44  ;;  %v3807_v21 = vmul.f32 1.442695, %v3781_v30  ;;  %v3785_v32 = vmul.f32 %v9222_v5, %v9235_v58  ;;  %v9276_v11 = vrot.slane %v3850_v7, %v6679_v61  ;;  %v6411_v44 = vpop.eup %6410 }
 0x4e4   :  { %11486 = vst [vmem:[#allocation45_spill] sm:$0xff] %v9263_v19  ;;  %v3864_v31 = vrot.slane %v3836_v59, %v7279_v51  ;;  %v3811_v52 = vmul.f32 1.442695, %v3783_v22  ;;  %v3772_v57 = vmul.f32 %v8502_v6, %v8994_v16  ;;  %4671 = vbcast.lane.b32.xlu0 %v9267_v41, 256  ;;  %v9285_v30 = vadd.f32 %v4015_v24, %v9144_v1  ;;  %v11490_v19 = vld [vmem:[#allocation89_spill] sm:$0xff]  ;;  %v11492_v22 = vld [vmem:[#allocation139_spill] sm:$0xff] }
 0x4e5   :  { %v9288_v8 = vadd.f32 %v3460_v40, %v9109_v43  ;;  %v9291_v3 = vadd.f32 %v2896_v35, %v11490_v19  ;;  %v3774_v59 = vmul.f32 %v8502_v6, %v9054_v48  ;;  %v4017_v17 = vmul.f32 %v6411_v44, %v11492_v22  ;;  %v9307_v40 = vpop.permute.xlu0 %1214  ;;  %v11507_v22 = vld [vmem:[#allocation14_spill] sm:$0xff] }
 0x4e6   :  { %11488 = vst [vmem:[#allocation154_spill] sm:$0xff] %v9285_v30  ;;  %6416 = vpow2.f32 %v3803_v23  ;;  %v9298_v16 = vmul.f32 %v9276_v11, %v8858_v55  ;;  %v9302_v1 = vrot.slane %v9048_v63, %v11424_v25  ;;  %1834 = vbcast.lane.b32.xlu1 %v8918_v62, 264  ;;  %v6413_v43 = vpop.eup %6412  ;;  %v3866_v35 = vcombine.high %v3850_v7, %v3850_v7  ;;  %v9315_v62 = vpop.permute.xlu1 %3933  ;;  %v11513_v30 = vld [vmem:[#allocation57_spill] sm:$0xff] }
 0x4e7   :  { %11489 = vst [vmem:[#allocation155_spill] sm:$0xff] %v9288_v8  ;;  %11491 = vst [vmem:[#allocation89_spill] sm:$0xff] %v9291_v3  ;;  %6418 = vpow2.f32 %v3807_v21  ;;  %v3815_v19 = vmul.f32 1.442695, %v3785_v32  ;;  %v3776_v48 = vmul.f32 %v8502_v6, %v9082_v12  ;;  %v9310_v23 = vrot.slane %v3864_v31, %v6679_v61 }
 0x4e8   :  { %6420 = vpow2.f32 %v3811_v52  ;;  %v3789_v55 = vmul.f32 1.442695, %v3772_v57  ;;  %v3778_v24 = vmul.f32 %v8502_v6, %v9152_v60  ;;  %4682 = vbcast.lane.b32.xlu0 %v9302_v1, 256  ;;  %v3462_v7 = vmul.f32 %v6413_v43, %v9291_v3  ;;  %v11495_v43 = vld [vmem:[#allocation30_spill] sm:$0xff]  ;;  %v11510_v3 = vld [vmem:[#allocation128_spill] sm:$0xff] }
 0x4e9   :  { %v9320_v21 = vmul.f32 %v8902_v13, %v8942_v54  ;;  %v3793_v12 = vmul.f32 1.442695, %v3774_v59  ;;  %v3780_v32 = vmul.f32 %v8502_v6, %v9176_v20  ;;  %v9325_v52 = vadd.f32 %v4017_v17, %v9192_v15  ;;  %v9340_v15 = vld [vmem:[#allocation6 + $0x20] sm:$0xff]  ;;  %v9342_v17 = vpop.permute.xlu0 %1225 }
 0x4ea   :  { %v4007_v60 = vmul.f32 %v9310_v23, %v8898_v18  ;;  %v3868_v57 = vcombine.high %v3864_v31, %v3864_v31  ;;  %v9331_v44 = vrot.slane %v9048_v63, %v11438_v27  ;;  %1845 = vbcast.lane.b32.xlu1 %v11495_v43, 264  ;;  %v9335_v13 = vadd.f32 %v3462_v7, %v9196_v46  ;;  %v11498_v18 = vld [vmem:[#allocation95_spill] sm:$0xff]  ;;  %v11499_v31 = vld [vmem:[#allocation108_spill] sm:$0xff]  ;;  %v9349_v7 = vpop.permute.xlu1 %3944 }
 0x4eb   :  { %11493 = vst [vmem:[#allocation156_spill] sm:$0xff] %v9320_v21  ;;  %11494 = vst [vmem:[#allocation157_spill] sm:$0xff] %v9325_v52  ;;  %v9338_v54 = vrot.slane %v3866_v35, %v6679_v61  ;;  %6422 = vpow2.f32 %v3815_v19  ;;  %v3797_v20 = vmul.f32 1.442695, %v3776_v48  ;;  %v2435_v59 = vmul.f32 %v11499_v31, %v11498_v18  ;;  %v11500_v43 = vld [vmem:[#allocation127_spill] sm:$0xff]  ;;  %v11501_v19 = vld [vmem:[#allocation145_spill] sm:$0xff] }
 0x4ec   :  { %11496 = vst [vmem:[#allocation30_spill] sm:$0xff] %v9335_v13  ;;  %6424 = vpow2.f32 %v3789_v55  ;;  %v3801_v63 = vmul.f32 1.442695, %v3778_v24  ;;  %4693 = vbcast.lane.b32.xlu0 %v9331_v44, 256  ;;  %v3782_v46 = vmul.f32 %v8502_v6, %v9186_v2  ;;  %v9353_v48 = vmul.f32 %v11501_v19, %v11500_v43  ;;  %v9358_v18 = vld [vmem:[%s10748_s1 + $0x10] sm:$0xff]  ;;  %v11504_v24 = vld [vmem:[#allocation143_spill] sm:$0xff] }
 0x4ed   :  { %11497 = vst [vmem:[#allocation158_spill] sm:$0xff] %v9338_v54  ;;  %v6415_v35 = vpop.eup %6414  ;;  %6426 = vpow2.f32 %v3793_v12  ;;  %v3805_v21 = vmul.f32 1.442695, %v3780_v32  ;;  %11503 = vst [vmem:[#allocation108_spill] sm:$0xff] %v9358_v18  ;;  %v3784_v55 = vmul.f32 %v9358_v18, %v9200_v9  ;;  %v4009_v6 = vmul.f32 %v9338_v54, %v11504_v24  ;;  %v11506_v31 = vld [vmem:[#allocation56_spill] sm:$0xff]  ;;  %v11508_v32 = vld [vmem:[#allocation13_spill] sm:$0xff] }
 0x4ee   :  { %11502 = vst [vmem:[#allocation95_spill] sm:$0xff] %v9353_v48  ;;  %v9365_v2 = vrot.slane %v3868_v57, %v6679_v61  ;;  %v2437_v43 = vmul.f32 %v11507_v22, %v11506_v31  ;;  %v9371_v12 = vrot.slane %v9340_v15, %v6679_v61  ;;  %1856 = vbcast.lane.b32.xlu1 %v11508_v32, 264  ;;  %v11509_v19 = vld [vmem:[#allocation84_spill] sm:$0xff]  ;;  %v11511_v52 = vld [vmem:[#allocation10_spill] sm:$0xff]  ;;  %v11514_v24 = vld [vmem:[#allocation73_spill] sm:$0xff]  ;;  %6428 = vpow2.f32 %v3797_v20  ;;  %v9381_v57 = vpop.permute.xlu0 %1236  ;;  %v9389_v32 = vpop.permute.xlu1 %3955 }
 0x4ef   :  { %v4019_v48 = vmul.f32 %v6415_v35, %v11509_v19  ;;  %v9377_v9 = vmul.f32 %v11511_v52, %v11510_v3  ;;  %v2439_v49 = vmul.f32 %v11514_v24, %v11513_v30  ;;  %11515 = vst [vmem:[#allocation143_spill] sm:$0xff] %v9381_v57  ;;  %v9384_v22 = vsel %vm31_vm0, %v2435_v59, 0.0  ;;  %11516 = vst [vmem:[#allocation56_spill] sm:$0xff] %v9389_v32  ;;  %v11517_v52 = vld [vmem:[#allocation125_spill] sm:$0xff]  ;;  %v11518_v20 = vld [vmem:[#allocation26_spill] sm:$0xff] }
 0x4f0   :  { %11505 = vst [vmem:[#allocation127_spill] sm:$0xff] %v9365_v2  ;;  %v6417_v54 = vpop.eup %6416  ;;  %6430 = vpow2.f32 %v3801_v63  ;;  %v3809_v31 = vmul.f32 1.442695, %v3782_v46  ;;  %3484 = vbcast.lane.b32.xlu0 %v9371_v12, 256  ;;  %v3786_v35 = vmul.f32 %v9358_v18, %v9235_v58  ;;  %v4011_v30 = vmul.f32 %v9365_v2, %v11517_v52  ;;  %v11520_v46 = vld [vmem:[#allocation9_spill] sm:$0xff]  ;;  %v11521_v58 = vld [vmem:[#allocation8_spill] sm:$0xff] }
 0x4f1   :  { %11512 = vst [vmem:[#allocation145_spill] sm:$0xff] %v9377_v9  ;;  %v6419_v3 = vpop.eup %6418  ;;  %v2441_v24 = vmul.f32 %v9120_v0, %v11518_v20  ;;  %6432 = vpow2.f32 %v3805_v21  ;;  %v3813_v9 = vmul.f32 1.442695, %v3784_v55  ;;  %v9396_v63 = vadd.f32 %v4019_v48, %v9258_v50  ;;  %v11523_v32 = vld [vmem:[#allocation136_spill] sm:$0xff]  ;;  %v11524_v52 = vld [vmem:[#allocation142_spill] sm:$0xff]  ;;  %v11526_v50 = vld [vmem:[#allocation101_spill] sm:$0xff] }
 0x4f2   :  { %v6421_v59 = vpop.eup %6420  ;;  %v4021_v19 = vmul.f32 %v6417_v54, %v11520_v46  ;;  %v9400_v57 = vsel %vm31_vm0, %v2437_v43, 0.0  ;;  %v9404_v18 = vrot.slane %v9340_v15, %v11521_v58  ;;  %1867 = vbcast.lane.b32.xlu1 %v11523_v32, 264  ;;  %v4023_v2 = vmul.f32 %v6419_v3, %v11524_v52  ;;  %v11525_v0 = vld [vmem:[#allocation144_spill] sm:$0xff]  ;;  %v9414_v54 = vpop.permute.xlu0 %1247  ;;  %v11529_v20 = vld [vmem:[#allocation61_spill] sm:$0xff] }
 0x4f3   :  { %11519 = vst [vmem:[#allocation14_spill] sm:$0xff] %v9396_v63  ;;  %v4025_v21 = vmul.f32 %v6421_v59, %v11525_v0  ;;  %v9410_v55 = vsel %vm31_vm0, %v2439_v49, 0.0  ;;  %v2443_v48 = vmul.f32 %v9155_v37, %v11526_v50  ;;  %11527 = vst [vmem:[#allocation128_spill] sm:$0xff] %v9414_v54  ;;  %v3998_v46 = vmul.f32 %v11529_v20, %v9131_v34  ;;  %v2357_v3 = vpop.permute.xlu1 %2356 }
 0x4f4   :  { %11522 = vst [vmem:[#allocation13_spill] sm:$0xff] %v9404_v18  ;;  %v9417_v43 = vadd.f32 %v4021_v19, %v9298_v16  ;;  %6434 = vpow2.f32 %v3809_v31  ;;  %3495 = vbcast.lane.b32.xlu0 %v9404_v18, 256  ;;  %v3817_v32 = vmul.f32 1.442695, %v3786_v35  ;;  %v9422_v0 = vadd.f32 %v4023_v2, %v4007_v60  ;;  %v11533_v60 = vld [vmem:[#allocation135_spill] sm:$0xff] }
 0x4f5   :  { %v6423_v59 = vpop.eup %6422  ;;  %v9424_v49 = vadd.f32 %v4025_v21, %v4009_v6  ;;  %v9427_v37 = vsel %vm31_vm0, %v2441_v24, 0.0  ;;  %6436 = vpow2.f32 %v3813_v9  ;;  %v4000_v16 = vmul.f32 %v9127_v29, %v9163_v45  ;;  %v11534_v9 = vld [vmem:[#allocation11_spill] sm:$0xff]  ;;  %v11535_v29 = vld [vmem:[#allocation105_spill] sm:$0xff]  ;;  %v11536_v45 = vld [vmem:[#allocation148_spill] sm:$0xff] }
 0x4f6   :  { %11528 = vst [vmem:[#allocation10_spill] sm:$0xff] %v9417_v43  ;;  %11530 = vst [vmem:[#allocation57_spill] sm:$0xff] %v9422_v0  ;;  %v6425_v50 = vpop.eup %6424  ;;  %v9433_v34 = vrot.slane %v9340_v15, %v11388_v39  ;;  %v9437_v19 = vrot.slane %v9340_v15, %v11306_v56  ;;  %4620 = vbcast.lane.b32.xlu1 %v11533_v60, 264  ;;  %v9442_v6 = vrot.slane %v9340_v15, %v11310_v38  ;;  %v9450_v21 = vpop.permute.xlu0 %1258  ;;  %v11538_v60 = vld [vmem:[#allocation68_spill] sm:$0xff] }
 0x4f7   :  { %11531 = vst [vmem:[#allocation73_spill] sm:$0xff] %v9424_v49  ;;  %v6427_v2 = vpop.eup %6426  ;;  %v4027_v31 = vmul.f32 %v6423_v59, %v11534_v9  ;;  %v9446_v35 = vsel %vm31_vm0, %v2443_v48, 0.0  ;;  %v2445_v24 = vmul.f32 %v11536_v45, %v11535_v29  ;;  %11537 = vst [vmem:[#allocation26_spill] sm:$0xff] %v9450_v21  ;;  %v9454_v20 = vrot.slane %v9340_v15, %v11325_v36  ;;  %v11539_v49 = vld [vmem:[#allocation133_spill] sm:$0xff]  ;;  %v2368_v48 = vpop.permute.xlu1 %2367  ;;  %v9461_v59 = vld [vmem:[#allocation6 + $0x38] sm:$0xff] }
 0x4f8   :  { %11532 = vst [vmem:[#allocation125_spill] sm:$0xff] %v9433_v34  ;;  %v4014_v52 = vmul.f32 %v6425_v50, %v11538_v60  ;;  %v4016_v0 = vmul.f32 %v6427_v2, %v11539_v49  ;;  %v4002_v43 = vmul.f32 %v9167_v33, %v9203_v26  ;;  %6438 = vpow2.f32 %v3817_v32  ;;  %3506 = vbcast.lane.b32.xlu0 %v9433_v34, 256  ;;  %v6429_v29 = vpop.eup %6428  ;;  %v11541_v9 = vld [vmem:[#allocation112_spill] sm:$0xff]  ;;  %v11544_v2 = vld [vmem:[#allocation137_spill] sm:$0xff]  ;;  %v11545_v49 = vld [vmem:[#allocation78_spill] sm:$0xff] }
 0x4f9   :  { %v9463_v45 = vadd.f32 %v4027_v31, %v4011_v30  ;;  %v2438_v63 = vmul.f32 %v2368_v48, %v11541_v9  ;;  %v9468_v21 = vrot.slane %v9340_v15, %v11424_v25  ;;  %v9472_v50 = vrot.slane %v9340_v15, %v11438_v27  ;;  %v11546_v31 = vld [vmem:[#allocation140_spill] sm:$0xff]  ;;  %v11548_v15 = vld [vmem:[#allocation75_spill] sm:$0xff] }
 0x4fa   :  { %v6431_v33 = vpop.eup %6430  ;;  %v9474_v26 = vadd.f32 %v4014_v52, %v3998_v46  ;;  %v9476_v32 = vadd.f32 %v4016_v0, %v4000_v16  ;;  %v4018_v60 = vmul.f32 %v6429_v29, %v11544_v2  ;;  %v2436_v30 = vmul.f32 %v2357_v3, %v11545_v49  ;;  %4631 = vbcast.lane.b32.xlu1 %v11546_v31, 264  ;;  %v9487_v18 = vpop.permute.xlu0 %1269  ;;  %v11550_v3 = vld [vmem:[#allocation90_spill] sm:$0xff]  ;;  %v11553_v31 = vld [vmem:[#allocation97_spill] sm:$0xff] }
 0x4fb   :  { %11540 = vst [vmem:[#allocation8_spill] sm:$0xff] %v9463_v45  ;;  %v6433_v9 = vpop.eup %6432  ;;  %v9482_v48 = vsel %vm31_vm0, %v2445_v24, 0.0  ;;  %v11547_v45 = vld [vmem:[#allocation47_spill] sm:$0xff]  ;;  %v4020_v34 = vmul.f32 %v6431_v33, %v11548_v15  ;;  %v9491_v46 = vrot.slane %v9461_v59, %v6679_v61  ;;  %v4004_v0 = vmul.f32 %v9217_v47, %v9247_v10  ;;  %v2379_v16 = vpop.permute.xlu1 %2378  ;;  %v3680_v24 = vld [vmem:[#allocation6 + $0x28] sm:$0xff] }
 0x4fc   :  { %11542 = vst [vmem:[#allocation136_spill] sm:$0xff] %v9474_v26  ;;  %11543 = vst [vmem:[#allocation101_spill] sm:$0xff] %v9476_v32  ;;  %v2447_v54 = vmul.f32 %v9237_v53, %v11547_v45  ;;  %v9493_v52 = vadd.f32 %v4018_v60, %v4002_v43  ;;  %v4022_v49 = vmul.f32 %v6433_v9, %v11550_v3  ;;  %3517 = vbcast.lane.b32.xlu0 %v9437_v19, 256  ;;  %v11552_v45 = vld [vmem:[#allocation79_spill] sm:$0xff] }
 0x4fd   :  { %v9501_v53 = vrot.slane %v9461_v59, %v11521_v58  ;;  %v2461_v29 = vsel %vm31_vm0, %v2438_v63, 0.0  ;;  %v2440_v33 = vmul.f32 %v2379_v16, %v11552_v45  ;;  %v9507_v43 = vrot.slane %v9461_v59, %v11388_v39 }
 0x4fe   :  { %11549 = vst [vmem:[#allocation61_spill] sm:$0xff] %v9493_v52  ;;  %v9511_v47 = vrot.slane %v9461_v59, %v11306_v56  ;;  %v6435_v10 = vpop.eup %6434  ;;  %v2452_v60 = vsel %vm31_vm0, %v2436_v30, 0.0  ;;  %4642 = vbcast.lane.b32.xlu1 %v11553_v31, 264  ;;  %v9517_v9 = vrot.slane %v9461_v59, %v11310_v38  ;;  %v9521_v63 = vrot.slane %v9461_v59, %v11325_v36  ;;  %v9534_v15 = vpop.permute.xlu0 %1280 }
 0x4ff   :  { %11551 = vst [vmem:[#allocation135_spill] sm:$0xff] %v9501_v53  ;;  %v9525_v16 = vrot.slane %v9461_v59, %v11424_v25  ;;  %v6437_v45 = vpop.eup %6436  ;;  %v9528_v3 = vsel %vm31_vm0, %v2447_v54, 0.0  ;;  %v9531_v30 = vmul.f32 %v6435_v10, %v9253_v14  ;;  %v2470_v31 = vsel %vm31_vm0, %v2440_v33, 0.0  ;;  %11555 = vst [vmem:[#allocation148_spill] sm:$0xff] %v9534_v15  ;;  %v2390_v54 = vpop.permute.xlu1 %2389  ;;  %v4240_v14 = vld [vmem:[#allocation3 + $0x30] sm:$0xff] }
 0x500   :  { %v9537_v2 = vrot.slane %v3680_v24, %v6679_v61  ;;  %v9539_v52 = vadd.f32 %v4020_v34, %v4004_v0  ;;  %v9542_v32 = vmul.f32 %v6437_v45, %v9288_v8  ;;  %v2462_v26 = vadd.f32 %v2461_v29, %v9400_v57  ;;  %3528 = vbcast.lane.b32.xlu0 %v9442_v6, 256  ;;  %v11559_v45 = vld [vmem:[#allocation64_spill] sm:$0xff]  ;;  %v11560_v29 = vld [vmem:[#allocation147_spill] sm:$0xff] }
 0x501   :  { %11554 = vst [vmem:[#allocation105_spill] sm:$0xff] %v9525_v16  ;;  %v9547_v10 = vrot.slane %v3680_v24, %v11521_v58  ;;  %v2453_v33 = vadd.f32 %v2452_v60, %v9384_v22  ;;  %v2471_v15 = vadd.f32 %v2470_v31, %v9410_v55  ;;  %v11558_v16 = vld [vmem:[#allocation29_spill] sm:$0xff]  ;;  %v9553_v34 = vrot.slane %v3680_v24, %v11388_v39 }
 0x502   :  { %11556 = vst [vmem:[#allocation112_spill] sm:$0xff] %v9537_v2  ;;  %11557 = vst [vmem:[#allocation78_spill] sm:$0xff] %v9539_v52  ;;  %v2442_v2 = vmul.f32 %v2390_v54, %v11558_v16  ;;  %v6439_v0 = vpop.eup %6438  ;;  %v2449_v57 = vmul.f32 %v9273_v28, %v11559_v45  ;;  %4653 = vbcast.lane.b32.xlu1 %v11560_v29, 264  ;;  %v9559_v8 = vrot.slane %v3680_v24, %v11306_v56  ;;  %v9570_v60 = vpop.permute.xlu0 %1291  ;;  %v9576_v56 = vld [vmem:[#allocation3 + $0x38] sm:$0xff] }
 0x503   :  { %v9562_v58 = vrot.slane %v3680_v24, %v11310_v38  ;;  %v9565_v22 = vrot.slane %v3680_v24, %v11325_v36  ;;  %v4006_v55 = vmul.f32 %v9276_v11, %v9282_v4  ;;  %v9573_v28 = vrot.slane %v3680_v24, %v11424_v25  ;;  %11564 = vst [vmem:[#allocation97_spill] sm:$0xff] %v9576_v56  ;;  %v2401_v36 = vpop.permute.xlu1 %2400 }
 0x504   :  { %v2479_v39 = vsel %vm31_vm0, %v2442_v2, 0.0  ;;  %v4255_v16 = vrot.slane %v4240_v14, %v7279_v51  ;;  %v2463_v31 = vrot.slane %v2462_v26, 4  ;;  %3539 = vbcast.lane.b32.xlu0 %v9454_v20, 256  ;;  %v9581_v54 = vrot.slane %v3680_v24, %v11438_v27  ;;  %v11567_v2 = vld [vmem:[#allocation44_spill] sm:$0xff] }
 0x505   :  { %11561 = vst [vmem:[#allocation140_spill] sm:$0xff] %v9562_v58  ;;  %11562 = vst [vmem:[#allocation47_spill] sm:$0xff] %v9565_v22  ;;  %v2480_v38 = vadd.f32 %v2479_v39, %v9427_v37  ;;  %v9585_v11 = vrot.slane %v9461_v59, %v11438_v27  ;;  %v2454_v4 = vrot.slane %v2453_v33, 4  ;;  %v2472_v25 = vrot.slane %v2471_v15, 4  ;;  %v11568_v39 = vld [vmem:[#allocation150_spill] sm:$0xff] }
 0x506   :  { %11563 = vst [vmem:[#allocation79_spill] sm:$0xff] %v9573_v28  ;;  %11565 = vst [vmem:[#allocation29_spill] sm:$0xff] %v9581_v54  ;;  %v2444_v45 = vmul.f32 %v2401_v36, %v11567_v2  ;;  %v4248_v29 = vcombine.high %v4240_v14, %v4240_v14  ;;  %v9589_v52 = vsel %vm31_vm0, %v2449_v57, 0.0  ;;  %v9592_v28 = vmul.f32 %v6439_v0, %v9335_v13  ;;  %v11572_v36 = vld [vmem:[#allocation93_spill] sm:$0xff] }
 0x507   :  { %11566 = vst [vmem:[#allocation64_spill] sm:$0xff] %v9585_v11  ;;  %v2481_v37 = vrot.slane %v2480_v38, 4  ;;  %4664 = vbcast.lane.b32.xlu1 %v11568_v39, 264  ;;  %v9597_v24 = vrot.slane %v9576_v56, %v7279_v51  ;;  %v9599_v27 = vadd.f32 %v4022_v49, %v4006_v55  ;;  %v9602_v11 = vpop.permute.xlu0 %2918  ;;  %v4271_v14 = vrot.slane %v4255_v16, %v7279_v51  ;;  %v2412_v13 = vpop.permute.xlu1 %2411 }
 0x508   :  { %v2488_v59 = vsel %vm31_vm0, %v2444_v45, 0.0  ;;  %11571 = vst [vmem:[#allocation150_spill] sm:$0xff] %v9602_v11  ;;  %v4263_v57 = vcombine.high %v4255_v16, %v4255_v16  ;;  %v1297_v0 = vmul.f32 %v9307_v40, %v11572_v36  ;;  %v2464_v2 = vadd.f32 %v2463_v31, %v2462_v26  ;;  %3550 = vbcast.lane.b32.xlu0 %v9468_v21, 256  ;;  %v11573_v45 = vld [vmem:[#allocation31_spill] sm:$0xff]  ;;  %v11586_v11 = vld [vmem:[#allocation13_spill] sm:$0xff] }
 0x509   :  { %11569 = vst [vmem:[#allocation147_spill] sm:$0xff] %v9597_v24  ;;  %11570 = vst [vmem:[#allocation44_spill] sm:$0xff] %v9599_v27  ;;  %v2489_v39 = vadd.f32 %v2488_v59, %v9446_v35  ;;  %v2455_v55 = vadd.f32 %v2454_v4, %v2453_v33  ;;  %v2473_v27 = vadd.f32 %v2472_v25, %v2471_v15 }
 0x50a   :  { %v2446_v54 = vmul.f32 %v2412_v13, %v11573_v45  ;;  %v9613_v22 = vrot.slane %v4248_v29, %v7279_v51  ;;  %v2482_v16 = vadd.f32 %v2481_v37, %v2480_v38  ;;  %v9618_v40 = vrot.slane %v9597_v24, %v7279_v51  ;;  %v11576_v37 = vld [vmem:[#allocation92_spill] sm:$0xff] }
 0x50b   :  { %v2490_v58 = vrot.slane %v2489_v39, 4  ;;  %4675 = vbcast.lane.b32.xlu1 %v9267_v41, 264  ;;  %v4008_v26 = vmul.f32 %v9310_v23, %v9315_v62  ;;  %v9625_v13 = vpop.permute.xlu0 %2929  ;;  %v9628_v33 = vrot.slane %v4271_v14, %v6679_v61  ;;  %v9631_v31 = vrot.slane %v4263_v57, %v7279_v51  ;;  %v2423_v25 = vpop.permute.xlu1 %2422 }
 0x50c   :  { %11574 = vst [vmem:[#allocation93_spill] sm:$0xff] %v9618_v40  ;;  %v2497_v15 = vsel %vm31_vm0, %v2446_v54, 0.0  ;;  %11575 = vst [vmem:[#allocation31_spill] sm:$0xff] %v9625_v13  ;;  %v2465_v41 = vrot.slane %v2464_v2, 2  ;;  %3561 = vbcast.lane.b32.xlu0 %v9472_v50, 256  ;;  %v4293_v29 = vcombine.high %v4271_v14, %v4271_v14  ;;  %v9636_v23 = vsel %vm31_vm0, %v1297_v0, 0.0 }
 0x50d   :  { %v2491_v38 = vadd.f32 %v2490_v58, %v2489_v39  ;;  %v2498_v4 = vadd.f32 %v2497_v15, %v9482_v48  ;;  %v2456_v62 = vrot.slane %v2455_v55, 2  ;;  %v2474_v54 = vrot.slane %v2473_v27, 2  ;;  %v11585_v13 = vld [vmem:[#allocation107_spill] sm:$0xff] }
 0x50e   :  { %v2448_v59 = vmul.f32 %v2423_v25, %v11576_v37  ;;  %v2483_v36 = vrot.slane %v2482_v16, 2  ;;  %v9642_v58 = vrot.slane %v9613_v22, %v7279_v51  ;;  %v4264_v48 = vcombine.high %v9613_v22, %v9613_v22 }
 0x50f   :  { %v2499_v45 = vrot.slane %v2498_v4, 4  ;;  %4686 = vbcast.lane.b32.xlu1 %v9302_v1, 264  ;;  %v9647_v14 = vadd.f32 %v9531_v30, %v4008_v26  ;;  %v2492_v57 = vrot.slane %v2491_v38, 2  ;;  %v9650_v39 = vpop.permute.xlu0 %2940  ;;  %v9654_v15 = vrot.slane %v9618_v40, %v6679_v61  ;;  %v2434_v49 = vpop.permute.xlu1 %2433 }
 0x510   :  { %v2506_v0 = vsel %vm31_vm0, %v2448_v59, 0.0  ;;  %11578 = vst [vmem:[#allocation159_spill] sm:$0xff] %v9650_v39  ;;  %v2466_v1 = vadd.f32 %v2465_v41, %v2464_v2  ;;  %5182 = vbcast.lane.b32.xlu0 %v9491_v46, 256  ;;  %v4337_v30 = vmul.f32 %v9222_v5, %v9628_v33  ;;  %v2457_v22 = vadd.f32 %v2456_v62, %v2455_v55 }
 0x511   :  { %11577 = vst [vmem:[#allocation92_spill] sm:$0xff] %v9647_v14  ;;  %11579 = vst [vmem:[#allocation160_spill] sm:$0xff] %v9654_v15  ;;  %v2500_v25 = vadd.f32 %v2499_v45, %v2498_v4  ;;  %v2507_v37 = vadd.f32 %v2506_v0, %v9528_v3  ;;  %v2475_v26 = vadd.f32 %v2474_v54, %v2473_v27  ;;  %v11580_v45 = vld [vmem:[#allocation32_spill] sm:$0xff]  ;;  %v11584_v15 = vld [vmem:[#allocation49_spill] sm:$0xff] }
 0x512   :  { %v2450_v59 = vmul.f32 %v2434_v49, %v11485_v42  ;;  %v9663_v35 = vrot.slane %v9631_v31, %v6679_v61  ;;  %v2484_v2 = vadd.f32 %v2483_v36, %v2482_v16  ;;  %v9667_v3 = vrot.slane %v4293_v29, %v6679_v61 }
 0x513   :  { %v2501_v41 = vrot.slane %v2500_v25, 2  ;;  %v2508_v4 = vrot.slane %v2507_v37, 4  ;;  %4697 = vbcast.lane.b32.xlu1 %v9331_v44, 264  ;;  %v1299_v55 = vmul.f32 %v9342_v17, %v11580_v45  ;;  %v2493_v27 = vadd.f32 %v2492_v57, %v2491_v38  ;;  %v9672_v49 = vpop.permute.xlu0 %2951  ;;  %v1219_v29 = vpop.permute.xlu1 %1218 }
 0x514   :  { %v2515_v42 = vsel %vm31_vm0, %v2450_v59, 0.0  ;;  %11581 = vst [vmem:[#allocation32_spill] sm:$0xff] %v9672_v49  ;;  %v4295_v62 = vcombine.high %v9631_v31, %v9631_v31  ;;  %v2467_v16 = vrot.slane %v2466_v1, 1  ;;  %5193 = vbcast.lane.b32.xlu0 %v9501_v53, 256  ;;  %v2458_v0 = vrot.slane %v2457_v22, 1  ;;  %v11582_v31 = vld [vmem:[#allocation158_spill] sm:$0xff] }
 0x515   :  { %v2502_v54 = vadd.f32 %v2501_v41, %v2500_v25  ;;  %v2509_v36 = vadd.f32 %v2508_v4, %v2507_v37  ;;  %v2516_v44 = vadd.f32 %v2515_v42, %v9589_v52  ;;  %v2476_v17 = vrot.slane %v2475_v26, 1 }
 0x516   :  { %v9680_v38 = vrot.slane %v9642_v58, %v6679_v61  ;;  %v9683_v57 = vrot.slane %v4264_v48, %v7279_v51  ;;  %v4010_v59 = vmul.f32 %v11582_v31, %v9349_v7  ;;  %v2485_v25 = vrot.slane %v2484_v2, 1 }
 0x517   :  { %v2510_v37 = vrot.slane %v2509_v36, 2  ;;  %v2517_v41 = vrot.slane %v2516_v44, 4  ;;  %3488 = vbcast.lane.b32.xlu1 %v9371_v12, 264  ;;  %v2494_v52 = vrot.slane %v2493_v27, 1  ;;  %v9688_v4 = vpop.permute.xlu0 %2962  ;;  %v4353_v45 = vmul.f32 1.442695, %v4337_v30  ;;  %v1230_v40 = vpop.permute.xlu1 %1229 }
 0x518   :  { %11583 = vst [vmem:[#allocation158_spill] sm:$0xff] %v9688_v4  ;;  %v4339_v42 = vmul.f32 %v9222_v5, %v9663_v35  ;;  %v4341_v48 = vmul.f32 %v9222_v5, %v9667_v3  ;;  %v2468_v14 = vadd.f32 %v2467_v16, %v2466_v1  ;;  %v2503_v56 = vrot.slane %v2502_v54, 1  ;;  %5204 = vbcast.lane.b32.xlu0 %v9507_v43, 256 }
 0x519   :  { %v2511_v7 = vadd.f32 %v2510_v37, %v2509_v36  ;;  %v2518_v31 = vadd.f32 %v2517_v41, %v2516_v44  ;;  %v1322_v12 = vsel %vm31_vm0, %v1299_v55, 0.0  ;;  %v2459_v24 = vadd.f32 %v2458_v0, %v2457_v22  ;;  %v11589_v0 = vld [vmem:[#allocation109_spill] sm:$0xff] }
 0x51a   :  { %v2477_v51 = vadd.f32 %v2476_v17, %v2475_v26  ;;  %v1300_v4 = vmul.f32 %v1230_v40, %v11584_v15  ;;  %v2486_v30 = vadd.f32 %v2485_v25, %v2484_v2  ;;  %v1298_v53 = vmul.f32 %v1219_v29, %v11585_v13  ;;  %v11587_v40 = vld [vmem:[#allocation33_spill] sm:$0xff]  ;;  %v11588_v15 = vld [vmem:[#allocation143_spill] sm:$0xff] }
 0x51b   :  { %v2512_v49 = vrot.slane %v2511_v7, 1  ;;  %v2519_v39 = vrot.slane %v2518_v31, 2  ;;  %3499 = vbcast.lane.b32.xlu1 %v11586_v11, 264  ;;  %v2495_v1 = vadd.f32 %v2494_v52, %v2493_v27  ;;  %v9699_v16 = vpop.permute.xlu0 %2973  ;;  %v9702_v36 = vrot.slane %v4295_v62, %v6679_v61  ;;  %v1241_v27 = vpop.permute.xlu1 %1240 }
 0x51c   :  { %v4345_v55 = vmul.f32 %v9222_v5, %v9680_v38  ;;  %v9708_v22 = vrot.slane %v9683_v57, %v6679_v61  ;;  %v1301_v26 = vmul.f32 %v11588_v15, %v11587_v40  ;;  %v2531_v13 = vsel %vm1393_vm10, %v2468_v14, %v2459_v24  ;;  %5215 = vbcast.lane.b32.xlu0 %v9511_v47, 256  ;;  %v11592_v14 = vld [vmem:[#allocation42_spill] sm:$0xff] }
 0x51d   :  { %v2504_v2 = vadd.f32 %v2503_v56, %v2502_v54  ;;  %v2520_v11 = vadd.f32 %v2519_v39, %v2518_v31  ;;  %v2532_v62 = vsel %vm1395_vm11, %v2477_v51, %v2531_v13  ;;  %v2513_v44 = vadd.f32 %v2512_v49, %v2511_v7  ;;  %v11591_v56 = vld [vmem:[#allocation125_spill] sm:$0xff]  ;;  %v11593_v39 = vld [vmem:[#allocation128_spill] sm:$0xff] }
 0x51e   :  { %v1323_v29 = vsel %vm31_vm0, %v1300_v4, 0.0  ;;  %v1302_v17 = vmul.f32 %v1241_v27, %v11589_v0  ;;  %v9718_v25 = vadd.f32 %v9542_v32, %v4010_v59  ;;  %v2533_v37 = vsel %vm1397_vm12, %v2486_v30, %v2532_v62  ;;  %v11597_v0 = vld [vmem:[#allocation56_spill] sm:$0xff] }
 0x51f   :  { %v2521_v41 = vrot.slane %v2520_v11, 1  ;;  %v1314_v24 = vsel %vm31_vm0, %v1298_v53, 0.0  ;;  %3510 = vbcast.lane.b32.xlu1 %v11591_v56, 264  ;;  %v1303_v54 = vmul.f32 %v11593_v39, %v11592_v14  ;;  %v2534_v51 = vsel %vm1399_vm13, %v2495_v1, %v2533_v37  ;;  %v9727_v52 = vpop.permute.xlu0 %2984  ;;  %v1252_v53 = vpop.permute.xlu1 %1251  ;;  %v11594_v1 = vld [vmem:[#allocation50_spill] sm:$0xff]  ;;  %v11599_v14 = vld [vmem:[#allocation51_spill] sm:$0xff] }
 0x520   :  { %11590 = vst [vmem:[#allocation49_spill] sm:$0xff] %v9718_v25  ;;  %v1332_v49 = vsel %vm31_vm0, %v1302_v17, 0.0  ;;  %v4357_v4 = vmul.f32 1.442695, %v4339_v42  ;;  %v1331_v32 = vsel %vm31_vm0, %v1301_v26, 0.0  ;;  %v2535_v59 = vsel %vm1401_vm14, %v2504_v2, %v2534_v51  ;;  %5226 = vbcast.lane.b32.xlu0 %v9517_v9, 256 }
 0x521   :  { %v2522_v7 = vadd.f32 %v2521_v41, %v2520_v11  ;;  %v1324_v31 = vadd.f32 %v1323_v29, %v1322_v12  ;;  %v2536_v30 = vsel %vm1403_vm15, %v2513_v44, %v2535_v59  ;;  %v1315_v40 = vadd.f32 %v1314_v24, %v9636_v23  ;;  %v11595_v2 = vld [vmem:[#allocation67_spill] sm:$0xff]  ;;  %v11596_v11 = vld [vmem:[#allocation26_spill] sm:$0xff] }
 0x522   :  { %v1333_v15 = vadd.f32 %v1332_v49, %v1331_v32  ;;  %v1304_v13 = vmul.f32 %v1252_v53, %v11594_v1  ;;  %6440 = vpow2.f32 %v4353_v45  ;;  %v4361_v42 = vmul.f32 1.442695, %v4341_v48  ;;  %v11598_v17 = vld [vmem:[#allocation127_spill] sm:$0xff]  ;;  %v11602_v1 = vld [vmem:[#allocation105_spill] sm:$0xff] }
 0x523   :  { %v2537_v27 = vsel %vm1405_vm1, %v2522_v7, %v2536_v30  ;;  %3521 = vbcast.lane.b32.xlu1 %v9437_v19, 264  ;;  %v4343_v26 = vmul.f32 %v9222_v5, %v9702_v36  ;;  %v1340_v12 = vsel %vm31_vm0, %v1303_v54, 0.0  ;;  %v1305_v62 = vmul.f32 %v11596_v11, %v11595_v2  ;;  %v9744_v44 = vpop.permute.xlu0 %2995  ;;  %v1263_v37 = vpop.permute.xlu1 %1262  ;;  %v11600_v32 = vld [vmem:[#allocation43_spill] sm:$0xff] }
 0x524   :  { %2540 = vst.msk [vmem:[#allocation2 + $0x10] sm:$0xff] %vm31_vm0, %v2537_v27  ;;  %v1341_v23 = vsel %vm31_vm0, %v1304_v13, 0.0  ;;  %v4369_v29 = vmul.f32 1.442695, %v4345_v55  ;;  %v4012_v19 = vmul.f32 %v11598_v17, %v11597_v0  ;;  %v1325_v45 = vrot.slane %v1324_v31, 4  ;;  %5237 = vbcast.lane.b32.xlu0 %v9521_v63, 256 }
 0x525   :  { %v1342_v48 = vadd.f32 %v1341_v23, %v1340_v12  ;;  %v4347_v41 = vmul.f32 %v9222_v5, %v9708_v22  ;;  %v1316_v24 = vrot.slane %v1315_v40, 4  ;;  %v1334_v56 = vrot.slane %v1333_v15, 4  ;;  %v11603_v12 = vld [vmem:[#allocation113_spill] sm:$0xff]  ;;  %v11607_v23 = vld [vmem:[#allocation148_spill] sm:$0xff] }
 0x526   :  { %v1306_v39 = vmul.f32 %v1263_v37, %v11599_v14  ;;  %6442 = vpow2.f32 %v4357_v4  ;;  %v4294_v55 = vcombine.high %v9642_v58, %v9642_v58  ;;  %v4296_v51 = vcombine.high %v9683_v57, %v9683_v57  ;;  %v11609_v37 = vld [vmem:[#allocation108_spill] sm:$0xff]  ;;  %v11610_v14 = vld [vmem:[#allocation55_spill] sm:$0xff] }
 0x527   :  { %v1343_v54 = vrot.slane %v1342_v48, 4  ;;  %3532 = vbcast.lane.b32.xlu1 %v9442_v6, 264  ;;  %6444 = vpow2.f32 %v4361_v42  ;;  %v1349_v49 = vsel %vm31_vm0, %v1305_v62, 0.0  ;;  %v1307_v59 = vmul.f32 %v9487_v18, %v11600_v32  ;;  %v9761_v53 = vpop.permute.xlu0 %1786  ;;  %v1274_v13 = vpop.permute.xlu1 %1273  ;;  %v11606_v62 = vld [vmem:[#allocation98_spill] sm:$0xff] }
 0x528   :  { %v1350_v7 = vsel %vm31_vm0, %v1306_v39, 0.0  ;;  %v4365_v4 = vmul.f32 1.442695, %v4343_v26  ;;  %v9764_v30 = vadd.f32 %v9592_v28, %v4012_v19  ;;  %v1326_v6 = vadd.f32 %v1325_v45, %v1324_v31  ;;  %5248 = vbcast.lane.b32.xlu0 %v11602_v1, 256  ;;  %v11608_v19 = vld [vmem:[#allocation112_spill] sm:$0xff] }
 0x529   :  { %v1351_v58 = vadd.f32 %v1350_v7, %v1349_v49  ;;  %v4373_v27 = vmul.f32 1.442695, %v4347_v41  ;;  %v1317_v57 = vadd.f32 %v1316_v24, %v1315_v40  ;;  %v1335_v42 = vadd.f32 %v1334_v56, %v1333_v15 }
 0x52a   :  { %11601 = vst [vmem:[#allocation107_spill] sm:$0xff] %v9764_v30  ;;  %v1308_v2 = vmul.f32 %v1274_v13, %v11603_v12  ;;  %6446 = vpow2.f32 %v4369_v29  ;;  %v1344_v18 = vadd.f32 %v1343_v54, %v1342_v48  ;;  %v9770_v26 = vrot.slane %v4294_v55, %v6679_v61 }
 0x52b   :  { %v1352_v11 = vrot.slane %v1351_v58, 4  ;;  %3543 = vbcast.lane.b32.xlu1 %v9454_v20, 264  ;;  %v9773_v28 = vrot.slane %v4296_v51, %v6679_v61  ;;  %v1358_v31 = vsel %vm31_vm0, %v1307_v59, 0.0  ;;  %v1309_v0 = vmul.f32 %v11607_v23, %v11606_v62  ;;  %v9779_v15 = vpop.permute.xlu0 %1797  ;;  %v1285_v48 = vpop.permute.xlu1 %1284  ;;  %v11612_v23 = vld [vmem:[#allocation24_spill] sm:$0xff] }
 0x52c   :  { %11604 = vst [vmem:[#allocation13_spill] sm:$0xff] %v9770_v26  ;;  %v1359_v40 = vsel %vm31_vm0, %v1308_v2, 0.0  ;;  %6448 = vpow2.f32 %v4365_v4  ;;  %v9781_v29 = vpop.eup %6440  ;;  %v1327_v17 = vrot.slane %v1326_v6, 2  ;;  %4050 = vbcast.lane.b32.xlu0 %v11608_v19, 256  ;;  %v4338_v41 = vmul.f32 %v11609_v37, %v9628_v33  ;;  %v11611_v33 = vld [vmem:[#allocation103_spill] sm:$0xff] }
 0x52d   :  { %11605 = vst [vmem:[#allocation33_spill] sm:$0xff] %v9773_v28  ;;  %v1353_v20 = vadd.f32 %v1352_v11, %v1351_v58  ;;  %v1360_v45 = vadd.f32 %v1359_v40, %v1358_v31  ;;  %v1318_v24 = vrot.slane %v1317_v57, 2  ;;  %v1336_v56 = vrot.slane %v1335_v42, 2 }
 0x52e   :  { %v1310_v39 = vmul.f32 %v1285_v48, %v11610_v14  ;;  %v4340_v54 = vmul.f32 %v11609_v37, %v9663_v35  ;;  %v1345_v55 = vrot.slane %v1344_v18, 2  ;;  %6450 = vpow2.f32 %v4373_v27 }
 0x52f   :  { %v1361_v51 = vrot.slane %v1360_v45, 4  ;;  %3554 = vbcast.lane.b32.xlu1 %v9468_v21, 264  ;;  %v4349_v49 = vmul.f32 %v9222_v5, %v9770_v26  ;;  %v1367_v59 = vsel %vm31_vm0, %v1309_v0, 0.0  ;;  %v1311_v7 = vmul.f32 %v9570_v60, %v11611_v33  ;;  %v9798_v13 = vpop.permute.xlu0 %1808  ;;  %v1296_v2 = vpop.permute.xlu1 %1295 }
 0x530   :  { %v9792_v32 = vpop.eup %6442  ;;  %v1354_v4 = vrot.slane %v1353_v20, 2  ;;  %v1368_v58 = vsel %vm31_vm0, %v1310_v39, 0.0  ;;  %v1328_v12 = vadd.f32 %v1327_v17, %v1326_v6  ;;  %4061 = vbcast.lane.b32.xlu0 %v9547_v10, 256  ;;  %v4351_v11 = vmul.f32 %v9222_v5, %v9773_v28 }
 0x531   :  { %v9800_v35 = vpop.eup %6444  ;;  %v1362_v21 = vadd.f32 %v1361_v51, %v1360_v45  ;;  %v1369_v27 = vadd.f32 %v1368_v58, %v1367_v59  ;;  %v1319_v31 = vadd.f32 %v1318_v24, %v1317_v57  ;;  %v1337_v62 = vadd.f32 %v1336_v56, %v1335_v42 }
 0x532   :  { %v1312_v60 = vmul.f32 %v1296_v2, %v11612_v23  ;;  %v4355_v0 = vmul.f32 1.442695, %v4338_v41  ;;  %v1346_v40 = vadd.f32 %v1345_v55, %v1344_v18  ;;  %v4342_v6 = vmul.f32 %v11609_v37, %v9667_v3 }
 0x533   :  { %v1363_v48 = vrot.slane %v1362_v21, 2  ;;  %v1370_v14 = vrot.slane %v1369_v27, 4  ;;  %3565 = vbcast.lane.b32.xlu1 %v9472_v50, 264  ;;  %v1376_v45 = vsel %vm31_vm0, %v1311_v7, 0.0  ;;  %v1355_v39 = vadd.f32 %v1354_v4, %v1353_v20  ;;  %v9813_v57 = vpop.permute.xlu0 %1819  ;;  %v2923_v50 = vpop.permute.xlu1 %2922 }
 0x534   :  { %v9809_v17 = vpop.eup %6446  ;;  %v1377_v5 = vsel %vm31_vm0, %v1312_v60, 0.0  ;;  %v4377_v42 = vmul.f32 1.442695, %v4349_v49  ;;  %v1329_v24 = vrot.slane %v1328_v12, 1  ;;  %4072 = vbcast.lane.b32.xlu0 %v9553_v34, 256  ;;  %v1320_v3 = vrot.slane %v1319_v31, 1 }
 0x535   :  { %v1364_v41 = vadd.f32 %v1363_v48, %v1362_v21  ;;  %v1371_v18 = vadd.f32 %v1370_v14, %v1369_v27  ;;  %v1378_v56 = vadd.f32 %v1377_v5, %v1376_v45  ;;  %v1338_v51 = vrot.slane %v1337_v62, 1 }
 0x536   :  { %v9816_v55 = vpop.eup %6448  ;;  %v4381_v59 = vmul.f32 1.442695, %v4351_v11  ;;  %v9818_v33 = vmul.f32 1.442695, %v4340_v54  ;;  %v1347_v20 = vrot.slane %v1346_v40, 1  ;;  %6452 = vpow2.f32 %v4355_v0  ;;  %v11615_v0 = vld [vmem:[#allocation150_spill] sm:$0xff] }
 0x537   :  { %v1372_v7 = vrot.slane %v1371_v18, 2  ;;  %v1379_v4 = vrot.slane %v1378_v56, 4  ;;  %5186 = vbcast.lane.b32.xlu1 %v9491_v46, 264  ;;  %v1356_v49 = vrot.slane %v1355_v39, 1  ;;  %v9821_v58 = vpop.permute.xlu0 %1830  ;;  %6454 = vpow2.f32 %v4377_v42  ;;  %v2934_v48 = vpop.permute.xlu1 %2933  ;;  %v11614_v46 = vld [vmem:[#allocation69_spill] sm:$0xff] }
 0x538   :  { %11613 = vst [vmem:[#allocation143_spill] sm:$0xff] %v9821_v58  ;;  %v9823_v21 = vmul.f32 1.442695, %v4342_v6  ;;  %v4344_v27 = vmul.f32 %v11609_v37, %v9702_v36  ;;  %v9827_v2 = vpop.eup %6450  ;;  %v1330_v11 = vadd.f32 %v1329_v24, %v1328_v12  ;;  %v1365_v54 = vrot.slane %v1364_v41, 1  ;;  %4083 = vbcast.lane.b32.xlu0 %v9559_v8, 256  ;;  %v11616_v42 = vld [vmem:[#allocation129_spill] sm:$0xff] }
 0x539   :  { %v1373_v23 = vadd.f32 %v1372_v7, %v1371_v18  ;;  %v1380_v60 = vadd.f32 %v1379_v4, %v1378_v56  ;;  %v3001_v14 = vmul.f32 %v11615_v0, %v11614_v46  ;;  %v1321_v45 = vadd.f32 %v1320_v3, %v1319_v31  ;;  %v11617_v36 = vld [vmem:[#allocation94_spill] sm:$0xff]  ;;  %v11618_v58 = vld [vmem:[#allocation135_spill] sm:$0xff] }
 0x53a   :  { %v1339_v5 = vadd.f32 %v1338_v51, %v1337_v62  ;;  %v3004_v6 = vmul.f32 %v2934_v48, %v11616_v42  ;;  %v1348_v30 = vadd.f32 %v1347_v20, %v1346_v40  ;;  %v3002_v26 = vmul.f32 %v2923_v50, %v11617_v36  ;;  %v11619_v12 = vld [vmem:[#allocation54_spill] sm:$0xff]  ;;  %v11620_v24 = vld [vmem:[#allocation31_spill] sm:$0xff]  ;;  %v11621_v62 = vld [vmem:[#allocation96_spill] sm:$0xff] }
 0x53b   :  { %v1374_v25 = vrot.slane %v1373_v23, 1  ;;  %v1381_v28 = vrot.slane %v1380_v60, 2  ;;  %5197 = vbcast.lane.b32.xlu1 %v11618_v58, 264  ;;  %v3003_v18 = vmul.f32 %v11620_v24, %v11619_v12  ;;  %v1357_v56 = vadd.f32 %v1356_v49, %v1355_v39  ;;  %v9837_v7 = vpop.permute.xlu0 %1841  ;;  %v11622_v3 = vld [vmem:[#allocation159_spill] sm:$0xff]  ;;  %v11623_v50 = vld [vmem:[#allocation140_spill] sm:$0xff]  ;;  %v2945_v58 = vpop.permute.xlu1 %2944 }
 0x53c   :  { %6456 = vpow2.f32 %v4381_v59  ;;  %v4346_v31 = vmul.f32 %v11609_v37, %v9680_v38  ;;  %v3005_v51 = vmul.f32 %v11622_v3, %v11621_v62  ;;  %v1394_v40 = vsel %vm1393_vm10, %v1330_v11, %v1321_v45  ;;  %4094 = vbcast.lane.b32.xlu0 %v11623_v50, 256  ;;  %v11624_v49 = vld [vmem:[#allocation116_spill] sm:$0xff] }
 0x53d   :  { %v1366_v20 = vadd.f32 %v1365_v54, %v1364_v41  ;;  %v1382_v4 = vadd.f32 %v1381_v28, %v1380_v60  ;;  %v1396_v48 = vsel %vm1395_vm11, %v1339_v5, %v1394_v40  ;;  %v1375_v46 = vadd.f32 %v1374_v25, %v1373_v23  ;;  %v11625_v41 = vld [vmem:[#allocation104_spill] sm:$0xff] }
 0x53e   :  { %v3027_v39 = vsel %vm31_vm0, %v3004_v6, 0.0  ;;  %v3006_v59 = vmul.f32 %v2945_v58, %v11624_v49  ;;  %v3017_v0 = vsel %vm31_vm0, %v3001_v14, 0.0  ;;  %v1398_v38 = vsel %vm1397_vm12, %v1348_v30, %v1396_v48  ;;  %v11626_v11 = vld [vmem:[#allocation32_spill] sm:$0xff]  ;;  %v11630_v58 = vld [vmem:[#allocation77_spill] sm:$0xff]  ;;  %v11631_v48 = vld [vmem:[#allocation158_spill] sm:$0xff] }
 0x53f   :  { %v1383_v37 = vrot.slane %v1382_v4, 1  ;;  %v3018_v42 = vsel %vm31_vm0, %v3002_v26, 0.0  ;;  %5208 = vbcast.lane.b32.xlu1 %v9507_v43, 264  ;;  %v3026_v28 = vsel %vm31_vm0, %v3003_v18, 0.0  ;;  %v3007_v54 = vmul.f32 %v11626_v11, %v11625_v41  ;;  %v9857_v60 = vpop.permute.xlu0 %1852  ;;  %v11627_v43 = vld [vmem:[#allocation47_spill] sm:$0xff]  ;;  %v2956_v6 = vpop.permute.xlu1 %2955 }
 0x540   :  { %v1400_v25 = vsel %vm1399_vm13, %v1357_v56, %v1398_v38  ;;  %v3036_v23 = vsel %vm31_vm0, %v3006_v59, 0.0  ;;  %v9859_v45 = vpop.eup %6452  ;;  %v3035_v30 = vsel %vm31_vm0, %v3005_v51, 0.0  ;;  %v3028_v5 = vadd.f32 %v3027_v39, %v3026_v28  ;;  %4105 = vbcast.lane.b32.xlu0 %v11627_v43, 256  ;;  %v11628_v56 = vld [vmem:[#allocation25_spill] sm:$0xff]  ;;  %v11629_v51 = vld [vmem:[#allocation152_spill] sm:$0xff] }
 0x541   :  { %v1402_v14 = vsel %vm1401_vm14, %v1366_v20, %v1400_v25  ;;  %v1384_v26 = vadd.f32 %v1383_v37, %v1382_v4  ;;  %v9864_v36 = vpop.eup %6454  ;;  %v3019_v24 = vadd.f32 %v3018_v42, %v3017_v0  ;;  %v3037_v18 = vadd.f32 %v3036_v23, %v3035_v30  ;;  %v11632_v0 = vld [vmem:[#allocation79_spill] sm:$0xff]  ;;  %v11634_v37 = vld [vmem:[#allocation157_spill] sm:$0xff]  ;;  %v11636_v23 = vld [vmem:[#allocation14_spill] sm:$0xff] }
 0x542   :  { %v1404_v12 = vsel %vm1403_vm15, %v1375_v46, %v1402_v14  ;;  %v3008_v62 = vmul.f32 %v2956_v6, %v11628_v56  ;;  %v4579_v40 = vmul.f32 %v9781_v29, %v11629_v51  ;;  %6458 = vpow2.f32 %v9818_v33  ;;  %v11633_v33 = vld [vmem:[#allocation154_spill] sm:$0xff] }
 0x543   :  { %v1406_v3 = vsel %vm1405_vm1, %v1384_v26, %v1404_v12  ;;  %5219 = vbcast.lane.b32.xlu1 %v9511_v47, 264  ;;  %v4367_v20 = vmul.f32 1.442695, %v4344_v27  ;;  %v3044_v4 = vsel %vm31_vm0, %v3007_v54, 0.0  ;;  %v3009_v39 = vmul.f32 %v11631_v48, %v11630_v58  ;;  %v9878_v49 = vpop.permute.xlu0 %1863  ;;  %v2967_v38 = vpop.permute.xlu1 %2966  ;;  %v11635_v54 = vld [vmem:[#allocation70_spill] sm:$0xff]  ;;  %v11639_v12 = vld [vmem:[#allocation160_spill] sm:$0xff] }
 0x544   :  { %1408 = vst.msk [vmem:[#allocation2] sm:$0xff] %vm31_vm0, %v1406_v3  ;;  %v3045_v46 = vsel %vm31_vm0, %v3008_v62, 0.0  ;;  %v9880_v59 = vmul.f32 1.442695, %v4346_v31  ;;  %v3029_v47 = vrot.slane %v3028_v5, 4  ;;  %4116 = vbcast.lane.b32.xlu0 %v11632_v0, 256  ;;  %v4581_v27 = vmul.f32 %v9792_v32, %v11633_v33 }
 0x545   :  { %v3046_v29 = vadd.f32 %v3045_v46, %v3044_v4  ;;  %v4583_v42 = vmul.f32 %v9800_v35, %v11634_v37  ;;  %v3020_v41 = vrot.slane %v3019_v24, 4  ;;  %v3038_v11 = vrot.slane %v3037_v18, 4  ;;  %v11637_v14 = vld [vmem:[#allocation102_spill] sm:$0xff]  ;;  %v9899_v35 = vld [vmem:[%s10748_s1 + $0x8] sm:$0xff]  ;;  %v11641_v4 = vld [vmem:[#allocation29_spill] sm:$0xff] }
 0x546   :  { %v6457_v28 = vpop.eup %6456  ;;  %v3010_v25 = vmul.f32 %v2967_v38, %v11635_v54  ;;  %v4585_v31 = vmul.f32 %v9816_v55, %v11636_v23  ;;  %v9892_v26 = vadd.f32 %v4579_v40, %v11637_v14  ;;  %v11638_v6 = vld [vmem:[#allocation10_spill] sm:$0xff]  ;;  %v9903_v56 = vmul.f32 %v9899_v35, %v11639_v12  ;;  %v11642_v46 = vld [vmem:[#allocation59_spill] sm:$0xff]  ;;  %v11643_v54 = vld [vmem:[#allocation76_spill] sm:$0xff] }
 0x547   :  { %v3047_v30 = vrot.slane %v3046_v29, 4  ;;  %5230 = vbcast.lane.b32.xlu1 %v9517_v9, 264  ;;  %v4587_v32 = vmul.f32 %v9809_v17, %v11638_v6  ;;  %v3053_v55 = vsel %vm31_vm0, %v3009_v39, 0.0  ;;  %v11640_v62 = vld [vmem:[#allocation86_spill] sm:$0xff]  ;;  %v9909_v40 = vpop.permute.xlu0 %4616  ;;  %6460 = vpow2.f32 %v9823_v21  ;;  %v2978_v48 = vpop.permute.xlu1 %2977  ;;  %v11661_v33 = vld [vmem:[#allocation123_spill] sm:$0xff] }
 0x548   :  { %v3011_v9 = vmul.f32 %v9699_v16, %v11640_v62  ;;  %v3054_v3 = vsel %vm31_vm0, %v3010_v25, 0.0  ;;  %v3030_v17 = vadd.f32 %v3029_v47, %v3028_v5  ;;  %4127 = vbcast.lane.b32.xlu0 %v11641_v4, 256  ;;  %v9914_v38 = vadd.f32 %v4581_v27, %v11642_v46  ;;  %v11644_v16 = vld [vmem:[#allocation100_spill] sm:$0xff]  ;;  %v11646_v5 = vld [vmem:[#allocation121_spill] sm:$0xff]  ;;  %v11659_v51 = vld [vmem:[#allocation118_spill] sm:$0xff] }
 0x549   :  { %v3055_v58 = vadd.f32 %v3054_v3, %v3053_v55  ;;  %v9917_v14 = vadd.f32 %v4583_v42, %v11643_v54  ;;  %v3021_v39 = vadd.f32 %v3020_v41, %v3019_v24  ;;  %v3039_v6 = vadd.f32 %v3038_v11, %v3037_v18  ;;  %v11645_v25 = vld [vmem:[#allocation60_spill] sm:$0xff]  ;;  %v11648_v55 = vld [vmem:[#allocation57_spill] sm:$0xff]  ;;  %v11649_v3 = vld [vmem:[#allocation46_spill] sm:$0xff] }
 0x54a   :  { %v3012_v62 = vmul.f32 %v2978_v48, %v11644_v16  ;;  %v9921_v23 = vadd.f32 %v4585_v31, %v11645_v25  ;;  %v3048_v37 = vadd.f32 %v3047_v30, %v3046_v29  ;;  %v9925_v47 = vadd.f32 %v4587_v32, %v11646_v5  ;;  %v11650_v11 = vld [vmem:[#allocation136_spill] sm:$0xff]  ;;  %v11652_v54 = vld [vmem:[#allocation71_spill] sm:$0xff] }
 0x54b   :  { %v3056_v21 = vrot.slane %v3055_v58, 4  ;;  %5241 = vbcast.lane.b32.xlu1 %v9521_v63, 264  ;;  %v4589_v27 = vmul.f32 %v9827_v2, %v11648_v55  ;;  %v3062_v42 = vsel %vm31_vm0, %v3011_v9, 0.0  ;;  %v3013_v24 = vmul.f32 %v9727_v52, %v11649_v3  ;;  %v9933_v41 = vpop.permute.xlu0 %4627  ;;  %v11651_v32 = vld [vmem:[#allocation64_spill] sm:$0xff]  ;;  %v2989_v46 = vpop.permute.xlu1 %2988  ;;  %v11653_v52 = vld [vmem:[#allocation73_spill] sm:$0xff] }
 0x54c   :  { %11647 = vst [vmem:[#allocation109_spill] sm:$0xff] %v9925_v47  ;;  %v3063_v18 = vsel %vm31_vm0, %v3012_v62, 0.0  ;;  %v4580_v29 = vmul.f32 %v9859_v45, %v11650_v11  ;;  %v6459_v31 = vpop.eup %6458  ;;  %v3031_v63 = vrot.slane %v3030_v17, 2  ;;  %5259 = vbcast.lane.b32.xlu0 %v11651_v32, 256  ;;  %6462 = vpow2.f32 %v4367_v20  ;;  %v11654_v45 = vld [vmem:[#allocation53_spill] sm:$0xff] }
 0x54d   :  { %v3057_v30 = vadd.f32 %v3056_v21, %v3055_v58  ;;  %v3064_v48 = vadd.f32 %v3063_v18, %v3062_v42  ;;  %v3022_v2 = vrot.slane %v3021_v39, 2  ;;  %v3040_v9 = vrot.slane %v3039_v6, 2  ;;  %v11656_v58 = vld [vmem:[#allocation8_spill] sm:$0xff]  ;;  %v11657_v18 = vld [vmem:[#allocation87_spill] sm:$0xff] }
 0x54e   :  { %v3014_v16 = vmul.f32 %v2989_v46, %v11652_v54  ;;  %v4591_v62 = vmul.f32 %v9864_v36, %v11653_v52  ;;  %v3049_v25 = vrot.slane %v3048_v37, 2  ;;  %v9943_v3 = vadd.f32 %v4589_v27, %v11654_v45 }
 0x54f   :  { %v3065_v5 = vrot.slane %v3064_v48, 4  ;;  %5252 = vbcast.lane.b32.xlu1 %v11602_v1, 264  ;;  %v4593_v21 = vmul.f32 %v6457_v28, %v11656_v58  ;;  %v3071_v42 = vsel %vm31_vm0, %v3013_v24, 0.0  ;;  %v3015_v20 = vmul.f32 %v9744_v44, %v11657_v18  ;;  %v9950_v54 = vpop.permute.xlu0 %4638  ;;  %v11658_v1 = vld [vmem:[#allocation36_spill] sm:$0xff]  ;;  %v3000_v45 = vpop.permute.xlu1 %2999  ;;  %v11660_v44 = vld [vmem:[#allocation89_spill] sm:$0xff] }
 0x550   :  { %11655 = vst [vmem:[#allocation125_spill] sm:$0xff] %v9943_v3  ;;  %v3058_v55 = vrot.slane %v3057_v30, 2  ;;  %v3072_v46 = vsel %vm31_vm0, %v3014_v16, 0.0  ;;  %v3032_v36 = vadd.f32 %v3031_v63, %v3030_v17  ;;  %5464 = vrot.lane.b32.xlu0 %v11658_v1, %s6541_s16  ;;  %v9955_v28 = vadd.f32 %v4580_v29, %v11659_v51 }
 0x551   :  { %v3066_v52 = vadd.f32 %v3065_v5, %v3064_v48  ;;  %v3073_v27 = vadd.f32 %v3072_v46, %v3071_v42  ;;  %v6461_v24 = vpop.eup %6460  ;;  %v3023_v58 = vadd.f32 %v3022_v2, %v3021_v39  ;;  %v3041_v11 = vadd.f32 %v3040_v9, %v3039_v6  ;;  %v11663_v48 = vld [vmem:[#allocation65_spill] sm:$0xff] }
 0x552   :  { %v3016_v18 = vmul.f32 %v3000_v45, %v11660_v44  ;;  %v9959_v16 = vadd.f32 %v4591_v62, %v11661_v33  ;;  %v3050_v12 = vadd.f32 %v3049_v25, %v3048_v37  ;;  %v9963_v5 = vadd.f32 %v4593_v21, %v11663_v48  ;;  %v11665_v37 = vld [vmem:[#allocation37_spill] sm:$0xff] }
 0x553   :  { %v3067_v17 = vrot.slane %v3066_v52, 2  ;;  %v3074_v63 = vrot.slane %v3073_v27, 4  ;;  %4054 = vbcast.lane.b32.xlu1 %v11608_v19, 264  ;;  %v3080_v42 = vsel %vm31_vm0, %v3015_v20, 0.0  ;;  %v3059_v51 = vadd.f32 %v3058_v55, %v3057_v30  ;;  %v9967_v39 = vpop.permute.xlu0 %4649  ;;  %v1791_v19 = vpop.permute.xlu1 %1790  ;;  %v11666_v46 = vld [vmem:[#allocation101_spill] sm:$0xff] }
 0x554   :  { %11662 = vst [vmem:[#allocation42_spill] sm:$0xff] %v9959_v16  ;;  %11664 = vst [vmem:[#allocation128_spill] sm:$0xff] %v9963_v5  ;;  %v3081_v29 = vsel %vm31_vm0, %v3016_v18, 0.0  ;;  %v4919_v6 = vmul.f32 1.442695, %v9903_v56  ;;  %v3033_v2 = vrot.slane %v3032_v36, 1  ;;  %5468 = vrot.lane.b32.xlu0 %v11665_v37, %s6541_s16  ;;  %v9973_v1 = vmul.f32 %v6459_v31, %v11666_v46 }
 0x555   :  { %v3068_v33 = vadd.f32 %v3067_v17, %v3066_v52  ;;  %v3075_v9 = vadd.f32 %v3074_v63, %v3073_v27  ;;  %v3082_v62 = vadd.f32 %v3081_v29, %v3080_v42  ;;  %v3024_v25 = vrot.slane %v3023_v58, 1  ;;  %v11667_v56 = vld [vmem:[#allocation61_spill] sm:$0xff]  ;;  %v11669_v18 = vld [vmem:[#allocation78_spill] sm:$0xff]  ;;  %v11670_v63 = vld [vmem:[#allocation48_spill] sm:$0xff] }
 0x556   :  { %v3042_v21 = vrot.slane %v3041_v11, 1  ;;  %6464 = vpow2.f32 %v9880_v59  ;;  %v6463_v55 = vpop.eup %6462  ;;  %v3051_v30 = vrot.slane %v3050_v12, 1  ;;  %v4584_v52 = vmul.f32 %v6461_v24, %v11667_v56  ;;  %v11671_v31 = vld [vmem:[#allocation147_spill] sm:$0xff]  ;;  %v11674_v56 = vld [vmem:[#allocation110_spill] sm:$0xff] }
 0x557   :  { %v3076_v20 = vrot.slane %v3075_v9, 2  ;;  %v3083_v45 = vrot.slane %v3082_v62, 4  ;;  %4065 = vbcast.lane.b32.xlu1 %v9547_v10, 264  ;;  %v3060_v27 = vrot.slane %v3059_v51, 1  ;;  %v9978_v44 = vpop.permute.xlu0 %4660  ;;  %v9981_v17 = vmul.f32 %v6463_v55, %v11669_v18  ;;  %v11673_v10 = vld [vmem:[#allocation39_spill] sm:$0xff]  ;;  %v1802_v24 = vpop.permute.xlu1 %1801 }
 0x558   :  { %11668 = vst [vmem:[#allocation50_spill] sm:$0xff] %v9978_v44  ;;  %6466 = vpow2.f32 %v4919_v6  ;;  %v11672_v48 = vcombine.high %v11671_v31, %v11671_v31  ;;  %v3034_v42 = vadd.f32 %v3033_v2, %v3032_v36  ;;  %v3069_v29 = vrot.slane %v3068_v33, 1  ;;  %5472 = vrot.lane.b32.xlu0 %v11673_v10, %s6541_s16  ;;  %v11675_v6 = vld [vmem:[#allocation52_spill] sm:$0xff]  ;;  %v11677_v36 = vld [vmem:[#allocation114_spill] sm:$0xff] }
 0x559   :  { %v3077_v37 = vadd.f32 %v3076_v20, %v3075_v9  ;;  %v3084_v46 = vadd.f32 %v3083_v45, %v3082_v62  ;;  %v1869_v5 = vmul.f32 %v9761_v53, %v11674_v56  ;;  %v3025_v55 = vadd.f32 %v3024_v25, %v3023_v58  ;;  %v10003_v53 = vld [vmem:[%s10748_s1 + $0x10] sm:$0xff]  ;;  %v11678_v58 = vld [vmem:[#allocation23_spill] sm:$0xff]  ;;  %v11679_v25 = vld [vmem:[#allocation34_spill] sm:$0xff] }
 0x55a   :  { %v9987_v59 = vrot.slane %v11672_v48, %v11670_v63  ;;  %v3043_v18 = vadd.f32 %v3042_v21, %v3041_v11  ;;  %v1872_v16 = vmul.f32 %v1802_v24, %v11675_v6  ;;  %v3052_v3 = vadd.f32 %v3051_v30, %v3050_v12  ;;  %v11676_v48 = vld [vmem:[#allocation120_spill] sm:$0xff]  ;;  %v11680_v45 = vld [vmem:[#allocation27_spill] sm:$0xff] }
 0x55b   :  { %v3078_v44 = vrot.slane %v3077_v37, 1  ;;  %v3085_v31 = vrot.slane %v3084_v46, 2  ;;  %v1870_v47 = vmul.f32 %v1791_v19, %v11676_v48  ;;  %4076 = vbcast.lane.b32.xlu1 %v9553_v34, 264  ;;  %v1871_v2 = vmul.f32 %v9779_v15, %v11677_v36  ;;  %v9998_v62 = vpop.permute.xlu0 %4671  ;;  %v1813_v21 = vpop.permute.xlu1 %1812  ;;  %v11682_v36 = vld [vmem:[#allocation88_spill] sm:$0xff] }
 0x55c   :  { %v3061_v9 = vadd.f32 %v3060_v27, %v3059_v51  ;;  %v4348_v12 = vmul.f32 %v10003_v53, %v9708_v22  ;;  %v10009_v11 = vrot.slane %v9987_v59, %v6679_v61  ;;  %v1873_v34 = vmul.f32 %v9798_v13, %v11678_v58  ;;  %5476 = vrot.lane.b32.xlu0 %v11679_v25, %s6541_s16  ;;  %v11685_v25 = vld [vmem:[#allocation117_spill] sm:$0xff] }
 0x55d   :  { %v3097_v15 = vsel %vm1393_vm10, %v3034_v42, %v3025_v55  ;;  %v3070_v51 = vadd.f32 %v3069_v29, %v3068_v33  ;;  %v3086_v19 = vadd.f32 %v3085_v31, %v3084_v46  ;;  %v3079_v20 = vadd.f32 %v3078_v44, %v3077_v37  ;;  %v11681_v29 = vld [vmem:[#allocation115_spill] sm:$0xff] }
 0x55e   :  { %v3098_v30 = vsel %vm1395_vm11, %v3043_v18, %v3097_v15  ;;  %v1895_v22 = vsel %vm31_vm0, %v1872_v16, 0.0  ;;  %v1874_v56 = vmul.f32 %v1813_v21, %v11680_v45  ;;  %v1885_v27 = vsel %vm31_vm0, %v1869_v5, 0.0  ;;  %v11686_v21 = vld [vmem:[#allocation143_spill] sm:$0xff] }
 0x55f   :  { %v3099_v10 = vsel %vm1397_vm12, %v3052_v3, %v3098_v30  ;;  %v3087_v13 = vrot.slane %v3086_v19, 1  ;;  %v1886_v42 = vsel %vm31_vm0, %v1870_v47, 0.0  ;;  %4087 = vbcast.lane.b32.xlu1 %v9559_v8, 264  ;;  %v1894_v46 = vsel %vm31_vm0, %v1871_v2, 0.0  ;;  %v10028_v37 = vpop.permute.xlu0 %4682  ;;  %v1824_v55 = vpop.permute.xlu1 %1823 }
 0x560   :  { %v6465_v33 = vpop.eup %6464  ;;  %v1875_v18 = vmul.f32 %v9813_v57, %v11681_v29  ;;  %v3100_v44 = vsel %vm1399_vm13, %v3061_v9, %v3099_v10  ;;  %v1904_v16 = vsel %vm31_vm0, %v1874_v56, 0.0  ;;  %v1903_v5 = vsel %vm31_vm0, %v1873_v34, 0.0  ;;  %v11683_v9 = vld [vmem:[#allocation106_spill] sm:$0xff]  ;;  %v11684_v34 = vld [vmem:[#allocation119_spill] sm:$0xff] }
 0x561   :  { %v3101_v3 = vsel %vm1401_vm14, %v3070_v51, %v3100_v44  ;;  %v3088_v24 = vadd.f32 %v3087_v13, %v3086_v19  ;;  %v1896_v47 = vadd.f32 %v1895_v22, %v1894_v46  ;;  %v1887_v31 = vadd.f32 %v1886_v42, %v1885_v27  ;;  %v11689_v46 = vld [vmem:[#allocation66_spill] sm:$0xff] }
 0x562   :  { %v6467_v8 = vpop.eup %6466  ;;  %v3102_v6 = vsel %vm1403_vm15, %v3079_v20, %v3101_v3  ;;  %v1905_v48 = vadd.f32 %v1904_v16, %v1903_v5  ;;  %v1876_v57 = vmul.f32 %v1824_v55, %v11682_v36  ;;  %v10038_v58 = vadd.f32 %v9973_v1, %v11683_v9  ;;  %v11691_v5 = vld [vmem:[#allocation13_spill] sm:$0xff]  ;;  %v11692_v55 = vld [vmem:[#allocation58_spill] sm:$0xff] }
 0x563   :  { %v3103_v2 = vsel %vm1405_vm1, %v3088_v24, %v3102_v6  ;;  %4098 = vbcast.lane.b32.xlu1 %v11623_v50, 264  ;;  %v10041_v15 = vadd.f32 %v4584_v52, %v11684_v34  ;;  %v4375_v51 = vmul.f32 1.442695, %v4348_v12  ;;  %v1912_v19 = vsel %vm31_vm0, %v1875_v18, 0.0  ;;  %v10048_v22 = vpop.permute.xlu0 %4693  ;;  %v1835_v56 = vpop.permute.xlu1 %1834  ;;  %v11687_v52 = vld [vmem:[#allocation44_spill] sm:$0xff]  ;;  %v11688_v12 = vld [vmem:[#allocation93_spill] sm:$0xff] }
 0x564   :  { %v1877_v30 = vmul.f32 %v11686_v21, %v11685_v25  ;;  %3106 = vst.msk [vmem:[#allocation2 + $0x18] sm:$0xff] %vm31_vm0, %v3103_v2  ;;  %v1913_v20 = vsel %vm31_vm0, %v1876_v57, 0.0  ;;  %v4905_v50 = vmul.f32 %v9899_v35, %v10009_v11  ;;  %v1897_v1 = vrot.slane %v1896_v47, 4  ;;  %v11690_v18 = vld [vmem:[#allocation82_spill] sm:$0xff]  ;;  %v11693_v34 = vld [vmem:[#allocation111_spill] sm:$0xff]  ;;  %v11694_v21 = vld [vmem:[#allocation80_spill] sm:$0xff] }
 0x565   :  { %v1914_v45 = vadd.f32 %v1913_v20, %v1912_v19  ;;  %v4588_v27 = vmul.f32 %v6465_v33, %v11687_v52  ;;  %v4859_v10 = vcombine.high %v11688_v12, %v11688_v12  ;;  %v1888_v13 = vrot.slane %v1887_v31, 4  ;;  %v11718_v52 = vld [vmem:[#allocation99_spill] sm:$0xff] }
 0x566   :  { %v1906_v42 = vrot.slane %v1905_v48, 4  ;;  %v1878_v29 = vmul.f32 %v1835_v56, %v11689_v46  ;;  %v10058_v44 = vadd.f32 %v9981_v17, %v11690_v18  ;;  %6468 = vpow2.f32 %v4375_v51 }
 0x567   :  { %v1915_v16 = vrot.slane %v1914_v45, 4  ;;  %4109 = vbcast.lane.b32.xlu1 %v11627_v43, 264  ;;  %v4350_v3 = vmul.f32 %v10003_v53, %v11691_v5  ;;  %v4861_v33 = vcombine.high %v9987_v59, %v9987_v59  ;;  %v1921_v24 = vsel %vm31_vm0, %v1877_v30, 0.0  ;;  %v10069_v57 = vpop.permute.xlu0 %3484  ;;  %v1846_v43 = vpop.permute.xlu1 %1845 }
 0x568   :  { %v1879_v6 = vmul.f32 %v9837_v7, %v11692_v55  ;;  %v1922_v36 = vsel %vm31_vm0, %v1878_v29, 0.0  ;;  %v4923_v17 = vmul.f32 1.442695, %v4905_v50  ;;  %v1898_v2 = vadd.f32 %v1897_v1, %v1896_v47  ;;  %v11696_v29 = vld [vmem:[#allocation126_spill] sm:$0xff] }
 0x569   :  { %v1923_v9 = vadd.f32 %v1922_v36, %v1921_v24  ;;  %v10072_v51 = vadd.f32 %v4588_v27, %v11693_v34  ;;  %v10075_v19 = vrot.slane %v4859_v10, %v6679_v61  ;;  %v1889_v59 = vadd.f32 %v1888_v13, %v1887_v31  ;;  %v11695_v27 = vld [vmem:[#allocation72_spill] sm:$0xff]  ;;  %v11698_v55 = vld [vmem:[#allocation62_spill] sm:$0xff] }
 0x56a   :  { %v1907_v25 = vadd.f32 %v1906_v42, %v1905_v48  ;;  %v1880_v30 = vmul.f32 %v1846_v43, %v11694_v21  ;;  %v10079_v7 = vmul.f32 %v6467_v8, %v9892_v26  ;;  %v1916_v20 = vadd.f32 %v1915_v16, %v1914_v45  ;;  %v11697_v16 = vld [vmem:[#allocation33_spill] sm:$0xff] }
 0x56b   :  { %v1924_v56 = vrot.slane %v1923_v9, 4  ;;  %4120 = vbcast.lane.b32.xlu1 %v11632_v0, 264  ;;  %v4379_v47 = vmul.f32 1.442695, %v4350_v3  ;;  %v10083_v50 = vrot.slane %v4861_v33, %v6679_v61  ;;  %v1930_v1 = vsel %vm31_vm0, %v1879_v6, 0.0  ;;  %v10089_v48 = vpop.permute.xlu0 %3495  ;;  %v1857_v13 = vpop.permute.xlu1 %1856 }
 0x56c   :  { %v1881_v12 = vmul.f32 %v9857_v60, %v11695_v27  ;;  %v1931_v31 = vsel %vm31_vm0, %v1880_v30, 0.0  ;;  %6470 = vpow2.f32 %v4923_v17  ;;  %v1899_v8 = vrot.slane %v1898_v2, 2  ;;  %v11699_v27 = vld [vmem:[#allocation134_spill] sm:$0xff] }
 0x56d   :  { %v1925_v10 = vadd.f32 %v1924_v56, %v1923_v9  ;;  %v1932_v45 = vadd.f32 %v1931_v31, %v1930_v1  ;;  %v4907_v0 = vmul.f32 %v9899_v35, %v10075_v19  ;;  %v1890_v42 = vrot.slane %v1889_v59, 2 }
 0x56e   :  { %v1908_v46 = vrot.slane %v1907_v25, 2  ;;  %v1882_v18 = vmul.f32 %v1857_v13, %v11696_v29  ;;  %v4352_v5 = vmul.f32 %v10003_v53, %v11697_v16  ;;  %v1917_v60 = vrot.slane %v1916_v20, 2 }
 0x56f   :  { %v1933_v3 = vrot.slane %v1932_v45, 4  ;;  %4131 = vbcast.lane.b32.xlu1 %v11641_v4, 264  ;;  %6472 = vpow2.f32 %v4379_v47  ;;  %v4909_v33 = vmul.f32 %v9899_v35, %v10083_v50  ;;  %v1939_v24 = vsel %vm31_vm0, %v1881_v12, 0.0  ;;  %v10103_v9 = vpop.permute.xlu0 %3506  ;;  %v1868_v56 = vpop.permute.xlu1 %1867 }
 0x570   :  { %v1883_v6 = vmul.f32 %v9878_v49, %v11698_v55  ;;  %v1926_v36 = vrot.slane %v1925_v10, 2  ;;  %v1940_v17 = vsel %vm31_vm0, %v1882_v18, 0.0  ;;  %v6469_v43 = vpop.eup %6468  ;;  %v1900_v34 = vadd.f32 %v1899_v8, %v1898_v2 }
 0x571   :  { %v1934_v21 = vadd.f32 %v1933_v3, %v1932_v45  ;;  %v1941_v30 = vadd.f32 %v1940_v17, %v1939_v24  ;;  %v4927_v4 = vmul.f32 1.442695, %v4907_v0  ;;  %v1891_v47 = vadd.f32 %v1890_v42, %v1889_v59  ;;  %v11700_v45 = vld [vmem:[#allocation97_spill] sm:$0xff]  ;;  %v11703_v17 = vld [vmem:[#allocation40_spill] sm:$0xff] }
 0x572   :  { %v1909_v1 = vadd.f32 %v1908_v46, %v1907_v25  ;;  %v1884_v31 = vmul.f32 %v1868_v56, %v11699_v27  ;;  %v4383_v13 = vmul.f32 1.442695, %v4352_v5  ;;  %v1918_v12 = vadd.f32 %v1917_v60, %v1916_v20 }
 0x573   :  { %v1935_v29 = vrot.slane %v1934_v21, 2  ;;  %v1942_v16 = vrot.slane %v1941_v30, 4  ;;  %5263 = vbcast.lane.b32.xlu1 %v11651_v32, 264  ;;  %v4931_v49 = vmul.f32 1.442695, %v4909_v33  ;;  %v1948_v18 = vsel %vm31_vm0, %v1883_v6, 0.0  ;;  %v10109_v8 = vpop.permute.xlu0 %3517  ;;  %v4621_v5 = vpop.permute.xlu1 %4620 }
 0x574   :  { %v1927_v55 = vadd.f32 %v1926_v36, %v1925_v10  ;;  %v1949_v2 = vsel %vm31_vm0, %v1884_v31, 0.0  ;;  %v11701_v59 = vcombine.high %v11700_v45, %v11700_v45  ;;  %v1901_v0 = vrot.slane %v1900_v34, 1  ;;  %v11702_v33 = vld [vmem:[#allocation92_spill] sm:$0xff] }
 0x575   :  { %v1936_v42 = vadd.f32 %v1935_v29, %v1934_v21  ;;  %v1943_v20 = vadd.f32 %v1942_v16, %v1941_v30  ;;  %v1950_v46 = vadd.f32 %v1949_v2, %v1948_v18  ;;  %v1892_v32 = vrot.slane %v1891_v47, 1 }
 0x576   :  { %v4828_v25 = vrot.slane %v11701_v59, %v11670_v63  ;;  %v10115_v60 = vpop.eup %6470  ;;  %v1910_v3 = vrot.slane %v1909_v1, 1  ;;  %v10118_v10 = vmul.f32 %v6469_v43, %v11702_v33  ;;  %6474 = vpow2.f32 %v4927_v4 }
 0x577   :  { %v1919_v24 = vrot.slane %v1918_v12, 1  ;;  %v1944_v6 = vrot.slane %v1943_v20, 2  ;;  %v1951_v36 = vrot.slane %v1950_v46, 4  ;;  %5466 = vrot.lane.b32.xlu1 %v11703_v17, %s6541_s16  ;;  %6476 = vpow2.f32 %v4383_v13  ;;  %v10127_v4 = vpop.permute.xlu0 %3528  ;;  %v4632_v18 = vpop.permute.xlu1 %4631 }
 0x578   :  { %v1928_v56 = vrot.slane %v1927_v55, 1  ;;  %6478 = vpow2.f32 %v4931_v49  ;;  %v10123_v21 = vrot.slane %v4828_v25, %v11670_v63  ;;  %v4830_v30 = vcombine.high %v4828_v25, %v4828_v25 }
 0x579   :  { %v10125_v27 = vpop.eup %6472  ;;  %v1902_v31 = vadd.f32 %v1901_v0, %v1900_v34  ;;  %v1937_v29 = vrot.slane %v1936_v42, 1  ;;  %v1945_v43 = vadd.f32 %v1944_v6, %v1943_v20  ;;  %v1952_v16 = vadd.f32 %v1951_v36, %v1950_v46  ;;  %v11704_v34 = vld [vmem:[#allocation38_spill] sm:$0xff] }
 0x57a   :  { %v4699_v2 = vmul.f32 %v9909_v40, %v9892_v26  ;;  %v1893_v45 = vadd.f32 %v1892_v32, %v1891_v47  ;;  %v1911_v13 = vadd.f32 %v1910_v3, %v1909_v1  ;;  %v4702_v49 = vmul.f32 %v4632_v18, %v10038_v58 }
 0x57b   :  { %v1920_v59 = vadd.f32 %v1919_v24, %v1918_v12  ;;  %v1946_v17 = vrot.slane %v1945_v43, 1  ;;  %v1953_v33 = vrot.slane %v1952_v16, 2  ;;  %v4700_v25 = vmul.f32 %v4621_v5, %v9955_v28  ;;  %5470 = vrot.lane.b32.xlu1 %v11704_v34, %s6541_s16  ;;  %v4643_v5 = vpop.permute.xlu1 %4642 }
 0x57c   :  { %v4701_v0 = vmul.f32 %v9933_v41, %v9914_v38  ;;  %v1929_v20 = vadd.f32 %v1928_v56, %v1927_v55  ;;  %v10139_v46 = vrot.slane %v10123_v21, %v6679_v61  ;;  %v10142_v26 = vrot.slane %v4830_v30, %v11670_v63 }
 0x57d   :  { %v4703_v40 = vmul.f32 %v9950_v54, %v9917_v14  ;;  %v1965_v47 = vsel %vm1393_vm10, %v1902_v31, %v1893_v45  ;;  %v1938_v1 = vadd.f32 %v1937_v29, %v1936_v42  ;;  %v1954_v12 = vadd.f32 %v1953_v33, %v1952_v16  ;;  %v10153_v54 = vpop.permute.xlu0 %3539  ;;  %v11706_v42 = vld [vmem:[#allocation41_spill] sm:$0xff] }
 0x57e   :  { %11705 = vst [vmem:[#allocation67_spill] sm:$0xff] %v10142_v26  ;;  %v1966_v32 = vsel %vm1395_vm11, %v1911_v13, %v1965_v47  ;;  %v1947_v3 = vadd.f32 %v1946_v17, %v1945_v43  ;;  %v4725_v41 = vsel %vm31_vm0, %v4702_v49, 0.0  ;;  %v4704_v55 = vmul.f32 %v4643_v5, %v10041_v15  ;;  %v11709_v5 = vld [vmem:[#allocation109_spill] sm:$0xff] }
 0x57f   :  { %v4715_v24 = vsel %vm31_vm0, %v4699_v2, 0.0  ;;  %v1967_v63 = vsel %vm1397_vm12, %v1920_v59, %v1966_v32  ;;  %v1955_v6 = vrot.slane %v1954_v12, 1  ;;  %v4716_v36 = vsel %vm31_vm0, %v4700_v25, 0.0  ;;  %5474 = vrot.lane.b32.xlu1 %v11706_v42, %s6541_s16  ;;  %v4654_v13 = vpop.permute.xlu1 %4653  ;;  %v11710_v32 = vld [vmem:[#allocation50_spill] sm:$0xff] }
 0x580   :  { %v6475_v33 = vpop.eup %6474  ;;  %v4724_v56 = vsel %vm31_vm0, %v4701_v0, 0.0  ;;  %v4705_v30 = vmul.f32 %v9967_v39, %v9921_v23  ;;  %v1968_v31 = vsel %vm1399_vm13, %v1929_v20, %v1967_v63  ;;  %v4734_v29 = vsel %vm31_vm0, %v4704_v55, 0.0  ;;  %v11707_v0 = vld [vmem:[#allocation35_spill] sm:$0xff]  ;;  %v11708_v20 = vld [vmem:[#allocation122_spill] sm:$0xff] }
 0x581   :  { %v6477_v43 = vpop.eup %6476  ;;  %v4733_v16 = vsel %vm31_vm0, %v4703_v40, 0.0  ;;  %v1969_v18 = vsel %vm1401_vm14, %v1938_v1, %v1968_v31  ;;  %v1956_v2 = vadd.f32 %v1955_v6, %v1954_v12  ;;  %v4726_v45 = vadd.f32 %v4725_v41, %v4724_v56  ;;  %v11711_v55 = vld [vmem:[#allocation63_spill] sm:$0xff] }
 0x582   :  { %v6479_v49 = vpop.eup %6478  ;;  %v1970_v59 = vsel %vm1403_vm15, %v1947_v3, %v1969_v18  ;;  %v4717_v17 = vadd.f32 %v4716_v36, %v4715_v24  ;;  %v4735_v25 = vadd.f32 %v4734_v29, %v4733_v16  ;;  %v4706_v34 = vmul.f32 %v4654_v13, %v10058_v44  ;;  %v5500_v24 = vld [vmem:[%s10748_s1 + $0x18] sm:$0xff]  ;;  %v5501_v63 = vld [vmem:[%s10748_s1 + $0x20] sm:$0xff]  ;;  %v10194_v36 = vpop.permute.xlu0 %3550  ;;  %v5503_v18 = vld [vmem:[%s10748_s1 + $0x30] sm:$0xff] }
 0x583   :  { %v1971_v39 = vsel %vm1405_vm1, %v1956_v2, %v1970_v59  ;;  %5478 = vrot.lane.b32.xlu1 %v11707_v0, %s6541_s16  ;;  %v10171_v40 = vadd.f32 %v10079_v7, %v11708_v20  ;;  %v4911_v47 = vmul.f32 %v9899_v35, %v10139_v46  ;;  %v10177_v1 = vrot.slane %v10142_v26, %v6679_v61  ;;  %v4665_v56 = vpop.permute.xlu1 %4664  ;;  %v11714_v29 = vld [vmem:[#allocation107_spill] sm:$0xff] }
 0x584   :  { %v4742_v12 = vsel %vm31_vm0, %v4705_v30, 0.0  ;;  %v4707_v3 = vmul.f32 %v11710_v32, %v11709_v5  ;;  %1974 = vst.msk [vmem:[#allocation2 + $0x8] sm:$0xff] %vm31_vm0, %v1971_v39  ;;  %v4743_v41 = vsel %vm31_vm0, %v4706_v34, 0.0  ;;  %v10186_v7 = vadd.f32 %v10118_v10, %v11711_v55  ;;  %v11713_v30 = vld [vmem:[#allocation49_spill] sm:$0xff]  ;;  %v5502_v10 = vld [vmem:[%s10748_s1 + $0x28] sm:$0xff] }
 0x585   :  { %v4727_v6 = vrot.slane %v4726_v45, 4  ;;  %v4744_v42 = vadd.f32 %v4743_v41, %v4742_v12  ;;  %v4592_v31 = vmul.f32 %v10125_v27, %v11713_v30  ;;  %v4594_v16 = vmul.f32 %v6477_v43, %v11714_v29  ;;  %v11715_v12 = vld [vmem:[#allocation125_spill] sm:$0xff] }
 0x586   :  { %11712 = vst [vmem:[#allocation26_spill] sm:$0xff] %v10186_v7  ;;  %v4718_v2 = vrot.slane %v4717_v17, 4  ;;  %v4736_v13 = vrot.slane %v4735_v25, 4  ;;  %v4708_v59 = vmul.f32 %v4665_v56, %v10072_v51  ;;  %v5504_v34 = vpack.c.bf16 %v5501_v63, %v5500_v24  ;;  %v11716_v29 = vld [vmem:[#allocation85_spill] sm:$0xff] }
 0x587   :  { %v4745_v39 = vrot.slane %v4744_v42, 4  ;;  %v10208_v0 = vmul.f32 %v10115_v60, %v9914_v38  ;;  %v4935_v27 = vmul.f32 1.442695, %v4911_v47  ;;  %v4913_v43 = vmul.f32 %v9899_v35, %v10177_v1  ;;  %v4676_v63 = vpop.permute.xlu1 %4675 }
 0x588   :  { %v4751_v20 = vsel %vm31_vm0, %v4707_v3, 0.0  ;;  %v4709_v32 = vmul.f32 %v9998_v62, %v11715_v12  ;;  %v4752_v41 = vsel %vm31_vm0, %v4708_v59, 0.0  ;;  %6056 = vmatprep.subr.bf16.mxu0 %v5504_v34  ;;  %v5505_v55 = vpack.c.bf16 %v5503_v18, %v5502_v10  ;;  %v10226_v10 = vpop.permute.xlu0 %3561  ;;  %v11721_v18 = vld [vmem:[#allocation160_spill] sm:$0xff] }
 0x589   :  { %v4728_v56 = vadd.f32 %v4727_v6, %v4726_v45  ;;  %v4753_v24 = vadd.f32 %v4752_v41, %v4751_v20  ;;  %v10217_v30 = vadd.f32 %v4592_v31, %v11716_v29  ;;  %v10220_v38 = vmul.f32 %v6475_v33, %v9917_v14  ;;  %6057 = vmatpush3.bf16.msra.mxu0 %v5504_v34  ;;  %v11720_v33 = vld [vmem:[#allocation42_spill] sm:$0xff] }
 0x58a   :  { %v4719_v60 = vadd.f32 %v4718_v2, %v4717_v17  ;;  %v4737_v47 = vadd.f32 %v4736_v13, %v4735_v25  ;;  %v4710_v3 = vmul.f32 %v4676_v63, %v10186_v7  ;;  %v10224_v62 = vadd.f32 %v4594_v16, %v11718_v52  ;;  %6058 = vmatprep.subr.bf16.mxu0 %v5505_v55  ;;  %v11726_v7 = vld [vmem:[#allocation68_spill] sm:$0xff] }
 0x58b   :  { %11717 = vst [vmem:[#allocation56_spill] sm:$0xff] %v10217_v30  ;;  %v4746_v59 = vadd.f32 %v4745_v39, %v4744_v42  ;;  %v4754_v45 = vrot.slane %v4753_v24, 4  ;;  %v10229_v6 = vmul.f32 %v6479_v49, %v9921_v23  ;;  %6480 = vpow2.f32 %v4935_v27  ;;  %v4687_v42 = vpop.permute.xlu1 %4686 }
 0x58c   :  { %11719 = vst [vmem:[#allocation127_spill] sm:$0xff] %v10224_v62  ;;  %v4760_v14 = vsel %vm31_vm0, %v4709_v32, 0.0  ;;  %v4711_v17 = vmul.f32 %v10028_v37, %v11720_v33  ;;  %v4761_v25 = vsel %vm31_vm0, %v4710_v3, 0.0  ;;  %v10235_v31 = vmul.f32 1.442695, %v4913_v43  ;;  %v11722_v32 = vld [vmem:[#allocation128_spill] sm:$0xff]  ;;  %v10250_v3 = vpop.permute.xlu0 %5182 }
 0x58d   :  { %v4729_v52 = vrot.slane %v4728_v56, 2  ;;  %v4755_v29 = vadd.f32 %v4754_v45, %v4753_v24  ;;  %v4762_v16 = vadd.f32 %v4761_v25, %v4760_v14  ;;  %v4904_v2 = vmul.f32 %v10003_v53, %v11721_v18  ;;  %6059 = vmatpush3.bf16.msra.mxu0 %v5505_v55 }
 0x58e   :  { %v4720_v23 = vrot.slane %v4719_v60, 2  ;;  %v4738_v49 = vrot.slane %v4737_v47, 2  ;;  %v4712_v13 = vmul.f32 %v4687_v42, %v10217_v30  ;;  %v4906_v34 = vmul.f32 %v10003_v53, %v10009_v11 }
 0x58f   :  { %v4747_v37 = vrot.slane %v4746_v59, 2  ;;  %v4763_v39 = vrot.slane %v4762_v16, 4  ;;  %v4860_v27 = vcombine.high %v10123_v21, %v10123_v21  ;;  %v4908_v43 = vmul.f32 %v10003_v53, %v10075_v19  ;;  %v4698_v14 = vpop.permute.xlu1 %4697 }
 0x590   :  { %v4769_v20 = vsel %vm31_vm0, %v4711_v17, 0.0  ;;  %v4713_v41 = vmul.f32 %v10048_v22, %v11722_v32  ;;  %v4756_v55 = vrot.slane %v4755_v29, 2  ;;  %v4770_v24 = vsel %vm31_vm0, %v4712_v13, 0.0 }
 0x591   :  { %v4730_v63 = vadd.f32 %v4729_v52, %v4728_v56  ;;  %v4764_v11 = vadd.f32 %v4763_v39, %v4762_v16  ;;  %v4771_v45 = vadd.f32 %v4770_v24, %v4769_v20  ;;  %v4921_v25 = vmul.f32 1.442695, %v4904_v2 }
 0x592   :  { %v4721_v42 = vadd.f32 %v4720_v23, %v4719_v60  ;;  %v4739_v21 = vadd.f32 %v4738_v49, %v4737_v47  ;;  %v4714_v18 = vmul.f32 %v4698_v14, %v10224_v62  ;;  %v4925_v19 = vmul.f32 1.442695, %v4906_v34 }
 0x593   :  { %v4748_v26 = vadd.f32 %v4747_v37, %v4746_v59  ;;  %v4765_v17 = vrot.slane %v4764_v11, 2  ;;  %v4772_v30 = vrot.slane %v4771_v45, 4  ;;  %v4929_v33 = vmul.f32 1.442695, %v4908_v43  ;;  %v3489_v49 = vpop.permute.xlu1 %3488 }
 0x594   :  { %v4778_v22 = vsel %vm31_vm0, %v4713_v41, 0.0  ;;  %v4757_v32 = vadd.f32 %v4756_v55, %v4755_v29  ;;  %v4779_v56 = vsel %vm31_vm0, %v4714_v18, 0.0  ;;  %v4910_v52 = vmul.f32 %v10003_v53, %v10083_v50  ;;  %v10262_v29 = vpop.permute.xlu0 %5193  ;;  %v11723_v50 = vld [vmem:[#allocation74_spill] sm:$0xff] }
 0x595   :  { %v10257_v16 = vpop.eup %6480  ;;  %v4731_v2 = vrot.slane %v4730_v63, 1  ;;  %v4766_v60 = vadd.f32 %v4765_v17, %v4764_v11  ;;  %v4773_v47 = vadd.f32 %v4772_v30, %v4771_v45  ;;  %v4780_v23 = vadd.f32 %v4779_v56, %v4778_v22  ;;  %v11725_v22 = vld [vmem:[#allocation133_spill] sm:$0xff] }
 0x596   :  { %v4722_v13 = vrot.slane %v4721_v42, 1  ;;  %v4740_v59 = vrot.slane %v4739_v21, 1  ;;  %v10260_v34 = vrot.slane %v4860_v27, %v6679_v61  ;;  %6482 = vpow2.f32 %v4921_v25  ;;  %v11724_v27 = vld [vmem:[#allocation139_spill] sm:$0xff] }
 0x597   :  { %v4749_v37 = vrot.slane %v4748_v26, 1  ;;  %v4774_v39 = vrot.slane %v4773_v47, 2  ;;  %v4781_v43 = vrot.slane %v4780_v23, 4  ;;  %6484 = vpow2.f32 %v4925_v19  ;;  %v3500_v14 = vpop.permute.xlu1 %3499 }
 0x598   :  { %v3569_v20 = vmul.f32 %v10089_v48, %v11723_v50  ;;  %v4758_v41 = vrot.slane %v4757_v32, 1  ;;  %6486 = vpow2.f32 %v4929_v33  ;;  %v4933_v30 = vmul.f32 1.442695, %v4910_v52  ;;  %v11727_v50 = vld [vmem:[#allocation130_spill] sm:$0xff] }
 0x599   :  { %v4732_v55 = vadd.f32 %v4731_v2, %v4730_v63  ;;  %v4767_v24 = vrot.slane %v4766_v60, 1  ;;  %v4775_v11 = vadd.f32 %v4774_v39, %v4773_v47  ;;  %v4782_v45 = vadd.f32 %v4781_v43, %v4780_v23  ;;  %v11729_v39 = vld [vmem:[#allocation84_spill] sm:$0xff] }
 0x59a   :  { %v3571_v25 = vmul.f32 %v10103_v9, %v11724_v27  ;;  %v4723_v18 = vadd.f32 %v4722_v13, %v4721_v42  ;;  %v4741_v17 = vadd.f32 %v4740_v59, %v4739_v21  ;;  %v3570_v56 = vmul.f32 %v3500_v14, %v11725_v22  ;;  %v10275_v42 = vpop.permute.xlu0 %5204  ;;  %v11731_v22 = vld [vmem:[#allocation141_spill] sm:$0xff] }
 0x59b   :  { %v4750_v62 = vadd.f32 %v4749_v37, %v4748_v26  ;;  %v4776_v19 = vrot.slane %v4775_v11, 1  ;;  %v4783_v61 = vrot.slane %v4782_v45, 2  ;;  %v3568_v48 = vmul.f32 %v3489_v49, %v11726_v7  ;;  %v3511_v47 = vpop.permute.xlu1 %3510 }
 0x59c   :  { %v3567_v33 = vmul.f32 %v10069_v57, %v11727_v50  ;;  %v4759_v63 = vadd.f32 %v4758_v41, %v4757_v32  ;;  %v4915_v52 = vmul.f32 %v9899_v35, %v10260_v34  ;;  %6488 = vpow2.f32 %v4933_v30  ;;  %v11728_v57 = vld [vmem:[#allocation137_spill] sm:$0xff] }
 0x59d   :  { %v4795_v2 = vsel %vm1393_vm10, %v4732_v55, %v4723_v18  ;;  %v4768_v9 = vadd.f32 %v4767_v24, %v4766_v60  ;;  %v4784_v21 = vadd.f32 %v4783_v61, %v4782_v45  ;;  %v3593_v26 = vsel %vm31_vm0, %v3570_v56, 0.0  ;;  %v11730_v18 = vld [vmem:[#allocation75_spill] sm:$0xff] }
 0x59e   :  { %v3592_v23 = vsel %vm31_vm0, %v3569_v20, 0.0  ;;  %v4796_v7 = vsel %vm1395_vm11, %v4741_v17, %v4795_v2  ;;  %v4777_v49 = vadd.f32 %v4776_v19, %v4775_v11  ;;  %v3572_v32 = vmul.f32 %v3511_v47, %v11728_v57  ;;  %v11732_v19 = vld [vmem:[#allocation83_spill] sm:$0xff] }
 0x59f   :  { %v3601_v13 = vsel %vm31_vm0, %v3571_v25, 0.0  ;;  %v4797_v35 = vsel %vm1397_vm12, %v4750_v62, %v4796_v7  ;;  %v4785_v59 = vrot.slane %v4784_v21, 1  ;;  %v3584_v60 = vsel %vm31_vm0, %v3568_v48, 0.0  ;;  %v3522_v62 = vpop.permute.xlu1 %3521  ;;  %v11735_v57 = vld [vmem:[#allocation91_spill] sm:$0xff] }
 0x5a0   :  { %v6483_v37 = vpop.eup %6482  ;;  %v3573_v61 = vmul.f32 %v10109_v8, %v11729_v39  ;;  %v4798_v43 = vsel %vm1399_vm13, %v4759_v63, %v4797_v35  ;;  %v3594_v41 = vadd.f32 %v3593_v26, %v3592_v23  ;;  %v3602_v20 = vsel %vm31_vm0, %v3572_v32, 0.0  ;;  %v11737_v39 = vld [vmem:[#allocation142_spill] sm:$0xff] }
 0x5a1   :  { %v6485_v30 = vpop.eup %6484  ;;  %v3583_v55 = vsel %vm31_vm0, %v3567_v33, 0.0  ;;  %v4799_v24 = vsel %vm1401_vm14, %v4768_v9, %v4798_v43  ;;  %v4786_v11 = vadd.f32 %v4785_v59, %v4784_v21  ;;  %v3603_v45 = vadd.f32 %v3602_v20, %v3601_v13  ;;  %v10303_v33 = vpop.permute.xlu0 %5215  ;;  %v11733_v9 = vld [vmem:[#allocation9_spill] sm:$0xff] }
 0x5a2   :  { %v6487_v14 = vpop.eup %6486  ;;  %v4800_v27 = vsel %vm1403_vm15, %v4777_v49, %v4799_v24  ;;  %v3585_v25 = vadd.f32 %v3584_v60, %v3583_v55  ;;  %v5153_v8 = vmul.f32 %v10257_v16, %v11709_v5  ;;  %v3574_v17 = vmul.f32 %v3522_v62, %v11730_v18  ;;  %v11734_v21 = vld [vmem:[#allocation81_spill] sm:$0xff] }
 0x5a3   :  { %v10296_v56 = vadd.f32 %v10208_v0, %v11731_v22  ;;  %v10300_v48 = vadd.f32 %v10220_v38, %v11732_v19  ;;  %v4801_v50 = vsel %vm1405_vm1, %v4786_v11, %v4800_v27  ;;  %v4943_v63 = vmul.f32 1.442695, %v4915_v52  ;;  %v3533_v23 = vpop.permute.xlu1 %3532  ;;  %v11738_v24 = vld [vmem:[#allocation149_spill] sm:$0xff]  ;;  %v11740_v27 = vld [vmem:[#allocation151_spill] sm:$0xff]  ;;  %v11742_v19 = vld [vmem:[#allocation144_spill] sm:$0xff] }
 0x5a4   :  { %v3610_v2 = vsel %vm31_vm0, %v3573_v61, 0.0  ;;  %v3575_v5 = vmul.f32 %v10127_v4, %v11733_v9  ;;  %4804 = vst.msk [vmem:[#allocation2 + $0x30] sm:$0xff] %vm31_vm0, %v4801_v50  ;;  %v3595_v16 = vrot.slane %v3594_v41, 4  ;;  %v3611_v0 = vsel %vm31_vm0, %v3574_v17, 0.0  ;;  %v11736_v4 = vld [vmem:[#allocation90_spill] sm:$0xff]  ;;  %v11739_v62 = vld [vmem:[#allocation153_spill] sm:$0xff] }
 0x5a5   :  { %v10312_v26 = vadd.f32 %v10229_v6, %v11734_v21  ;;  %v3604_v38 = vrot.slane %v3603_v45, 4  ;;  %v3612_v47 = vadd.f32 %v3611_v0, %v3610_v2  ;;  %v5146_v7 = vmul.f32 %v6483_v37, %v9955_v28  ;;  %v10326_v43 = vpop.permute.xlu0 %5226  ;;  %v11741_v18 = vld [vmem:[#allocation45_spill] sm:$0xff]  ;;  %v11743_v21 = vld [vmem:[#allocation155_spill] sm:$0xff] }
 0x5a6   :  { %v6489_v52 = vpop.eup %6488  ;;  %v3586_v49 = vrot.slane %v3585_v25, 4  ;;  %v10316_v32 = vadd.f32 %v5153_v8, %v11735_v57  ;;  %6490 = vpow2.f32 %v10235_v31  ;;  %v3576_v13 = vmul.f32 %v3533_v23, %v11736_v4 }
 0x5a7   :  { %6492 = vpow2.f32 %v4943_v63  ;;  %v3613_v35 = vrot.slane %v3612_v47, 4  ;;  %v5148_v59 = vmul.f32 %v6485_v30, %v10038_v58  ;;  %v5150_v6 = vmul.f32 %v6487_v14, %v10041_v15  ;;  %v3544_v55 = vpop.permute.xlu1 %3543 }
 0x5a8   :  { %v3619_v60 = vsel %vm31_vm0, %v3575_v5, 0.0  ;;  %v3577_v28 = vmul.f32 %v10153_v54, %v11737_v39  ;;  %v3596_v37 = vadd.f32 %v3595_v16, %v3594_v41  ;;  %v3620_v61 = vsel %vm31_vm0, %v3576_v13, 0.0  ;;  %v11745_v13 = vld [vmem:[#allocation11_spill] sm:$0xff] }
 0x5a9   :  { %v3605_v20 = vadd.f32 %v3604_v38, %v3603_v45  ;;  %v3621_v31 = vadd.f32 %v3620_v61, %v3619_v60  ;;  %v5162_v11 = vadd.f32 %v5146_v7, %v11738_v24  ;;  %v4912_v58 = vmul.f32 %v10003_v53, %v10139_v46  ;;  %v10346_v23 = vpop.permute.xlu0 %5237 }
 0x5aa   :  { %v3587_v30 = vadd.f32 %v3586_v49, %v3585_v25  ;;  %v3614_v15 = vadd.f32 %v3613_v35, %v3612_v47  ;;  %v3578_v14 = vmul.f32 %v3544_v55, %v11739_v62  ;;  %v4914_v54 = vmul.f32 %v10003_v53, %v10177_v1 }
 0x5ab   :  { %v3622_v41 = vrot.slane %v3621_v31, 4  ;;  %v10335_v8 = vadd.f32 %v5148_v59, %v11740_v27  ;;  %v10338_v45 = vadd.f32 %v5150_v6, %v11741_v18  ;;  %v5152_v17 = vmul.f32 %v6489_v52, %v10058_v44  ;;  %v3555_v9 = vpop.permute.xlu1 %3554  ;;  %v11744_v52 = vld [vmem:[#allocation156_spill] sm:$0xff] }
 0x5ac   :  { %v3628_v22 = vsel %vm31_vm0, %v3577_v28, 0.0  ;;  %v3579_v46 = vmul.f32 %v10194_v36, %v11742_v19  ;;  %v3597_v25 = vrot.slane %v3596_v37, 2  ;;  %v3629_v50 = vsel %vm31_vm0, %v3578_v14, 0.0 }
 0x5ad   :  { %v3606_v63 = vrot.slane %v3605_v20, 2  ;;  %v3623_v2 = vadd.f32 %v3622_v41, %v3621_v31  ;;  %v3630_v1 = vadd.f32 %v3629_v50, %v3628_v22  ;;  %v4937_v5 = vmul.f32 1.442695, %v4912_v58  ;;  %v10366_v18 = vpop.permute.xlu0 %5248 }
 0x5ae   :  { %v3588_v16 = vrot.slane %v3587_v30, 2  ;;  %v3615_v0 = vrot.slane %v3614_v15, 2  ;;  %v3580_v38 = vmul.f32 %v3555_v9, %v11743_v21  ;;  %v4941_v47 = vmul.f32 1.442695, %v4914_v54 }
 0x5af   :  { %v3624_v44 = vrot.slane %v3623_v2, 2  ;;  %v3631_v7 = vrot.slane %v3630_v1, 4  ;;  %v10349_v49 = vadd.f32 %v5152_v17, %v11744_v52  ;;  %v4916_v36 = vmul.f32 %v10003_v53, %v10260_v34  ;;  %v3566_v31 = vpop.permute.xlu1 %3565  ;;  %v11746_v53 = vld [vmem:[#allocation30_spill] sm:$0xff] }
 0x5b0   :  { %v10353_v57 = vpop.eup %6490  ;;  %v3637_v4 = vsel %vm31_vm0, %v3579_v46, 0.0  ;;  %v3581_v35 = vmul.f32 %v10226_v10, %v11745_v13  ;;  %v3598_v59 = vadd.f32 %v3597_v25, %v3596_v37  ;;  %v3638_v6 = vsel %vm31_vm0, %v3580_v38, 0.0 }
 0x5b1   :  { %v10359_v60 = vpop.eup %6492  ;;  %v3607_v39 = vadd.f32 %v3606_v63, %v3605_v20  ;;  %v3632_v28 = vadd.f32 %v3631_v7, %v3630_v1  ;;  %v3639_v61 = vadd.f32 %v3638_v6, %v3637_v4  ;;  %6494 = vpow2.f32 %v4937_v5  ;;  %v10374_v52 = vpop.permute.xlu0 %4050 }
 0x5b2   :  { %v3589_v55 = vadd.f32 %v3588_v16, %v3587_v30  ;;  %v3616_v24 = vadd.f32 %v3615_v0, %v3614_v15  ;;  %v3582_v34 = vmul.f32 %v3566_v31, %v11746_v53  ;;  %6496 = vpow2.f32 %v4941_v47 }
 0x5b3   :  { %v3625_v58 = vadd.f32 %v3624_v44, %v3623_v2  ;;  %v3633_v62 = vrot.slane %v3632_v28, 2  ;;  %v3640_v14 = vrot.slane %v3639_v61, 4  ;;  %v4945_v54 = vmul.f32 1.442695, %v4916_v36  ;;  %v5187_v22 = vpop.permute.xlu1 %5186 }
 0x5b4   :  { %v3646_v10 = vsel %vm31_vm0, %v3581_v35, 0.0  ;;  %v5265_v37 = vmul.f32 %v10250_v3, %v10171_v40  ;;  %v3599_v41 = vrot.slane %v3598_v59, 1  ;;  %v3647_v20 = vsel %vm31_vm0, %v3582_v34, 0.0 }
 0x5b5   :  { %v3608_v27 = vrot.slane %v3607_v39, 1  ;;  %v3634_v30 = vadd.f32 %v3633_v62, %v3632_v28  ;;  %v3641_v15 = vadd.f32 %v3640_v14, %v3639_v61  ;;  %v3648_v17 = vadd.f32 %v3647_v20, %v3646_v10 }
 0x5b6   :  { %v5267_v19 = vmul.f32 %v10262_v29, %v10296_v56  ;;  %v3590_v46 = vrot.slane %v3589_v55, 1  ;;  %v3617_v25 = vrot.slane %v3616_v24, 1  ;;  %v5266_v50 = vmul.f32 %v5187_v22, %v5162_v11 }
 0x5b7   :  { %v3626_v63 = vrot.slane %v3625_v58, 1  ;;  %v3642_v2 = vrot.slane %v3641_v15, 2  ;;  %v3649_v1 = vrot.slane %v3648_v17, 4  ;;  %6498 = vpow2.f32 %v4945_v54  ;;  %v5198_v47 = vpop.permute.xlu1 %5197 }
 0x5b8   :  { %v5281_v40 = vsel %vm31_vm0, %v5265_v37, 0.0  ;;  %v3600_v3 = vadd.f32 %v3599_v41, %v3598_v59  ;;  %v3635_v9 = vrot.slane %v3634_v30, 1  ;;  %v5282_v5 = vsel %vm31_vm0, %v5266_v50, 0.0 }
 0x5b9   :  { %v3609_v16 = vadd.f32 %v3608_v27, %v3607_v39  ;;  %v3643_v0 = vadd.f32 %v3642_v2, %v3641_v15  ;;  %v3650_v21 = vadd.f32 %v3649_v1, %v3648_v17  ;;  %v5283_v38 = vadd.f32 %v5282_v5, %v5281_v40  ;;  %v10390_v15 = vpop.permute.xlu0 %4061  ;;  %v11748_v40 = vld [vmem:[#allocation95_spill] sm:$0xff] }
 0x5ba   :  { %v5290_v29 = vsel %vm31_vm0, %v5267_v19, 0.0  ;;  %v3591_v56 = vadd.f32 %v3590_v46, %v3589_v55  ;;  %v3618_v44 = vadd.f32 %v3617_v25, %v3616_v24  ;;  %v5268_v11 = vmul.f32 %v5198_v47, %v10335_v8 }
 0x5bb   :  { %v6495_v7 = vpop.eup %6494  ;;  %v3627_v36 = vadd.f32 %v3626_v63, %v3625_v58  ;;  %v3644_v4 = vrot.slane %v3643_v0, 1  ;;  %v3651_v13 = vrot.slane %v3650_v21, 2  ;;  %v5284_v35 = vrot.slane %v5283_v38, 4  ;;  %v5209_v53 = vpop.permute.xlu1 %5208 }
 0x5bc   :  { %v6497_v59 = vpop.eup %6496  ;;  %v5269_v6 = vmul.f32 %v10275_v42, %v10300_v48  ;;  %v3663_v39 = vsel %vm1393_vm10, %v3600_v3, %v3591_v56  ;;  %v3636_v28 = vadd.f32 %v3635_v9, %v3634_v30  ;;  %v5291_v61 = vsel %vm31_vm0, %v5268_v11, 0.0  ;;  %v11751_v56 = vld [vmem:[#allocation124_spill] sm:$0xff]  ;;  %v11752_v11 = vld [vmem:[#allocation42_spill] sm:$0xff] }
 0x5bd   :  { %v3664_v31 = vsel %vm1395_vm11, %v3609_v16, %v3663_v39  ;;  %v3652_v55 = vadd.f32 %v3651_v13, %v3650_v21  ;;  %v5285_v8 = vadd.f32 %v5284_v35, %v5283_v38  ;;  %v5292_v24 = vadd.f32 %v5291_v61, %v5290_v29  ;;  %v11749_v16 = vld [vmem:[#allocation131_spill] sm:$0xff] }
 0x5be   :  { %v3665_v34 = vsel %vm1397_vm12, %v3618_v44, %v3664_v31  ;;  %v3645_v58 = vadd.f32 %v3644_v4, %v3643_v0  ;;  %v5270_v62 = vmul.f32 %v5209_v53, %v10338_v45  ;;  %v5154_v14 = vmul.f32 %v6495_v7, %v10072_v51  ;;  %v11753_v4 = vld [vmem:[#allocation145_spill] sm:$0xff] }
 0x5bf   :  { %v3666_v42 = vsel %vm1399_vm13, %v3627_v36, %v3665_v34  ;;  %v3653_v48 = vrot.slane %v3652_v55, 1  ;;  %v5286_v54 = vrot.slane %v5285_v8, 2  ;;  %v5293_v10 = vrot.slane %v5292_v24, 4  ;;  %v5220_v19 = vpop.permute.xlu1 %5219 }
 0x5c0   :  { %v5299_v37 = vsel %vm31_vm0, %v5269_v6, 0.0  ;;  %v5271_v41 = vmul.f32 %v10303_v33, %v10312_v26  ;;  %v3667_v20 = vsel %vm1401_vm14, %v3636_v28, %v3666_v42  ;;  %v5300_v27 = vsel %vm31_vm0, %v5270_v62, 0.0  ;;  %v11747_v33 = vld [vmem:[#allocation26_spill] sm:$0xff]  ;;  %v11754_v6 = vld [vmem:[#allocation56_spill] sm:$0xff] }
 0x5c1   :  { %v6499_v30 = vpop.eup %6498  ;;  %v3654_v45 = vadd.f32 %v3653_v48, %v3652_v55  ;;  %v5287_v17 = vadd.f32 %v5286_v54, %v5285_v8  ;;  %v5294_v51 = vadd.f32 %v5293_v10, %v5292_v24  ;;  %v5301_v22 = vadd.f32 %v5300_v27, %v5299_v37 }
 0x5c2   :  { %v5155_v46 = vmul.f32 %v10353_v57, %v11715_v12  ;;  %v3668_v25 = vsel %vm1403_vm15, %v3645_v58, %v3667_v20  ;;  %v5272_v50 = vmul.f32 %v5220_v19, %v10349_v49  ;;  %v5156_v26 = vmul.f32 %v6497_v59, %v11747_v33  ;;  %v11750_v49 = vld [vmem:[#allocation146_spill] sm:$0xff]  ;;  %v11755_v58 = vld [vmem:[#allocation12_spill] sm:$0xff] }
 0x5c3   :  { %v3669_v63 = vsel %vm1405_vm1, %v3654_v45, %v3668_v25  ;;  %v5295_v2 = vrot.slane %v5294_v51, 2  ;;  %v5302_v1 = vrot.slane %v5301_v22, 4  ;;  %v5170_v3 = vadd.f32 %v5154_v14, %v11748_v40  ;;  %v5231_v29 = vpop.permute.xlu1 %5230 }
 0x5c4   :  { %v5308_v9 = vsel %vm31_vm0, %v5271_v41, 0.0  ;;  %v5273_v5 = vmul.f32 %v10326_v43, %v10316_v32  ;;  %3672 = vst.msk [vmem:[#allocation2 + $0x20] sm:$0xff] %vm31_vm0, %v3669_v63  ;;  %v5288_v12 = vrot.slane %v5287_v17, 1  ;;  %v5309_v57 = vsel %vm31_vm0, %v5272_v50, 0.0  ;;  %v10410_v43 = vpop.permute.xlu0 %4072 }
 0x5c5   :  { %v5141_v0 = vmul.f32 %v11750_v49, %v11749_v16  ;;  %v5296_v21 = vadd.f32 %v5295_v2, %v5294_v51  ;;  %v5303_v38 = vadd.f32 %v5302_v1, %v5301_v22  ;;  %v5310_v47 = vadd.f32 %v5309_v57, %v5308_v9  ;;  %v11757_v57 = vld [vmem:[#allocation7_spill] sm:$0xff] }
 0x5c6   :  { %v5171_v44 = vadd.f32 %v5155_v46, %v11751_v56  ;;  %v5157_v7 = vmul.f32 %v10359_v60, %v11752_v11  ;;  %v5274_v36 = vmul.f32 %v5231_v29, %v5170_v3  ;;  %v5172_v32 = vadd.f32 %v5156_v26, %v11753_v4  ;;  %v11756_v46 = vld [vmem:[#allocation67_spill] sm:$0xff]  ;;  %v6527_v4 = vld [vmem:[%s10748_s1 + $0x8] sm:$0xff] }
 0x5c7   :  { %v5297_v13 = vrot.slane %v5296_v21, 1  ;;  %v5304_v35 = vrot.slane %v5303_v38, 2  ;;  %v5311_v59 = vrot.slane %v5310_v47, 4  ;;  %v5158_v39 = vmul.f32 %v6499_v30, %v11754_v6  ;;  %v5242_v34 = vpop.permute.xlu1 %5241 }
 0x5c8   :  { %v5317_v28 = vsel %vm31_vm0, %v5273_v5, 0.0  ;;  %v5275_v61 = vmul.f32 %v10346_v23, %v5171_v44  ;;  %v5289_v31 = vadd.f32 %v5288_v12, %v5287_v17  ;;  %v5318_v55 = vsel %vm31_vm0, %v5274_v36, 0.0  ;;  %v4084_v30 = vpop.permute.xlu0 %4083 }
 0x5c9   :  { %v5298_v8 = vadd.f32 %v5297_v13, %v5296_v21  ;;  %v5305_v24 = vadd.f32 %v5304_v35, %v5303_v38  ;;  %v5312_v60 = vadd.f32 %v5311_v59, %v5310_v47  ;;  %v5319_v53 = vadd.f32 %v5318_v55, %v5317_v28  ;;  %v11759_v13 = vld [vmem:[#allocation101_spill] sm:$0xff] }
 0x5ca   :  { %v5142_v62 = vmul.f32 %v11750_v49, %v11755_v58  ;;  %v5173_v14 = vadd.f32 %v5157_v7, %v5141_v0  ;;  %v5276_v42 = vmul.f32 %v5242_v34, %v5172_v32  ;;  %v5326_v23 = vsel %vm31_vm0, %v5275_v61, 0.0  ;;  %v11758_v7 = vld [vmem:[#allocation154_spill] sm:$0xff]  ;;  %v6528_v59 = vld [vmem:[%s10748_s1 + $0x10] sm:$0xff] }
 0x5cb   :  { %v5361_v48 = vsel %vm1393_vm10, %v5298_v8, %v5289_v31  ;;  %v5306_v54 = vrot.slane %v5305_v24, 1  ;;  %v5313_v10 = vrot.slane %v5312_v60, 2  ;;  %v5320_v37 = vrot.slane %v5319_v53, 4  ;;  %v5253_v19 = vpop.permute.xlu1 %5252  ;;  %v11760_v31 = vld [vmem:[#allocation136_spill] sm:$0xff] }
 0x5cc   :  { %v5277_v41 = vmul.f32 %v10366_v18, %v5173_v14  ;;  %v5327_v20 = vsel %vm31_vm0, %v5276_v42, 0.0  ;;  %v5174_v27 = vadd.f32 %v5158_v39, %v5142_v62  ;;  %v4862_v25 = vcombine.high %v11756_v46, %v11756_v46  ;;  %v4095_v49 = vpop.permute.xlu0 %4094  ;;  %v11761_v8 = vld [vmem:[#allocation152_spill] sm:$0xff] }
 0x5cd   :  { %v5307_v45 = vadd.f32 %v5306_v54, %v5305_v24  ;;  %v5314_v17 = vadd.f32 %v5313_v10, %v5312_v60  ;;  %v5321_v51 = vadd.f32 %v5320_v37, %v5319_v53  ;;  %v5328_v22 = vadd.f32 %v5327_v20, %v5326_v23  ;;  %v11762_v24 = vld [vmem:[#allocation157_spill] sm:$0xff]  ;;  %v11764_v20 = vld [vmem:[#allocation14_spill] sm:$0xff] }
 0x5ce   :  { %v5278_v50 = vmul.f32 %v5253_v19, %v5174_v27  ;;  %v5335_v18 = vsel %vm31_vm0, %v5277_v41, 0.0  ;;  %v4894_v16 = vrot.slane %v4862_v25, %v11757_v57  ;;  %v4135_v36 = vmul.f32 %v10390_v15, %v11758_v7 }
 0x5cf   :  { %v5362_v33 = vsel %vm1395_vm11, %v5307_v45, %v5361_v48  ;;  %v5315_v26 = vrot.slane %v5314_v17, 1  ;;  %v5322_v63 = vrot.slane %v5321_v51, 2  ;;  %v5329_v2 = vrot.slane %v5328_v22, 4  ;;  %v4055_v12 = vpop.permute.xlu1 %4054  ;;  %v11763_v48 = vld [vmem:[#allocation61_spill] sm:$0xff] }
 0x5d0   :  { %v5336_v1 = vsel %vm31_vm0, %v5278_v50, 0.0  ;;  %v4917_v32 = vmul.f32 %v6527_v4, %v4894_v16  ;;  %v4918_v6 = vmul.f32 %v6528_v59, %v4894_v16  ;;  %v4134_v55 = vmul.f32 %v4055_v12, %v11760_v31  ;;  %v4106_v53 = vpop.permute.xlu0 %4105  ;;  %v11765_v50 = vld [vmem:[#allocation78_spill] sm:$0xff]  ;;  %v11767_v16 = vld [vmem:[#allocation44_spill] sm:$0xff]  ;;  %v11772_v31 = vld [vmem:[#allocation19_spill] sm:$0xff] }
 0x5d1   :  { %v5316_v40 = vadd.f32 %v5315_v26, %v5314_v17  ;;  %v5323_v3 = vadd.f32 %v5322_v63, %v5321_v51  ;;  %v5330_v9 = vadd.f32 %v5329_v2, %v5328_v22  ;;  %v5337_v5 = vadd.f32 %v5336_v1, %v5335_v18  ;;  %v11766_v2 = vld [vmem:[#allocation10_spill] sm:$0xff] }
 0x5d2   :  { %v4133_v15 = vmul.f32 %v10374_v52, %v11761_v8  ;;  %v4137_v60 = vmul.f32 %v10410_v43, %v11762_v24  ;;  %v4947_v42 = vmul.f32 1.442695, %v4917_v32  ;;  %v4949_v10 = vmul.f32 1.442695, %v4918_v6 }
 0x5d3   :  { %v5363_v0 = vsel %vm1397_vm12, %v5316_v40, %v5362_v33  ;;  %v5324_v21 = vrot.slane %v5323_v3, 1  ;;  %v5331_v38 = vrot.slane %v5330_v9, 2  ;;  %v5338_v47 = vrot.slane %v5337_v5, 4  ;;  %v4066_v11 = vpop.permute.xlu1 %4065 }
 0x5d4   :  { %v4136_v35 = vmul.f32 %v4066_v11, %v11759_v13  ;;  %v4158_v37 = vsel %vm31_vm0, %v4135_v36, 0.0  ;;  %v4150_v52 = vsel %vm31_vm0, %v4134_v55, 0.0  ;;  %v4139_v27 = vmul.f32 %v4084_v30, %v11764_v20  ;;  %v4117_v26 = vpop.permute.xlu0 %4116  ;;  %v11770_v13 = vld [vmem:[#allocation16_spill] sm:$0xff] }
 0x5d5   :  { %v5325_v29 = vadd.f32 %v5324_v21, %v5323_v3  ;;  %v5332_v56 = vadd.f32 %v5331_v38, %v5330_v9  ;;  %v5339_v44 = vadd.f32 %v5338_v47, %v5337_v5  ;;  %v4149_v17 = vsel %vm31_vm0, %v4133_v15, 0.0  ;;  %v11768_v21 = vld [vmem:[#allocation28_spill] sm:$0xff]  ;;  %v10466_v47 = vld [vmem:[%s10748_s1 + $0xe0] ss:$0 sm:$0xff] }
 0x5d6   :  { %v4159_v62 = vsel %vm31_vm0, %v4136_v35, 0.0  ;;  %v4167_v51 = vsel %vm31_vm0, %v4137_v60, 0.0  ;;  %6500 = vpow2.f32 %v4947_v42  ;;  %v4151_v46 = vadd.f32 %v4150_v52, %v4149_v17  ;;  %v11774_v42 = vld [vmem:[#allocation132_spill] sm:$0xff] }
 0x5d7   :  { %v5364_v39 = vsel %vm1399_vm13, %v5325_v29, %v5363_v0  ;;  %v5333_v28 = vrot.slane %v5332_v56, 1  ;;  %v5340_v61 = vrot.slane %v5339_v44, 2  ;;  %v4077_v14 = vpop.permute.xlu1 %4076  ;;  %v4160_v43 = vadd.f32 %v4159_v62, %v4158_v37 }
 0x5d8   :  { %v4138_v54 = vmul.f32 %v4077_v14, %v11763_v48  ;;  %6502 = vpow2.f32 %v4949_v10  ;;  %v4176_v30 = vsel %vm31_vm0, %v4139_v27, 0.0  ;;  %v4141_v18 = vmul.f32 %v4095_v49, %v11766_v2  ;;  %v4128_v36 = vpop.permute.xlu0 %4127  ;;  %v11776_v27 = vld [vmem:[#allocation49_spill] sm:$0xff] }
 0x5d9   :  { %v5334_v34 = vadd.f32 %v5333_v28, %v5332_v56  ;;  %v5341_v58 = vadd.f32 %v5340_v61, %v5339_v44  ;;  %v4161_v1 = vrot.slane %v4160_v43, 4  ;;  %v4152_v5 = vrot.slane %v4151_v46, 4  ;;  %v11769_v56 = vld [vmem:[#allocation57_spill] sm:$0xff] }
 0x5da   :  { %v4168_v45 = vsel %vm31_vm0, %v4138_v54, 0.0  ;;  %v5000_v38 = vcombine.high %v11768_v21, %v11768_v21  ;;  %v4185_v49 = vsel %vm31_vm0, %v4141_v18, 0.0  ;;  %v4143_v44 = vmul.f32 %v4106_v53, %v11769_v56  ;;  %v11773_v53 = vld [vmem:[#allocation73_spill] sm:$0xff]  ;;  %v11775_v54 = vld [vmem:[#allocation128_spill] sm:$0xff]  ;;  %v11781_v21 = vld [vmem:[#allocation107_spill] sm:$0xff] }
 0x5db   :  { %v5365_v23 = vsel %vm1401_vm14, %v5334_v34, %v5364_v39  ;;  %v5342_v41 = vrot.slane %v5341_v58, 1  ;;  %v4088_v19 = vpop.permute.xlu1 %4087  ;;  %v4169_v25 = vadd.f32 %v4168_v45, %v4167_v51  ;;  %v4162_v11 = vadd.f32 %v4161_v1, %v4160_v43  ;;  %v11771_v39 = vld [vmem:[#allocation92_spill] sm:$0xff]  ;;  %v11777_v45 = vld [vmem:[#allocation127_spill] sm:$0xff]  ;;  %v11778_v51 = vld [vmem:[#allocation138_spill] sm:$0xff] }
 0x5dc   :  { %v4140_v33 = vmul.f32 %v4088_v19, %v11765_v50  ;;  %v5384_v35 = vmul.f32 %v10466_v47, %v11770_v13  ;;  %v4153_v59 = vadd.f32 %v4152_v5, %v4151_v46  ;;  %v5120_v61 = vrot.slane %v5000_v38, %v11757_v57  ;;  %v11779_v19 = vld [vmem:[#allocation8_spill] sm:$0xff]  ;;  %v11780_v5 = vld [vmem:[#allocation17_spill] sm:$0xff]  ;;  %v5371_v56 = vld [vmem:[#allocation2] sm:$0xff] }
 0x5dd   :  { %v5343_v22 = vadd.f32 %v5342_v41, %v5341_v58  ;;  %v4170_v12 = vrot.slane %v4169_v25, 4  ;;  %v10477_v55 = vmul.f32 %v10466_v47, %v11772_v31  ;;  %v4194_v60 = vsel %vm31_vm0, %v4143_v44, 0.0 }
 0x5de   :  { %v4177_v40 = vsel %vm31_vm0, %v4140_v33, 0.0  ;;  %v4145_v34 = vmul.f32 %v4117_v26, %v11773_v53  ;;  %v4163_v58 = vrot.slane %v4162_v11, 2  ;;  %v5143_v48 = vmul.f32 %v5120_v61, %v11774_v42 }
 0x5df   :  { %v10455_v63 = vsel %vm1403_vm15, %v5343_v22, %v5365_v23  ;;  %v4178_v3 = vadd.f32 %v4177_v40, %v4176_v30  ;;  %v4099_v9 = vpop.permute.xlu1 %4098  ;;  %v4171_v6 = vadd.f32 %v4170_v12, %v4169_v25  ;;  %v4154_v52 = vrot.slane %v4153_v59, 2  ;;  %v5260_v25 = vpop.permute.xlu0 %5259 }
 0x5e0   :  { %v4142_v0 = vmul.f32 %v4099_v9, %v11767_v16  ;;  %v6501_v24 = vpop.eup %6500  ;;  %v5144_v22 = vmul.f32 %v5120_v61, %v11778_v51  ;;  %v4147_v46 = vmul.f32 %v4128_v36, %v11779_v19  ;;  %v4203_v26 = vsel %vm31_vm0, %v4145_v34, 0.0 }
 0x5e1   :  { %v4179_v29 = vrot.slane %v4178_v3, 4  ;;  %v5159_v10 = vmul.f32 %v6501_v24, %v11775_v54  ;;  %v4172_v20 = vrot.slane %v4171_v6, 2  ;;  %v4164_v30 = vadd.f32 %v4163_v58, %v4162_v11 }
 0x5e2   :  { %v4186_v7 = vsel %vm31_vm0, %v4142_v0, 0.0  ;;  %v6503_v14 = vpop.eup %6502  ;;  %v5385_v12 = vmul.f32 %v10466_v47, %v11780_v5  ;;  %v4155_v16 = vadd.f32 %v4154_v52, %v4153_v59 }
 0x5e3   :  { %v4187_v4 = vadd.f32 %v4186_v7, %v4185_v49  ;;  %v4110_v32 = vpop.permute.xlu1 %4109  ;;  %v4180_v8 = vadd.f32 %v4179_v29, %v4178_v3  ;;  %v5160_v17 = vmul.f32 %v6503_v14, %v11777_v45  ;;  %v5175_v1 = vadd.f32 %v5159_v10, %v5143_v48 }
 0x5e4   :  { %v4144_v28 = vmul.f32 %v4110_v32, %v11771_v39  ;;  %v4173_v0 = vadd.f32 %v4172_v20, %v4171_v6  ;;  %v4212_v49 = vsel %vm31_vm0, %v4147_v46, 0.0  ;;  %v5372_v39 = vld [vmem:[#allocation2 + $0x8] sm:$0xff]  ;;  %v4156_v53 = vrot.slane %v4155_v16, 1 }
 0x5e5   :  { %v4188_v15 = vrot.slane %v4187_v4, 4  ;;  %v4181_v50 = vrot.slane %v4180_v8, 2  ;;  %v5176_v29 = vadd.f32 %v5160_v17, %v5144_v22  ;;  %v5279_v36 = vmul.f32 %v5260_v25, %v5175_v1 }
 0x5e6   :  { %v4195_v62 = vsel %vm31_vm0, %v4144_v28, 0.0  ;;  %v5465_v28 = vpop.permute.xlu0 %5464  ;;  %v4174_v34 = vrot.slane %v4173_v0, 1  ;;  %v5393_v42 = vadd.f32 %v5385_v12, %v5372_v39  ;;  %v4157_v17 = vadd.f32 %v4156_v53, %v4155_v16 }
 0x5e7   :  { %v4189_v37 = vadd.f32 %v4188_v15, %v4187_v4  ;;  %v4196_v23 = vadd.f32 %v4195_v62, %v4194_v60  ;;  %v4121_v41 = vpop.permute.xlu1 %4120  ;;  %v4182_v44 = vadd.f32 %v4181_v50, %v4180_v8  ;;  %v4165_v4 = vrot.slane %v4164_v30, 1  ;;  %v11782_v15 = vld [vmem:[#allocation20_spill] sm:$0xff] }
 0x5e8   :  { %v4146_v43 = vmul.f32 %v4121_v41, %v11776_v27  ;;  %v5387_v24 = vmul.f32 %v10466_v47, %v11782_v15  ;;  %v5392_v60 = vadd.f32 %v5384_v35, %v5371_v56  ;;  %v5344_v48 = vsel %vm31_vm0, %v5279_v36, 0.0  ;;  %v5374_v35 = vld [vmem:[#allocation2 + $0x18] sm:$0xff] }
 0x5e9   :  { %v4197_v33 = vrot.slane %v4196_v23, 4  ;;  %v4190_v2 = vrot.slane %v4189_v37, 2  ;;  %v4183_v58 = vrot.slane %v4182_v44, 1  ;;  %v4166_v54 = vadd.f32 %v4165_v4, %v4164_v30 }
 0x5ea   :  { %v4204_v18 = vsel %vm31_vm0, %v4146_v43, 0.0  ;;  %v5488_v45 = vmul.f32 %v5465_v28, %v5392_v60  ;;  %v4175_v51 = vadd.f32 %v4174_v34, %v4173_v0  ;;  %v5469_v19 = vpop.permute.xlu0 %5468  ;;  %v5375_v28 = vld [vmem:[#allocation2 + $0x20] sm:$0xff] }
 0x5eb   :  { %v4198_v40 = vadd.f32 %v4197_v33, %v4196_v23  ;;  %v4205_v3 = vadd.f32 %v4204_v18, %v4203_v26  ;;  %v4132_v9 = vpop.permute.xlu1 %4131  ;;  %v4191_v32 = vadd.f32 %v4190_v2, %v4189_v37  ;;  %v5373_v23 = vld [vmem:[#allocation2 + $0x10] sm:$0xff]  ;;  %v4184_v46 = vadd.f32 %v4183_v58, %v4182_v44 }
 0x5ec   :  { %v4148_v38 = vmul.f32 %v4132_v9, %v11781_v21  ;;  %v5394_v26 = vadd.f32 %v10477_v55, %v5373_v23  ;;  %v5395_v2 = vadd.f32 %v5387_v24, %v5374_v35  ;;  %v4229_v1 = vsel %vm1393_vm10, %v4166_v54, %v4157_v17  ;;  %v6529_v17 = vld [vmem:[%s10746_s0] sm:$0xff] }
 0x5ed   :  { %v4199_v11 = vrot.slane %v4198_v40, 2  ;;  %v4206_v7 = vrot.slane %v4205_v3, 4  ;;  %v4192_v10 = vrot.slane %v4191_v32, 1  ;;  %v4230_v16 = vsel %vm1395_vm11, %v4175_v51, %v4229_v1 }
 0x5ee   :  { %v4213_v13 = vsel %vm31_vm0, %v4148_v38, 0.0  ;;  %v5490_v12 = vmul.f32 %v5469_v19, %v5394_v26  ;;  %v4231_v38 = vsel %vm1397_vm12, %v4184_v46, %v4230_v16  ;;  %v6530_v19 = vld [vmem:[%s10746_s0 + $0x10] sm:$0xff] }
 0x5ef   :  { %v4200_v61 = vadd.f32 %v4199_v11, %v4198_v40  ;;  %v4207_v31 = vadd.f32 %v4206_v7, %v4205_v3  ;;  %v4214_v59 = vadd.f32 %v4213_v13, %v4212_v49  ;;  %v5264_v6 = vpop.permute.xlu1 %5263  ;;  %v4193_v30 = vadd.f32 %v4192_v10, %v4191_v32 }
 0x5f0   :  { %v5280_v8 = vmul.f32 %v5264_v6, %v5176_v29  ;;  %v11784_v6 = vld [vmem:[#allocation15_spill] sm:$0xff] }
 0x5f1   :  { %v4208_v62 = vrot.slane %v4207_v31, 2  ;;  %v4215_v14 = vrot.slane %v4214_v59, 4  ;;  %v4201_v41 = vrot.slane %v4200_v61, 1  ;;  %v4232_v49 = vsel %vm1399_vm13, %v4193_v30, %v4231_v38  ;;  %v6532_v30 = vld [vmem:[%s10746_s0 + $0x18] sm:$0xff]  ;;  %v6535_v38 = vld [vmem:[%s10746_s0 + $0x28] sm:$0xff] }
 0x5f2   :  { %v5345_v37 = vsel %vm31_vm0, %v5280_v8, 0.0  ;;  %v5389_v15 = vmul.f32 %v10466_v47, %v11784_v6  ;;  %v5377_v8 = vld [vmem:[#allocation2 + $0x30] sm:$0xff] }
 0x5f3   :  { %v4209_v52 = vadd.f32 %v4208_v62, %v4207_v31  ;;  %v4216_v20 = vadd.f32 %v4215_v14, %v4214_v59  ;;  %v5346_v27 = vadd.f32 %v5345_v37, %v5344_v48  ;;  %v5467_v43 = vpop.permute.xlu1 %5466  ;;  %v4202_v40 = vadd.f32 %v4201_v41, %v4200_v61  ;;  %v5473_v61 = vpop.permute.xlu0 %5472  ;;  %v11783_v31 = vld [vmem:[#allocation18_spill] sm:$0xff] }
 0x5f4   :  { %v5489_v22 = vmul.f32 %v5467_v43, %v5393_v42  ;;  %v5388_v59 = vmul.f32 %v10466_v47, %v11783_v31  ;;  %v11785_v62 = vld [vmem:[#allocation22_spill] sm:$0xff]  ;;  %v11786_v42 = vld [vmem:[#allocation21_spill] sm:$0xff] }
 0x5f5   :  { %v4210_v25 = vrot.slane %v4209_v52, 1  ;;  %v4217_v50 = vrot.slane %v4216_v20, 2  ;;  %v5347_v33 = vrot.slane %v5346_v27, 4  ;;  %v4233_v44 = vsel %vm1401_vm14, %v4202_v40, %v4232_v49  ;;  %v6536_v49 = vld [vmem:[%s10746_s0 + $0x38] sm:$0xff] }
 0x5f6   :  { %v5496_v18 = vpack.c.bf16 %v5489_v22, %v5488_v45  ;;  %v5396_v53 = vadd.f32 %v5388_v59, %v5375_v28  ;;  %v5390_v14 = vmul.f32 %v10466_v47, %v11785_v62  ;;  %v5391_v48 = vmul.f32 %v10466_v47, %v11786_v42 }
 0x5f7   :  { %v4218_v3 = vadd.f32 %v4217_v50, %v4216_v20  ;;  %v5348_v9 = vadd.f32 %v5347_v33, %v5346_v27  ;;  %v5471_v5 = vpop.permute.xlu1 %5470  ;;  %v4211_v0 = vadd.f32 %v4210_v25, %v4209_v52  ;;  %v5477_v54 = vpop.permute.xlu0 %5476  ;;  %v6531_v25 = vld [vmem:[%s10746_s0 + $0x8] sm:$0xff] }
 0x5f8   :  { %v5491_v21 = vmul.f32 %v5471_v5, %v5395_v2  ;;  %6060 = vmatprep.mubr.msk.bf16.mxu0 %vm31_vm0, %v5496_v18  ;;  %v5492_v58 = vmul.f32 %v5473_v61, %v5396_v53  ;;  %v5398_v37 = vadd.f32 %v5390_v14, %v5377_v8 }
 0x5f9   :  { %v4219_v29 = vrot.slane %v4218_v3, 1  ;;  %v5349_v55 = vrot.slane %v5348_v9, 2  ;;  %v4234_v36 = vsel %vm1403_vm15, %v4211_v0, %v4233_v44  ;;  %v6534_v0 = vld [vmem:[%s10746_s0 + $0x30] sm:$0xff] }
 0x5fa   :  { %v5497_v56 = vpack.c.bf16 %v5491_v21, %v5490_v12  ;;  %v5494_v20 = vmul.f32 %v5477_v54, %v5398_v37 }
 0x5fb   :  { %v4220_v11 = vadd.f32 %v4219_v29, %v4218_v3  ;;  %v5350_v7 = vadd.f32 %v5349_v55, %v5348_v9  ;;  %v5475_v24 = vpop.permute.xlu1 %5474  ;;  %v6533_v9 = vld [vmem:[%s10746_s0 + $0x20] sm:$0xff] }
 0x5fc   :  { %6061 = vmatmul.mubr.msk.bf16.vlgmr.msra.gmra.mrb[0].mxu0 %vm31_vm0, %v5497_v56 }
 0x5fd   :  { %v4235_v4 = vsel %vm1405_vm1, %v4220_v11, %v4234_v36  ;;  %v5351_v32 = vrot.slane %v5350_v7, 1 }
 0x5fe   :  { %4238 = vst.msk [vmem:[#allocation2 + $0x28] sm:$0xff] %vm31_vm0, %v4235_v4 }
 0x5ff   :  { %v5352_v13 = vadd.f32 %v5351_v32, %v5350_v7  ;;  %v5479_v52 = vpop.permute.xlu1 %5478 }
 0x601   :  { %v5367_v39 = vsel %vm1405_vm1, %v5352_v13, %v10455_v63 }
 0x602   :  { %5370 = vst.msk [vmem:[#allocation2 + $0x38] sm:$0xff] %vm31_vm0, %v5367_v39 }
 0x605   :  { %v5376_v60 = vld [vmem:[#allocation2 + $0x28] sm:$0xff] }
 0x606   :  { %v5397_v34 = vadd.f32 %v5389_v15, %v5376_v60 }
 0x608   :  { %v5493_v63 = vmul.f32 %v5475_v24, %v5397_v34 }
 0x609   :  { %v5378_v10 = vld [vmem:[#allocation2 + $0x38] sm:$0xff] }
 0x60a   :  { %v5498_v23 = vpack.c.bf16 %v5493_v63, %v5492_v58  ;;  %v5399_v41 = vadd.f32 %v5391_v48, %v5378_v10 }
 0x60c   :  { %v5495_v27 = vmul.f32 %v5479_v52, %v5399_v41  ;;  %6064 = vmatprep.mubr.msk.bf16.mxu0 %vm31_vm0, %v5498_v23 }
 0x60e   :  { %v5499_v43 = vpack.c.bf16 %v5495_v27, %v5494_v20 }
 0x610   :  { %6065 = vmatmul.mubr.msk.bf16.gmra.mrb[4].mxu0 %vm31_vm0, %v5499_v43 }
 0x6cf   :  { %v6062_v35 = vpop.f32.mrb[0].mxu0 }
 0x6d0   :  { %v5552_v45 = vpop.f32.mrb[1].mxu0  ;;  %v10531_v46 = vadd.f32 %v6530_v19, %v6062_v35 }
 0x6d1   :  { %v10526_v47 = vadd.f32 %v6529_v17, %v5552_v45  ;;  %v6063_v51 = vpop.f32.mrb[2].mxu0 }
 0x6d2   :  { %v5555_v22 = vpop.f32.mrb[3].mxu0  ;;  %v10545_v2 = vadd.f32 %v6532_v30, %v6063_v51  ;;  %v5599_v18 = vsel %vm31_vm0, %v10531_v46, 0.0  ;;  %v6134_v30 = vld [vmem:[%s10750_s4] sm:$0xff]  }
 0x6d3   :  { %v10536_v50 = vadd.f32 %v6531_v25, %v5555_v22  ;;  %v5593_v33 = vsel %vm31_vm0, %v10526_v47, 0.0  ;;  %6068 = vmatprep.subr.bf16.mxu1 %v6134_v30 }
 0x6d4   :  { %5594 = vadd.xlane.f32.xlu0 %v5593_v33  ;;  %v5602_v1 = vsel %vm31_vm0, %v10545_v2, 0.0  ;;  %6069 = vmatpush3.bf16.msra.mxu1 %v6134_v30 }
 0x6d5   :  { %v5596_v26 = vsel %vm31_vm0, %v10536_v50, 0.0 }
 0x6d6   :  { %5597 = vadd.xlane.f32.xlu1 %v5596_v26 }
 0x6d8   :  { %5600 = vadd.xlane.f32.xlu0 %v5599_v18  ;;  %v6135_v18 = vld [vmem:[%s10750_s4 + $0x8] sm:$0xff]  }
 0x6d9   :  { %6070 = vmatprep.subr.bf16.mxu1 %v6135_v18 }
 0x6da   :  { %6071 = vmatpush3.bf16.msra.mxu1 %v6135_v18 }
 0x6dc   :  { %5603 = vadd.xlane.f32.xlu0 %v5602_v1  ;;  %v5836_v1 = vld [vmem:[%s10748_s1 + $0x38] sm:$0xff] }
 0x6e3   :  { %v6066_v40 = vpop.f32.mrb[4].mxu0 }
 0x6e4   :  { %v5568_v3 = vpop.f32.mrb[5].mxu0  ;;  %v10559_v21 = vadd.f32 %v6534_v0, %v6066_v40  ;;  %v5837_v40 = vld [vmem:[%s10748_s1 + $0x40] sm:$0xff]  ;;  %v5840_v0 = vld [vmem:[%s10748_s1 + $0x58] sm:$0xff] }
 0x6e5   :  { %v10554_v5 = vadd.f32 %v6533_v9, %v5568_v3  ;;  %v6067_v12 = vpop.f32.mrb[6].mxu0  ;;  %v5838_v3 = vld [vmem:[%s10748_s1 + $0x48] sm:$0xff]  ;;  %v5852_v9 = vpack.c.bf16 %v5837_v40, %v5836_v1 }
 0x6e6   :  { %v5571_v16 = vpop.f32.mrb[7].mxu0  ;;  %v10571_v56 = vadd.f32 %v6536_v49, %v6067_v12  ;;  %v5611_v11 = vsel %vm31_vm0, %v10559_v21, 0.0  ;;  %v5839_v12 = vld [vmem:[%s10748_s1 + $0x50] sm:$0xff]  ;;  %v5842_v49 = vld [vmem:[%s10748_s1 + $0x68] sm:$0xff] }
 0x6e7   :  { %v10564_v29 = vadd.f32 %v6535_v38, %v5571_v16  ;;  %v5605_v55 = vsel %vm31_vm0, %v10554_v5, 0.0  ;;  %v5853_v16 = vpack.c.bf16 %v5839_v12, %v5838_v3  ;;  %v5841_v38 = vld [vmem:[%s10748_s1 + $0x60] sm:$0xff]  ;;  %6080 = vmatprep.subr.bf16.mxu0 %v5852_v9 }
 0x6e8   :  { %5606 = vadd.xlane.f32.xlu1 %v5605_v55  ;;  %v5614_v7 = vsel %vm31_vm0, %v10571_v56, 0.0  ;;  %6081 = vmatpush3.bf16.msra.mxu0 %v5852_v9  ;;  %v5854_v55 = vpack.c.bf16 %v5841_v38, %v5840_v0 }
 0x6e9   :  { %v5608_v44 = vsel %vm31_vm0, %v10564_v29, 0.0  ;;  %6082 = vmatprep.subr.bf16.mxu0 %v5853_v16 }
 0x6ea   :  { %5609 = vadd.xlane.f32.xlu0 %v5608_v44  ;;  %v5843_v44 = vld [vmem:[%s10748_s1 + $0x70] sm:$0xff] }
 0x6ec   :  { %5612 = vadd.xlane.f32.xlu1 %v5611_v11  ;;  %6083 = vmatpush3.bf16.msra.mxu0 %v5853_v16  ;;  %v5855_v11 = vpack.c.bf16 %v5843_v44, %v5842_v49 }
 0x6ed   :  { %6084 = vmatprep.subr.bf16.mxu0 %v5854_v55 }
 0x6ee   :  { %5615 = vadd.xlane.f32.xlu0 %v5614_v7  ;;  %v5844_v7 = vld [vmem:[%s10748_s1 + $0x78] sm:$0xff] }
 0x6f0   :  { %6085 = vmatpush3.bf16.msra.mxu0 %v5854_v55 }
 0x6f1   :  { %6086 = vmatprep.subr.bf16.mxu0 %v5855_v11 }
 0x6f4   :  { %6087 = vmatpush3.bf16.msra.mxu0 %v5855_v11 }
 0x761   :  { %v5595_v36 = vpop.xlane.xlu0 %5594 }
 0x762   :  { %v5617_v4 = vmul.f32 0.03125, %v5595_v36  ;;  %v5845_v36 = vld [vmem:[%s10748_s1 + $0x80] sm:$0xff] }
 0x763   :  { %v5598_v32 = vpop.xlane.xlu1 %5597 }
 0x764   :  { %v10580_v13 = vsub.f32 %v10526_v47, %v5617_v4  ;;  %v5618_v39 = vmul.f32 0.03125, %v5598_v32  ;;  %v5856_v4 = vpack.c.bf16 %v5845_v36, %v5844_v7  ;;  %v5846_v32 = vld [vmem:[%s10748_s1 + $0x88] sm:$0xff] }
 0x765   :  { %v5601_v28 = vpop.xlane.xlu0 %5600 }
 0x766   :  { %v10583_v61 = vsub.f32 %v10536_v50, %v5618_v39  ;;  %v5619_v31 = vmul.f32 0.03125, %v5601_v28  ;;  %v5633_v59 = vmul.f32 %v10580_v13, %v10580_v13  ;;  %v5847_v39 = vld [vmem:[%s10748_s1 + $0x90] sm:$0xff]  ;;  %6088 = vmatprep.subr.bf16.mxu0 %v5856_v4 }
 0x767   :  { %v5857_v28 = vpack.c.bf16 %v5847_v39, %v5846_v32  ;;  %6089 = vmatpush3.bf16.msra.mxu0 %v5856_v4 }
 0x768   :  { %v10588_v6 = vsub.f32 %v10531_v46, %v5619_v31  ;;  %v5641_v15 = vsel %vm31_vm0, %v5633_v59, 0.0  ;;  %v5634_v24 = vmul.f32 %v10583_v61, %v10583_v61 }
 0x769   :  { %5642 = vadd.xlane.f32.xlu1 %v5641_v15  ;;  %v5604_v60 = vpop.xlane.xlu0 %5603  ;;  %6090 = vmatprep.subr.bf16.mxu0 %v5857_v28 }
 0x76a   :  { %v5620_v53 = vmul.f32 0.03125, %v5604_v60  ;;  %v5644_v34 = vsel %vm31_vm0, %v5634_v24, 0.0  ;;  %v5635_v8 = vmul.f32 %v10588_v6, %v10588_v6 }
 0x76b   :  { %5645 = vadd.xlane.f32.xlu0 %v5644_v34  ;;  %6091 = vmatpush3.bf16.msra.mxu0 %v5857_v28 }
 0x76c   :  { %v10597_v58 = vsub.f32 %v10545_v2, %v5620_v53  ;;  %v5647_v62 = vsel %vm31_vm0, %v5635_v8, 0.0 }
 0x76d   :  { %5648 = vadd.xlane.f32.xlu1 %v5647_v62 }
 0x76e   :  { %v5636_v14 = vmul.f32 %v10597_v58, %v10597_v58 }
 0x770   :  { %v5650_v63 = vsel %vm31_vm0, %v5636_v14, 0.0 }
 0x771   :  { %5651 = vadd.xlane.f32.xlu0 %v5650_v63 }
 0x775   :  { %v5607_v42 = vpop.xlane.xlu1 %5606 }
 0x776   :  { %v5621_v48 = vmul.f32 0.03125, %v5607_v42 }
 0x777   :  { %v5610_v54 = vpop.xlane.xlu0 %5609 }
 0x778   :  { %v10604_v10 = vsub.f32 %v10554_v5, %v5621_v48  ;;  %v5622_v37 = vmul.f32 0.03125, %v5610_v54  ;;  %v5987_v54 = vld [vmem:[%s10748_s1 + $0xe8] ss:$0 sm:$0xff] }
 0x779   :  { %v5613_v23 = vpop.xlane.xlu1 %5612 }
 0x77a   :  { %v10607_v41 = vsub.f32 %v10564_v29, %v5622_v37  ;;  %v5623_v52 = vmul.f32 0.03125, %v5613_v23  ;;  %v5637_v20 = vmul.f32 %v10604_v10, %v10604_v10 }
 0x77b   :  { %v5616_v27 = vpop.xlane.xlu0 %5615 }
 0x77c   :  { %v10612_v43 = vsub.f32 %v10559_v21, %v5623_v52  ;;  %v5624_v35 = vmul.f32 0.03125, %v5616_v27  ;;  %v5653_v45 = vsel %vm31_vm0, %v5637_v20, 0.0  ;;  %v5638_v17 = vmul.f32 %v10607_v41, %v10607_v41 }
 0x77d   :  { %5654 = vadd.xlane.f32.xlu1 %v5653_v45 }
 0x77e   :  { %v10618_v51 = vsub.f32 %v10571_v56, %v5624_v35  ;;  %v5656_v22 = vsel %vm31_vm0, %v5638_v17, 0.0  ;;  %v5639_v19 = vmul.f32 %v10612_v43, %v10612_v43  ;;  %v5988_v35 = vld [vmem:[%s10748_s1 + $0xf0] ss:$0 sm:$0xff] }
 0x77f   :  { %5657 = vadd.xlane.f32.xlu0 %v5656_v22 }
 0x780   :  { %v5659_v25 = vsel %vm31_vm0, %v5639_v19, 0.0  ;;  %v5640_v33 = vmul.f32 %v10618_v51, %v10618_v51 }
 0x781   :  { %5660 = vadd.xlane.f32.xlu1 %v5659_v25 }
 0x782   :  { %v5662_v26 = vsel %vm31_vm0, %v5640_v33, 0.0 }
 0x783   :  { %5663 = vadd.xlane.f32.xlu0 %v5662_v26 }
 0x7f6   :  { %v5643_v31 = vpop.xlane.xlu1 %5642 }
 0x7f7   :  { %v5665_v59 = vmul.f32 0.03125, %v5643_v31 }
 0x7f8   :  { %v5646_v15 = vpop.xlane.xlu0 %5645 }
 0x7f9   :  { %v5673_v24 = vadd.f32 1e-05, %v5665_v59  ;;  %v5666_v60 = vmul.f32 0.03125, %v5646_v15 }
 0x7fa   :  { %v5649_v53 = vpop.xlane.xlu1 %5648 }
 0x7fb   :  { %6504 = vrsqrt.f32 %v5673_v24  ;;  %v5674_v34 = vadd.f32 1e-05, %v5666_v60  ;;  %v5667_v8 = vmul.f32 0.03125, %v5649_v53 }
 0x7fd   :  { %6506 = vrsqrt.f32 %v5674_v34  ;;  %v5675_v62 = vadd.f32 1e-05, %v5667_v8 }
 0x7fe   :  { %v5652_v14 = vpop.xlane.xlu0 %5651 }
 0x7ff   :  { %6508 = vrsqrt.f32 %v5675_v62  ;;  %v5668_v63 = vmul.f32 0.03125, %v5652_v14 }
 0x801   :  { %v5676_v42 = vadd.f32 1e-05, %v5668_v63 }
 0x803   :  { %6510 = vrsqrt.f32 %v5676_v42  ;;  %v5851_v42 = vld [vmem:[%s10748_s1 + $0xb0] sm:$0xff] }
 0x805   :  { %v6505_v48 = vpop.eup %6504 }
 0x806   :  { %v5689_v37 = vmul.f32 %v6505_v48, %v10580_v13 }
 0x807   :  { %v6507_v23 = vpop.eup %6506 }
 0x808   :  { %v5690_v52 = vmul.f32 %v6507_v23, %v10583_v61  ;;  %v5701_v20 = vmul.f32 %v5987_v54, %v5689_v37 }
 0x809   :  { %v6509_v27 = vpop.eup %6508 }
 0x80a   :  { %v5691_v45 = vmul.f32 %v6509_v27, %v10588_v6  ;;  %v5655_v17 = vpop.xlane.xlu1 %5654  ;;  %v5702_v22 = vmul.f32 %v5987_v54, %v5690_v52  ;;  %v5713_v33 = vadd.f32 %v5988_v35, %v5701_v20 }
 0x80b   :  { %v5669_v19 = vmul.f32 0.03125, %v5655_v17 }
 0x80c   :  { %v5658_v25 = vpop.xlane.xlu0 %5657  ;;  %v5714_v26 = vadd.f32 %v5988_v35, %v5702_v22  ;;  %v5703_v1 = vmul.f32 %v5987_v54, %v5691_v45 }
 0x80d   :  { %v6511_v30 = vpop.eup %6510  ;;  %v5677_v18 = vadd.f32 1e-05, %v5669_v19  ;;  %v5670_v13 = vmul.f32 0.03125, %v5658_v25 }
 0x80e   :  { %v5692_v61 = vmul.f32 %v6511_v30, %v10597_v58  ;;  %v5661_v40 = vpop.xlane.xlu1 %5660  ;;  %v5721_v3 = vpack.c.bf16 %v5714_v26, %v5713_v33  ;;  %v5715_v55 = vadd.f32 %v5988_v35, %v5703_v1 }
 0x80f   :  { %6512 = vrsqrt.f32 %v5677_v18  ;;  %v5678_v9 = vadd.f32 1e-05, %v5670_v13  ;;  %v5671_v12 = vmul.f32 0.03125, %v5661_v40 }
 0x810   :  { %v5704_v16 = vmul.f32 %v5987_v54, %v5692_v61  ;;  %6072 = vmatprep.mubr.msk.bf16.mxu1 %vm31_vm0, %v5721_v3  ;;  %v5664_v6 = vpop.xlane.xlu0 %5663 }
 0x811   :  { %6514 = vrsqrt.f32 %v5678_v9  ;;  %v5679_v0 = vadd.f32 1e-05, %v5671_v12  ;;  %v5672_v38 = vmul.f32 0.03125, %v5664_v6 }
 0x812   :  { %v5716_v49 = vadd.f32 %v5988_v35, %v5704_v16 }
 0x813   :  { %6516 = vrsqrt.f32 %v5679_v0  ;;  %v5680_v44 = vadd.f32 1e-05, %v5672_v38 }
 0x814   :  { %v5722_v11 = vpack.c.bf16 %v5716_v49, %v5715_v55 }
 0x815   :  { %6518 = vrsqrt.f32 %v5680_v44 }
 0x816   :  { %6073 = vmatmul.mubr.msk.bf16.vlgmr.msra.gmra.mrb[16].mxu1 %vm31_vm0, %v5722_v11  ;;  %v5995_v11 = vld [vmem:[%s10748_s1 + $0xf8] ss:$0 sm:$0xff] }
 0x819   :  { %v6513_v58 = vpop.eup %6512 }
 0x81a   :  { %v5693_v7 = vmul.f32 %v6513_v58, %v10604_v10 }
 0x81b   :  { %v6515_v36 = vpop.eup %6514 }
 0x81c   :  { %v5694_v4 = vmul.f32 %v6515_v36, %v10607_v41  ;;  %v5705_v32 = vmul.f32 %v5987_v54, %v5693_v7  ;;  %v5848_v41 = vld [vmem:[%s10748_s1 + $0x98] sm:$0xff] }
 0x81d   :  { %v6517_v39 = vpop.eup %6516 }
 0x81e   :  { %v5695_v28 = vmul.f32 %v6517_v39, %v10612_v43  ;;  %v5706_v31 = vmul.f32 %v5987_v54, %v5694_v4  ;;  %v5717_v24 = vadd.f32 %v5988_v35, %v5705_v32  ;;  %v5849_v43 = vld [vmem:[%s10748_s1 + $0xa0] sm:$0xff] }
 0x81f   :  { %v6519_v59 = vpop.eup %6518  ;;  %v5858_v63 = vpack.c.bf16 %v5849_v43, %v5848_v41 }
 0x820   :  { %v5696_v15 = vmul.f32 %v6519_v59, %v10618_v51  ;;  %v5718_v60 = vadd.f32 %v5988_v35, %v5706_v31  ;;  %v5707_v53 = vmul.f32 %v5987_v54, %v5695_v28  ;;  %v5850_v51 = vld [vmem:[%s10748_s1 + $0xa8] sm:$0xff] }
 0x821   :  { %v5859_v48 = vpack.c.bf16 %v5851_v42, %v5850_v51  ;;  %6092 = vmatprep.subr.bf16.mxu0 %v5858_v63 }
 0x822   :  { %v5723_v34 = vpack.c.bf16 %v5718_v60, %v5717_v24  ;;  %v5708_v8 = vmul.f32 %v5987_v54, %v5696_v15  ;;  %v5719_v62 = vadd.f32 %v5988_v35, %v5707_v53  ;;  %6093 = vmatpush3.bf16.msra.mxu0 %v5858_v63  ;;  %v5729_v54 = vld [vmem:[%s10750_s4 + $0x10] sm:$0x1] }
 0x823   :  { %6094 = vmatprep.subr.bf16.mxu0 %v5859_v48  ;;  %v5730_v37 = vunpack.c.l.bf16 %v5729_v54 }
 0x824   :  { %6076 = vmatprep.mubr.msk.bf16.mxu1 %vm31_vm0, %v5723_v34  ;;  %v5720_v10 = vadd.f32 %v5988_v35, %v5708_v8 }
 0x825   :  { %v5734_v23 = vrot.slane %v5730_v37, %v11757_v57 }
 0x826   :  { %v5724_v14 = vpack.c.bf16 %v5720_v10, %v5719_v62  ;;  %6095 = vmatpush3.bf16.msra.mxu0 %v5859_v48 }
 0x828   :  { %6077 = vmatmul.mubr.msk.bf16.gmra.mrb[20].mxu1 %vm31_vm0, %v5724_v14 }
 0x8e9   :  { %v6074_v52 = vpop.f32.mrb[16].mxu1 }
 0x8ea   :  { %v5802_v20 = vadd.f32 %v6074_v52, %v5734_v23  ;;  %v5793_v27 = vpop.f32.mrb[17].mxu1 }
 0x8eb   :  { %v5794_v35 = vadd.f32 %v5793_v27, %v5734_v23  ;;  %v6075_v45 = vpop.f32.mrb[18].mxu1 }
 0x8ec   :  { %v5805_v17 = vadd.f32 %v6075_v45, %v5734_v23  ;;  %v5796_v22 = vpop.f32.mrb[19].mxu1  ;;  %v5826_v25 = vmax.f32 %v5802_v20, 0.0 }
 0x8ed   :  { %v5797_v19 = vadd.f32 %v5796_v22, %v5734_v23  ;;  %v5824_v26 = vmax.f32 %v5794_v35, 0.0 }
 0x8ee   :  { %v5827_v33 = vmax.f32 %v5805_v17, 0.0 }
 0x8ef   :  { %v5825_v30 = vmax.f32 %v5797_v19, 0.0 }
 0x8f0   :  { %v5833_v18 = vpack.c.bf16 %v5827_v33, %v5826_v25 }
 0x8f1   :  { %v5832_v13 = vpack.c.bf16 %v5825_v30, %v5824_v26 }
 0x8f3   :  { %6096 = vmatprep.mubr.bf16.mxu0 %v5832_v13 }
 0x8f4   :  { %6097 = vmatmul.mubr.bf16.vlgmr.msra.gmra.mrb[8].mxu0 %v5833_v18 }
 0x8fb   :  { %v6078_v1 = vpop.f32.mrb[20].mxu1 }
 0x8fc   :  { %v5818_v61 = vadd.f32 %v6078_v1, %v5734_v23  ;;  %v5809_v40 = vpop.f32.mrb[21].mxu1 }
 0x8fd   :  { %v5810_v57 = vadd.f32 %v5809_v40, %v5734_v23  ;;  %v6079_v3 = vpop.f32.mrb[22].mxu1 }
 0x8fe   :  { %v5821_v9 = vadd.f32 %v6079_v3, %v5734_v23  ;;  %v5812_v12 = vpop.f32.mrb[23].mxu1  ;;  %v5830_v6 = vmax.f32 %v5818_v61, 0.0 }
 0x8ff   :  { %v5813_v16 = vadd.f32 %v5812_v12, %v5734_v23  ;;  %v5828_v38 = vmax.f32 %v5810_v57, 0.0 }
 0x900   :  { %v5831_v0 = vmax.f32 %v5821_v9, 0.0 }
 0x901   :  { %v5829_v55 = vmax.f32 %v5813_v16, 0.0 }
 0x902   :  { %v5835_v49 = vpack.c.bf16 %v5831_v0, %v5830_v6 }
 0x903   :  { %v5834_v44 = vpack.c.bf16 %v5829_v55, %v5828_v38 }
 0x905   :  { %6100 = vmatprep.mubr.bf16.mxu0 %v5834_v44 }
 0x906   :  { %6101 = vmatmul.mubr.bf16.gmra.mrb[12].mxu0 %v5835_v49 }
 0x9c7   :  { %v6098_v58 = vpop.f32.mrb[8].mxu0 }
 0x9c8   :  { %v5908_v7 = vadd.f32 %v6098_v58, %v5995_v11  ;;  %v5899_v36 = vpop.f32.mrb[9].mxu0 }
 0x9c9   :  { %v5900_v4 = vadd.f32 %v5995_v11, %v5899_v36  ;;  %v6099_v32 = vpop.f32.mrb[10].mxu0 }
 0x9ca   :  { %v5932_v39 = vadd.f32 %v5908_v7, %v10531_v46  ;;  %v5911_v28 = vadd.f32 %v6099_v32, %v5995_v11  ;;  %v5902_v31 = vpop.f32.mrb[11].mxu0 }
 0x9cb   :  { %v5930_v59 = vadd.f32 %v5900_v4, %v10526_v47  ;;  %v5903_v15 = vadd.f32 %v5995_v11, %v5902_v31 }
 0x9cc   :  { %5940 = vst.msk [vmem:[%s10751_s5 + $0x10] sm:$0xff] %vm31_vm0, %v5932_v39  ;;  %v5933_v24 = vadd.f32 %v5911_v28, %v10545_v2 }
 0x9cd   :  { %5938 = vst.msk [vmem:[%s10751_s5] sm:$0xff] %vm31_vm0, %v5930_v59  ;;  %v5931_v60 = vadd.f32 %v5903_v15, %v10536_v50 }
 0x9ce   :  { %5941 = vst.msk [vmem:[%s10751_s5 + $0x18] sm:$0xff] %vm31_vm0, %v5933_v24 }
 0x9cf   :  { %5939 = vst.msk [vmem:[%s10751_s5 + $0x8] sm:$0xff] %vm31_vm0, %v5931_v60 }
 0x9d9   :  { %v6102_v47 = vpop.f32.mrb[12].mxu0 }
 0x9da   :  { %v5924_v46 = vadd.f32 %v6102_v47, %v5995_v11  ;;  %v5915_v2 = vpop.f32.mrb[13].mxu0 }
 0x9db   :  { %v5916_v53 = vadd.f32 %v5995_v11, %v5915_v2  ;;  %v6103_v34 = vpop.f32.mrb[14].mxu0 }
 0x9dc   :  { %v5936_v8 = vadd.f32 %v5924_v46, %v10559_v21  ;;  %v5927_v62 = vadd.f32 %v6103_v34, %v5995_v11  ;;  %v5918_v10 = vpop.f32.mrb[15].mxu0 }
 0x9dd   :  { %v5934_v50 = vadd.f32 %v5916_v53, %v10554_v5  ;;  %v5919_v14 = vadd.f32 %v5995_v11, %v5918_v10 }
 0x9de   :  { %5944 = vst.msk [vmem:[%s10751_s5 + $0x30] sm:$0xff] %vm31_vm0, %v5936_v8  ;;  %v5937_v41 = vadd.f32 %v5927_v62, %v10571_v56 }
 0x9df   :  { %5942 = vst.msk [vmem:[%s10751_s5 + $0x20] sm:$0xff] %vm31_vm0, %v5934_v50  ;;  %v5935_v43 = vadd.f32 %v5919_v14, %v10564_v29 }
 0x9e0   :  { %5945 = vst.msk [vmem:[%s10751_s5 + $0x38] sm:$0xff] %vm31_vm0, %v5937_v41 }
 0x9e1   :  { %5943 = vst.msk [vmem:[%s10751_s5 + $0x28] sm:$0xff] %vm31_vm0, %v5935_v43 }

</bundles_post_ra>
